<compile_context>
chip_gen: v6e
topology: v6e:2x2x1
jax: 0.10.0
libtpu: 0.0.40
codegen_flags: <defaults>
</compile_context>

<pallas_src>
import functools

import numpy as np
import jax
import jax.numpy as jnp
from jax.experimental import pallas as pl
from jax.experimental.pallas import tpu as pltpu

CL_WEIGHT = 0.1          # stand-in for config.CL.weight
N_SUMS = 11              # scalar partial sums per image
N_LANES = 128            # lane-dense output width

# Deterministic stand-ins for the random torchvision ColorJitter parameter sets
# (brightness, contrast, saturation).
AUG_PARAMS = ((1.05, 0.95, 1.10), (0.95, 1.05, 0.90), (1.10, 0.90, 1.05))


# ---------------------------------------------------------------------------
# Host-side helpers.
# ---------------------------------------------------------------------------
def _round_up(x, m):
    return ((x + m - 1) // m) * m


def gaussian_kernel1d(ksize, sigma):
    x = np.arange(ksize, dtype=np.float32) - (ksize - 1) / 2.0
    k = np.exp(-0.5 * (x / sigma) ** 2)
    return (k / k.sum()).astype(np.float32)


def conv1d_matrix_reflect(n, kernel1d):
    """Matrix M with (M @ v) == 1-D convolution of v using 'reflect' padding."""
    k = len(kernel1d)
    r = k // 2
    m = np.zeros((n, n), dtype=np.float32)
    for i in range(n):
        for t in range(k):
            j = i + t - r
            if j < 0:
                j = -j
            if j >= n:
                j = 2 * n - 2 - j
            m[i, j] += kernel1d[t]
    return m


def _stacked_operator_matrices(H, W, H2p, W2p):
    """Polyphase-sliced, zero-padded, stacked row/col matrices (bf16).

    rstk[ri]  : (4*H2p, H2p)   row blocks = [gauss ro=0; gauss ro=1; net ro=0; net ro=1]
    cc[o, ci] : (W2p, 2*W2p)   col blocks = [co=0 | co=1]

    For input phase planes X[ri, ci] (H2p, W2p):
      Rcat[ci]  = sum_ri rstk[ri] @ X[ri, ci]
      OutCat_o  = sum_ci Rcat[ci][o*2*H2p:(o+1)*2*H2p] @ cc[o, ci]
      phase (ro, co) of operator o = OutCat_o[ro*H2p:(ro+1)*H2p, co*W2p:(co+1)*W2p]
    """
    # TODO(synk): RandomChoice over kernel sizes {3,5,5,7} replaced by fixed 5;
    # the external `network` replaced by a fixed separable [0.25, 0.5, 0.25].
    gk = gaussian_kernel1d(5, 10.0)
    nk = np.array([0.25, 0.5, 0.25], dtype=np.float32)
    rows = [conv1d_matrix_reflect(H, gk), conv1d_matrix_reflect(H, nk)]
    cols = [conv1d_matrix_reflect(W, gk), conv1d_matrix_reflect(W, nk)]

    def pad(m, r, c):
        out = np.zeros((r, c), np.float32)
        out[: m.shape[0], : m.shape[1]] = m
        return out

    rstk = np.stack(
        [np.concatenate([pad(rows[o][ro::2, ri::2], H2p, H2p)
                         for o in (0, 1) for ro in (0, 1)], axis=0)
         for ri in (0, 1)], axis=0)                        # (2, 4*H2p, H2p)
    cc = np.stack(
        [np.stack([np.concatenate([pad(cols[o][co::2, ci::2].T, W2p, W2p)
                                   for co in (0, 1)], axis=1)
                   for ci in (0, 1)], axis=0)
         for o in (0, 1)], axis=0)                         # (2, 2, W2p, 2*W2p)
    # bf16 operands: MXU runs native bf16 passes, f32 accumulation kept.
    return jnp.asarray(rstk, jnp.bfloat16), jnp.asarray(cc, jnp.bfloat16)


# ---------------------------------------------------------------------------
# The fused loss kernel: one grid step == one batch image.
#   partial-sum slots:
#     0: sum|a_LL - GT_LL|        1: sum|a_H - GT_H|
#     2-5: sum|a_H - n_k_H|       6: sum|mean_k(reb_k_H) - blur_ex_H|
#     7-10: sum|pex_H - reb_k_H|
# ---------------------------------------------------------------------------
def _fracl_kernel(a_ref, g_ref, b_ref, xq_ref, rstk_ref, cc_ref, out_ref,
                  *, inv_hw):
    C = a_ref.shape[1]
    H2p, W2p = a_ref.shape[3], a_ref.shape[4]
    f32, bf16 = jnp.float32, jnp.bfloat16

    # ---- deferred plane readers (re-reading VMEM refs is cheap) ------------
    a_get = lambda c, p: a_ref[0, c, p]
    g_get = lambda c, p: g_ref[0, c, p]
    b_get = lambda c, p: b_ref[0, c, p]

    def bex_get(c, p):                     # blur_ex phase plane, packed layout
        ri, ci = p // 2, p % 2
        return xq_ref[0, ri, ci][:, c * W2p:(c + 1) * W2p]

    # ---- Haar J=1 bands of a polyphase difference (2x orthonormal bands;
    #      the 0.5 is applied in the wrapper) --------------------------------
    def band_abs(d0, d1, d2, d3, need_ll=False):
        s01, m01 = d0 + d1, d0 - d1
        s23, m23 = d2 + d3, d2 - d3
        hb = jnp.abs(m01 + m23) + jnp.abs(s01 - s23) + jnp.abs(m01 - m23)
        ll = jnp.abs(s01 + s23) if need_ll else None
        return ll, hb

    def hband_sum(get_a, get_b):
        acc = None
        for c in range(C):
            _, hb = band_abs(*[get_a(c, p) - get_b(c, p) for p in range(4)])
            acc = hb if acc is None else acc + hb
        return jnp.sum(acc)

    # ---- deterministic ColorJitter stand-in ---------------------------------
    # TODO(synk): an optional bf16 elementwise path (v6e/v7x) was not adopted
    # to keep the small-difference L1 terms in f32 and stay v5e-friendly.
    def rgb_gray(y):
        return [0.2989 * y[0][p] + 0.587 * y[1][p] + 0.114 * y[2][p]
                for p in range(4)]

    def color_jitter(get_plane, brightness, contrast, saturation):
        y = [[jnp.clip(get_plane(c, p) * brightness, 0.0, 1.0)
              for p in range(4)] for c in range(C)]
        gray = rgb_gray(y)
        mean = (jnp.sum(gray[0]) + jnp.sum(gray[1])
                + jnp.sum(gray[2]) + jnp.sum(gray[3])) * inv_hw
        cmean = (1.0 - contrast) * mean                      # hoisted scalar
        y = [[jnp.clip(contrast * y[c][p] + cmean, 0.0, 1.0)
              for p in range(4)] for c in range(C)]
        gray = rgb_gray(y)
        sgray = [(1.0 - saturation) * gray[p] for p in range(4)]   # hoisted
        return [[jnp.clip(saturation * y[c][p] + sgray[p], 0.0, 1.0)
                 for p in range(4)] for c in range(C)]

    # ---- fused separable conv (reblur + network stand-ins), bf16 on MXU -----
    # TODO(synk): if profiling at large H,W shows the MXU binding on v5e, a
    # banded shifted-add (pltpu.roll) version would remove redundant FLOPs.
    def sep_apply():
        rcat = []
        for ci in range(2):
            acc = jnp.dot(rstk_ref[0], xq_ref[0, 0, ci].astype(bf16),
                          preferred_element_type=f32)
            acc = acc + jnp.dot(rstk_ref[1], xq_ref[0, 1, ci].astype(bf16),
                                preferred_element_type=f32)
            rcat.append(acc)                                 # (4*H2p, C*W2p)
        results = []
        for o in range(2):                                   # 0: gauss, 1: net
            r0 = o * 2 * H2p
            img = []
            for c in range(C):
                l0 = c * W2p
                blk0 = rcat[0][r0:r0 + 2 * H2p, l0:l0 + W2p].astype(bf16)
                blk1 = rcat[1][r0:r0 + 2 * H2p, l0:l0 + W2p].astype(bf16)
                quad = (jnp.dot(blk0, cc_ref[o, 0], preferred_element_type=f32)
                        + jnp.dot(blk1, cc_ref[o, 1], preferred_element_type=f32))
                img.append([quad[ro * H2p:(ro + 1) * H2p,
                                 co * W2p:(co + 1) * W2p]
                            for ro in range(2) for co in range(2)])
            results.append(img)
        return results[0], results[1]                        # rebl, pex

    s = [None] * N_SUMS

    # slots 0/1: anchor vs GT (LL + high-frequency bands)
    ll_acc = None
    h_acc = None
    for c in range(C):
        ll, hb = band_abs(*[a_get(c, p) - g_get(c, p) for p in range(4)],
                          need_ll=True)
        ll_acc = ll if ll_acc is None else ll_acc + ll
        h_acc = hb if h_acc is None else h_acc + hb
    s[0] = jnp.sum(ll_acc)
    s[1] = jnp.sum(h_acc)

    # slots 2-5: anchor vs negatives (blur + 3 jittered copies of blur).
    # Only ONE jittered variant is live at a time.
    s[2] = hband_sum(a_get, b_get)
    for k, prm in enumerate(AUG_PARAMS):
        n = color_jitter(b_get, *prm)
        s[3 + k] = hband_sum(a_get, lambda c, p, n=n: n[c][p])

    # reblurrdm(blur_ex) / network(blur_ex) stand-ins.
    rebl, pex = sep_apply()
    r_get = lambda c, p: rebl[c][p]
    p_get = lambda c, p: pex[c][p]

    # slots 7-10 + running phase-sum for slot 6 -- one live reb_k at a time.
    acc6 = [[None] * 4 for _ in range(C)]
    for k in range(4):
        r = rebl if k == 0 else color_jitter(r_get, *AUG_PARAMS[k - 1])
        for c in range(C):
            for p in range(4):
                acc6[c][p] = (r[c][p] if acc6[c][p] is None
                              else acc6[c][p] + r[c][p])
        s[7 + k] = hband_sum(p_get, lambda c, p, r=r: r[c][p])

    # slot 6: || mean_k(DWT_H(reb_k)) - DWT_H(blur_ex) ||_1   (DWT linearity)
    acc = None
    for c in range(C):
        _, hb = band_abs(*[acc6[c][p] * 0.25 - bex_get(c, p) for p in range(4)])
        acc = hb if acc is None else acc + hb
    s[6] = jnp.sum(acc)

    # Lane-dense (8, 128) partial-sum slab for this image (sums in lanes 0..10).
    lane = jax.lax.broadcasted_iota(jnp.int32, (8, N_LANES), 1)
    vec = jnp.zeros((8, N_LANES), f32)
    for j in range(N_SUMS):
        vec = vec + jnp.where(lane == j, s[j], 0.0)
    out_ref[0] = vec


def _vmem_limit_bytes():
    """Generation-aware VMEM budget with headroom (75% of physical)."""
    cap = 128 * 1024 * 1024
    try:
        cap = int(getattr(pltpu.get_tpu_info(), "vmem_capacity_bytes", cap))
    except Exception:
        pass
    return max(16 * 1024 * 1024, (cap * 3) // 4)


def _fracl_sums(a_s, g_s, b_s, x_q, rstk, cc, inv_hw):
    N, C, _, H2p, W2p = a_s.shape
    kernel = functools.partial(_fracl_kernel, inv_hw=inv_hw)
    return pl.pallas_call(
        kernel,
        out_shape=jax.ShapeDtypeStruct((N, 8, N_LANES), jnp.float32),
        grid_spec=pltpu.PrefetchScalarGridSpec(
            num_scalar_prefetch=0,
            grid=(N,),
            in_specs=[
                pl.BlockSpec((1, C, 4, H2p, W2p), lambda i: (i, 0, 0, 0, 0)),
                pl.BlockSpec((1, C, 4, H2p, W2p), lambda i: (i, 0, 0, 0, 0)),
                pl.BlockSpec((1, C, 4, H2p, W2p), lambda i: (i, 0, 0, 0, 0)),
                # blur_ex, passed once: (ri, ci, H2p, channels-in-lanes).
                pl.BlockSpec((1, 2, 2, H2p, C * W2p), lambda i: (i, 0, 0, 0, 0)),
                # Constant bf16 operator matrices (constant index_map -> fetched
                # once).  TODO(synk): single-buffer via pipeline_mode=
                # pl.Buffered(1) once validated on all target generations.
                pl.BlockSpec((2, 4 * H2p, H2p), lambda i: (0, 0, 0)),
                pl.BlockSpec((2, 2, W2p, 2 * W2p), lambda i: (0, 0, 0, 0)),
            ],
            out_specs=pl.BlockSpec((1, 8, N_LANES), lambda i: (i, 0, 0)),
        ),
        compiler_params=pltpu.CompilerParams(
            # v7x has 2 TCs/chip: keep the per-image axis parallel so the batch
            # shards across cores (use even N where possible).
            dimension_semantics=("parallel",),
            vmem_limit_bytes=_vmem_limit_bytes(),
            # TODO(synk): for H,W >= 512 on v7x (64 MiB VMEM), add a second
            # grid axis tiling H2p and the matching row slice of rstk.
        ),
    )(a_s, g_s, b_s, x_q, rstk, cc)


# ---------------------------------------------------------------------------
# Wrapper
# ---------------------------------------------------------------------------
def _phase_split_pad(x, H2p, W2p):
    """(N, C, H, W) -> (N, C, 2, 2, H2p, W2p) zero-padded polyphase planes.

    Phase index = 2*row_parity + col_parity.  Zero padding is inert for the
    loss: every padded location is phase-constant, so all H-band terms vanish
    there, and the LL band is only used on zero-padded anchor/GT.
    """
    N, C, H, W = x.shape
    x = x.reshape(N, C, H // 2, 2, W // 2, 2)
    x = jnp.transpose(x, (0, 1, 3, 5, 2, 4))         # (N, C, ri, ci, H2, W2)
    return jnp.pad(x, ((0, 0), (0, 0), (0, 0), (0, 0),
                       (0, H2p - H // 2), (0, W2p - W // 2)))


@jax.jit
def fraclexmb_loss(blur, GT, anchor, blur_ex):
    N, C, H, W = blur.shape
    assert C == 3, "color-jitter stand-in requires RGB inputs"
    assert H % 2 == 0 and W % 2 == 0
    H2, W2 = H // 2, W // 2
    H2p, W2p = _round_up(H2, 8), _round_up(W2, 128)   # lane/sublane-dense pads

    f32 = jnp.float32
    a_q = _phase_split_pad(anchor.astype(f32), H2p, W2p)
    g_q = _phase_split_pad(GT.astype(f32), H2p, W2p)
    b_q = _phase_split_pad(blur.astype(f32), H2p, W2p)
    x_q = _phase_split_pad(blur_ex.astype(f32), H2p, W2p)

    a_s = a_q.reshape(N, C, 4, H2p, W2p)
    g_s = g_q.reshape(N, C, 4, H2p, W2p)
    b_s = b_q.reshape(N, C, 4, H2p, W2p)
    # blur_ex packed once: channels along lanes, usable by both the MXU stage
    # and the slot-6 reads.
    x_p = jnp.transpose(x_q, (0, 2, 3, 4, 1, 5)).reshape(N, 2, 2, H2p, C * W2p)

    rstk, cc = _stacked_operator_matrices(H, W, H2p, W2p)

    out = _fracl_sums(a_s, g_s, b_s, x_p, rstk, cc, 1.0 / float(H * W))
    sums = jnp.sum(out[:, 0, :], axis=0)[:N_SUMS] * 0.5     # 0.5: Haar norm.

    n_ll = float(N * C * H2 * W2)
    n_hi = 3.0 * n_ll
    pos_loss = sums[0] / n_ll + sums[1] / n_hi                         # cl_pos
    neg_loss = (sums[2] + sums[3] + sums[4] + sums[5]) / (4.0 * n_hi)  # cl_neg
    # Faithful to the PyTorch module: no epsilon on the sums[6] denominator.
    negres_loss = 0.1 * (sums[7] + sums[8] + sums[9] + sums[10]) / sums[6] / 4.0
    loss = pos_loss / (neg_loss + negres_loss + 3e-7) * CL_WEIGHT       # 'l1'
    return loss


# ---------------------------------------------------------------------------
# Pure-JAX (non-Pallas) reference with identical deterministic stand-ins.
# ---------------------------------------------------------------------------
@jax.jit
def _reference_loss(blur, GT, anchor, blur_ex):
    N, C, H, W = blur.shape
    f32 = jnp.float32
    blur, GT = blur.astype(f32), GT.astype(f32)
    anchor, blur_ex = anchor.astype(f32), blur_ex.astype(f32)
    hp = jax.lax.Precision.HIGHEST

    def sep(x, rm, cm):
        y = jnp.einsum('hk,nckw->nchw', jnp.asarray(rm), x, precision=hp)
        return jnp.einsum('nchw,vw->nchv', y, jnp.asarray(cm), precision=hp)

    g = gaussian_kernel1d(5, 10.0)
    rebl_ex = sep(blur_ex, conv1d_matrix_reflect(H, g), conv1d_matrix_reflect(W, g))
    net_k = np.array([0.25, 0.5, 0.25], dtype=np.float32)
    pex = sep(blur_ex, conv1d_matrix_reflect(H, net_k), conv1d_matrix_reflect(W, net_k))

    def gray(x):
        return 0.2989 * x[:, 0:1] + 0.587 * x[:, 1:2] + 0.114 * x[:, 2:3]

    def jitter(x, b, c, s):
        y = jnp.clip(x * b, 0.0, 1.0)
        m = jnp.mean(gray(y), axis=(-1, -2), keepdims=True)
        y = jnp.clip(c * y + (1.0 - c) * m, 0.0, 1.0)
        return jnp.clip(s * y + (1.0 - s) * gray(y), 0.0, 1.0)

    def dwt(x):
        xr = x.reshape(N, C, H // 2, 2, W // 2, 2)
        p0, p1 = xr[:, :, :, 0, :, 0], xr[:, :, :, 0, :, 1]
        p2, p3 = xr[:, :, :, 1, :, 0], xr[:, :, :, 1, :, 1]
        ll = (p0 + p1 + p2 + p3) * 0.5
        hi = jnp.stack([(p0 - p1 + p2 - p3) * 0.5,
                        (p0 + p1 - p2 - p3) * 0.5,
                        (p0 - p1 - p2 + p3) * 0.5], axis=2)
        return ll, hi

    def l1(a, b):
        return jnp.mean(jnp.abs(a - b))

    n_list = [blur] + [jitter(blur, *p) for p in AUG_PARAMS]
    rebs = [rebl_ex] + [jitter(rebl_ex, *p) for p in AUG_PARAMS]

    a_ll, a_hi = dwt(anchor)
    g_ll, g_hi = dwt(GT)
    pos = l1(a_ll, g_ll) + l1(a_hi, g_hi)
    neg = sum(l1(a_hi, dwt(n)[1]) for n in n_list) / len(n_list)

    bx_hi = dwt(blur_ex)[1]
    reb_hi = [dwt(r)[1] for r in rebs]
    pex_hi = dwt(pex)[1]
    res_b = jnp.mean(jnp.stack([rh - bx_hi for rh in reb_hi], 0), 0)
    denom = jnp.sum(jnp.abs(res_b))
    negres = sum(jnp.sum(jnp.abs(pex_hi - rh)) / denom * 0.1 for rh in reb_hi)
    negres = negres / len(reb_hi)

    return pos / (neg + negres + 3e-7) * CL_WEIGHT


if __name__ == "__main__":
    key = jax.random.PRNGKey(0)
    k1, k2, k3, k4 = jax.random.split(key, 4)
    shape = (2, 3, 16, 16)   # N, C (RGB for the color jitter), H, W
    blur = jax.random.uniform(k1, shape, jnp.float32)
    GT = jax.random.uniform(k2, shape, jnp.float32)
    anchor = jax.random.uniform(k3, shape, jnp.float32)
    blur_ex = jax.random.uniform(k4, shape, jnp.float32)   # kwargs['inputs']['c_ex']

    loss = jax.block_until_ready(fraclexmb_loss(blur, GT, anchor, blur_ex))
    ref = jax.block_until_ready(_reference_loss(blur, GT, anchor, blur_ex))
    rel_err = abs(float(loss) - float(ref)) / max(abs(float(ref)), 1e-8)
    if (not np.isfinite(float(loss))) or rel_err > 5e-2:
        raise AssertionError(
            f"Pallas loss {float(loss)} != reference {float(ref)} (rel {rel_err})")
    print("KERNEL_OK")
</pallas_src>

<mosaic_0001>
module attributes {stable_mosaic.version = 11 : i64} {
  func.func @_fracl_kernel(%arg0: i32, %arg1: memref<1x3x4x8x128xf32, #tpu.memory_space<vmem>>, %arg2: memref<1x3x4x8x128xf32, #tpu.memory_space<vmem>>, %arg3: memref<1x3x4x8x128xf32, #tpu.memory_space<vmem>>, %arg4: memref<1x2x2x8x384xf32, #tpu.memory_space<vmem>>, %arg5: memref<2x32x8xbf16, #tpu.memory_space<vmem>>, %arg6: memref<2x2x128x256xbf16, #tpu.memory_space<vmem>>, %arg7: memref<1x8x128xf32, #tpu.memory_space<vmem>>) attributes {dimension_semantics = [#tpu.dimension_semantics<parallel>], iteration_bounds = array<i64: 2>, scalar_prefetch = 0 : i64, scratch_operands = 0 : i64, tpu.core_type = #tpu.core_type<tc>, window_params = [{transform_indices = @transform_0, window_bounds = array<i64: 1, 3, 4, 8, 128>}, {transform_indices = @transform_1, window_bounds = array<i64: 1, 3, 4, 8, 128>}, {transform_indices = @transform_2, window_bounds = array<i64: 1, 3, 4, 8, 128>}, {transform_indices = @transform_3, window_bounds = array<i64: 1, 2, 2, 8, 384>}, {pipeline_mode = #tpu.pipeline_mode<synchronous>, transform_indices = @transform_4, window_bounds = array<i64: 2, 32, 8>}, {pipeline_mode = #tpu.pipeline_mode<synchronous>, transform_indices = @transform_5, window_bounds = array<i64: 2, 2, 128, 256>}, {transform_indices = @transform_6, window_bounds = array<i64: 1, 8, 128>}]} {
    %c0 = arith.constant 0 : index
    %c0_0 = arith.constant 0 : index
    %c0_1 = arith.constant 0 : index
    %c0_2 = arith.constant 0 : index
    %c0_3 = arith.constant 0 : index
    %0 = vector.load %arg1[%c0, %c0_0, %c0_1, %c0_2, %c0_3] : memref<1x3x4x8x128xf32, #tpu.memory_space<vmem>>, vector<1x1x1x8x128xf32>
    %1 = vector.shape_cast %0 : vector<1x1x1x8x128xf32> to vector<8x128xf32>
    %c0_4 = arith.constant 0 : index
    %c0_5 = arith.constant 0 : index
    %c0_6 = arith.constant 0 : index
    %c0_7 = arith.constant 0 : index
    %c0_8 = arith.constant 0 : index
    %2 = vector.load %arg2[%c0_4, %c0_5, %c0_6, %c0_7, %c0_8] : memref<1x3x4x8x128xf32, #tpu.memory_space<vmem>>, vector<1x1x1x8x128xf32>
    %3 = vector.shape_cast %2 : vector<1x1x1x8x128xf32> to vector<8x128xf32>
    %4 = arith.subf %1, %3 : vector<8x128xf32>
    %c0_9 = arith.constant 0 : index
    %c0_10 = arith.constant 0 : index
    %c1 = arith.constant 1 : index
    %c0_11 = arith.constant 0 : index
    %c0_12 = arith.constant 0 : index
    %5 = vector.load %arg1[%c0_9, %c0_10, %c1, %c0_11, %c0_12] : memref<1x3x4x8x128xf32, #tpu.memory_space<vmem>>, vector<1x1x1x8x128xf32>
    %6 = vector.shape_cast %5 : vector<1x1x1x8x128xf32> to vector<8x128xf32>
    %c0_13 = arith.constant 0 : index
    %c0_14 = arith.constant 0 : index
    %c1_15 = arith.constant 1 : index
    %c0_16 = arith.constant 0 : index
    %c0_17 = arith.constant 0 : index
    %7 = vector.load %arg2[%c0_13, %c0_14, %c1_15, %c0_16, %c0_17] : memref<1x3x4x8x128xf32, #tpu.memory_space<vmem>>, vector<1x1x1x8x128xf32>
    %8 = vector.shape_cast %7 : vector<1x1x1x8x128xf32> to vector<8x128xf32>
    %9 = arith.subf %6, %8 : vector<8x128xf32>
    %c0_18 = arith.constant 0 : index
    %c0_19 = arith.constant 0 : index
    %c2 = arith.constant 2 : index
    %c0_20 = arith.constant 0 : index
    %c0_21 = arith.constant 0 : index
    %10 = vector.load %arg1[%c0_18, %c0_19, %c2, %c0_20, %c0_21] : memref<1x3x4x8x128xf32, #tpu.memory_space<vmem>>, vector<1x1x1x8x128xf32>
    %11 = vector.shape_cast %10 : vector<1x1x1x8x128xf32> to vector<8x128xf32>
    %c0_22 = arith.constant 0 : index
    %c0_23 = arith.constant 0 : index
    %c2_24 = arith.constant 2 : index
    %c0_25 = arith.constant 0 : index
    %c0_26 = arith.constant 0 : index
    %12 = vector.load %arg2[%c0_22, %c0_23, %c2_24, %c0_25, %c0_26] : memref<1x3x4x8x128xf32, #tpu.memory_space<vmem>>, vector<1x1x1x8x128xf32>
    %13 = vector.shape_cast %12 : vector<1x1x1x8x128xf32> to vector<8x128xf32>
    %14 = arith.subf %11, %13 : vector<8x128xf32>
    %c0_27 = arith.constant 0 : index
    %c0_28 = arith.constant 0 : index
    %c3 = arith.constant 3 : index
    %c0_29 = arith.constant 0 : index
    %c0_30 = arith.constant 0 : index
    %15 = vector.load %arg1[%c0_27, %c0_28, %c3, %c0_29, %c0_30] : memref<1x3x4x8x128xf32, #tpu.memory_space<vmem>>, vector<1x1x1x8x128xf32>
    %16 = vector.shape_cast %15 : vector<1x1x1x8x128xf32> to vector<8x128xf32>
    %c0_31 = arith.constant 0 : index
    %c0_32 = arith.constant 0 : index
    %c3_33 = arith.constant 3 : index
    %c0_34 = arith.constant 0 : index
    %c0_35 = arith.constant 0 : index
    %17 = vector.load %arg2[%c0_31, %c0_32, %c3_33, %c0_34, %c0_35] : memref<1x3x4x8x128xf32, #tpu.memory_space<vmem>>, vector<1x1x1x8x128xf32>
    %18 = vector.shape_cast %17 : vector<1x1x1x8x128xf32> to vector<8x128xf32>
    %19 = arith.subf %16, %18 : vector<8x128xf32>
    %20 = arith.addf %4, %9 : vector<8x128xf32>
    %21 = arith.subf %4, %9 : vector<8x128xf32>
    %22 = arith.addf %14, %19 : vector<8x128xf32>
    %23 = arith.subf %14, %19 : vector<8x128xf32>
    %24 = arith.addf %21, %23 : vector<8x128xf32>
    %25 = math.absf %24 : vector<8x128xf32>
    %26 = arith.subf %20, %22 : vector<8x128xf32>
    %27 = math.absf %26 : vector<8x128xf32>
    %28 = arith.addf %25, %27 : vector<8x128xf32>
    %29 = arith.subf %21, %23 : vector<8x128xf32>
    %30 = math.absf %29 : vector<8x128xf32>
    %31 = arith.addf %28, %30 : vector<8x128xf32>
    %32 = arith.addf %20, %22 : vector<8x128xf32>
    %33 = math.absf %32 : vector<8x128xf32>
    %c0_36 = arith.constant 0 : index
    %c1_37 = arith.constant 1 : index
    %c0_38 = arith.constant 0 : index
    %c0_39 = arith.constant 0 : index
    %c0_40 = arith.constant 0 : index
    %34 = vector.load %arg1[%c0_36, %c1_37, %c0_38, %c0_39, %c0_40] : memref<1x3x4x8x128xf32, #tpu.memory_space<vmem>>, vector<1x1x1x8x128xf32>
    %35 = vector.shape_cast %34 : vector<1x1x1x8x128xf32> to vector<8x128xf32>
    %c0_41 = arith.constant 0 : index
    %c1_42 = arith.constant 1 : index
    %c0_43 = arith.constant 0 : index
    %c0_44 = arith.constant 0 : index
    %c0_45 = arith.constant 0 : index
    %36 = vector.load %arg2[%c0_41, %c1_42, %c0_43, %c0_44, %c0_45] : memref<1x3x4x8x128xf32, #tpu.memory_space<vmem>>, vector<1x1x1x8x128xf32>
    %37 = vector.shape_cast %36 : vector<1x1x1x8x128xf32> to vector<8x128xf32>
    %38 = arith.subf %35, %37 : vector<8x128xf32>
    %c0_46 = arith.constant 0 : index
    %c1_47 = arith.constant 1 : index
    %c1_48 = arith.constant 1 : index
    %c0_49 = arith.constant 0 : index
    %c0_50 = arith.constant 0 : index
    %39 = vector.load %arg1[%c0_46, %c1_47, %c1_48, %c0_49, %c0_50] : memref<1x3x4x8x128xf32, #tpu.memory_space<vmem>>, vector<1x1x1x8x128xf32>
    %40 = vector.shape_cast %39 : vector<1x1x1x8x128xf32> to vector<8x128xf32>
    %c0_51 = arith.constant 0 : index
    %c1_52 = arith.constant 1 : index
    %c1_53 = arith.constant 1 : index
    %c0_54 = arith.constant 0 : index
    %c0_55 = arith.constant 0 : index
    %41 = vector.load %arg2[%c0_51, %c1_52, %c1_53, %c0_54, %c0_55] : memref<1x3x4x8x128xf32, #tpu.memory_space<vmem>>, vector<1x1x1x8x128xf32>
    %42 = vector.shape_cast %41 : vector<1x1x1x8x128xf32> to vector<8x128xf32>
    %43 = arith.subf %40, %42 : vector<8x128xf32>
    %c0_56 = arith.constant 0 : index
    %c1_57 = arith.constant 1 : index
    %c2_58 = arith.constant 2 : index
    %c0_59 = arith.constant 0 : index
    %c0_60 = arith.constant 0 : index
    %44 = vector.load %arg1[%c0_56, %c1_57, %c2_58, %c0_59, %c0_60] : memref<1x3x4x8x128xf32, #tpu.memory_space<vmem>>, vector<1x1x1x8x128xf32>
    %45 = vector.shape_cast %44 : vector<1x1x1x8x128xf32> to vector<8x128xf32>
    %c0_61 = arith.constant 0 : index
    %c1_62 = arith.constant 1 : index
    %c2_63 = arith.constant 2 : index
    %c0_64 = arith.constant 0 : index
    %c0_65 = arith.constant 0 : index
    %46 = vector.load %arg2[%c0_61, %c1_62, %c2_63, %c0_64, %c0_65] : memref<1x3x4x8x128xf32, #tpu.memory_space<vmem>>, vector<1x1x1x8x128xf32>
    %47 = vector.shape_cast %46 : vector<1x1x1x8x128xf32> to vector<8x128xf32>
    %48 = arith.subf %45, %47 : vector<8x128xf32>
    %c0_66 = arith.constant 0 : index
    %c1_67 = arith.constant 1 : index
    %c3_68 = arith.constant 3 : index
    %c0_69 = arith.constant 0 : index
    %c0_70 = arith.constant 0 : index
    %49 = vector.load %arg1[%c0_66, %c1_67, %c3_68, %c0_69, %c0_70] : memref<1x3x4x8x128xf32, #tpu.memory_space<vmem>>, vector<1x1x1x8x128xf32>
    %50 = vector.shape_cast %49 : vector<1x1x1x8x128xf32> to vector<8x128xf32>
    %c0_71 = arith.constant 0 : index
    %c1_72 = arith.constant 1 : index
    %c3_73 = arith.constant 3 : index
    %c0_74 = arith.constant 0 : index
    %c0_75 = arith.constant 0 : index
    %51 = vector.load %arg2[%c0_71, %c1_72, %c3_73, %c0_74, %c0_75] : memref<1x3x4x8x128xf32, #tpu.memory_space<vmem>>, vector<1x1x1x8x128xf32>
    %52 = vector.shape_cast %51 : vector<1x1x1x8x128xf32> to vector<8x128xf32>
    %53 = arith.subf %50, %52 : vector<8x128xf32>
    %54 = arith.addf %38, %43 : vector<8x128xf32>
    %55 = arith.subf %38, %43 : vector<8x128xf32>
    %56 = arith.addf %48, %53 : vector<8x128xf32>
    %57 = arith.subf %48, %53 : vector<8x128xf32>
    %58 = arith.addf %55, %57 : vector<8x128xf32>
    %59 = math.absf %58 : vector<8x128xf32>
    %60 = arith.subf %54, %56 : vector<8x128xf32>
    %61 = math.absf %60 : vector<8x128xf32>
    %62 = arith.addf %59, %61 : vector<8x128xf32>
    %63 = arith.subf %55, %57 : vector<8x128xf32>
    %64 = math.absf %63 : vector<8x128xf32>
    %65 = arith.addf %62, %64 : vector<8x128xf32>
    %66 = arith.addf %54, %56 : vector<8x128xf32>
    %67 = math.absf %66 : vector<8x128xf32>
    %68 = arith.addf %33, %67 : vector<8x128xf32>
    %69 = arith.addf %31, %65 : vector<8x128xf32>
    %c0_76 = arith.constant 0 : index
    %c2_77 = arith.constant 2 : index
    %c0_78 = arith.constant 0 : index
    %c0_79 = arith.constant 0 : index
    %c0_80 = arith.constant 0 : index
    %70 = vector.load %arg1[%c0_76, %c2_77, %c0_78, %c0_79, %c0_80] : memref<1x3x4x8x128xf32, #tpu.memory_space<vmem>>, vector<1x1x1x8x128xf32>
    %71 = vector.shape_cast %70 : vector<1x1x1x8x128xf32> to vector<8x128xf32>
    %c0_81 = arith.constant 0 : index
    %c2_82 = arith.constant 2 : index
    %c0_83 = arith.constant 0 : index
    %c0_84 = arith.constant 0 : index
    %c0_85 = arith.constant 0 : index
    %72 = vector.load %arg2[%c0_81, %c2_82, %c0_83, %c0_84, %c0_85] : memref<1x3x4x8x128xf32, #tpu.memory_space<vmem>>, vector<1x1x1x8x128xf32>
    %73 = vector.shape_cast %72 : vector<1x1x1x8x128xf32> to vector<8x128xf32>
    %74 = arith.subf %71, %73 : vector<8x128xf32>
    %c0_86 = arith.constant 0 : index
    %c2_87 = arith.constant 2 : index
    %c1_88 = arith.constant 1 : index
    %c0_89 = arith.constant 0 : index
    %c0_90 = arith.constant 0 : index
    %75 = vector.load %arg1[%c0_86, %c2_87, %c1_88, %c0_89, %c0_90] : memref<1x3x4x8x128xf32, #tpu.memory_space<vmem>>, vector<1x1x1x8x128xf32>
    %76 = vector.shape_cast %75 : vector<1x1x1x8x128xf32> to vector<8x128xf32>
    %c0_91 = arith.constant 0 : index
    %c2_92 = arith.constant 2 : index
    %c1_93 = arith.constant 1 : index
    %c0_94 = arith.constant 0 : index
    %c0_95 = arith.constant 0 : index
    %77 = vector.load %arg2[%c0_91, %c2_92, %c1_93, %c0_94, %c0_95] : memref<1x3x4x8x128xf32, #tpu.memory_space<vmem>>, vector<1x1x1x8x128xf32>
    %78 = vector.shape_cast %77 : vector<1x1x1x8x128xf32> to vector<8x128xf32>
    %79 = arith.subf %76, %78 : vector<8x128xf32>
    %c0_96 = arith.constant 0 : index
    %c2_97 = arith.constant 2 : index
    %c2_98 = arith.constant 2 : index
    %c0_99 = arith.constant 0 : index
    %c0_100 = arith.constant 0 : index
    %80 = vector.load %arg1[%c0_96, %c2_97, %c2_98, %c0_99, %c0_100] : memref<1x3x4x8x128xf32, #tpu.memory_space<vmem>>, vector<1x1x1x8x128xf32>
    %81 = vector.shape_cast %80 : vector<1x1x1x8x128xf32> to vector<8x128xf32>
    %c0_101 = arith.constant 0 : index
    %c2_102 = arith.constant 2 : index
    %c2_103 = arith.constant 2 : index
    %c0_104 = arith.constant 0 : index
    %c0_105 = arith.constant 0 : index
    %82 = vector.load %arg2[%c0_101, %c2_102, %c2_103, %c0_104, %c0_105] : memref<1x3x4x8x128xf32, #tpu.memory_space<vmem>>, vector<1x1x1x8x128xf32>
    %83 = vector.shape_cast %82 : vector<1x1x1x8x128xf32> to vector<8x128xf32>
    %84 = arith.subf %81, %83 : vector<8x128xf32>
    %c0_106 = arith.constant 0 : index
    %c2_107 = arith.constant 2 : index
    %c3_108 = arith.constant 3 : index
    %c0_109 = arith.constant 0 : index
    %c0_110 = arith.constant 0 : index
    %85 = vector.load %arg1[%c0_106, %c2_107, %c3_108, %c0_109, %c0_110] : memref<1x3x4x8x128xf32, #tpu.memory_space<vmem>>, vector<1x1x1x8x128xf32>
    %86 = vector.shape_cast %85 : vector<1x1x1x8x128xf32> to vector<8x128xf32>
    %c0_111 = arith.constant 0 : index
    %c2_112 = arith.constant 2 : index
    %c3_113 = arith.constant 3 : index
    %c0_114 = arith.constant 0 : index
    %c0_115 = arith.constant 0 : index
    %87 = vector.load %arg2[%c0_111, %c2_112, %c3_113, %c0_114, %c0_115] : memref<1x3x4x8x128xf32, #tpu.memory_space<vmem>>, vector<1x1x1x8x128xf32>
    %88 = vector.shape_cast %87 : vector<1x1x1x8x128xf32> to vector<8x128xf32>
    %89 = arith.subf %86, %88 : vector<8x128xf32>
    %90 = arith.addf %74, %79 : vector<8x128xf32>
    %91 = arith.subf %74, %79 : vector<8x128xf32>
    %92 = arith.addf %84, %89 : vector<8x128xf32>
    %93 = arith.subf %84, %89 : vector<8x128xf32>
    %94 = arith.addf %91, %93 : vector<8x128xf32>
    %95 = math.absf %94 : vector<8x128xf32>
    %96 = arith.subf %90, %92 : vector<8x128xf32>
    %97 = math.absf %96 : vector<8x128xf32>
    %98 = arith.addf %95, %97 : vector<8x128xf32>
    %99 = arith.subf %91, %93 : vector<8x128xf32>
    %100 = math.absf %99 : vector<8x128xf32>
    %101 = arith.addf %98, %100 : vector<8x128xf32>
    %102 = arith.addf %90, %92 : vector<8x128xf32>
    %103 = math.absf %102 : vector<8x128xf32>
    %104 = arith.addf %68, %103 : vector<8x128xf32>
    %105 = arith.addf %69, %101 : vector<8x128xf32>
    %106 = vector.shape_cast %104 : vector<8x128xf32> to vector<1x8x128xf32>
    %cst = arith.constant dense<0.000000e+00> : vector<1xf32>
    %107 = vector.multi_reduction <add>, %106, %cst [1, 2] : vector<1x8x128xf32> to vector<1xf32>
    %108 = vector.shape_cast %107 : vector<1xf32> to vector<1x1x1xf32>
    %109 = vector.extract %108[0, 0, 0] : f32 from vector<1x1x1xf32>
    %110 = vector.shape_cast %105 : vector<8x128xf32> to vector<1x8x128xf32>
    %cst_116 = arith.constant dense<0.000000e+00> : vector<1xf32>
    %111 = vector.multi_reduction <add>, %110, %cst_116 [1, 2] : vector<1x8x128xf32> to vector<1xf32>
    %112 = vector.shape_cast %111 : vector<1xf32> to vector<1x1x1xf32>
    %113 = vector.extract %112[0, 0, 0] : f32 from vector<1x1x1xf32>
    %c0_117 = arith.constant 0 : index
    %c0_118 = arith.constant 0 : index
    %c0_119 = arith.constant 0 : index
    %c0_120 = arith.constant 0 : index
    %c0_121 = arith.constant 0 : index
    %114 = vector.load %arg1[%c0_117, %c0_118, %c0_119, %c0_120, %c0_121] : memref<1x3x4x8x128xf32, #tpu.memory_space<vmem>>, vector<1x1x1x8x128xf32>
    %115 = vector.shape_cast %114 : vector<1x1x1x8x128xf32> to vector<8x128xf32>
    %c0_122 = arith.constant 0 : index
    %c0_123 = arith.constant 0 : index
    %c0_124 = arith.constant 0 : index
    %c0_125 = arith.constant 0 : index
    %c0_126 = arith.constant 0 : index
    %116 = vector.load %arg3[%c0_122, %c0_123, %c0_124, %c0_125, %c0_126] : memref<1x3x4x8x128xf32, #tpu.memory_space<vmem>>, vector<1x1x1x8x128xf32>
    %117 = vector.shape_cast %116 : vector<1x1x1x8x128xf32> to vector<8x128xf32>
    %118 = arith.subf %115, %117 : vector<8x128xf32>
    %c0_127 = arith.constant 0 : index
    %c0_128 = arith.constant 0 : index
    %c1_129 = arith.constant 1 : index
    %c0_130 = arith.constant 0 : index
    %c0_131 = arith.constant 0 : index
    %119 = vector.load %arg1[%c0_127, %c0_128, %c1_129, %c0_130, %c0_131] : memref<1x3x4x8x128xf32, #tpu.memory_space<vmem>>, vector<1x1x1x8x128xf32>
    %120 = vector.shape_cast %119 : vector<1x1x1x8x128xf32> to vector<8x128xf32>
    %c0_132 = arith.constant 0 : index
    %c0_133 = arith.constant 0 : index
    %c1_134 = arith.constant 1 : index
    %c0_135 = arith.constant 0 : index
    %c0_136 = arith.constant 0 : index
    %121 = vector.load %arg3[%c0_132, %c0_133, %c1_134, %c0_135, %c0_136] : memref<1x3x4x8x128xf32, #tpu.memory_space<vmem>>, vector<1x1x1x8x128xf32>
    %122 = vector.shape_cast %121 : vector<1x1x1x8x128xf32> to vector<8x128xf32>
    %123 = arith.subf %120, %122 : vector<8x128xf32>
    %c0_137 = arith.constant 0 : index
    %c0_138 = arith.constant 0 : index
    %c2_139 = arith.constant 2 : index
    %c0_140 = arith.constant 0 : index
    %c0_141 = arith.constant 0 : index
    %124 = vector.load %arg1[%c0_137, %c0_138, %c2_139, %c0_140, %c0_141] : memref<1x3x4x8x128xf32, #tpu.memory_space<vmem>>, vector<1x1x1x8x128xf32>
    %125 = vector.shape_cast %124 : vector<1x1x1x8x128xf32> to vector<8x128xf32>
    %c0_142 = arith.constant 0 : index
    %c0_143 = arith.constant 0 : index
    %c2_144 = arith.constant 2 : index
    %c0_145 = arith.constant 0 : index
    %c0_146 = arith.constant 0 : index
    %126 = vector.load %arg3[%c0_142, %c0_143, %c2_144, %c0_145, %c0_146] : memref<1x3x4x8x128xf32, #tpu.memory_space<vmem>>, vector<1x1x1x8x128xf32>
    %127 = vector.shape_cast %126 : vector<1x1x1x8x128xf32> to vector<8x128xf32>
    %128 = arith.subf %125, %127 : vector<8x128xf32>
    %c0_147 = arith.constant 0 : index
    %c0_148 = arith.constant 0 : index
    %c3_149 = arith.constant 3 : index
    %c0_150 = arith.constant 0 : index
    %c0_151 = arith.constant 0 : index
    %129 = vector.load %arg1[%c0_147, %c0_148, %c3_149, %c0_150, %c0_151] : memref<1x3x4x8x128xf32, #tpu.memory_space<vmem>>, vector<1x1x1x8x128xf32>
    %130 = vector.shape_cast %129 : vector<1x1x1x8x128xf32> to vector<8x128xf32>
    %c0_152 = arith.constant 0 : index
    %c0_153 = arith.constant 0 : index
    %c3_154 = arith.constant 3 : index
    %c0_155 = arith.constant 0 : index
    %c0_156 = arith.constant 0 : index
    %131 = vector.load %arg3[%c0_152, %c0_153, %c3_154, %c0_155, %c0_156] : memref<1x3x4x8x128xf32, #tpu.memory_space<vmem>>, vector<1x1x1x8x128xf32>
    %132 = vector.shape_cast %131 : vector<1x1x1x8x128xf32> to vector<8x128xf32>
    %133 = arith.subf %130, %132 : vector<8x128xf32>
    %134 = arith.addf %118, %123 : vector<8x128xf32>
    %135 = arith.subf %118, %123 : vector<8x128xf32>
    %136 = arith.addf %128, %133 : vector<8x128xf32>
    %137 = arith.subf %128, %133 : vector<8x128xf32>
    %138 = arith.addf %135, %137 : vector<8x128xf32>
    %139 = math.absf %138 : vector<8x128xf32>
    %140 = arith.subf %134, %136 : vector<8x128xf32>
    %141 = math.absf %140 : vector<8x128xf32>
    %142 = arith.addf %139, %141 : vector<8x128xf32>
    %143 = arith.subf %135, %137 : vector<8x128xf32>
    %144 = math.absf %143 : vector<8x128xf32>
    %145 = arith.addf %142, %144 : vector<8x128xf32>
    %c0_157 = arith.constant 0 : index
    %c1_158 = arith.constant 1 : index
    %c0_159 = arith.constant 0 : index
    %c0_160 = arith.constant 0 : index
    %c0_161 = arith.constant 0 : index
    %146 = vector.load %arg1[%c0_157, %c1_158, %c0_159, %c0_160, %c0_161] : memref<1x3x4x8x128xf32, #tpu.memory_space<vmem>>, vector<1x1x1x8x128xf32>
    %147 = vector.shape_cast %146 : vector<1x1x1x8x128xf32> to vector<8x128xf32>
    %c0_162 = arith.constant 0 : index
    %c1_163 = arith.constant 1 : index
    %c0_164 = arith.constant 0 : index
    %c0_165 = arith.constant 0 : index
    %c0_166 = arith.constant 0 : index
    %148 = vector.load %arg3[%c0_162, %c1_163, %c0_164, %c0_165, %c0_166] : memref<1x3x4x8x128xf32, #tpu.memory_space<vmem>>, vector<1x1x1x8x128xf32>
    %149 = vector.shape_cast %148 : vector<1x1x1x8x128xf32> to vector<8x128xf32>
    %150 = arith.subf %147, %149 : vector<8x128xf32>
    %c0_167 = arith.constant 0 : index
    %c1_168 = arith.constant 1 : index
    %c1_169 = arith.constant 1 : index
    %c0_170 = arith.constant 0 : index
    %c0_171 = arith.constant 0 : index
    %151 = vector.load %arg1[%c0_167, %c1_168, %c1_169, %c0_170, %c0_171] : memref<1x3x4x8x128xf32, #tpu.memory_space<vmem>>, vector<1x1x1x8x128xf32>
    %152 = vector.shape_cast %151 : vector<1x1x1x8x128xf32> to vector<8x128xf32>
    %c0_172 = arith.constant 0 : index
    %c1_173 = arith.constant 1 : index
    %c1_174 = arith.constant 1 : index
    %c0_175 = arith.constant 0 : index
    %c0_176 = arith.constant 0 : index
    %153 = vector.load %arg3[%c0_172, %c1_173, %c1_174, %c0_175, %c0_176] : memref<1x3x4x8x128xf32, #tpu.memory_space<vmem>>, vector<1x1x1x8x128xf32>
    %154 = vector.shape_cast %153 : vector<1x1x1x8x128xf32> to vector<8x128xf32>
    %155 = arith.subf %152, %154 : vector<8x128xf32>
    %c0_177 = arith.constant 0 : index
    %c1_178 = arith.constant 1 : index
    %c2_179 = arith.constant 2 : index
    %c0_180 = arith.constant 0 : index
    %c0_181 = arith.constant 0 : index
    %156 = vector.load %arg1[%c0_177, %c1_178, %c2_179, %c0_180, %c0_181] : memref<1x3x4x8x128xf32, #tpu.memory_space<vmem>>, vector<1x1x1x8x128xf32>
    %157 = vector.shape_cast %156 : vector<1x1x1x8x128xf32> to vector<8x128xf32>
    %c0_182 = arith.constant 0 : index
    %c1_183 = arith.constant 1 : index
    %c2_184 = arith.constant 2 : index
    %c0_185 = arith.constant 0 : index
    %c0_186 = arith.constant 0 : index
    %158 = vector.load %arg3[%c0_182, %c1_183, %c2_184, %c0_185, %c0_186] : memref<1x3x4x8x128xf32, #tpu.memory_space<vmem>>, vector<1x1x1x8x128xf32>
    %159 = vector.shape_cast %158 : vector<1x1x1x8x128xf32> to vector<8x128xf32>
    %160 = arith.subf %157, %159 : vector<8x128xf32>
    %c0_187 = arith.constant 0 : index
    %c1_188 = arith.constant 1 : index
    %c3_189 = arith.constant 3 : index
    %c0_190 = arith.constant 0 : index
    %c0_191 = arith.constant 0 : index
    %161 = vector.load %arg1[%c0_187, %c1_188, %c3_189, %c0_190, %c0_191] : memref<1x3x4x8x128xf32, #tpu.memory_space<vmem>>, vector<1x1x1x8x128xf32>
    %162 = vector.shape_cast %161 : vector<1x1x1x8x128xf32> to vector<8x128xf32>
    %c0_192 = arith.constant 0 : index
    %c1_193 = arith.constant 1 : index
    %c3_194 = arith.constant 3 : index
    %c0_195 = arith.constant 0 : index
    %c0_196 = arith.constant 0 : index
    %163 = vector.load %arg3[%c0_192, %c1_193, %c3_194, %c0_195, %c0_196] : memref<1x3x4x8x128xf32, #tpu.memory_space<vmem>>, vector<1x1x1x8x128xf32>
    %164 = vector.shape_cast %163 : vector<1x1x1x8x128xf32> to vector<8x128xf32>
    %165 = arith.subf %162, %164 : vector<8x128xf32>
    %166 = arith.addf %150, %155 : vector<8x128xf32>
    %167 = arith.subf %150, %155 : vector<8x128xf32>
    %168 = arith.addf %160, %165 : vector<8x128xf32>
    %169 = arith.subf %160, %165 : vector<8x128xf32>
    %170 = arith.addf %167, %169 : vector<8x128xf32>
    %171 = math.absf %170 : vector<8x128xf32>
    %172 = arith.subf %166, %168 : vector<8x128xf32>
    %173 = math.absf %172 : vector<8x128xf32>
    %174 = arith.addf %171, %173 : vector<8x128xf32>
    %175 = arith.subf %167, %169 : vector<8x128xf32>
    %176 = math.absf %175 : vector<8x128xf32>
    %177 = arith.addf %174, %176 : vector<8x128xf32>
    %178 = arith.addf %145, %177 : vector<8x128xf32>
    %c0_197 = arith.constant 0 : index
    %c2_198 = arith.constant 2 : index
    %c0_199 = arith.constant 0 : index
    %c0_200 = arith.constant 0 : index
    %c0_201 = arith.constant 0 : index
    %179 = vector.load %arg1[%c0_197, %c2_198, %c0_199, %c0_200, %c0_201] : memref<1x3x4x8x128xf32, #tpu.memory_space<vmem>>, vector<1x1x1x8x128xf32>
    %180 = vector.shape_cast %179 : vector<1x1x1x8x128xf32> to vector<8x128xf32>
    %c0_202 = arith.constant 0 : index
    %c2_203 = arith.constant 2 : index
    %c0_204 = arith.constant 0 : index
    %c0_205 = arith.constant 0 : index
    %c0_206 = arith.constant 0 : index
    %181 = vector.load %arg3[%c0_202, %c2_203, %c0_204, %c0_205, %c0_206] : memref<1x3x4x8x128xf32, #tpu.memory_space<vmem>>, vector<1x1x1x8x128xf32>
    %182 = vector.shape_cast %181 : vector<1x1x1x8x128xf32> to vector<8x128xf32>
    %183 = arith.subf %180, %182 : vector<8x128xf32>
    %c0_207 = arith.constant 0 : index
    %c2_208 = arith.constant 2 : index
    %c1_209 = arith.constant 1 : index
    %c0_210 = arith.constant 0 : index
    %c0_211 = arith.constant 0 : index
    %184 = vector.load %arg1[%c0_207, %c2_208, %c1_209, %c0_210, %c0_211] : memref<1x3x4x8x128xf32, #tpu.memory_space<vmem>>, vector<1x1x1x8x128xf32>
    %185 = vector.shape_cast %184 : vector<1x1x1x8x128xf32> to vector<8x128xf32>
    %c0_212 = arith.constant 0 : index
    %c2_213 = arith.constant 2 : index
    %c1_214 = arith.constant 1 : index
    %c0_215 = arith.constant 0 : index
    %c0_216 = arith.constant 0 : index
    %186 = vector.load %arg3[%c0_212, %c2_213, %c1_214, %c0_215, %c0_216] : memref<1x3x4x8x128xf32, #tpu.memory_space<vmem>>, vector<1x1x1x8x128xf32>
    %187 = vector.shape_cast %186 : vector<1x1x1x8x128xf32> to vector<8x128xf32>
    %188 = arith.subf %185, %187 : vector<8x128xf32>
    %c0_217 = arith.constant 0 : index
    %c2_218 = arith.constant 2 : index
    %c2_219 = arith.constant 2 : index
    %c0_220 = arith.constant 0 : index
    %c0_221 = arith.constant 0 : index
    %189 = vector.load %arg1[%c0_217, %c2_218, %c2_219, %c0_220, %c0_221] : memref<1x3x4x8x128xf32, #tpu.memory_space<vmem>>, vector<1x1x1x8x128xf32>
    %190 = vector.shape_cast %189 : vector<1x1x1x8x128xf32> to vector<8x128xf32>
    %c0_222 = arith.constant 0 : index
    %c2_223 = arith.constant 2 : index
    %c2_224 = arith.constant 2 : index
    %c0_225 = arith.constant 0 : index
    %c0_226 = arith.constant 0 : index
    %191 = vector.load %arg3[%c0_222, %c2_223, %c2_224, %c0_225, %c0_226] : memref<1x3x4x8x128xf32, #tpu.memory_space<vmem>>, vector<1x1x1x8x128xf32>
    %192 = vector.shape_cast %191 : vector<1x1x1x8x128xf32> to vector<8x128xf32>
    %193 = arith.subf %190, %192 : vector<8x128xf32>
    %c0_227 = arith.constant 0 : index
    %c2_228 = arith.constant 2 : index
    %c3_229 = arith.constant 3 : index
    %c0_230 = arith.constant 0 : index
    %c0_231 = arith.constant 0 : index
    %194 = vector.load %arg1[%c0_227, %c2_228, %c3_229, %c0_230, %c0_231] : memref<1x3x4x8x128xf32, #tpu.memory_space<vmem>>, vector<1x1x1x8x128xf32>
    %195 = vector.shape_cast %194 : vector<1x1x1x8x128xf32> to vector<8x128xf32>
    %c0_232 = arith.constant 0 : index
    %c2_233 = arith.constant 2 : index
    %c3_234 = arith.constant 3 : index
    %c0_235 = arith.constant 0 : index
    %c0_236 = arith.constant 0 : index
    %196 = vector.load %arg3[%c0_232, %c2_233, %c3_234, %c0_235, %c0_236] : memref<1x3x4x8x128xf32, #tpu.memory_space<vmem>>, vector<1x1x1x8x128xf32>
    %197 = vector.shape_cast %196 : vector<1x1x1x8x128xf32> to vector<8x128xf32>
    %198 = arith.subf %195, %197 : vector<8x128xf32>
    %199 = arith.addf %183, %188 : vector<8x128xf32>
    %200 = arith.subf %183, %188 : vector<8x128xf32>
    %201 = arith.addf %193, %198 : vector<8x128xf32>
    %202 = arith.subf %193, %198 : vector<8x128xf32>
    %203 = arith.addf %200, %202 : vector<8x128xf32>
    %204 = math.absf %203 : vector<8x128xf32>
    %205 = arith.subf %199, %201 : vector<8x128xf32>
    %206 = math.absf %205 : vector<8x128xf32>
    %207 = arith.addf %204, %206 : vector<8x128xf32>
    %208 = arith.subf %200, %202 : vector<8x128xf32>
    %209 = math.absf %208 : vector<8x128xf32>
    %210 = arith.addf %207, %209 : vector<8x128xf32>
    %211 = arith.addf %178, %210 : vector<8x128xf32>
    %212 = vector.shape_cast %211 : vector<8x128xf32> to vector<1x8x128xf32>
    %cst_237 = arith.constant dense<0.000000e+00> : vector<1xf32>
    %213 = vector.multi_reduction <add>, %212, %cst_237 [1, 2] : vector<1x8x128xf32> to vector<1xf32>
    %214 = vector.shape_cast %213 : vector<1xf32> to vector<1x1x1xf32>
    %215 = vector.extract %214[0, 0, 0] : f32 from vector<1x1x1xf32>
    %c0_238 = arith.constant 0 : index
    %c0_239 = arith.constant 0 : index
    %c0_240 = arith.constant 0 : index
    %c0_241 = arith.constant 0 : index
    %c0_242 = arith.constant 0 : index
    %216 = vector.load %arg3[%c0_238, %c0_239, %c0_240, %c0_241, %c0_242] : memref<1x3x4x8x128xf32, #tpu.memory_space<vmem>>, vector<1x1x1x8x128xf32>
    %217 = vector.shape_cast %216 : vector<1x1x1x8x128xf32> to vector<8x128xf32>
    %cst_243 = arith.constant 1.050000e+00 : f32
    %218 = vector.broadcast %cst_243 : f32 to vector<8x128xf32>
    %219 = arith.mulf %217, %218 : vector<8x128xf32>
    %cst_244 = arith.constant 0.000000e+00 : f32
    %cst_245 = arith.constant 1.000000e+00 : f32
    %220 = vector.broadcast %cst_244 : f32 to vector<8x128xf32>
    %221 = arith.maximumf %220, %219 : vector<8x128xf32>
    %222 = vector.broadcast %cst_245 : f32 to vector<8x128xf32>
    %223 = arith.minimumf %222, %221 : vector<8x128xf32>
    %c0_246 = arith.constant 0 : index
    %c0_247 = arith.constant 0 : index
    %c1_248 = arith.constant 1 : index
    %c0_249 = arith.constant 0 : index
    %c0_250 = arith.constant 0 : index
    %224 = vector.load %arg3[%c0_246, %c0_247, %c1_248, %c0_249, %c0_250] : memref<1x3x4x8x128xf32, #tpu.memory_space<vmem>>, vector<1x1x1x8x128xf32>
    %225 = vector.shape_cast %224 : vector<1x1x1x8x128xf32> to vector<8x128xf32>
    %cst_251 = arith.constant 1.050000e+00 : f32
    %226 = vector.broadcast %cst_251 : f32 to vector<8x128xf32>
    %227 = arith.mulf %225, %226 : vector<8x128xf32>
    %cst_252 = arith.constant 0.000000e+00 : f32
    %cst_253 = arith.constant 1.000000e+00 : f32
    %228 = vector.broadcast %cst_252 : f32 to vector<8x128xf32>
    %229 = arith.maximumf %228, %227 : vector<8x128xf32>
    %230 = vector.broadcast %cst_253 : f32 to vector<8x128xf32>
    %231 = arith.minimumf %230, %229 : vector<8x128xf32>
    %c0_254 = arith.constant 0 : index
    %c0_255 = arith.constant 0 : index
    %c2_256 = arith.constant 2 : index
    %c0_257 = arith.constant 0 : index
    %c0_258 = arith.constant 0 : index
    %232 = vector.load %arg3[%c0_254, %c0_255, %c2_256, %c0_257, %c0_258] : memref<1x3x4x8x128xf32, #tpu.memory_space<vmem>>, vector<1x1x1x8x128xf32>
    %233 = vector.shape_cast %232 : vector<1x1x1x8x128xf32> to vector<8x128xf32>
    %cst_259 = arith.constant 1.050000e+00 : f32
    %234 = vector.broadcast %cst_259 : f32 to vector<8x128xf32>
    %235 = arith.mulf %233, %234 : vector<8x128xf32>
    %cst_260 = arith.constant 0.000000e+00 : f32
    %cst_261 = arith.constant 1.000000e+00 : f32
    %236 = vector.broadcast %cst_260 : f32 to vector<8x128xf32>
    %237 = arith.maximumf %236, %235 : vector<8x128xf32>
    %238 = vector.broadcast %cst_261 : f32 to vector<8x128xf32>
    %239 = arith.minimumf %238, %237 : vector<8x128xf32>
    %c0_262 = arith.constant 0 : index
    %c0_263 = arith.constant 0 : index
    %c3_264 = arith.constant 3 : index
    %c0_265 = arith.constant 0 : index
    %c0_266 = arith.constant 0 : index
    %240 = vector.load %arg3[%c0_262, %c0_263, %c3_264, %c0_265, %c0_266] : memref<1x3x4x8x128xf32, #tpu.memory_space<vmem>>, vector<1x1x1x8x128xf32>
    %241 = vector.shape_cast %240 : vector<1x1x1x8x128xf32> to vector<8x128xf32>
    %cst_267 = arith.constant 1.050000e+00 : f32
    %242 = vector.broadcast %cst_267 : f32 to vector<8x128xf32>
    %243 = arith.mulf %241, %242 : vector<8x128xf32>
    %cst_268 = arith.constant 0.000000e+00 : f32
    %cst_269 = arith.constant 1.000000e+00 : f32
    %244 = vector.broadcast %cst_268 : f32 to vector<8x128xf32>
    %245 = arith.maximumf %244, %243 : vector<8x128xf32>
    %246 = vector.broadcast %cst_269 : f32 to vector<8x128xf32>
    %247 = arith.minimumf %246, %245 : vector<8x128xf32>
    %c0_270 = arith.constant 0 : index
    %c1_271 = arith.constant 1 : index
    %c0_272 = arith.constant 0 : index
    %c0_273 = arith.constant 0 : index
    %c0_274 = arith.constant 0 : index
    %248 = vector.load %arg3[%c0_270, %c1_271, %c0_272, %c0_273, %c0_274] : memref<1x3x4x8x128xf32, #tpu.memory_space<vmem>>, vector<1x1x1x8x128xf32>
    %249 = vector.shape_cast %248 : vector<1x1x1x8x128xf32> to vector<8x128xf32>
    %cst_275 = arith.constant 1.050000e+00 : f32
    %250 = vector.broadcast %cst_275 : f32 to vector<8x128xf32>
    %251 = arith.mulf %249, %250 : vector<8x128xf32>
    %cst_276 = arith.constant 0.000000e+00 : f32
    %cst_277 = arith.constant 1.000000e+00 : f32
    %252 = vector.broadcast %cst_276 : f32 to vector<8x128xf32>
    %253 = arith.maximumf %252, %251 : vector<8x128xf32>
    %254 = vector.broadcast %cst_277 : f32 to vector<8x128xf32>
    %255 = arith.minimumf %254, %253 : vector<8x128xf32>
    %c0_278 = arith.constant 0 : index
    %c1_279 = arith.constant 1 : index
    %c1_280 = arith.constant 1 : index
    %c0_281 = arith.constant 0 : index
    %c0_282 = arith.constant 0 : index
    %256 = vector.load %arg3[%c0_278, %c1_279, %c1_280, %c0_281, %c0_282] : memref<1x3x4x8x128xf32, #tpu.memory_space<vmem>>, vector<1x1x1x8x128xf32>
    %257 = vector.shape_cast %256 : vector<1x1x1x8x128xf32> to vector<8x128xf32>
    %cst_283 = arith.constant 1.050000e+00 : f32
    %258 = vector.broadcast %cst_283 : f32 to vector<8x128xf32>
    %259 = arith.mulf %257, %258 : vector<8x128xf32>
    %cst_284 = arith.constant 0.000000e+00 : f32
    %cst_285 = arith.constant 1.000000e+00 : f32
    %260 = vector.broadcast %cst_284 : f32 to vector<8x128xf32>
    %261 = arith.maximumf %260, %259 : vector<8x128xf32>
    %262 = vector.broadcast %cst_285 : f32 to vector<8x128xf32>
    %263 = arith.minimumf %262, %261 : vector<8x128xf32>
    %c0_286 = arith.constant 0 : index
    %c1_287 = arith.constant 1 : index
    %c2_288 = arith.constant 2 : index
    %c0_289 = arith.constant 0 : index
    %c0_290 = arith.constant 0 : index
    %264 = vector.load %arg3[%c0_286, %c1_287, %c2_288, %c0_289, %c0_290] : memref<1x3x4x8x128xf32, #tpu.memory_space<vmem>>, vector<1x1x1x8x128xf32>
    %265 = vector.shape_cast %264 : vector<1x1x1x8x128xf32> to vector<8x128xf32>
    %cst_291 = arith.constant 1.050000e+00 : f32
    %266 = vector.broadcast %cst_291 : f32 to vector<8x128xf32>
    %267 = arith.mulf %265, %266 : vector<8x128xf32>
    %cst_292 = arith.constant 0.000000e+00 : f32
    %cst_293 = arith.constant 1.000000e+00 : f32
    %268 = vector.broadcast %cst_292 : f32 to vector<8x128xf32>
    %269 = arith.maximumf %268, %267 : vector<8x128xf32>
    %270 = vector.broadcast %cst_293 : f32 to vector<8x128xf32>
    %271 = arith.minimumf %270, %269 : vector<8x128xf32>
    %c0_294 = arith.constant 0 : index
    %c1_295 = arith.constant 1 : index
    %c3_296 = arith.constant 3 : index
    %c0_297 = arith.constant 0 : index
    %c0_298 = arith.constant 0 : index
    %272 = vector.load %arg3[%c0_294, %c1_295, %c3_296, %c0_297, %c0_298] : memref<1x3x4x8x128xf32, #tpu.memory_space<vmem>>, vector<1x1x1x8x128xf32>
    %273 = vector.shape_cast %272 : vector<1x1x1x8x128xf32> to vector<8x128xf32>
    %cst_299 = arith.constant 1.050000e+00 : f32
    %274 = vector.broadcast %cst_299 : f32 to vector<8x128xf32>
    %275 = arith.mulf %273, %274 : vector<8x128xf32>
    %cst_300 = arith.constant 0.000000e+00 : f32
    %cst_301 = arith.constant 1.000000e+00 : f32
    %276 = vector.broadcast %cst_300 : f32 to vector<8x128xf32>
    %277 = arith.maximumf %276, %275 : vector<8x128xf32>
    %278 = vector.broadcast %cst_301 : f32 to vector<8x128xf32>
    %279 = arith.minimumf %278, %277 : vector<8x128xf32>
    %c0_302 = arith.constant 0 : index
    %c2_303 = arith.constant 2 : index
    %c0_304 = arith.constant 0 : index
    %c0_305 = arith.constant 0 : index
    %c0_306 = arith.constant 0 : index
    %280 = vector.load %arg3[%c0_302, %c2_303, %c0_304, %c0_305, %c0_306] : memref<1x3x4x8x128xf32, #tpu.memory_space<vmem>>, vector<1x1x1x8x128xf32>
    %281 = vector.shape_cast %280 : vector<1x1x1x8x128xf32> to vector<8x128xf32>
    %cst_307 = arith.constant 1.050000e+00 : f32
    %282 = vector.broadcast %cst_307 : f32 to vector<8x128xf32>
    %283 = arith.mulf %281, %282 : vector<8x128xf32>
    %cst_308 = arith.constant 0.000000e+00 : f32
    %cst_309 = arith.constant 1.000000e+00 : f32
    %284 = vector.broadcast %cst_308 : f32 to vector<8x128xf32>
    %285 = arith.maximumf %284, %283 : vector<8x128xf32>
    %286 = vector.broadcast %cst_309 : f32 to vector<8x128xf32>
    %287 = arith.minimumf %286, %285 : vector<8x128xf32>
    %c0_310 = arith.constant 0 : index
    %c2_311 = arith.constant 2 : index
    %c1_312 = arith.constant 1 : index
    %c0_313 = arith.constant 0 : index
    %c0_314 = arith.constant 0 : index
    %288 = vector.load %arg3[%c0_310, %c2_311, %c1_312, %c0_313, %c0_314] : memref<1x3x4x8x128xf32, #tpu.memory_space<vmem>>, vector<1x1x1x8x128xf32>
    %289 = vector.shape_cast %288 : vector<1x1x1x8x128xf32> to vector<8x128xf32>
    %cst_315 = arith.constant 1.050000e+00 : f32
    %290 = vector.broadcast %cst_315 : f32 to vector<8x128xf32>
    %291 = arith.mulf %289, %290 : vector<8x128xf32>
    %cst_316 = arith.constant 0.000000e+00 : f32
    %cst_317 = arith.constant 1.000000e+00 : f32
    %292 = vector.broadcast %cst_316 : f32 to vector<8x128xf32>
    %293 = arith.maximumf %292, %291 : vector<8x128xf32>
    %294 = vector.broadcast %cst_317 : f32 to vector<8x128xf32>
    %295 = arith.minimumf %294, %293 : vector<8x128xf32>
    %c0_318 = arith.constant 0 : index
    %c2_319 = arith.constant 2 : index
    %c2_320 = arith.constant 2 : index
    %c0_321 = arith.constant 0 : index
    %c0_322 = arith.constant 0 : index
    %296 = vector.load %arg3[%c0_318, %c2_319, %c2_320, %c0_321, %c0_322] : memref<1x3x4x8x128xf32, #tpu.memory_space<vmem>>, vector<1x1x1x8x128xf32>
    %297 = vector.shape_cast %296 : vector<1x1x1x8x128xf32> to vector<8x128xf32>
    %cst_323 = arith.constant 1.050000e+00 : f32
    %298 = vector.broadcast %cst_323 : f32 to vector<8x128xf32>
    %299 = arith.mulf %297, %298 : vector<8x128xf32>
    %cst_324 = arith.constant 0.000000e+00 : f32
    %cst_325 = arith.constant 1.000000e+00 : f32
    %300 = vector.broadcast %cst_324 : f32 to vector<8x128xf32>
    %301 = arith.maximumf %300, %299 : vector<8x128xf32>
    %302 = vector.broadcast %cst_325 : f32 to vector<8x128xf32>
    %303 = arith.minimumf %302, %301 : vector<8x128xf32>
    %c0_326 = arith.constant 0 : index
    %c2_327 = arith.constant 2 : index
    %c3_328 = arith.constant 3 : index
    %c0_329 = arith.constant 0 : index
    %c0_330 = arith.constant 0 : index
    %304 = vector.load %arg3[%c0_326, %c2_327, %c3_328, %c0_329, %c0_330] : memref<1x3x4x8x128xf32, #tpu.memory_space<vmem>>, vector<1x1x1x8x128xf32>
    %305 = vector.shape_cast %304 : vector<1x1x1x8x128xf32> to vector<8x128xf32>
    %cst_331 = arith.constant 1.050000e+00 : f32
    %306 = vector.broadcast %cst_331 : f32 to vector<8x128xf32>
    %307 = arith.mulf %305, %306 : vector<8x128xf32>
    %cst_332 = arith.constant 0.000000e+00 : f32
    %cst_333 = arith.constant 1.000000e+00 : f32
    %308 = vector.broadcast %cst_332 : f32 to vector<8x128xf32>
    %309 = arith.maximumf %308, %307 : vector<8x128xf32>
    %310 = vector.broadcast %cst_333 : f32 to vector<8x128xf32>
    %311 = arith.minimumf %310, %309 : vector<8x128xf32>
    %cst_334 = arith.constant 2.989000e-01 : f32
    %312 = vector.broadcast %cst_334 : f32 to vector<8x128xf32>
    %313 = arith.mulf %312, %223 : vector<8x128xf32>
    %cst_335 = arith.constant 5.870000e-01 : f32
    %314 = vector.broadcast %cst_335 : f32 to vector<8x128xf32>
    %315 = arith.mulf %314, %255 : vector<8x128xf32>
    %316 = arith.addf %313, %315 : vector<8x128xf32>
    %cst_336 = arith.constant 1.140000e-01 : f32
    %317 = vector.broadcast %cst_336 : f32 to vector<8x128xf32>
    %318 = arith.mulf %317, %287 : vector<8x128xf32>
    %319 = arith.addf %316, %318 : vector<8x128xf32>
    %cst_337 = arith.constant 2.989000e-01 : f32
    %320 = vector.broadcast %cst_337 : f32 to vector<8x128xf32>
    %321 = arith.mulf %320, %231 : vector<8x128xf32>
    %cst_338 = arith.constant 5.870000e-01 : f32
    %322 = vector.broadcast %cst_338 : f32 to vector<8x128xf32>
    %323 = arith.mulf %322, %263 : vector<8x128xf32>
    %324 = arith.addf %321, %323 : vector<8x128xf32>
    %cst_339 = arith.constant 1.140000e-01 : f32
    %325 = vector.broadcast %cst_339 : f32 to vector<8x128xf32>
    %326 = arith.mulf %325, %295 : vector<8x128xf32>
    %327 = arith.addf %324, %326 : vector<8x128xf32>
    %cst_340 = arith.constant 2.989000e-01 : f32
    %328 = vector.broadcast %cst_340 : f32 to vector<8x128xf32>
    %329 = arith.mulf %328, %239 : vector<8x128xf32>
    %cst_341 = arith.constant 5.870000e-01 : f32
    %330 = vector.broadcast %cst_341 : f32 to vector<8x128xf32>
    %331 = arith.mulf %330, %271 : vector<8x128xf32>
    %332 = arith.addf %329, %331 : vector<8x128xf32>
    %cst_342 = arith.constant 1.140000e-01 : f32
    %333 = vector.broadcast %cst_342 : f32 to vector<8x128xf32>
    %334 = arith.mulf %333, %303 : vector<8x128xf32>
    %335 = arith.addf %332, %334 : vector<8x128xf32>
    %cst_343 = arith.constant 2.989000e-01 : f32
    %336 = vector.broadcast %cst_343 : f32 to vector<8x128xf32>
    %337 = arith.mulf %336, %247 : vector<8x128xf32>
    %cst_344 = arith.constant 5.870000e-01 : f32
    %338 = vector.broadcast %cst_344 : f32 to vector<8x128xf32>
    %339 = arith.mulf %338, %279 : vector<8x128xf32>
    %340 = arith.addf %337, %339 : vector<8x128xf32>
    %cst_345 = arith.constant 1.140000e-01 : f32
    %341 = vector.broadcast %cst_345 : f32 to vector<8x128xf32>
    %342 = arith.mulf %341, %311 : vector<8x128xf32>
    %343 = arith.addf %340, %342 : vector<8x128xf32>
    %344 = vector.shape_cast %319 : vector<8x128xf32> to vector<1x8x128xf32>
    %cst_346 = arith.constant dense<0.000000e+00> : vector<1xf32>
    %345 = vector.multi_reduction <add>, %344, %cst_346 [1, 2] : vector<1x8x128xf32> to vector<1xf32>
    %346 = vector.shape_cast %345 : vector<1xf32> to vector<1x1x1xf32>
    %347 = vector.extract %346[0, 0, 0] : f32 from vector<1x1x1xf32>
    %348 = vector.shape_cast %327 : vector<8x128xf32> to vector<1x8x128xf32>
    %cst_347 = arith.constant dense<0.000000e+00> : vector<1xf32>
    %349 = vector.multi_reduction <add>, %348, %cst_347 [1, 2] : vector<1x8x128xf32> to vector<1xf32>
    %350 = vector.shape_cast %349 : vector<1xf32> to vector<1x1x1xf32>
    %351 = vector.extract %350[0, 0, 0] : f32 from vector<1x1x1xf32>
    %352 = arith.addf %347, %351 : f32
    %353 = vector.shape_cast %335 : vector<8x128xf32> to vector<1x8x128xf32>
    %cst_348 = arith.constant dense<0.000000e+00> : vector<1xf32>
    %354 = vector.multi_reduction <add>, %353, %cst_348 [1, 2] : vector<1x8x128xf32> to vector<1xf32>
    %355 = vector.shape_cast %354 : vector<1xf32> to vector<1x1x1xf32>
    %356 = vector.extract %355[0, 0, 0] : f32 from vector<1x1x1xf32>
    %357 = arith.addf %352, %356 : f32
    %358 = vector.shape_cast %343 : vector<8x128xf32> to vector<1x8x128xf32>
    %cst_349 = arith.constant dense<0.000000e+00> : vector<1xf32>
    %359 = vector.multi_reduction <add>, %358, %cst_349 [1, 2] : vector<1x8x128xf32> to vector<1xf32>
    %360 = vector.shape_cast %359 : vector<1xf32> to vector<1x1x1xf32>
    %361 = vector.extract %360[0, 0, 0] : f32 from vector<1x1x1xf32>
    %362 = arith.addf %357, %361 : f32
    %cst_350 = arith.constant 3.906250e-03 : f32
    %363 = arith.mulf %362, %cst_350 : f32
    %cst_351 = arith.constant 5.000000e-02 : f32
    %364 = arith.mulf %cst_351, %363 : f32
    %cst_352 = arith.constant 0.949999988 : f32
    %365 = vector.broadcast %cst_352 : f32 to vector<8x128xf32>
    %366 = arith.mulf %365, %223 : vector<8x128xf32>
    %367 = vector.broadcast %364 : f32 to vector<8x128xf32>
    %368 = arith.addf %366, %367 : vector<8x128xf32>
    %cst_353 = arith.constant 0.000000e+00 : f32
    %cst_354 = arith.constant 1.000000e+00 : f32
    %369 = vector.broadcast %cst_353 : f32 to vector<8x128xf32>
    %370 = arith.maximumf %369, %368 : vector<8x128xf32>
    %371 = vector.broadcast %cst_354 : f32 to vector<8x128xf32>
    %372 = arith.minimumf %371, %370 : vector<8x128xf32>
    %cst_355 = arith.constant 0.949999988 : f32
    %373 = vector.broadcast %cst_355 : f32 to vector<8x128xf32>
    %374 = arith.mulf %373, %231 : vector<8x128xf32>
    %375 = vector.broadcast %364 : f32 to vector<8x128xf32>
    %376 = arith.addf %374, %375 : vector<8x128xf32>
    %cst_356 = arith.constant 0.000000e+00 : f32
    %cst_357 = arith.constant 1.000000e+00 : f32
    %377 = vector.broadcast %cst_356 : f32 to vector<8x128xf32>
    %378 = arith.maximumf %377, %376 : vector<8x128xf32>
    %379 = vector.broadcast %cst_357 : f32 to vector<8x128xf32>
    %380 = arith.minimumf %379, %378 : vector<8x128xf32>
    %cst_358 = arith.constant 0.949999988 : f32
    %381 = vector.broadcast %cst_358 : f32 to vector<8x128xf32>
    %382 = arith.mulf %381, %239 : vector<8x128xf32>
    %383 = vector.broadcast %364 : f32 to vector<8x128xf32>
    %384 = arith.addf %382, %383 : vector<8x128xf32>
    %cst_359 = arith.constant 0.000000e+00 : f32
    %cst_360 = arith.constant 1.000000e+00 : f32
    %385 = vector.broadcast %cst_359 : f32 to vector<8x128xf32>
    %386 = arith.maximumf %385, %384 : vector<8x128xf32>
    %387 = vector.broadcast %cst_360 : f32 to vector<8x128xf32>
    %388 = arith.minimumf %387, %386 : vector<8x128xf32>
    %cst_361 = arith.constant 0.949999988 : f32
    %389 = vector.broadcast %cst_361 : f32 to vector<8x128xf32>
    %390 = arith.mulf %389, %247 : vector<8x128xf32>
    %391 = vector.broadcast %364 : f32 to vector<8x128xf32>
    %392 = arith.addf %390, %391 : vector<8x128xf32>
    %cst_362 = arith.constant 0.000000e+00 : f32
    %cst_363 = arith.constant 1.000000e+00 : f32
    %393 = vector.broadcast %cst_362 : f32 to vector<8x128xf32>
    %394 = arith.maximumf %393, %392 : vector<8x128xf32>
    %395 = vector.broadcast %cst_363 : f32 to vector<8x128xf32>
    %396 = arith.minimumf %395, %394 : vector<8x128xf32>
    %cst_364 = arith.constant 0.949999988 : f32
    %397 = vector.broadcast %cst_364 : f32 to vector<8x128xf32>
    %398 = arith.mulf %397, %255 : vector<8x128xf32>
    %399 = vector.broadcast %364 : f32 to vector<8x128xf32>
    %400 = arith.addf %398, %399 : vector<8x128xf32>
    %cst_365 = arith.constant 0.000000e+00 : f32
    %cst_366 = arith.constant 1.000000e+00 : f32
    %401 = vector.broadcast %cst_365 : f32 to vector<8x128xf32>
    %402 = arith.maximumf %401, %400 : vector<8x128xf32>
    %403 = vector.broadcast %cst_366 : f32 to vector<8x128xf32>
    %404 = arith.minimumf %403, %402 : vector<8x128xf32>
    %cst_367 = arith.constant 0.949999988 : f32
    %405 = vector.broadcast %cst_367 : f32 to vector<8x128xf32>
    %406 = arith.mulf %405, %263 : vector<8x128xf32>
    %407 = vector.broadcast %364 : f32 to vector<8x128xf32>
    %408 = arith.addf %406, %407 : vector<8x128xf32>
    %cst_368 = arith.constant 0.000000e+00 : f32
    %cst_369 = arith.constant 1.000000e+00 : f32
    %409 = vector.broadcast %cst_368 : f32 to vector<8x128xf32>
    %410 = arith.maximumf %409, %408 : vector<8x128xf32>
    %411 = vector.broadcast %cst_369 : f32 to vector<8x128xf32>
    %412 = arith.minimumf %411, %410 : vector<8x128xf32>
    %cst_370 = arith.constant 0.949999988 : f32
    %413 = vector.broadcast %cst_370 : f32 to vector<8x128xf32>
    %414 = arith.mulf %413, %271 : vector<8x128xf32>
    %415 = vector.broadcast %364 : f32 to vector<8x128xf32>
    %416 = arith.addf %414, %415 : vector<8x128xf32>
    %cst_371 = arith.constant 0.000000e+00 : f32
    %cst_372 = arith.constant 1.000000e+00 : f32
    %417 = vector.broadcast %cst_371 : f32 to vector<8x128xf32>
    %418 = arith.maximumf %417, %416 : vector<8x128xf32>
    %419 = vector.broadcast %cst_372 : f32 to vector<8x128xf32>
    %420 = arith.minimumf %419, %418 : vector<8x128xf32>
    %cst_373 = arith.constant 0.949999988 : f32
    %421 = vector.broadcast %cst_373 : f32 to vector<8x128xf32>
    %422 = arith.mulf %421, %279 : vector<8x128xf32>
    %423 = vector.broadcast %364 : f32 to vector<8x128xf32>
    %424 = arith.addf %422, %423 : vector<8x128xf32>
    %cst_374 = arith.constant 0.000000e+00 : f32
    %cst_375 = arith.constant 1.000000e+00 : f32
    %425 = vector.broadcast %cst_374 : f32 to vector<8x128xf32>
    %426 = arith.maximumf %425, %424 : vector<8x128xf32>
    %427 = vector.broadcast %cst_375 : f32 to vector<8x128xf32>
    %428 = arith.minimumf %427, %426 : vector<8x128xf32>
    %cst_376 = arith.constant 0.949999988 : f32
    %429 = vector.broadcast %cst_376 : f32 to vector<8x128xf32>
    %430 = arith.mulf %429, %287 : vector<8x128xf32>
    %431 = vector.broadcast %364 : f32 to vector<8x128xf32>
    %432 = arith.addf %430, %431 : vector<8x128xf32>
    %cst_377 = arith.constant 0.000000e+00 : f32
    %cst_378 = arith.constant 1.000000e+00 : f32
    %433 = vector.broadcast %cst_377 : f32 to vector<8x128xf32>
    %434 = arith.maximumf %433, %432 : vector<8x128xf32>
    %435 = vector.broadcast %cst_378 : f32 to vector<8x128xf32>
    %436 = arith.minimumf %435, %434 : vector<8x128xf32>
    %cst_379 = arith.constant 0.949999988 : f32
    %437 = vector.broadcast %cst_379 : f32 to vector<8x128xf32>
    %438 = arith.mulf %437, %295 : vector<8x128xf32>
    %439 = vector.broadcast %364 : f32 to vector<8x128xf32>
    %440 = arith.addf %438, %439 : vector<8x128xf32>
    %cst_380 = arith.constant 0.000000e+00 : f32
    %cst_381 = arith.constant 1.000000e+00 : f32
    %441 = vector.broadcast %cst_380 : f32 to vector<8x128xf32>
    %442 = arith.maximumf %441, %440 : vector<8x128xf32>
    %443 = vector.broadcast %cst_381 : f32 to vector<8x128xf32>
    %444 = arith.minimumf %443, %442 : vector<8x128xf32>
    %cst_382 = arith.constant 0.949999988 : f32
    %445 = vector.broadcast %cst_382 : f32 to vector<8x128xf32>
    %446 = arith.mulf %445, %303 : vector<8x128xf32>
    %447 = vector.broadcast %364 : f32 to vector<8x128xf32>
    %448 = arith.addf %446, %447 : vector<8x128xf32>
    %cst_383 = arith.constant 0.000000e+00 : f32
    %cst_384 = arith.constant 1.000000e+00 : f32
    %449 = vector.broadcast %cst_383 : f32 to vector<8x128xf32>
    %450 = arith.maximumf %449, %448 : vector<8x128xf32>
    %451 = vector.broadcast %cst_384 : f32 to vector<8x128xf32>
    %452 = arith.minimumf %451, %450 : vector<8x128xf32>
    %cst_385 = arith.constant 0.949999988 : f32
    %453 = vector.broadcast %cst_385 : f32 to vector<8x128xf32>
    %454 = arith.mulf %453, %311 : vector<8x128xf32>
    %455 = vector.broadcast %364 : f32 to vector<8x128xf32>
    %456 = arith.addf %454, %455 : vector<8x128xf32>
    %cst_386 = arith.constant 0.000000e+00 : f32
    %cst_387 = arith.constant 1.000000e+00 : f32
    %457 = vector.broadcast %cst_386 : f32 to vector<8x128xf32>
    %458 = arith.maximumf %457, %456 : vector<8x128xf32>
    %459 = vector.broadcast %cst_387 : f32 to vector<8x128xf32>
    %460 = arith.minimumf %459, %458 : vector<8x128xf32>
    %cst_388 = arith.constant 2.989000e-01 : f32
    %461 = vector.broadcast %cst_388 : f32 to vector<8x128xf32>
    %462 = arith.mulf %461, %372 : vector<8x128xf32>
    %cst_389 = arith.constant 5.870000e-01 : f32
    %463 = vector.broadcast %cst_389 : f32 to vector<8x128xf32>
    %464 = arith.mulf %463, %404 : vector<8x128xf32>
    %465 = arith.addf %462, %464 : vector<8x128xf32>
    %cst_390 = arith.constant 1.140000e-01 : f32
    %466 = vector.broadcast %cst_390 : f32 to vector<8x128xf32>
    %467 = arith.mulf %466, %436 : vector<8x128xf32>
    %468 = arith.addf %465, %467 : vector<8x128xf32>
    %cst_391 = arith.constant 2.989000e-01 : f32
    %469 = vector.broadcast %cst_391 : f32 to vector<8x128xf32>
    %470 = arith.mulf %469, %380 : vector<8x128xf32>
    %cst_392 = arith.constant 5.870000e-01 : f32
    %471 = vector.broadcast %cst_392 : f32 to vector<8x128xf32>
    %472 = arith.mulf %471, %412 : vector<8x128xf32>
    %473 = arith.addf %470, %472 : vector<8x128xf32>
    %cst_393 = arith.constant 1.140000e-01 : f32
    %474 = vector.broadcast %cst_393 : f32 to vector<8x128xf32>
    %475 = arith.mulf %474, %444 : vector<8x128xf32>
    %476 = arith.addf %473, %475 : vector<8x128xf32>
    %cst_394 = arith.constant 2.989000e-01 : f32
    %477 = vector.broadcast %cst_394 : f32 to vector<8x128xf32>
    %478 = arith.mulf %477, %388 : vector<8x128xf32>
    %cst_395 = arith.constant 5.870000e-01 : f32
    %479 = vector.broadcast %cst_395 : f32 to vector<8x128xf32>
    %480 = arith.mulf %479, %420 : vector<8x128xf32>
    %481 = arith.addf %478, %480 : vector<8x128xf32>
    %cst_396 = arith.constant 1.140000e-01 : f32
    %482 = vector.broadcast %cst_396 : f32 to vector<8x128xf32>
    %483 = arith.mulf %482, %452 : vector<8x128xf32>
    %484 = arith.addf %481, %483 : vector<8x128xf32>
    %cst_397 = arith.constant 2.989000e-01 : f32
    %485 = vector.broadcast %cst_397 : f32 to vector<8x128xf32>
    %486 = arith.mulf %485, %396 : vector<8x128xf32>
    %cst_398 = arith.constant 5.870000e-01 : f32
    %487 = vector.broadcast %cst_398 : f32 to vector<8x128xf32>
    %488 = arith.mulf %487, %428 : vector<8x128xf32>
    %489 = arith.addf %486, %488 : vector<8x128xf32>
    %cst_399 = arith.constant 1.140000e-01 : f32
    %490 = vector.broadcast %cst_399 : f32 to vector<8x128xf32>
    %491 = arith.mulf %490, %460 : vector<8x128xf32>
    %492 = arith.addf %489, %491 : vector<8x128xf32>
    %cst_400 = arith.constant -1.000000e-01 : f32
    %493 = vector.broadcast %cst_400 : f32 to vector<8x128xf32>
    %494 = arith.mulf %493, %468 : vector<8x128xf32>
    %cst_401 = arith.constant -1.000000e-01 : f32
    %495 = vector.broadcast %cst_401 : f32 to vector<8x128xf32>
    %496 = arith.mulf %495, %476 : vector<8x128xf32>
    %cst_402 = arith.constant -1.000000e-01 : f32
    %497 = vector.broadcast %cst_402 : f32 to vector<8x128xf32>
    %498 = arith.mulf %497, %484 : vector<8x128xf32>
    %cst_403 = arith.constant -1.000000e-01 : f32
    %499 = vector.broadcast %cst_403 : f32 to vector<8x128xf32>
    %500 = arith.mulf %499, %492 : vector<8x128xf32>
    %cst_404 = arith.constant 1.100000e+00 : f32
    %501 = vector.broadcast %cst_404 : f32 to vector<8x128xf32>
    %502 = arith.mulf %501, %372 : vector<8x128xf32>
    %503 = arith.addf %502, %494 : vector<8x128xf32>
    %cst_405 = arith.constant 0.000000e+00 : f32
    %cst_406 = arith.constant 1.000000e+00 : f32
    %504 = vector.broadcast %cst_405 : f32 to vector<8x128xf32>
    %505 = arith.maximumf %504, %503 : vector<8x128xf32>
    %506 = vector.broadcast %cst_406 : f32 to vector<8x128xf32>
    %507 = arith.minimumf %506, %505 : vector<8x128xf32>
    %cst_407 = arith.constant 1.100000e+00 : f32
    %508 = vector.broadcast %cst_407 : f32 to vector<8x128xf32>
    %509 = arith.mulf %508, %380 : vector<8x128xf32>
    %510 = arith.addf %509, %496 : vector<8x128xf32>
    %cst_408 = arith.constant 0.000000e+00 : f32
    %cst_409 = arith.constant 1.000000e+00 : f32
    %511 = vector.broadcast %cst_408 : f32 to vector<8x128xf32>
    %512 = arith.maximumf %511, %510 : vector<8x128xf32>
    %513 = vector.broadcast %cst_409 : f32 to vector<8x128xf32>
    %514 = arith.minimumf %513, %512 : vector<8x128xf32>
    %cst_410 = arith.constant 1.100000e+00 : f32
    %515 = vector.broadcast %cst_410 : f32 to vector<8x128xf32>
    %516 = arith.mulf %515, %388 : vector<8x128xf32>
    %517 = arith.addf %516, %498 : vector<8x128xf32>
    %cst_411 = arith.constant 0.000000e+00 : f32
    %cst_412 = arith.constant 1.000000e+00 : f32
    %518 = vector.broadcast %cst_411 : f32 to vector<8x128xf32>
    %519 = arith.maximumf %518, %517 : vector<8x128xf32>
    %520 = vector.broadcast %cst_412 : f32 to vector<8x128xf32>
    %521 = arith.minimumf %520, %519 : vector<8x128xf32>
    %cst_413 = arith.constant 1.100000e+00 : f32
    %522 = vector.broadcast %cst_413 : f32 to vector<8x128xf32>
    %523 = arith.mulf %522, %396 : vector<8x128xf32>
    %524 = arith.addf %523, %500 : vector<8x128xf32>
    %cst_414 = arith.constant 0.000000e+00 : f32
    %cst_415 = arith.constant 1.000000e+00 : f32
    %525 = vector.broadcast %cst_414 : f32 to vector<8x128xf32>
    %526 = arith.maximumf %525, %524 : vector<8x128xf32>
    %527 = vector.broadcast %cst_415 : f32 to vector<8x128xf32>
    %528 = arith.minimumf %527, %526 : vector<8x128xf32>
    %cst_416 = arith.constant 1.100000e+00 : f32
    %529 = vector.broadcast %cst_416 : f32 to vector<8x128xf32>
    %530 = arith.mulf %529, %404 : vector<8x128xf32>
    %531 = arith.addf %530, %494 : vector<8x128xf32>
    %cst_417 = arith.constant 0.000000e+00 : f32
    %cst_418 = arith.constant 1.000000e+00 : f32
    %532 = vector.broadcast %cst_417 : f32 to vector<8x128xf32>
    %533 = arith.maximumf %532, %531 : vector<8x128xf32>
    %534 = vector.broadcast %cst_418 : f32 to vector<8x128xf32>
    %535 = arith.minimumf %534, %533 : vector<8x128xf32>
    %cst_419 = arith.constant 1.100000e+00 : f32
    %536 = vector.broadcast %cst_419 : f32 to vector<8x128xf32>
    %537 = arith.mulf %536, %412 : vector<8x128xf32>
    %538 = arith.addf %537, %496 : vector<8x128xf32>
    %cst_420 = arith.constant 0.000000e+00 : f32
    %cst_421 = arith.constant 1.000000e+00 : f32
    %539 = vector.broadcast %cst_420 : f32 to vector<8x128xf32>
    %540 = arith.maximumf %539, %538 : vector<8x128xf32>
    %541 = vector.broadcast %cst_421 : f32 to vector<8x128xf32>
    %542 = arith.minimumf %541, %540 : vector<8x128xf32>
    %cst_422 = arith.constant 1.100000e+00 : f32
    %543 = vector.broadcast %cst_422 : f32 to vector<8x128xf32>
    %544 = arith.mulf %543, %420 : vector<8x128xf32>
    %545 = arith.addf %544, %498 : vector<8x128xf32>
    %cst_423 = arith.constant 0.000000e+00 : f32
    %cst_424 = arith.constant 1.000000e+00 : f32
    %546 = vector.broadcast %cst_423 : f32 to vector<8x128xf32>
    %547 = arith.maximumf %546, %545 : vector<8x128xf32>
    %548 = vector.broadcast %cst_424 : f32 to vector<8x128xf32>
    %549 = arith.minimumf %548, %547 : vector<8x128xf32>
    %cst_425 = arith.constant 1.100000e+00 : f32
    %550 = vector.broadcast %cst_425 : f32 to vector<8x128xf32>
    %551 = arith.mulf %550, %428 : vector<8x128xf32>
    %552 = arith.addf %551, %500 : vector<8x128xf32>
    %cst_426 = arith.constant 0.000000e+00 : f32
    %cst_427 = arith.constant 1.000000e+00 : f32
    %553 = vector.broadcast %cst_426 : f32 to vector<8x128xf32>
    %554 = arith.maximumf %553, %552 : vector<8x128xf32>
    %555 = vector.broadcast %cst_427 : f32 to vector<8x128xf32>
    %556 = arith.minimumf %555, %554 : vector<8x128xf32>
    %cst_428 = arith.constant 1.100000e+00 : f32
    %557 = vector.broadcast %cst_428 : f32 to vector<8x128xf32>
    %558 = arith.mulf %557, %436 : vector<8x128xf32>
    %559 = arith.addf %558, %494 : vector<8x128xf32>
    %cst_429 = arith.constant 0.000000e+00 : f32
    %cst_430 = arith.constant 1.000000e+00 : f32
    %560 = vector.broadcast %cst_429 : f32 to vector<8x128xf32>
    %561 = arith.maximumf %560, %559 : vector<8x128xf32>
    %562 = vector.broadcast %cst_430 : f32 to vector<8x128xf32>
    %563 = arith.minimumf %562, %561 : vector<8x128xf32>
    %cst_431 = arith.constant 1.100000e+00 : f32
    %564 = vector.broadcast %cst_431 : f32 to vector<8x128xf32>
    %565 = arith.mulf %564, %444 : vector<8x128xf32>
    %566 = arith.addf %565, %496 : vector<8x128xf32>
    %cst_432 = arith.constant 0.000000e+00 : f32
    %cst_433 = arith.constant 1.000000e+00 : f32
    %567 = vector.broadcast %cst_432 : f32 to vector<8x128xf32>
    %568 = arith.maximumf %567, %566 : vector<8x128xf32>
    %569 = vector.broadcast %cst_433 : f32 to vector<8x128xf32>
    %570 = arith.minimumf %569, %568 : vector<8x128xf32>
    %cst_434 = arith.constant 1.100000e+00 : f32
    %571 = vector.broadcast %cst_434 : f32 to vector<8x128xf32>
    %572 = arith.mulf %571, %452 : vector<8x128xf32>
    %573 = arith.addf %572, %498 : vector<8x128xf32>
    %cst_435 = arith.constant 0.000000e+00 : f32
    %cst_436 = arith.constant 1.000000e+00 : f32
    %574 = vector.broadcast %cst_435 : f32 to vector<8x128xf32>
    %575 = arith.maximumf %574, %573 : vector<8x128xf32>
    %576 = vector.broadcast %cst_436 : f32 to vector<8x128xf32>
    %577 = arith.minimumf %576, %575 : vector<8x128xf32>
    %cst_437 = arith.constant 1.100000e+00 : f32
    %578 = vector.broadcast %cst_437 : f32 to vector<8x128xf32>
    %579 = arith.mulf %578, %460 : vector<8x128xf32>
    %580 = arith.addf %579, %500 : vector<8x128xf32>
    %cst_438 = arith.constant 0.000000e+00 : f32
    %cst_439 = arith.constant 1.000000e+00 : f32
    %581 = vector.broadcast %cst_438 : f32 to vector<8x128xf32>
    %582 = arith.maximumf %581, %580 : vector<8x128xf32>
    %583 = vector.broadcast %cst_439 : f32 to vector<8x128xf32>
    %584 = arith.minimumf %583, %582 : vector<8x128xf32>
    %c0_440 = arith.constant 0 : index
    %c0_441 = arith.constant 0 : index
    %c0_442 = arith.constant 0 : index
    %c0_443 = arith.constant 0 : index
    %c0_444 = arith.constant 0 : index
    %585 = vector.load %arg1[%c0_440, %c0_441, %c0_442, %c0_443, %c0_444] : memref<1x3x4x8x128xf32, #tpu.memory_space<vmem>>, vector<1x1x1x8x128xf32>
    %586 = vector.shape_cast %585 : vector<1x1x1x8x128xf32> to vector<8x128xf32>
    %587 = arith.subf %586, %507 : vector<8x128xf32>
    %c0_445 = arith.constant 0 : index
    %c0_446 = arith.constant 0 : index
    %c1_447 = arith.constant 1 : index
    %c0_448 = arith.constant 0 : index
    %c0_449 = arith.constant 0 : index
    %588 = vector.load %arg1[%c0_445, %c0_446, %c1_447, %c0_448, %c0_449] : memref<1x3x4x8x128xf32, #tpu.memory_space<vmem>>, vector<1x1x1x8x128xf32>
    %589 = vector.shape_cast %588 : vector<1x1x1x8x128xf32> to vector<8x128xf32>
    %590 = arith.subf %589, %514 : vector<8x128xf32>
    %c0_450 = arith.constant 0 : index
    %c0_451 = arith.constant 0 : index
    %c2_452 = arith.constant 2 : index
    %c0_453 = arith.constant 0 : index
    %c0_454 = arith.constant 0 : index
    %591 = vector.load %arg1[%c0_450, %c0_451, %c2_452, %c0_453, %c0_454] : memref<1x3x4x8x128xf32, #tpu.memory_space<vmem>>, vector<1x1x1x8x128xf32>
    %592 = vector.shape_cast %591 : vector<1x1x1x8x128xf32> to vector<8x128xf32>
    %593 = arith.subf %592, %521 : vector<8x128xf32>
    %c0_455 = arith.constant 0 : index
    %c0_456 = arith.constant 0 : index
    %c3_457 = arith.constant 3 : index
    %c0_458 = arith.constant 0 : index
    %c0_459 = arith.constant 0 : index
    %594 = vector.load %arg1[%c0_455, %c0_456, %c3_457, %c0_458, %c0_459] : memref<1x3x4x8x128xf32, #tpu.memory_space<vmem>>, vector<1x1x1x8x128xf32>
    %595 = vector.shape_cast %594 : vector<1x1x1x8x128xf32> to vector<8x128xf32>
    %596 = arith.subf %595, %528 : vector<8x128xf32>
    %597 = arith.addf %587, %590 : vector<8x128xf32>
    %598 = arith.subf %587, %590 : vector<8x128xf32>
    %599 = arith.addf %593, %596 : vector<8x128xf32>
    %600 = arith.subf %593, %596 : vector<8x128xf32>
    %601 = arith.addf %598, %600 : vector<8x128xf32>
    %602 = math.absf %601 : vector<8x128xf32>
    %603 = arith.subf %597, %599 : vector<8x128xf32>
    %604 = math.absf %603 : vector<8x128xf32>
    %605 = arith.addf %602, %604 : vector<8x128xf32>
    %606 = arith.subf %598, %600 : vector<8x128xf32>
    %607 = math.absf %606 : vector<8x128xf32>
    %608 = arith.addf %605, %607 : vector<8x128xf32>
    %c0_460 = arith.constant 0 : index
    %c1_461 = arith.constant 1 : index
    %c0_462 = arith.constant 0 : index
    %c0_463 = arith.constant 0 : index
    %c0_464 = arith.constant 0 : index
    %609 = vector.load %arg1[%c0_460, %c1_461, %c0_462, %c0_463, %c0_464] : memref<1x3x4x8x128xf32, #tpu.memory_space<vmem>>, vector<1x1x1x8x128xf32>
    %610 = vector.shape_cast %609 : vector<1x1x1x8x128xf32> to vector<8x128xf32>
    %611 = arith.subf %610, %535 : vector<8x128xf32>
    %c0_465 = arith.constant 0 : index
    %c1_466 = arith.constant 1 : index
    %c1_467 = arith.constant 1 : index
    %c0_468 = arith.constant 0 : index
    %c0_469 = arith.constant 0 : index
    %612 = vector.load %arg1[%c0_465, %c1_466, %c1_467, %c0_468, %c0_469] : memref<1x3x4x8x128xf32, #tpu.memory_space<vmem>>, vector<1x1x1x8x128xf32>
    %613 = vector.shape_cast %612 : vector<1x1x1x8x128xf32> to vector<8x128xf32>
    %614 = arith.subf %613, %542 : vector<8x128xf32>
    %c0_470 = arith.constant 0 : index
    %c1_471 = arith.constant 1 : index
    %c2_472 = arith.constant 2 : index
    %c0_473 = arith.constant 0 : index
    %c0_474 = arith.constant 0 : index
    %615 = vector.load %arg1[%c0_470, %c1_471, %c2_472, %c0_473, %c0_474] : memref<1x3x4x8x128xf32, #tpu.memory_space<vmem>>, vector<1x1x1x8x128xf32>
    %616 = vector.shape_cast %615 : vector<1x1x1x8x128xf32> to vector<8x128xf32>
    %617 = arith.subf %616, %549 : vector<8x128xf32>
    %c0_475 = arith.constant 0 : index
    %c1_476 = arith.constant 1 : index
    %c3_477 = arith.constant 3 : index
    %c0_478 = arith.constant 0 : index
    %c0_479 = arith.constant 0 : index
    %618 = vector.load %arg1[%c0_475, %c1_476, %c3_477, %c0_478, %c0_479] : memref<1x3x4x8x128xf32, #tpu.memory_space<vmem>>, vector<1x1x1x8x128xf32>
    %619 = vector.shape_cast %618 : vector<1x1x1x8x128xf32> to vector<8x128xf32>
    %620 = arith.subf %619, %556 : vector<8x128xf32>
    %621 = arith.addf %611, %614 : vector<8x128xf32>
    %622 = arith.subf %611, %614 : vector<8x128xf32>
    %623 = arith.addf %617, %620 : vector<8x128xf32>
    %624 = arith.subf %617, %620 : vector<8x128xf32>
    %625 = arith.addf %622, %624 : vector<8x128xf32>
    %626 = math.absf %625 : vector<8x128xf32>
    %627 = arith.subf %621, %623 : vector<8x128xf32>
    %628 = math.absf %627 : vector<8x128xf32>
    %629 = arith.addf %626, %628 : vector<8x128xf32>
    %630 = arith.subf %622, %624 : vector<8x128xf32>
    %631 = math.absf %630 : vector<8x128xf32>
    %632 = arith.addf %629, %631 : vector<8x128xf32>
    %633 = arith.addf %608, %632 : vector<8x128xf32>
    %c0_480 = arith.constant 0 : index
    %c2_481 = arith.constant 2 : index
    %c0_482 = arith.constant 0 : index
    %c0_483 = arith.constant 0 : index
    %c0_484 = arith.constant 0 : index
    %634 = vector.load %arg1[%c0_480, %c2_481, %c0_482, %c0_483, %c0_484] : memref<1x3x4x8x128xf32, #tpu.memory_space<vmem>>, vector<1x1x1x8x128xf32>
    %635 = vector.shape_cast %634 : vector<1x1x1x8x128xf32> to vector<8x128xf32>
    %636 = arith.subf %635, %563 : vector<8x128xf32>
    %c0_485 = arith.constant 0 : index
    %c2_486 = arith.constant 2 : index
    %c1_487 = arith.constant 1 : index
    %c0_488 = arith.constant 0 : index
    %c0_489 = arith.constant 0 : index
    %637 = vector.load %arg1[%c0_485, %c2_486, %c1_487, %c0_488, %c0_489] : memref<1x3x4x8x128xf32, #tpu.memory_space<vmem>>, vector<1x1x1x8x128xf32>
    %638 = vector.shape_cast %637 : vector<1x1x1x8x128xf32> to vector<8x128xf32>
    %639 = arith.subf %638, %570 : vector<8x128xf32>
    %c0_490 = arith.constant 0 : index
    %c2_491 = arith.constant 2 : index
    %c2_492 = arith.constant 2 : index
    %c0_493 = arith.constant 0 : index
    %c0_494 = arith.constant 0 : index
    %640 = vector.load %arg1[%c0_490, %c2_491, %c2_492, %c0_493, %c0_494] : memref<1x3x4x8x128xf32, #tpu.memory_space<vmem>>, vector<1x1x1x8x128xf32>
    %641 = vector.shape_cast %640 : vector<1x1x1x8x128xf32> to vector<8x128xf32>
    %642 = arith.subf %641, %577 : vector<8x128xf32>
    %c0_495 = arith.constant 0 : index
    %c2_496 = arith.constant 2 : index
    %c3_497 = arith.constant 3 : index
    %c0_498 = arith.constant 0 : index
    %c0_499 = arith.constant 0 : index
    %643 = vector.load %arg1[%c0_495, %c2_496, %c3_497, %c0_498, %c0_499] : memref<1x3x4x8x128xf32, #tpu.memory_space<vmem>>, vector<1x1x1x8x128xf32>
    %644 = vector.shape_cast %643 : vector<1x1x1x8x128xf32> to vector<8x128xf32>
    %645 = arith.subf %644, %584 : vector<8x128xf32>
    %646 = arith.addf %636, %639 : vector<8x128xf32>
    %647 = arith.subf %636, %639 : vector<8x128xf32>
    %648 = arith.addf %642, %645 : vector<8x128xf32>
    %649 = arith.subf %642, %645 : vector<8x128xf32>
    %650 = arith.addf %647, %649 : vector<8x128xf32>
    %651 = math.absf %650 : vector<8x128xf32>
    %652 = arith.subf %646, %648 : vector<8x128xf32>
    %653 = math.absf %652 : vector<8x128xf32>
    %654 = arith.addf %651, %653 : vector<8x128xf32>
    %655 = arith.subf %647, %649 : vector<8x128xf32>
    %656 = math.absf %655 : vector<8x128xf32>
    %657 = arith.addf %654, %656 : vector<8x128xf32>
    %658 = arith.addf %633, %657 : vector<8x128xf32>
    %659 = vector.shape_cast %658 : vector<8x128xf32> to vector<1x8x128xf32>
    %cst_500 = arith.constant dense<0.000000e+00> : vector<1xf32>
    %660 = vector.multi_reduction <add>, %659, %cst_500 [1, 2] : vector<1x8x128xf32> to vector<1xf32>
    %661 = vector.shape_cast %660 : vector<1xf32> to vector<1x1x1xf32>
    %662 = vector.extract %661[0, 0, 0] : f32 from vector<1x1x1xf32>
    %c0_501 = arith.constant 0 : index
    %c0_502 = arith.constant 0 : index
    %c0_503 = arith.constant 0 : index
    %c0_504 = arith.constant 0 : index
    %c0_505 = arith.constant 0 : index
    %663 = vector.load %arg3[%c0_501, %c0_502, %c0_503, %c0_504, %c0_505] : memref<1x3x4x8x128xf32, #tpu.memory_space<vmem>>, vector<1x1x1x8x128xf32>
    %664 = vector.shape_cast %663 : vector<1x1x1x8x128xf32> to vector<8x128xf32>
    %cst_506 = arith.constant 0.949999988 : f32
    %665 = vector.broadcast %cst_506 : f32 to vector<8x128xf32>
    %666 = arith.mulf %664, %665 : vector<8x128xf32>
    %cst_507 = arith.constant 0.000000e+00 : f32
    %cst_508 = arith.constant 1.000000e+00 : f32
    %667 = vector.broadcast %cst_507 : f32 to vector<8x128xf32>
    %668 = arith.maximumf %667, %666 : vector<8x128xf32>
    %669 = vector.broadcast %cst_508 : f32 to vector<8x128xf32>
    %670 = arith.minimumf %669, %668 : vector<8x128xf32>
    %c0_509 = arith.constant 0 : index
    %c0_510 = arith.constant 0 : index
    %c1_511 = arith.constant 1 : index
    %c0_512 = arith.constant 0 : index
    %c0_513 = arith.constant 0 : index
    %671 = vector.load %arg3[%c0_509, %c0_510, %c1_511, %c0_512, %c0_513] : memref<1x3x4x8x128xf32, #tpu.memory_space<vmem>>, vector<1x1x1x8x128xf32>
    %672 = vector.shape_cast %671 : vector<1x1x1x8x128xf32> to vector<8x128xf32>
    %cst_514 = arith.constant 0.949999988 : f32
    %673 = vector.broadcast %cst_514 : f32 to vector<8x128xf32>
    %674 = arith.mulf %672, %673 : vector<8x128xf32>
    %cst_515 = arith.constant 0.000000e+00 : f32
    %cst_516 = arith.constant 1.000000e+00 : f32
    %675 = vector.broadcast %cst_515 : f32 to vector<8x128xf32>
    %676 = arith.maximumf %675, %674 : vector<8x128xf32>
    %677 = vector.broadcast %cst_516 : f32 to vector<8x128xf32>
    %678 = arith.minimumf %677, %676 : vector<8x128xf32>
    %c0_517 = arith.constant 0 : index
    %c0_518 = arith.constant 0 : index
    %c2_519 = arith.constant 2 : index
    %c0_520 = arith.constant 0 : index
    %c0_521 = arith.constant 0 : index
    %679 = vector.load %arg3[%c0_517, %c0_518, %c2_519, %c0_520, %c0_521] : memref<1x3x4x8x128xf32, #tpu.memory_space<vmem>>, vector<1x1x1x8x128xf32>
    %680 = vector.shape_cast %679 : vector<1x1x1x8x128xf32> to vector<8x128xf32>
    %cst_522 = arith.constant 0.949999988 : f32
    %681 = vector.broadcast %cst_522 : f32 to vector<8x128xf32>
    %682 = arith.mulf %680, %681 : vector<8x128xf32>
    %cst_523 = arith.constant 0.000000e+00 : f32
    %cst_524 = arith.constant 1.000000e+00 : f32
    %683 = vector.broadcast %cst_523 : f32 to vector<8x128xf32>
    %684 = arith.maximumf %683, %682 : vector<8x128xf32>
    %685 = vector.broadcast %cst_524 : f32 to vector<8x128xf32>
    %686 = arith.minimumf %685, %684 : vector<8x128xf32>
    %c0_525 = arith.constant 0 : index
    %c0_526 = arith.constant 0 : index
    %c3_527 = arith.constant 3 : index
    %c0_528 = arith.constant 0 : index
    %c0_529 = arith.constant 0 : index
    %687 = vector.load %arg3[%c0_525, %c0_526, %c3_527, %c0_528, %c0_529] : memref<1x3x4x8x128xf32, #tpu.memory_space<vmem>>, vector<1x1x1x8x128xf32>
    %688 = vector.shape_cast %687 : vector<1x1x1x8x128xf32> to vector<8x128xf32>
    %cst_530 = arith.constant 0.949999988 : f32
    %689 = vector.broadcast %cst_530 : f32 to vector<8x128xf32>
    %690 = arith.mulf %688, %689 : vector<8x128xf32>
    %cst_531 = arith.constant 0.000000e+00 : f32
    %cst_532 = arith.constant 1.000000e+00 : f32
    %691 = vector.broadcast %cst_531 : f32 to vector<8x128xf32>
    %692 = arith.maximumf %691, %690 : vector<8x128xf32>
    %693 = vector.broadcast %cst_532 : f32 to vector<8x128xf32>
    %694 = arith.minimumf %693, %692 : vector<8x128xf32>
    %c0_533 = arith.constant 0 : index
    %c1_534 = arith.constant 1 : index
    %c0_535 = arith.constant 0 : index
    %c0_536 = arith.constant 0 : index
    %c0_537 = arith.constant 0 : index
    %695 = vector.load %arg3[%c0_533, %c1_534, %c0_535, %c0_536, %c0_537] : memref<1x3x4x8x128xf32, #tpu.memory_space<vmem>>, vector<1x1x1x8x128xf32>
    %696 = vector.shape_cast %695 : vector<1x1x1x8x128xf32> to vector<8x128xf32>
    %cst_538 = arith.constant 0.949999988 : f32
    %697 = vector.broadcast %cst_538 : f32 to vector<8x128xf32>
    %698 = arith.mulf %696, %697 : vector<8x128xf32>
    %cst_539 = arith.constant 0.000000e+00 : f32
    %cst_540 = arith.constant 1.000000e+00 : f32
    %699 = vector.broadcast %cst_539 : f32 to vector<8x128xf32>
    %700 = arith.maximumf %699, %698 : vector<8x128xf32>
    %701 = vector.broadcast %cst_540 : f32 to vector<8x128xf32>
    %702 = arith.minimumf %701, %700 : vector<8x128xf32>
    %c0_541 = arith.constant 0 : index
    %c1_542 = arith.constant 1 : index
    %c1_543 = arith.constant 1 : index
    %c0_544 = arith.constant 0 : index
    %c0_545 = arith.constant 0 : index
    %703 = vector.load %arg3[%c0_541, %c1_542, %c1_543, %c0_544, %c0_545] : memref<1x3x4x8x128xf32, #tpu.memory_space<vmem>>, vector<1x1x1x8x128xf32>
    %704 = vector.shape_cast %703 : vector<1x1x1x8x128xf32> to vector<8x128xf32>
    %cst_546 = arith.constant 0.949999988 : f32
    %705 = vector.broadcast %cst_546 : f32 to vector<8x128xf32>
    %706 = arith.mulf %704, %705 : vector<8x128xf32>
    %cst_547 = arith.constant 0.000000e+00 : f32
    %cst_548 = arith.constant 1.000000e+00 : f32
    %707 = vector.broadcast %cst_547 : f32 to vector<8x128xf32>
    %708 = arith.maximumf %707, %706 : vector<8x128xf32>
    %709 = vector.broadcast %cst_548 : f32 to vector<8x128xf32>
    %710 = arith.minimumf %709, %708 : vector<8x128xf32>
    %c0_549 = arith.constant 0 : index
    %c1_550 = arith.constant 1 : index
    %c2_551 = arith.constant 2 : index
    %c0_552 = arith.constant 0 : index
    %c0_553 = arith.constant 0 : index
    %711 = vector.load %arg3[%c0_549, %c1_550, %c2_551, %c0_552, %c0_553] : memref<1x3x4x8x128xf32, #tpu.memory_space<vmem>>, vector<1x1x1x8x128xf32>
    %712 = vector.shape_cast %711 : vector<1x1x1x8x128xf32> to vector<8x128xf32>
    %cst_554 = arith.constant 0.949999988 : f32
    %713 = vector.broadcast %cst_554 : f32 to vector<8x128xf32>
    %714 = arith.mulf %712, %713 : vector<8x128xf32>
    %cst_555 = arith.constant 0.000000e+00 : f32
    %cst_556 = arith.constant 1.000000e+00 : f32
    %715 = vector.broadcast %cst_555 : f32 to vector<8x128xf32>
    %716 = arith.maximumf %715, %714 : vector<8x128xf32>
    %717 = vector.broadcast %cst_556 : f32 to vector<8x128xf32>
    %718 = arith.minimumf %717, %716 : vector<8x128xf32>
    %c0_557 = arith.constant 0 : index
    %c1_558 = arith.constant 1 : index
    %c3_559 = arith.constant 3 : index
    %c0_560 = arith.constant 0 : index
    %c0_561 = arith.constant 0 : index
    %719 = vector.load %arg3[%c0_557, %c1_558, %c3_559, %c0_560, %c0_561] : memref<1x3x4x8x128xf32, #tpu.memory_space<vmem>>, vector<1x1x1x8x128xf32>
    %720 = vector.shape_cast %719 : vector<1x1x1x8x128xf32> to vector<8x128xf32>
    %cst_562 = arith.constant 0.949999988 : f32
    %721 = vector.broadcast %cst_562 : f32 to vector<8x128xf32>
    %722 = arith.mulf %720, %721 : vector<8x128xf32>
    %cst_563 = arith.constant 0.000000e+00 : f32
    %cst_564 = arith.constant 1.000000e+00 : f32
    %723 = vector.broadcast %cst_563 : f32 to vector<8x128xf32>
    %724 = arith.maximumf %723, %722 : vector<8x128xf32>
    %725 = vector.broadcast %cst_564 : f32 to vector<8x128xf32>
    %726 = arith.minimumf %725, %724 : vector<8x128xf32>
    %c0_565 = arith.constant 0 : index
    %c2_566 = arith.constant 2 : index
    %c0_567 = arith.constant 0 : index
    %c0_568 = arith.constant 0 : index
    %c0_569 = arith.constant 0 : index
    %727 = vector.load %arg3[%c0_565, %c2_566, %c0_567, %c0_568, %c0_569] : memref<1x3x4x8x128xf32, #tpu.memory_space<vmem>>, vector<1x1x1x8x128xf32>
    %728 = vector.shape_cast %727 : vector<1x1x1x8x128xf32> to vector<8x128xf32>
    %cst_570 = arith.constant 0.949999988 : f32
    %729 = vector.broadcast %cst_570 : f32 to vector<8x128xf32>
    %730 = arith.mulf %728, %729 : vector<8x128xf32>
    %cst_571 = arith.constant 0.000000e+00 : f32
    %cst_572 = arith.constant 1.000000e+00 : f32
    %731 = vector.broadcast %cst_571 : f32 to vector<8x128xf32>
    %732 = arith.maximumf %731, %730 : vector<8x128xf32>
    %733 = vector.broadcast %cst_572 : f32 to vector<8x128xf32>
    %734 = arith.minimumf %733, %732 : vector<8x128xf32>
    %c0_573 = arith.constant 0 : index
    %c2_574 = arith.constant 2 : index
    %c1_575 = arith.constant 1 : index
    %c0_576 = arith.constant 0 : index
    %c0_577 = arith.constant 0 : index
    %735 = vector.load %arg3[%c0_573, %c2_574, %c1_575, %c0_576, %c0_577] : memref<1x3x4x8x128xf32, #tpu.memory_space<vmem>>, vector<1x1x1x8x128xf32>
    %736 = vector.shape_cast %735 : vector<1x1x1x8x128xf32> to vector<8x128xf32>
    %cst_578 = arith.constant 0.949999988 : f32
    %737 = vector.broadcast %cst_578 : f32 to vector<8x128xf32>
    %738 = arith.mulf %736, %737 : vector<8x128xf32>
    %cst_579 = arith.constant 0.000000e+00 : f32
    %cst_580 = arith.constant 1.000000e+00 : f32
    %739 = vector.broadcast %cst_579 : f32 to vector<8x128xf32>
    %740 = arith.maximumf %739, %738 : vector<8x128xf32>
    %741 = vector.broadcast %cst_580 : f32 to vector<8x128xf32>
    %742 = arith.minimumf %741, %740 : vector<8x128xf32>
    %c0_581 = arith.constant 0 : index
    %c2_582 = arith.constant 2 : index
    %c2_583 = arith.constant 2 : index
    %c0_584 = arith.constant 0 : index
    %c0_585 = arith.constant 0 : index
    %743 = vector.load %arg3[%c0_581, %c2_582, %c2_583, %c0_584, %c0_585] : memref<1x3x4x8x128xf32, #tpu.memory_space<vmem>>, vector<1x1x1x8x128xf32>
    %744 = vector.shape_cast %743 : vector<1x1x1x8x128xf32> to vector<8x128xf32>
    %cst_586 = arith.constant 0.949999988 : f32
    %745 = vector.broadcast %cst_586 : f32 to vector<8x128xf32>
    %746 = arith.mulf %744, %745 : vector<8x128xf32>
    %cst_587 = arith.constant 0.000000e+00 : f32
    %cst_588 = arith.constant 1.000000e+00 : f32
    %747 = vector.broadcast %cst_587 : f32 to vector<8x128xf32>
    %748 = arith.maximumf %747, %746 : vector<8x128xf32>
    %749 = vector.broadcast %cst_588 : f32 to vector<8x128xf32>
    %750 = arith.minimumf %749, %748 : vector<8x128xf32>
    %c0_589 = arith.constant 0 : index
    %c2_590 = arith.constant 2 : index
    %c3_591 = arith.constant 3 : index
    %c0_592 = arith.constant 0 : index
    %c0_593 = arith.constant 0 : index
    %751 = vector.load %arg3[%c0_589, %c2_590, %c3_591, %c0_592, %c0_593] : memref<1x3x4x8x128xf32, #tpu.memory_space<vmem>>, vector<1x1x1x8x128xf32>
    %752 = vector.shape_cast %751 : vector<1x1x1x8x128xf32> to vector<8x128xf32>
    %cst_594 = arith.constant 0.949999988 : f32
    %753 = vector.broadcast %cst_594 : f32 to vector<8x128xf32>
    %754 = arith.mulf %752, %753 : vector<8x128xf32>
    %cst_595 = arith.constant 0.000000e+00 : f32
    %cst_596 = arith.constant 1.000000e+00 : f32
    %755 = vector.broadcast %cst_595 : f32 to vector<8x128xf32>
    %756 = arith.maximumf %755, %754 : vector<8x128xf32>
    %757 = vector.broadcast %cst_596 : f32 to vector<8x128xf32>
    %758 = arith.minimumf %757, %756 : vector<8x128xf32>
    %cst_597 = arith.constant 2.989000e-01 : f32
    %759 = vector.broadcast %cst_597 : f32 to vector<8x128xf32>
    %760 = arith.mulf %759, %670 : vector<8x128xf32>
    %cst_598 = arith.constant 5.870000e-01 : f32
    %761 = vector.broadcast %cst_598 : f32 to vector<8x128xf32>
    %762 = arith.mulf %761, %702 : vector<8x128xf32>
    %763 = arith.addf %760, %762 : vector<8x128xf32>
    %cst_599 = arith.constant 1.140000e-01 : f32
    %764 = vector.broadcast %cst_599 : f32 to vector<8x128xf32>
    %765 = arith.mulf %764, %734 : vector<8x128xf32>
    %766 = arith.addf %763, %765 : vector<8x128xf32>
    %cst_600 = arith.constant 2.989000e-01 : f32
    %767 = vector.broadcast %cst_600 : f32 to vector<8x128xf32>
    %768 = arith.mulf %767, %678 : vector<8x128xf32>
    %cst_601 = arith.constant 5.870000e-01 : f32
    %769 = vector.broadcast %cst_601 : f32 to vector<8x128xf32>
    %770 = arith.mulf %769, %710 : vector<8x128xf32>
    %771 = arith.addf %768, %770 : vector<8x128xf32>
    %cst_602 = arith.constant 1.140000e-01 : f32
    %772 = vector.broadcast %cst_602 : f32 to vector<8x128xf32>
    %773 = arith.mulf %772, %742 : vector<8x128xf32>
    %774 = arith.addf %771, %773 : vector<8x128xf32>
    %cst_603 = arith.constant 2.989000e-01 : f32
    %775 = vector.broadcast %cst_603 : f32 to vector<8x128xf32>
    %776 = arith.mulf %775, %686 : vector<8x128xf32>
    %cst_604 = arith.constant 5.870000e-01 : f32
    %777 = vector.broadcast %cst_604 : f32 to vector<8x128xf32>
    %778 = arith.mulf %777, %718 : vector<8x128xf32>
    %779 = arith.addf %776, %778 : vector<8x128xf32>
    %cst_605 = arith.constant 1.140000e-01 : f32
    %780 = vector.broadcast %cst_605 : f32 to vector<8x128xf32>
    %781 = arith.mulf %780, %750 : vector<8x128xf32>
    %782 = arith.addf %779, %781 : vector<8x128xf32>
    %cst_606 = arith.constant 2.989000e-01 : f32
    %783 = vector.broadcast %cst_606 : f32 to vector<8x128xf32>
    %784 = arith.mulf %783, %694 : vector<8x128xf32>
    %cst_607 = arith.constant 5.870000e-01 : f32
    %785 = vector.broadcast %cst_607 : f32 to vector<8x128xf32>
    %786 = arith.mulf %785, %726 : vector<8x128xf32>
    %787 = arith.addf %784, %786 : vector<8x128xf32>
    %cst_608 = arith.constant 1.140000e-01 : f32
    %788 = vector.broadcast %cst_608 : f32 to vector<8x128xf32>
    %789 = arith.mulf %788, %758 : vector<8x128xf32>
    %790 = arith.addf %787, %789 : vector<8x128xf32>
    %791 = vector.shape_cast %766 : vector<8x128xf32> to vector<1x8x128xf32>
    %cst_609 = arith.constant dense<0.000000e+00> : vector<1xf32>
    %792 = vector.multi_reduction <add>, %791, %cst_609 [1, 2] : vector<1x8x128xf32> to vector<1xf32>
    %793 = vector.shape_cast %792 : vector<1xf32> to vector<1x1x1xf32>
    %794 = vector.extract %793[0, 0, 0] : f32 from vector<1x1x1xf32>
    %795 = vector.shape_cast %774 : vector<8x128xf32> to vector<1x8x128xf32>
    %cst_610 = arith.constant dense<0.000000e+00> : vector<1xf32>
    %796 = vector.multi_reduction <add>, %795, %cst_610 [1, 2] : vector<1x8x128xf32> to vector<1xf32>
    %797 = vector.shape_cast %796 : vector<1xf32> to vector<1x1x1xf32>
    %798 = vector.extract %797[0, 0, 0] : f32 from vector<1x1x1xf32>
    %799 = arith.addf %794, %798 : f32
    %800 = vector.shape_cast %782 : vector<8x128xf32> to vector<1x8x128xf32>
    %cst_611 = arith.constant dense<0.000000e+00> : vector<1xf32>
    %801 = vector.multi_reduction <add>, %800, %cst_611 [1, 2] : vector<1x8x128xf32> to vector<1xf32>
    %802 = vector.shape_cast %801 : vector<1xf32> to vector<1x1x1xf32>
    %803 = vector.extract %802[0, 0, 0] : f32 from vector<1x1x1xf32>
    %804 = arith.addf %799, %803 : f32
    %805 = vector.shape_cast %790 : vector<8x128xf32> to vector<1x8x128xf32>
    %cst_612 = arith.constant dense<0.000000e+00> : vector<1xf32>
    %806 = vector.multi_reduction <add>, %805, %cst_612 [1, 2] : vector<1x8x128xf32> to vector<1xf32>
    %807 = vector.shape_cast %806 : vector<1xf32> to vector<1x1x1xf32>
    %808 = vector.extract %807[0, 0, 0] : f32 from vector<1x1x1xf32>
    %809 = arith.addf %804, %808 : f32
    %cst_613 = arith.constant 3.906250e-03 : f32
    %810 = arith.mulf %809, %cst_613 : f32
    %cst_614 = arith.constant -5.000000e-02 : f32
    %811 = arith.mulf %cst_614, %810 : f32
    %cst_615 = arith.constant 1.050000e+00 : f32
    %812 = vector.broadcast %cst_615 : f32 to vector<8x128xf32>
    %813 = arith.mulf %812, %670 : vector<8x128xf32>
    %814 = vector.broadcast %811 : f32 to vector<8x128xf32>
    %815 = arith.addf %813, %814 : vector<8x128xf32>
    %cst_616 = arith.constant 0.000000e+00 : f32
    %cst_617 = arith.constant 1.000000e+00 : f32
    %816 = vector.broadcast %cst_616 : f32 to vector<8x128xf32>
    %817 = arith.maximumf %816, %815 : vector<8x128xf32>
    %818 = vector.broadcast %cst_617 : f32 to vector<8x128xf32>
    %819 = arith.minimumf %818, %817 : vector<8x128xf32>
    %cst_618 = arith.constant 1.050000e+00 : f32
    %820 = vector.broadcast %cst_618 : f32 to vector<8x128xf32>
    %821 = arith.mulf %820, %678 : vector<8x128xf32>
    %822 = vector.broadcast %811 : f32 to vector<8x128xf32>
    %823 = arith.addf %821, %822 : vector<8x128xf32>
    %cst_619 = arith.constant 0.000000e+00 : f32
    %cst_620 = arith.constant 1.000000e+00 : f32
    %824 = vector.broadcast %cst_619 : f32 to vector<8x128xf32>
    %825 = arith.maximumf %824, %823 : vector<8x128xf32>
    %826 = vector.broadcast %cst_620 : f32 to vector<8x128xf32>
    %827 = arith.minimumf %826, %825 : vector<8x128xf32>
    %cst_621 = arith.constant 1.050000e+00 : f32
    %828 = vector.broadcast %cst_621 : f32 to vector<8x128xf32>
    %829 = arith.mulf %828, %686 : vector<8x128xf32>
    %830 = vector.broadcast %811 : f32 to vector<8x128xf32>
    %831 = arith.addf %829, %830 : vector<8x128xf32>
    %cst_622 = arith.constant 0.000000e+00 : f32
    %cst_623 = arith.constant 1.000000e+00 : f32
    %832 = vector.broadcast %cst_622 : f32 to vector<8x128xf32>
    %833 = arith.maximumf %832, %831 : vector<8x128xf32>
    %834 = vector.broadcast %cst_623 : f32 to vector<8x128xf32>
    %835 = arith.minimumf %834, %833 : vector<8x128xf32>
    %cst_624 = arith.constant 1.050000e+00 : f32
    %836 = vector.broadcast %cst_624 : f32 to vector<8x128xf32>
    %837 = arith.mulf %836, %694 : vector<8x128xf32>
    %838 = vector.broadcast %811 : f32 to vector<8x128xf32>
    %839 = arith.addf %837, %838 : vector<8x128xf32>
    %cst_625 = arith.constant 0.000000e+00 : f32
    %cst_626 = arith.constant 1.000000e+00 : f32
    %840 = vector.broadcast %cst_625 : f32 to vector<8x128xf32>
    %841 = arith.maximumf %840, %839 : vector<8x128xf32>
    %842 = vector.broadcast %cst_626 : f32 to vector<8x128xf32>
    %843 = arith.minimumf %842, %841 : vector<8x128xf32>
    %cst_627 = arith.constant 1.050000e+00 : f32
    %844 = vector.broadcast %cst_627 : f32 to vector<8x128xf32>
    %845 = arith.mulf %844, %702 : vector<8x128xf32>
    %846 = vector.broadcast %811 : f32 to vector<8x128xf32>
    %847 = arith.addf %845, %846 : vector<8x128xf32>
    %cst_628 = arith.constant 0.000000e+00 : f32
    %cst_629 = arith.constant 1.000000e+00 : f32
    %848 = vector.broadcast %cst_628 : f32 to vector<8x128xf32>
    %849 = arith.maximumf %848, %847 : vector<8x128xf32>
    %850 = vector.broadcast %cst_629 : f32 to vector<8x128xf32>
    %851 = arith.minimumf %850, %849 : vector<8x128xf32>
    %cst_630 = arith.constant 1.050000e+00 : f32
    %852 = vector.broadcast %cst_630 : f32 to vector<8x128xf32>
    %853 = arith.mulf %852, %710 : vector<8x128xf32>
    %854 = vector.broadcast %811 : f32 to vector<8x128xf32>
    %855 = arith.addf %853, %854 : vector<8x128xf32>
    %cst_631 = arith.constant 0.000000e+00 : f32
    %cst_632 = arith.constant 1.000000e+00 : f32
    %856 = vector.broadcast %cst_631 : f32 to vector<8x128xf32>
    %857 = arith.maximumf %856, %855 : vector<8x128xf32>
    %858 = vector.broadcast %cst_632 : f32 to vector<8x128xf32>
    %859 = arith.minimumf %858, %857 : vector<8x128xf32>
    %cst_633 = arith.constant 1.050000e+00 : f32
    %860 = vector.broadcast %cst_633 : f32 to vector<8x128xf32>
    %861 = arith.mulf %860, %718 : vector<8x128xf32>
    %862 = vector.broadcast %811 : f32 to vector<8x128xf32>
    %863 = arith.addf %861, %862 : vector<8x128xf32>
    %cst_634 = arith.constant 0.000000e+00 : f32
    %cst_635 = arith.constant 1.000000e+00 : f32
    %864 = vector.broadcast %cst_634 : f32 to vector<8x128xf32>
    %865 = arith.maximumf %864, %863 : vector<8x128xf32>
    %866 = vector.broadcast %cst_635 : f32 to vector<8x128xf32>
    %867 = arith.minimumf %866, %865 : vector<8x128xf32>
    %cst_636 = arith.constant 1.050000e+00 : f32
    %868 = vector.broadcast %cst_636 : f32 to vector<8x128xf32>
    %869 = arith.mulf %868, %726 : vector<8x128xf32>
    %870 = vector.broadcast %811 : f32 to vector<8x128xf32>
    %871 = arith.addf %869, %870 : vector<8x128xf32>
    %cst_637 = arith.constant 0.000000e+00 : f32
    %cst_638 = arith.constant 1.000000e+00 : f32
    %872 = vector.broadcast %cst_637 : f32 to vector<8x128xf32>
    %873 = arith.maximumf %872, %871 : vector<8x128xf32>
    %874 = vector.broadcast %cst_638 : f32 to vector<8x128xf32>
    %875 = arith.minimumf %874, %873 : vector<8x128xf32>
    %cst_639 = arith.constant 1.050000e+00 : f32
    %876 = vector.broadcast %cst_639 : f32 to vector<8x128xf32>
    %877 = arith.mulf %876, %734 : vector<8x128xf32>
    %878 = vector.broadcast %811 : f32 to vector<8x128xf32>
    %879 = arith.addf %877, %878 : vector<8x128xf32>
    %cst_640 = arith.constant 0.000000e+00 : f32
    %cst_641 = arith.constant 1.000000e+00 : f32
    %880 = vector.broadcast %cst_640 : f32 to vector<8x128xf32>
    %881 = arith.maximumf %880, %879 : vector<8x128xf32>
    %882 = vector.broadcast %cst_641 : f32 to vector<8x128xf32>
    %883 = arith.minimumf %882, %881 : vector<8x128xf32>
    %cst_642 = arith.constant 1.050000e+00 : f32
    %884 = vector.broadcast %cst_642 : f32 to vector<8x128xf32>
    %885 = arith.mulf %884, %742 : vector<8x128xf32>
    %886 = vector.broadcast %811 : f32 to vector<8x128xf32>
    %887 = arith.addf %885, %886 : vector<8x128xf32>
    %cst_643 = arith.constant 0.000000e+00 : f32
    %cst_644 = arith.constant 1.000000e+00 : f32
    %888 = vector.broadcast %cst_643 : f32 to vector<8x128xf32>
    %889 = arith.maximumf %888, %887 : vector<8x128xf32>
    %890 = vector.broadcast %cst_644 : f32 to vector<8x128xf32>
    %891 = arith.minimumf %890, %889 : vector<8x128xf32>
    %cst_645 = arith.constant 1.050000e+00 : f32
    %892 = vector.broadcast %cst_645 : f32 to vector<8x128xf32>
    %893 = arith.mulf %892, %750 : vector<8x128xf32>
    %894 = vector.broadcast %811 : f32 to vector<8x128xf32>
    %895 = arith.addf %893, %894 : vector<8x128xf32>
    %cst_646 = arith.constant 0.000000e+00 : f32
    %cst_647 = arith.constant 1.000000e+00 : f32
    %896 = vector.broadcast %cst_646 : f32 to vector<8x128xf32>
    %897 = arith.maximumf %896, %895 : vector<8x128xf32>
    %898 = vector.broadcast %cst_647 : f32 to vector<8x128xf32>
    %899 = arith.minimumf %898, %897 : vector<8x128xf32>
    %cst_648 = arith.constant 1.050000e+00 : f32
    %900 = vector.broadcast %cst_648 : f32 to vector<8x128xf32>
    %901 = arith.mulf %900, %758 : vector<8x128xf32>
    %902 = vector.broadcast %811 : f32 to vector<8x128xf32>
    %903 = arith.addf %901, %902 : vector<8x128xf32>
    %cst_649 = arith.constant 0.000000e+00 : f32
    %cst_650 = arith.constant 1.000000e+00 : f32
    %904 = vector.broadcast %cst_649 : f32 to vector<8x128xf32>
    %905 = arith.maximumf %904, %903 : vector<8x128xf32>
    %906 = vector.broadcast %cst_650 : f32 to vector<8x128xf32>
    %907 = arith.minimumf %906, %905 : vector<8x128xf32>
    %cst_651 = arith.constant 2.989000e-01 : f32
    %908 = vector.broadcast %cst_651 : f32 to vector<8x128xf32>
    %909 = arith.mulf %908, %819 : vector<8x128xf32>
    %cst_652 = arith.constant 5.870000e-01 : f32
    %910 = vector.broadcast %cst_652 : f32 to vector<8x128xf32>
    %911 = arith.mulf %910, %851 : vector<8x128xf32>
    %912 = arith.addf %909, %911 : vector<8x128xf32>
    %cst_653 = arith.constant 1.140000e-01 : f32
    %913 = vector.broadcast %cst_653 : f32 to vector<8x128xf32>
    %914 = arith.mulf %913, %883 : vector<8x128xf32>
    %915 = arith.addf %912, %914 : vector<8x128xf32>
    %cst_654 = arith.constant 2.989000e-01 : f32
    %916 = vector.broadcast %cst_654 : f32 to vector<8x128xf32>
    %917 = arith.mulf %916, %827 : vector<8x128xf32>
    %cst_655 = arith.constant 5.870000e-01 : f32
    %918 = vector.broadcast %cst_655 : f32 to vector<8x128xf32>
    %919 = arith.mulf %918, %859 : vector<8x128xf32>
    %920 = arith.addf %917, %919 : vector<8x128xf32>
    %cst_656 = arith.constant 1.140000e-01 : f32
    %921 = vector.broadcast %cst_656 : f32 to vector<8x128xf32>
    %922 = arith.mulf %921, %891 : vector<8x128xf32>
    %923 = arith.addf %920, %922 : vector<8x128xf32>
    %cst_657 = arith.constant 2.989000e-01 : f32
    %924 = vector.broadcast %cst_657 : f32 to vector<8x128xf32>
    %925 = arith.mulf %924, %835 : vector<8x128xf32>
    %cst_658 = arith.constant 5.870000e-01 : f32
    %926 = vector.broadcast %cst_658 : f32 to vector<8x128xf32>
    %927 = arith.mulf %926, %867 : vector<8x128xf32>
    %928 = arith.addf %925, %927 : vector<8x128xf32>
    %cst_659 = arith.constant 1.140000e-01 : f32
    %929 = vector.broadcast %cst_659 : f32 to vector<8x128xf32>
    %930 = arith.mulf %929, %899 : vector<8x128xf32>
    %931 = arith.addf %928, %930 : vector<8x128xf32>
    %cst_660 = arith.constant 2.989000e-01 : f32
    %932 = vector.broadcast %cst_660 : f32 to vector<8x128xf32>
    %933 = arith.mulf %932, %843 : vector<8x128xf32>
    %cst_661 = arith.constant 5.870000e-01 : f32
    %934 = vector.broadcast %cst_661 : f32 to vector<8x128xf32>
    %935 = arith.mulf %934, %875 : vector<8x128xf32>
    %936 = arith.addf %933, %935 : vector<8x128xf32>
    %cst_662 = arith.constant 1.140000e-01 : f32
    %937 = vector.broadcast %cst_662 : f32 to vector<8x128xf32>
    %938 = arith.mulf %937, %907 : vector<8x128xf32>
    %939 = arith.addf %936, %938 : vector<8x128xf32>
    %cst_663 = arith.constant 1.000000e-01 : f32
    %940 = vector.broadcast %cst_663 : f32 to vector<8x128xf32>
    %941 = arith.mulf %940, %915 : vector<8x128xf32>
    %cst_664 = arith.constant 1.000000e-01 : f32
    %942 = vector.broadcast %cst_664 : f32 to vector<8x128xf32>
    %943 = arith.mulf %942, %923 : vector<8x128xf32>
    %cst_665 = arith.constant 1.000000e-01 : f32
    %944 = vector.broadcast %cst_665 : f32 to vector<8x128xf32>
    %945 = arith.mulf %944, %931 : vector<8x128xf32>
    %cst_666 = arith.constant 1.000000e-01 : f32
    %946 = vector.broadcast %cst_666 : f32 to vector<8x128xf32>
    %947 = arith.mulf %946, %939 : vector<8x128xf32>
    %cst_667 = arith.constant 0.899999976 : f32
    %948 = vector.broadcast %cst_667 : f32 to vector<8x128xf32>
    %949 = arith.mulf %948, %819 : vector<8x128xf32>
    %950 = arith.addf %949, %941 : vector<8x128xf32>
    %cst_668 = arith.constant 0.000000e+00 : f32
    %cst_669 = arith.constant 1.000000e+00 : f32
    %951 = vector.broadcast %cst_668 : f32 to vector<8x128xf32>
    %952 = arith.maximumf %951, %950 : vector<8x128xf32>
    %953 = vector.broadcast %cst_669 : f32 to vector<8x128xf32>
    %954 = arith.minimumf %953, %952 : vector<8x128xf32>
    %cst_670 = arith.constant 0.899999976 : f32
    %955 = vector.broadcast %cst_670 : f32 to vector<8x128xf32>
    %956 = arith.mulf %955, %827 : vector<8x128xf32>
    %957 = arith.addf %956, %943 : vector<8x128xf32>
    %cst_671 = arith.constant 0.000000e+00 : f32
    %cst_672 = arith.constant 1.000000e+00 : f32
    %958 = vector.broadcast %cst_671 : f32 to vector<8x128xf32>
    %959 = arith.maximumf %958, %957 : vector<8x128xf32>
    %960 = vector.broadcast %cst_672 : f32 to vector<8x128xf32>
    %961 = arith.minimumf %960, %959 : vector<8x128xf32>
    %cst_673 = arith.constant 0.899999976 : f32
    %962 = vector.broadcast %cst_673 : f32 to vector<8x128xf32>
    %963 = arith.mulf %962, %835 : vector<8x128xf32>
    %964 = arith.addf %963, %945 : vector<8x128xf32>
    %cst_674 = arith.constant 0.000000e+00 : f32
    %cst_675 = arith.constant 1.000000e+00 : f32
    %965 = vector.broadcast %cst_674 : f32 to vector<8x128xf32>
    %966 = arith.maximumf %965, %964 : vector<8x128xf32>
    %967 = vector.broadcast %cst_675 : f32 to vector<8x128xf32>
    %968 = arith.minimumf %967, %966 : vector<8x128xf32>
    %cst_676 = arith.constant 0.899999976 : f32
    %969 = vector.broadcast %cst_676 : f32 to vector<8x128xf32>
    %970 = arith.mulf %969, %843 : vector<8x128xf32>
    %971 = arith.addf %970, %947 : vector<8x128xf32>
    %cst_677 = arith.constant 0.000000e+00 : f32
    %cst_678 = arith.constant 1.000000e+00 : f32
    %972 = vector.broadcast %cst_677 : f32 to vector<8x128xf32>
    %973 = arith.maximumf %972, %971 : vector<8x128xf32>
    %974 = vector.broadcast %cst_678 : f32 to vector<8x128xf32>
    %975 = arith.minimumf %974, %973 : vector<8x128xf32>
    %cst_679 = arith.constant 0.899999976 : f32
    %976 = vector.broadcast %cst_679 : f32 to vector<8x128xf32>
    %977 = arith.mulf %976, %851 : vector<8x128xf32>
    %978 = arith.addf %977, %941 : vector<8x128xf32>
    %cst_680 = arith.constant 0.000000e+00 : f32
    %cst_681 = arith.constant 1.000000e+00 : f32
    %979 = vector.broadcast %cst_680 : f32 to vector<8x128xf32>
    %980 = arith.maximumf %979, %978 : vector<8x128xf32>
    %981 = vector.broadcast %cst_681 : f32 to vector<8x128xf32>
    %982 = arith.minimumf %981, %980 : vector<8x128xf32>
    %cst_682 = arith.constant 0.899999976 : f32
    %983 = vector.broadcast %cst_682 : f32 to vector<8x128xf32>
    %984 = arith.mulf %983, %859 : vector<8x128xf32>
    %985 = arith.addf %984, %943 : vector<8x128xf32>
    %cst_683 = arith.constant 0.000000e+00 : f32
    %cst_684 = arith.constant 1.000000e+00 : f32
    %986 = vector.broadcast %cst_683 : f32 to vector<8x128xf32>
    %987 = arith.maximumf %986, %985 : vector<8x128xf32>
    %988 = vector.broadcast %cst_684 : f32 to vector<8x128xf32>
    %989 = arith.minimumf %988, %987 : vector<8x128xf32>
    %cst_685 = arith.constant 0.899999976 : f32
    %990 = vector.broadcast %cst_685 : f32 to vector<8x128xf32>
    %991 = arith.mulf %990, %867 : vector<8x128xf32>
    %992 = arith.addf %991, %945 : vector<8x128xf32>
    %cst_686 = arith.constant 0.000000e+00 : f32
    %cst_687 = arith.constant 1.000000e+00 : f32
    %993 = vector.broadcast %cst_686 : f32 to vector<8x128xf32>
    %994 = arith.maximumf %993, %992 : vector<8x128xf32>
    %995 = vector.broadcast %cst_687 : f32 to vector<8x128xf32>
    %996 = arith.minimumf %995, %994 : vector<8x128xf32>
    %cst_688 = arith.constant 0.899999976 : f32
    %997 = vector.broadcast %cst_688 : f32 to vector<8x128xf32>
    %998 = arith.mulf %997, %875 : vector<8x128xf32>
    %999 = arith.addf %998, %947 : vector<8x128xf32>
    %cst_689 = arith.constant 0.000000e+00 : f32
    %cst_690 = arith.constant 1.000000e+00 : f32
    %1000 = vector.broadcast %cst_689 : f32 to vector<8x128xf32>
    %1001 = arith.maximumf %1000, %999 : vector<8x128xf32>
    %1002 = vector.broadcast %cst_690 : f32 to vector<8x128xf32>
    %1003 = arith.minimumf %1002, %1001 : vector<8x128xf32>
    %cst_691 = arith.constant 0.899999976 : f32
    %1004 = vector.broadcast %cst_691 : f32 to vector<8x128xf32>
    %1005 = arith.mulf %1004, %883 : vector<8x128xf32>
    %1006 = arith.addf %1005, %941 : vector<8x128xf32>
    %cst_692 = arith.constant 0.000000e+00 : f32
    %cst_693 = arith.constant 1.000000e+00 : f32
    %1007 = vector.broadcast %cst_692 : f32 to vector<8x128xf32>
    %1008 = arith.maximumf %1007, %1006 : vector<8x128xf32>
    %1009 = vector.broadcast %cst_693 : f32 to vector<8x128xf32>
    %1010 = arith.minimumf %1009, %1008 : vector<8x128xf32>
    %cst_694 = arith.constant 0.899999976 : f32
    %1011 = vector.broadcast %cst_694 : f32 to vector<8x128xf32>
    %1012 = arith.mulf %1011, %891 : vector<8x128xf32>
    %1013 = arith.addf %1012, %943 : vector<8x128xf32>
    %cst_695 = arith.constant 0.000000e+00 : f32
    %cst_696 = arith.constant 1.000000e+00 : f32
    %1014 = vector.broadcast %cst_695 : f32 to vector<8x128xf32>
    %1015 = arith.maximumf %1014, %1013 : vector<8x128xf32>
    %1016 = vector.broadcast %cst_696 : f32 to vector<8x128xf32>
    %1017 = arith.minimumf %1016, %1015 : vector<8x128xf32>
    %cst_697 = arith.constant 0.899999976 : f32
    %1018 = vector.broadcast %cst_697 : f32 to vector<8x128xf32>
    %1019 = arith.mulf %1018, %899 : vector<8x128xf32>
    %1020 = arith.addf %1019, %945 : vector<8x128xf32>
    %cst_698 = arith.constant 0.000000e+00 : f32
    %cst_699 = arith.constant 1.000000e+00 : f32
    %1021 = vector.broadcast %cst_698 : f32 to vector<8x128xf32>
    %1022 = arith.maximumf %1021, %1020 : vector<8x128xf32>
    %1023 = vector.broadcast %cst_699 : f32 to vector<8x128xf32>
    %1024 = arith.minimumf %1023, %1022 : vector<8x128xf32>
    %cst_700 = arith.constant 0.899999976 : f32
    %1025 = vector.broadcast %cst_700 : f32 to vector<8x128xf32>
    %1026 = arith.mulf %1025, %907 : vector<8x128xf32>
    %1027 = arith.addf %1026, %947 : vector<8x128xf32>
    %cst_701 = arith.constant 0.000000e+00 : f32
    %cst_702 = arith.constant 1.000000e+00 : f32
    %1028 = vector.broadcast %cst_701 : f32 to vector<8x128xf32>
    %1029 = arith.maximumf %1028, %1027 : vector<8x128xf32>
    %1030 = vector.broadcast %cst_702 : f32 to vector<8x128xf32>
    %1031 = arith.minimumf %1030, %1029 : vector<8x128xf32>
    %c0_703 = arith.constant 0 : index
    %c0_704 = arith.constant 0 : index
    %c0_705 = arith.constant 0 : index
    %c0_706 = arith.constant 0 : index
    %c0_707 = arith.constant 0 : index
    %1032 = vector.load %arg1[%c0_703, %c0_704, %c0_705, %c0_706, %c0_707] : memref<1x3x4x8x128xf32, #tpu.memory_space<vmem>>, vector<1x1x1x8x128xf32>
    %1033 = vector.shape_cast %1032 : vector<1x1x1x8x128xf32> to vector<8x128xf32>
    %1034 = arith.subf %1033, %954 : vector<8x128xf32>
    %c0_708 = arith.constant 0 : index
    %c0_709 = arith.constant 0 : index
    %c1_710 = arith.constant 1 : index
    %c0_711 = arith.constant 0 : index
    %c0_712 = arith.constant 0 : index
    %1035 = vector.load %arg1[%c0_708, %c0_709, %c1_710, %c0_711, %c0_712] : memref<1x3x4x8x128xf32, #tpu.memory_space<vmem>>, vector<1x1x1x8x128xf32>
    %1036 = vector.shape_cast %1035 : vector<1x1x1x8x128xf32> to vector<8x128xf32>
    %1037 = arith.subf %1036, %961 : vector<8x128xf32>
    %c0_713 = arith.constant 0 : index
    %c0_714 = arith.constant 0 : index
    %c2_715 = arith.constant 2 : index
    %c0_716 = arith.constant 0 : index
    %c0_717 = arith.constant 0 : index
    %1038 = vector.load %arg1[%c0_713, %c0_714, %c2_715, %c0_716, %c0_717] : memref<1x3x4x8x128xf32, #tpu.memory_space<vmem>>, vector<1x1x1x8x128xf32>
    %1039 = vector.shape_cast %1038 : vector<1x1x1x8x128xf32> to vector<8x128xf32>
    %1040 = arith.subf %1039, %968 : vector<8x128xf32>
    %c0_718 = arith.constant 0 : index
    %c0_719 = arith.constant 0 : index
    %c3_720 = arith.constant 3 : index
    %c0_721 = arith.constant 0 : index
    %c0_722 = arith.constant 0 : index
    %1041 = vector.load %arg1[%c0_718, %c0_719, %c3_720, %c0_721, %c0_722] : memref<1x3x4x8x128xf32, #tpu.memory_space<vmem>>, vector<1x1x1x8x128xf32>
    %1042 = vector.shape_cast %1041 : vector<1x1x1x8x128xf32> to vector<8x128xf32>
    %1043 = arith.subf %1042, %975 : vector<8x128xf32>
    %1044 = arith.addf %1034, %1037 : vector<8x128xf32>
    %1045 = arith.subf %1034, %1037 : vector<8x128xf32>
    %1046 = arith.addf %1040, %1043 : vector<8x128xf32>
    %1047 = arith.subf %1040, %1043 : vector<8x128xf32>
    %1048 = arith.addf %1045, %1047 : vector<8x128xf32>
    %1049 = math.absf %1048 : vector<8x128xf32>
    %1050 = arith.subf %1044, %1046 : vector<8x128xf32>
    %1051 = math.absf %1050 : vector<8x128xf32>
    %1052 = arith.addf %1049, %1051 : vector<8x128xf32>
    %1053 = arith.subf %1045, %1047 : vector<8x128xf32>
    %1054 = math.absf %1053 : vector<8x128xf32>
    %1055 = arith.addf %1052, %1054 : vector<8x128xf32>
    %c0_723 = arith.constant 0 : index
    %c1_724 = arith.constant 1 : index
    %c0_725 = arith.constant 0 : index
    %c0_726 = arith.constant 0 : index
    %c0_727 = arith.constant 0 : index
    %1056 = vector.load %arg1[%c0_723, %c1_724, %c0_725, %c0_726, %c0_727] : memref<1x3x4x8x128xf32, #tpu.memory_space<vmem>>, vector<1x1x1x8x128xf32>
    %1057 = vector.shape_cast %1056 : vector<1x1x1x8x128xf32> to vector<8x128xf32>
    %1058 = arith.subf %1057, %982 : vector<8x128xf32>
    %c0_728 = arith.constant 0 : index
    %c1_729 = arith.constant 1 : index
    %c1_730 = arith.constant 1 : index
    %c0_731 = arith.constant 0 : index
    %c0_732 = arith.constant 0 : index
    %1059 = vector.load %arg1[%c0_728, %c1_729, %c1_730, %c0_731, %c0_732] : memref<1x3x4x8x128xf32, #tpu.memory_space<vmem>>, vector<1x1x1x8x128xf32>
    %1060 = vector.shape_cast %1059 : vector<1x1x1x8x128xf32> to vector<8x128xf32>
    %1061 = arith.subf %1060, %989 : vector<8x128xf32>
    %c0_733 = arith.constant 0 : index
    %c1_734 = arith.constant 1 : index
    %c2_735 = arith.constant 2 : index
    %c0_736 = arith.constant 0 : index
    %c0_737 = arith.constant 0 : index
    %1062 = vector.load %arg1[%c0_733, %c1_734, %c2_735, %c0_736, %c0_737] : memref<1x3x4x8x128xf32, #tpu.memory_space<vmem>>, vector<1x1x1x8x128xf32>
    %1063 = vector.shape_cast %1062 : vector<1x1x1x8x128xf32> to vector<8x128xf32>
    %1064 = arith.subf %1063, %996 : vector<8x128xf32>
    %c0_738 = arith.constant 0 : index
    %c1_739 = arith.constant 1 : index
    %c3_740 = arith.constant 3 : index
    %c0_741 = arith.constant 0 : index
    %c0_742 = arith.constant 0 : index
    %1065 = vector.load %arg1[%c0_738, %c1_739, %c3_740, %c0_741, %c0_742] : memref<1x3x4x8x128xf32, #tpu.memory_space<vmem>>, vector<1x1x1x8x128xf32>
    %1066 = vector.shape_cast %1065 : vector<1x1x1x8x128xf32> to vector<8x128xf32>
    %1067 = arith.subf %1066, %1003 : vector<8x128xf32>
    %1068 = arith.addf %1058, %1061 : vector<8x128xf32>
    %1069 = arith.subf %1058, %1061 : vector<8x128xf32>
    %1070 = arith.addf %1064, %1067 : vector<8x128xf32>
    %1071 = arith.subf %1064, %1067 : vector<8x128xf32>
    %1072 = arith.addf %1069, %1071 : vector<8x128xf32>
    %1073 = math.absf %1072 : vector<8x128xf32>
    %1074 = arith.subf %1068, %1070 : vector<8x128xf32>
    %1075 = math.absf %1074 : vector<8x128xf32>
    %1076 = arith.addf %1073, %1075 : vector<8x128xf32>
    %1077 = arith.subf %1069, %1071 : vector<8x128xf32>
    %1078 = math.absf %1077 : vector<8x128xf32>
    %1079 = arith.addf %1076, %1078 : vector<8x128xf32>
    %1080 = arith.addf %1055, %1079 : vector<8x128xf32>
    %c0_743 = arith.constant 0 : index
    %c2_744 = arith.constant 2 : index
    %c0_745 = arith.constant 0 : index
    %c0_746 = arith.constant 0 : index
    %c0_747 = arith.constant 0 : index
    %1081 = vector.load %arg1[%c0_743, %c2_744, %c0_745, %c0_746, %c0_747] : memref<1x3x4x8x128xf32, #tpu.memory_space<vmem>>, vector<1x1x1x8x128xf32>
    %1082 = vector.shape_cast %1081 : vector<1x1x1x8x128xf32> to vector<8x128xf32>
    %1083 = arith.subf %1082, %1010 : vector<8x128xf32>
    %c0_748 = arith.constant 0 : index
    %c2_749 = arith.constant 2 : index
    %c1_750 = arith.constant 1 : index
    %c0_751 = arith.constant 0 : index
    %c0_752 = arith.constant 0 : index
    %1084 = vector.load %arg1[%c0_748, %c2_749, %c1_750, %c0_751, %c0_752] : memref<1x3x4x8x128xf32, #tpu.memory_space<vmem>>, vector<1x1x1x8x128xf32>
    %1085 = vector.shape_cast %1084 : vector<1x1x1x8x128xf32> to vector<8x128xf32>
    %1086 = arith.subf %1085, %1017 : vector<8x128xf32>
    %c0_753 = arith.constant 0 : index
    %c2_754 = arith.constant 2 : index
    %c2_755 = arith.constant 2 : index
    %c0_756 = arith.constant 0 : index
    %c0_757 = arith.constant 0 : index
    %1087 = vector.load %arg1[%c0_753, %c2_754, %c2_755, %c0_756, %c0_757] : memref<1x3x4x8x128xf32, #tpu.memory_space<vmem>>, vector<1x1x1x8x128xf32>
    %1088 = vector.shape_cast %1087 : vector<1x1x1x8x128xf32> to vector<8x128xf32>
    %1089 = arith.subf %1088, %1024 : vector<8x128xf32>
    %c0_758 = arith.constant 0 : index
    %c2_759 = arith.constant 2 : index
    %c3_760 = arith.constant 3 : index
    %c0_761 = arith.constant 0 : index
    %c0_762 = arith.constant 0 : index
    %1090 = vector.load %arg1[%c0_758, %c2_759, %c3_760, %c0_761, %c0_762] : memref<1x3x4x8x128xf32, #tpu.memory_space<vmem>>, vector<1x1x1x8x128xf32>
    %1091 = vector.shape_cast %1090 : vector<1x1x1x8x128xf32> to vector<8x128xf32>
    %1092 = arith.subf %1091, %1031 : vector<8x128xf32>
    %1093 = arith.addf %1083, %1086 : vector<8x128xf32>
    %1094 = arith.subf %1083, %1086 : vector<8x128xf32>
    %1095 = arith.addf %1089, %1092 : vector<8x128xf32>
    %1096 = arith.subf %1089, %1092 : vector<8x128xf32>
    %1097 = arith.addf %1094, %1096 : vector<8x128xf32>
    %1098 = math.absf %1097 : vector<8x128xf32>
    %1099 = arith.subf %1093, %1095 : vector<8x128xf32>
    %1100 = math.absf %1099 : vector<8x128xf32>
    %1101 = arith.addf %1098, %1100 : vector<8x128xf32>
    %1102 = arith.subf %1094, %1096 : vector<8x128xf32>
    %1103 = math.absf %1102 : vector<8x128xf32>
    %1104 = arith.addf %1101, %1103 : vector<8x128xf32>
    %1105 = arith.addf %1080, %1104 : vector<8x128xf32>
    %1106 = vector.shape_cast %1105 : vector<8x128xf32> to vector<1x8x128xf32>
    %cst_763 = arith.constant dense<0.000000e+00> : vector<1xf32>
    %1107 = vector.multi_reduction <add>, %1106, %cst_763 [1, 2] : vector<1x8x128xf32> to vector<1xf32>
    %1108 = vector.shape_cast %1107 : vector<1xf32> to vector<1x1x1xf32>
    %1109 = vector.extract %1108[0, 0, 0] : f32 from vector<1x1x1xf32>
    %c0_764 = arith.constant 0 : index
    %c0_765 = arith.constant 0 : index
    %c0_766 = arith.constant 0 : index
    %c0_767 = arith.constant 0 : index
    %c0_768 = arith.constant 0 : index
    %1110 = vector.load %arg3[%c0_764, %c0_765, %c0_766, %c0_767, %c0_768] : memref<1x3x4x8x128xf32, #tpu.memory_space<vmem>>, vector<1x1x1x8x128xf32>
    %1111 = vector.shape_cast %1110 : vector<1x1x1x8x128xf32> to vector<8x128xf32>
    %cst_769 = arith.constant 1.100000e+00 : f32
    %1112 = vector.broadcast %cst_769 : f32 to vector<8x128xf32>
    %1113 = arith.mulf %1111, %1112 : vector<8x128xf32>
    %cst_770 = arith.constant 0.000000e+00 : f32
    %cst_771 = arith.constant 1.000000e+00 : f32
    %1114 = vector.broadcast %cst_770 : f32 to vector<8x128xf32>
    %1115 = arith.maximumf %1114, %1113 : vector<8x128xf32>
    %1116 = vector.broadcast %cst_771 : f32 to vector<8x128xf32>
    %1117 = arith.minimumf %1116, %1115 : vector<8x128xf32>
    %c0_772 = arith.constant 0 : index
    %c0_773 = arith.constant 0 : index
    %c1_774 = arith.constant 1 : index
    %c0_775 = arith.constant 0 : index
    %c0_776 = arith.constant 0 : index
    %1118 = vector.load %arg3[%c0_772, %c0_773, %c1_774, %c0_775, %c0_776] : memref<1x3x4x8x128xf32, #tpu.memory_space<vmem>>, vector<1x1x1x8x128xf32>
    %1119 = vector.shape_cast %1118 : vector<1x1x1x8x128xf32> to vector<8x128xf32>
    %cst_777 = arith.constant 1.100000e+00 : f32
    %1120 = vector.broadcast %cst_777 : f32 to vector<8x128xf32>
    %1121 = arith.mulf %1119, %1120 : vector<8x128xf32>
    %cst_778 = arith.constant 0.000000e+00 : f32
    %cst_779 = arith.constant 1.000000e+00 : f32
    %1122 = vector.broadcast %cst_778 : f32 to vector<8x128xf32>
    %1123 = arith.maximumf %1122, %1121 : vector<8x128xf32>
    %1124 = vector.broadcast %cst_779 : f32 to vector<8x128xf32>
    %1125 = arith.minimumf %1124, %1123 : vector<8x128xf32>
    %c0_780 = arith.constant 0 : index
    %c0_781 = arith.constant 0 : index
    %c2_782 = arith.constant 2 : index
    %c0_783 = arith.constant 0 : index
    %c0_784 = arith.constant 0 : index
    %1126 = vector.load %arg3[%c0_780, %c0_781, %c2_782, %c0_783, %c0_784] : memref<1x3x4x8x128xf32, #tpu.memory_space<vmem>>, vector<1x1x1x8x128xf32>
    %1127 = vector.shape_cast %1126 : vector<1x1x1x8x128xf32> to vector<8x128xf32>
    %cst_785 = arith.constant 1.100000e+00 : f32
    %1128 = vector.broadcast %cst_785 : f32 to vector<8x128xf32>
    %1129 = arith.mulf %1127, %1128 : vector<8x128xf32>
    %cst_786 = arith.constant 0.000000e+00 : f32
    %cst_787 = arith.constant 1.000000e+00 : f32
    %1130 = vector.broadcast %cst_786 : f32 to vector<8x128xf32>
    %1131 = arith.maximumf %1130, %1129 : vector<8x128xf32>
    %1132 = vector.broadcast %cst_787 : f32 to vector<8x128xf32>
    %1133 = arith.minimumf %1132, %1131 : vector<8x128xf32>
    %c0_788 = arith.constant 0 : index
    %c0_789 = arith.constant 0 : index
    %c3_790 = arith.constant 3 : index
    %c0_791 = arith.constant 0 : index
    %c0_792 = arith.constant 0 : index
    %1134 = vector.load %arg3[%c0_788, %c0_789, %c3_790, %c0_791, %c0_792] : memref<1x3x4x8x128xf32, #tpu.memory_space<vmem>>, vector<1x1x1x8x128xf32>
    %1135 = vector.shape_cast %1134 : vector<1x1x1x8x128xf32> to vector<8x128xf32>
    %cst_793 = arith.constant 1.100000e+00 : f32
    %1136 = vector.broadcast %cst_793 : f32 to vector<8x128xf32>
    %1137 = arith.mulf %1135, %1136 : vector<8x128xf32>
    %cst_794 = arith.constant 0.000000e+00 : f32
    %cst_795 = arith.constant 1.000000e+00 : f32
    %1138 = vector.broadcast %cst_794 : f32 to vector<8x128xf32>
    %1139 = arith.maximumf %1138, %1137 : vector<8x128xf32>
    %1140 = vector.broadcast %cst_795 : f32 to vector<8x128xf32>
    %1141 = arith.minimumf %1140, %1139 : vector<8x128xf32>
    %c0_796 = arith.constant 0 : index
    %c1_797 = arith.constant 1 : index
    %c0_798 = arith.constant 0 : index
    %c0_799 = arith.constant 0 : index
    %c0_800 = arith.constant 0 : index
    %1142 = vector.load %arg3[%c0_796, %c1_797, %c0_798, %c0_799, %c0_800] : memref<1x3x4x8x128xf32, #tpu.memory_space<vmem>>, vector<1x1x1x8x128xf32>
    %1143 = vector.shape_cast %1142 : vector<1x1x1x8x128xf32> to vector<8x128xf32>
    %cst_801 = arith.constant 1.100000e+00 : f32
    %1144 = vector.broadcast %cst_801 : f32 to vector<8x128xf32>
    %1145 = arith.mulf %1143, %1144 : vector<8x128xf32>
    %cst_802 = arith.constant 0.000000e+00 : f32
    %cst_803 = arith.constant 1.000000e+00 : f32
    %1146 = vector.broadcast %cst_802 : f32 to vector<8x128xf32>
    %1147 = arith.maximumf %1146, %1145 : vector<8x128xf32>
    %1148 = vector.broadcast %cst_803 : f32 to vector<8x128xf32>
    %1149 = arith.minimumf %1148, %1147 : vector<8x128xf32>
    %c0_804 = arith.constant 0 : index
    %c1_805 = arith.constant 1 : index
    %c1_806 = arith.constant 1 : index
    %c0_807 = arith.constant 0 : index
    %c0_808 = arith.constant 0 : index
    %1150 = vector.load %arg3[%c0_804, %c1_805, %c1_806, %c0_807, %c0_808] : memref<1x3x4x8x128xf32, #tpu.memory_space<vmem>>, vector<1x1x1x8x128xf32>
    %1151 = vector.shape_cast %1150 : vector<1x1x1x8x128xf32> to vector<8x128xf32>
    %cst_809 = arith.constant 1.100000e+00 : f32
    %1152 = vector.broadcast %cst_809 : f32 to vector<8x128xf32>
    %1153 = arith.mulf %1151, %1152 : vector<8x128xf32>
    %cst_810 = arith.constant 0.000000e+00 : f32
    %cst_811 = arith.constant 1.000000e+00 : f32
    %1154 = vector.broadcast %cst_810 : f32 to vector<8x128xf32>
    %1155 = arith.maximumf %1154, %1153 : vector<8x128xf32>
    %1156 = vector.broadcast %cst_811 : f32 to vector<8x128xf32>
    %1157 = arith.minimumf %1156, %1155 : vector<8x128xf32>
    %c0_812 = arith.constant 0 : index
    %c1_813 = arith.constant 1 : index
    %c2_814 = arith.constant 2 : index
    %c0_815 = arith.constant 0 : index
    %c0_816 = arith.constant 0 : index
    %1158 = vector.load %arg3[%c0_812, %c1_813, %c2_814, %c0_815, %c0_816] : memref<1x3x4x8x128xf32, #tpu.memory_space<vmem>>, vector<1x1x1x8x128xf32>
    %1159 = vector.shape_cast %1158 : vector<1x1x1x8x128xf32> to vector<8x128xf32>
    %cst_817 = arith.constant 1.100000e+00 : f32
    %1160 = vector.broadcast %cst_817 : f32 to vector<8x128xf32>
    %1161 = arith.mulf %1159, %1160 : vector<8x128xf32>
    %cst_818 = arith.constant 0.000000e+00 : f32
    %cst_819 = arith.constant 1.000000e+00 : f32
    %1162 = vector.broadcast %cst_818 : f32 to vector<8x128xf32>
    %1163 = arith.maximumf %1162, %1161 : vector<8x128xf32>
    %1164 = vector.broadcast %cst_819 : f32 to vector<8x128xf32>
    %1165 = arith.minimumf %1164, %1163 : vector<8x128xf32>
    %c0_820 = arith.constant 0 : index
    %c1_821 = arith.constant 1 : index
    %c3_822 = arith.constant 3 : index
    %c0_823 = arith.constant 0 : index
    %c0_824 = arith.constant 0 : index
    %1166 = vector.load %arg3[%c0_820, %c1_821, %c3_822, %c0_823, %c0_824] : memref<1x3x4x8x128xf32, #tpu.memory_space<vmem>>, vector<1x1x1x8x128xf32>
    %1167 = vector.shape_cast %1166 : vector<1x1x1x8x128xf32> to vector<8x128xf32>
    %cst_825 = arith.constant 1.100000e+00 : f32
    %1168 = vector.broadcast %cst_825 : f32 to vector<8x128xf32>
    %1169 = arith.mulf %1167, %1168 : vector<8x128xf32>
    %cst_826 = arith.constant 0.000000e+00 : f32
    %cst_827 = arith.constant 1.000000e+00 : f32
    %1170 = vector.broadcast %cst_826 : f32 to vector<8x128xf32>
    %1171 = arith.maximumf %1170, %1169 : vector<8x128xf32>
    %1172 = vector.broadcast %cst_827 : f32 to vector<8x128xf32>
    %1173 = arith.minimumf %1172, %1171 : vector<8x128xf32>
    %c0_828 = arith.constant 0 : index
    %c2_829 = arith.constant 2 : index
    %c0_830 = arith.constant 0 : index
    %c0_831 = arith.constant 0 : index
    %c0_832 = arith.constant 0 : index
    %1174 = vector.load %arg3[%c0_828, %c2_829, %c0_830, %c0_831, %c0_832] : memref<1x3x4x8x128xf32, #tpu.memory_space<vmem>>, vector<1x1x1x8x128xf32>
    %1175 = vector.shape_cast %1174 : vector<1x1x1x8x128xf32> to vector<8x128xf32>
    %cst_833 = arith.constant 1.100000e+00 : f32
    %1176 = vector.broadcast %cst_833 : f32 to vector<8x128xf32>
    %1177 = arith.mulf %1175, %1176 : vector<8x128xf32>
    %cst_834 = arith.constant 0.000000e+00 : f32
    %cst_835 = arith.constant 1.000000e+00 : f32
    %1178 = vector.broadcast %cst_834 : f32 to vector<8x128xf32>
    %1179 = arith.maximumf %1178, %1177 : vector<8x128xf32>
    %1180 = vector.broadcast %cst_835 : f32 to vector<8x128xf32>
    %1181 = arith.minimumf %1180, %1179 : vector<8x128xf32>
    %c0_836 = arith.constant 0 : index
    %c2_837 = arith.constant 2 : index
    %c1_838 = arith.constant 1 : index
    %c0_839 = arith.constant 0 : index
    %c0_840 = arith.constant 0 : index
    %1182 = vector.load %arg3[%c0_836, %c2_837, %c1_838, %c0_839, %c0_840] : memref<1x3x4x8x128xf32, #tpu.memory_space<vmem>>, vector<1x1x1x8x128xf32>
    %1183 = vector.shape_cast %1182 : vector<1x1x1x8x128xf32> to vector<8x128xf32>
    %cst_841 = arith.constant 1.100000e+00 : f32
    %1184 = vector.broadcast %cst_841 : f32 to vector<8x128xf32>
    %1185 = arith.mulf %1183, %1184 : vector<8x128xf32>
    %cst_842 = arith.constant 0.000000e+00 : f32
    %cst_843 = arith.constant 1.000000e+00 : f32
    %1186 = vector.broadcast %cst_842 : f32 to vector<8x128xf32>
    %1187 = arith.maximumf %1186, %1185 : vector<8x128xf32>
    %1188 = vector.broadcast %cst_843 : f32 to vector<8x128xf32>
    %1189 = arith.minimumf %1188, %1187 : vector<8x128xf32>
    %c0_844 = arith.constant 0 : index
    %c2_845 = arith.constant 2 : index
    %c2_846 = arith.constant 2 : index
    %c0_847 = arith.constant 0 : index
    %c0_848 = arith.constant 0 : index
    %1190 = vector.load %arg3[%c0_844, %c2_845, %c2_846, %c0_847, %c0_848] : memref<1x3x4x8x128xf32, #tpu.memory_space<vmem>>, vector<1x1x1x8x128xf32>
    %1191 = vector.shape_cast %1190 : vector<1x1x1x8x128xf32> to vector<8x128xf32>
    %cst_849 = arith.constant 1.100000e+00 : f32
    %1192 = vector.broadcast %cst_849 : f32 to vector<8x128xf32>
    %1193 = arith.mulf %1191, %1192 : vector<8x128xf32>
    %cst_850 = arith.constant 0.000000e+00 : f32
    %cst_851 = arith.constant 1.000000e+00 : f32
    %1194 = vector.broadcast %cst_850 : f32 to vector<8x128xf32>
    %1195 = arith.maximumf %1194, %1193 : vector<8x128xf32>
    %1196 = vector.broadcast %cst_851 : f32 to vector<8x128xf32>
    %1197 = arith.minimumf %1196, %1195 : vector<8x128xf32>
    %c0_852 = arith.constant 0 : index
    %c2_853 = arith.constant 2 : index
    %c3_854 = arith.constant 3 : index
    %c0_855 = arith.constant 0 : index
    %c0_856 = arith.constant 0 : index
    %1198 = vector.load %arg3[%c0_852, %c2_853, %c3_854, %c0_855, %c0_856] : memref<1x3x4x8x128xf32, #tpu.memory_space<vmem>>, vector<1x1x1x8x128xf32>
    %1199 = vector.shape_cast %1198 : vector<1x1x1x8x128xf32> to vector<8x128xf32>
    %cst_857 = arith.constant 1.100000e+00 : f32
    %1200 = vector.broadcast %cst_857 : f32 to vector<8x128xf32>
    %1201 = arith.mulf %1199, %1200 : vector<8x128xf32>
    %cst_858 = arith.constant 0.000000e+00 : f32
    %cst_859 = arith.constant 1.000000e+00 : f32
    %1202 = vector.broadcast %cst_858 : f32 to vector<8x128xf32>
    %1203 = arith.maximumf %1202, %1201 : vector<8x128xf32>
    %1204 = vector.broadcast %cst_859 : f32 to vector<8x128xf32>
    %1205 = arith.minimumf %1204, %1203 : vector<8x128xf32>
    %cst_860 = arith.constant 2.989000e-01 : f32
    %1206 = vector.broadcast %cst_860 : f32 to vector<8x128xf32>
    %1207 = arith.mulf %1206, %1117 : vector<8x128xf32>
    %cst_861 = arith.constant 5.870000e-01 : f32
    %1208 = vector.broadcast %cst_861 : f32 to vector<8x128xf32>
    %1209 = arith.mulf %1208, %1149 : vector<8x128xf32>
    %1210 = arith.addf %1207, %1209 : vector<8x128xf32>
    %cst_862 = arith.constant 1.140000e-01 : f32
    %1211 = vector.broadcast %cst_862 : f32 to vector<8x128xf32>
    %1212 = arith.mulf %1211, %1181 : vector<8x128xf32>
    %1213 = arith.addf %1210, %1212 : vector<8x128xf32>
    %cst_863 = arith.constant 2.989000e-01 : f32
    %1214 = vector.broadcast %cst_863 : f32 to vector<8x128xf32>
    %1215 = arith.mulf %1214, %1125 : vector<8x128xf32>
    %cst_864 = arith.constant 5.870000e-01 : f32
    %1216 = vector.broadcast %cst_864 : f32 to vector<8x128xf32>
    %1217 = arith.mulf %1216, %1157 : vector<8x128xf32>
    %1218 = arith.addf %1215, %1217 : vector<8x128xf32>
    %cst_865 = arith.constant 1.140000e-01 : f32
    %1219 = vector.broadcast %cst_865 : f32 to vector<8x128xf32>
    %1220 = arith.mulf %1219, %1189 : vector<8x128xf32>
    %1221 = arith.addf %1218, %1220 : vector<8x128xf32>
    %cst_866 = arith.constant 2.989000e-01 : f32
    %1222 = vector.broadcast %cst_866 : f32 to vector<8x128xf32>
    %1223 = arith.mulf %1222, %1133 : vector<8x128xf32>
    %cst_867 = arith.constant 5.870000e-01 : f32
    %1224 = vector.broadcast %cst_867 : f32 to vector<8x128xf32>
    %1225 = arith.mulf %1224, %1165 : vector<8x128xf32>
    %1226 = arith.addf %1223, %1225 : vector<8x128xf32>
    %cst_868 = arith.constant 1.140000e-01 : f32
    %1227 = vector.broadcast %cst_868 : f32 to vector<8x128xf32>
    %1228 = arith.mulf %1227, %1197 : vector<8x128xf32>
    %1229 = arith.addf %1226, %1228 : vector<8x128xf32>
    %cst_869 = arith.constant 2.989000e-01 : f32
    %1230 = vector.broadcast %cst_869 : f32 to vector<8x128xf32>
    %1231 = arith.mulf %1230, %1141 : vector<8x128xf32>
    %cst_870 = arith.constant 5.870000e-01 : f32
    %1232 = vector.broadcast %cst_870 : f32 to vector<8x128xf32>
    %1233 = arith.mulf %1232, %1173 : vector<8x128xf32>
    %1234 = arith.addf %1231, %1233 : vector<8x128xf32>
    %cst_871 = arith.constant 1.140000e-01 : f32
    %1235 = vector.broadcast %cst_871 : f32 to vector<8x128xf32>
    %1236 = arith.mulf %1235, %1205 : vector<8x128xf32>
    %1237 = arith.addf %1234, %1236 : vector<8x128xf32>
    %1238 = vector.shape_cast %1213 : vector<8x128xf32> to vector<1x8x128xf32>
    %cst_872 = arith.constant dense<0.000000e+00> : vector<1xf32>
    %1239 = vector.multi_reduction <add>, %1238, %cst_872 [1, 2] : vector<1x8x128xf32> to vector<1xf32>
    %1240 = vector.shape_cast %1239 : vector<1xf32> to vector<1x1x1xf32>
    %1241 = vector.extract %1240[0, 0, 0] : f32 from vector<1x1x1xf32>
    %1242 = vector.shape_cast %1221 : vector<8x128xf32> to vector<1x8x128xf32>
    %cst_873 = arith.constant dense<0.000000e+00> : vector<1xf32>
    %1243 = vector.multi_reduction <add>, %1242, %cst_873 [1, 2] : vector<1x8x128xf32> to vector<1xf32>
    %1244 = vector.shape_cast %1243 : vector<1xf32> to vector<1x1x1xf32>
    %1245 = vector.extract %1244[0, 0, 0] : f32 from vector<1x1x1xf32>
    %1246 = arith.addf %1241, %1245 : f32
    %1247 = vector.shape_cast %1229 : vector<8x128xf32> to vector<1x8x128xf32>
    %cst_874 = arith.constant dense<0.000000e+00> : vector<1xf32>
    %1248 = vector.multi_reduction <add>, %1247, %cst_874 [1, 2] : vector<1x8x128xf32> to vector<1xf32>
    %1249 = vector.shape_cast %1248 : vector<1xf32> to vector<1x1x1xf32>
    %1250 = vector.extract %1249[0, 0, 0] : f32 from vector<1x1x1xf32>
    %1251 = arith.addf %1246, %1250 : f32
    %1252 = vector.shape_cast %1237 : vector<8x128xf32> to vector<1x8x128xf32>
    %cst_875 = arith.constant dense<0.000000e+00> : vector<1xf32>
    %1253 = vector.multi_reduction <add>, %1252, %cst_875 [1, 2] : vector<1x8x128xf32> to vector<1xf32>
    %1254 = vector.shape_cast %1253 : vector<1xf32> to vector<1x1x1xf32>
    %1255 = vector.extract %1254[0, 0, 0] : f32 from vector<1x1x1xf32>
    %1256 = arith.addf %1251, %1255 : f32
    %cst_876 = arith.constant 3.906250e-03 : f32
    %1257 = arith.mulf %1256, %cst_876 : f32
    %cst_877 = arith.constant 1.000000e-01 : f32
    %1258 = arith.mulf %cst_877, %1257 : f32
    %cst_878 = arith.constant 0.899999976 : f32
    %1259 = vector.broadcast %cst_878 : f32 to vector<8x128xf32>
    %1260 = arith.mulf %1259, %1117 : vector<8x128xf32>
    %1261 = vector.broadcast %1258 : f32 to vector<8x128xf32>
    %1262 = arith.addf %1260, %1261 : vector<8x128xf32>
    %cst_879 = arith.constant 0.000000e+00 : f32
    %cst_880 = arith.constant 1.000000e+00 : f32
    %1263 = vector.broadcast %cst_879 : f32 to vector<8x128xf32>
    %1264 = arith.maximumf %1263, %1262 : vector<8x128xf32>
    %1265 = vector.broadcast %cst_880 : f32 to vector<8x128xf32>
    %1266 = arith.minimumf %1265, %1264 : vector<8x128xf32>
    %cst_881 = arith.constant 0.899999976 : f32
    %1267 = vector.broadcast %cst_881 : f32 to vector<8x128xf32>
    %1268 = arith.mulf %1267, %1125 : vector<8x128xf32>
    %1269 = vector.broadcast %1258 : f32 to vector<8x128xf32>
    %1270 = arith.addf %1268, %1269 : vector<8x128xf32>
    %cst_882 = arith.constant 0.000000e+00 : f32
    %cst_883 = arith.constant 1.000000e+00 : f32
    %1271 = vector.broadcast %cst_882 : f32 to vector<8x128xf32>
    %1272 = arith.maximumf %1271, %1270 : vector<8x128xf32>
    %1273 = vector.broadcast %cst_883 : f32 to vector<8x128xf32>
    %1274 = arith.minimumf %1273, %1272 : vector<8x128xf32>
    %cst_884 = arith.constant 0.899999976 : f32
    %1275 = vector.broadcast %cst_884 : f32 to vector<8x128xf32>
    %1276 = arith.mulf %1275, %1133 : vector<8x128xf32>
    %1277 = vector.broadcast %1258 : f32 to vector<8x128xf32>
    %1278 = arith.addf %1276, %1277 : vector<8x128xf32>
    %cst_885 = arith.constant 0.000000e+00 : f32
    %cst_886 = arith.constant 1.000000e+00 : f32
    %1279 = vector.broadcast %cst_885 : f32 to vector<8x128xf32>
    %1280 = arith.maximumf %1279, %1278 : vector<8x128xf32>
    %1281 = vector.broadcast %cst_886 : f32 to vector<8x128xf32>
    %1282 = arith.minimumf %1281, %1280 : vector<8x128xf32>
    %cst_887 = arith.constant 0.899999976 : f32
    %1283 = vector.broadcast %cst_887 : f32 to vector<8x128xf32>
    %1284 = arith.mulf %1283, %1141 : vector<8x128xf32>
    %1285 = vector.broadcast %1258 : f32 to vector<8x128xf32>
    %1286 = arith.addf %1284, %1285 : vector<8x128xf32>
    %cst_888 = arith.constant 0.000000e+00 : f32
    %cst_889 = arith.constant 1.000000e+00 : f32
    %1287 = vector.broadcast %cst_888 : f32 to vector<8x128xf32>
    %1288 = arith.maximumf %1287, %1286 : vector<8x128xf32>
    %1289 = vector.broadcast %cst_889 : f32 to vector<8x128xf32>
    %1290 = arith.minimumf %1289, %1288 : vector<8x128xf32>
    %cst_890 = arith.constant 0.899999976 : f32
    %1291 = vector.broadcast %cst_890 : f32 to vector<8x128xf32>
    %1292 = arith.mulf %1291, %1149 : vector<8x128xf32>
    %1293 = vector.broadcast %1258 : f32 to vector<8x128xf32>
    %1294 = arith.addf %1292, %1293 : vector<8x128xf32>
    %cst_891 = arith.constant 0.000000e+00 : f32
    %cst_892 = arith.constant 1.000000e+00 : f32
    %1295 = vector.broadcast %cst_891 : f32 to vector<8x128xf32>
    %1296 = arith.maximumf %1295, %1294 : vector<8x128xf32>
    %1297 = vector.broadcast %cst_892 : f32 to vector<8x128xf32>
    %1298 = arith.minimumf %1297, %1296 : vector<8x128xf32>
    %cst_893 = arith.constant 0.899999976 : f32
    %1299 = vector.broadcast %cst_893 : f32 to vector<8x128xf32>
    %1300 = arith.mulf %1299, %1157 : vector<8x128xf32>
    %1301 = vector.broadcast %1258 : f32 to vector<8x128xf32>
    %1302 = arith.addf %1300, %1301 : vector<8x128xf32>
    %cst_894 = arith.constant 0.000000e+00 : f32
    %cst_895 = arith.constant 1.000000e+00 : f32
    %1303 = vector.broadcast %cst_894 : f32 to vector<8x128xf32>
    %1304 = arith.maximumf %1303, %1302 : vector<8x128xf32>
    %1305 = vector.broadcast %cst_895 : f32 to vector<8x128xf32>
    %1306 = arith.minimumf %1305, %1304 : vector<8x128xf32>
    %cst_896 = arith.constant 0.899999976 : f32
    %1307 = vector.broadcast %cst_896 : f32 to vector<8x128xf32>
    %1308 = arith.mulf %1307, %1165 : vector<8x128xf32>
    %1309 = vector.broadcast %1258 : f32 to vector<8x128xf32>
    %1310 = arith.addf %1308, %1309 : vector<8x128xf32>
    %cst_897 = arith.constant 0.000000e+00 : f32
    %cst_898 = arith.constant 1.000000e+00 : f32
    %1311 = vector.broadcast %cst_897 : f32 to vector<8x128xf32>
    %1312 = arith.maximumf %1311, %1310 : vector<8x128xf32>
    %1313 = vector.broadcast %cst_898 : f32 to vector<8x128xf32>
    %1314 = arith.minimumf %1313, %1312 : vector<8x128xf32>
    %cst_899 = arith.constant 0.899999976 : f32
    %1315 = vector.broadcast %cst_899 : f32 to vector<8x128xf32>
    %1316 = arith.mulf %1315, %1173 : vector<8x128xf32>
    %1317 = vector.broadcast %1258 : f32 to vector<8x128xf32>
    %1318 = arith.addf %1316, %1317 : vector<8x128xf32>
    %cst_900 = arith.constant 0.000000e+00 : f32
    %cst_901 = arith.constant 1.000000e+00 : f32
    %1319 = vector.broadcast %cst_900 : f32 to vector<8x128xf32>
    %1320 = arith.maximumf %1319, %1318 : vector<8x128xf32>
    %1321 = vector.broadcast %cst_901 : f32 to vector<8x128xf32>
    %1322 = arith.minimumf %1321, %1320 : vector<8x128xf32>
    %cst_902 = arith.constant 0.899999976 : f32
    %1323 = vector.broadcast %cst_902 : f32 to vector<8x128xf32>
    %1324 = arith.mulf %1323, %1181 : vector<8x128xf32>
    %1325 = vector.broadcast %1258 : f32 to vector<8x128xf32>
    %1326 = arith.addf %1324, %1325 : vector<8x128xf32>
    %cst_903 = arith.constant 0.000000e+00 : f32
    %cst_904 = arith.constant 1.000000e+00 : f32
    %1327 = vector.broadcast %cst_903 : f32 to vector<8x128xf32>
    %1328 = arith.maximumf %1327, %1326 : vector<8x128xf32>
    %1329 = vector.broadcast %cst_904 : f32 to vector<8x128xf32>
    %1330 = arith.minimumf %1329, %1328 : vector<8x128xf32>
    %cst_905 = arith.constant 0.899999976 : f32
    %1331 = vector.broadcast %cst_905 : f32 to vector<8x128xf32>
    %1332 = arith.mulf %1331, %1189 : vector<8x128xf32>
    %1333 = vector.broadcast %1258 : f32 to vector<8x128xf32>
    %1334 = arith.addf %1332, %1333 : vector<8x128xf32>
    %cst_906 = arith.constant 0.000000e+00 : f32
    %cst_907 = arith.constant 1.000000e+00 : f32
    %1335 = vector.broadcast %cst_906 : f32 to vector<8x128xf32>
    %1336 = arith.maximumf %1335, %1334 : vector<8x128xf32>
    %1337 = vector.broadcast %cst_907 : f32 to vector<8x128xf32>
    %1338 = arith.minimumf %1337, %1336 : vector<8x128xf32>
    %cst_908 = arith.constant 0.899999976 : f32
    %1339 = vector.broadcast %cst_908 : f32 to vector<8x128xf32>
    %1340 = arith.mulf %1339, %1197 : vector<8x128xf32>
    %1341 = vector.broadcast %1258 : f32 to vector<8x128xf32>
    %1342 = arith.addf %1340, %1341 : vector<8x128xf32>
    %cst_909 = arith.constant 0.000000e+00 : f32
    %cst_910 = arith.constant 1.000000e+00 : f32
    %1343 = vector.broadcast %cst_909 : f32 to vector<8x128xf32>
    %1344 = arith.maximumf %1343, %1342 : vector<8x128xf32>
    %1345 = vector.broadcast %cst_910 : f32 to vector<8x128xf32>
    %1346 = arith.minimumf %1345, %1344 : vector<8x128xf32>
    %cst_911 = arith.constant 0.899999976 : f32
    %1347 = vector.broadcast %cst_911 : f32 to vector<8x128xf32>
    %1348 = arith.mulf %1347, %1205 : vector<8x128xf32>
    %1349 = vector.broadcast %1258 : f32 to vector<8x128xf32>
    %1350 = arith.addf %1348, %1349 : vector<8x128xf32>
    %cst_912 = arith.constant 0.000000e+00 : f32
    %cst_913 = arith.constant 1.000000e+00 : f32
    %1351 = vector.broadcast %cst_912 : f32 to vector<8x128xf32>
    %1352 = arith.maximumf %1351, %1350 : vector<8x128xf32>
    %1353 = vector.broadcast %cst_913 : f32 to vector<8x128xf32>
    %1354 = arith.minimumf %1353, %1352 : vector<8x128xf32>
    %cst_914 = arith.constant 2.989000e-01 : f32
    %1355 = vector.broadcast %cst_914 : f32 to vector<8x128xf32>
    %1356 = arith.mulf %1355, %1266 : vector<8x128xf32>
    %cst_915 = arith.constant 5.870000e-01 : f32
    %1357 = vector.broadcast %cst_915 : f32 to vector<8x128xf32>
    %1358 = arith.mulf %1357, %1298 : vector<8x128xf32>
    %1359 = arith.addf %1356, %1358 : vector<8x128xf32>
    %cst_916 = arith.constant 1.140000e-01 : f32
    %1360 = vector.broadcast %cst_916 : f32 to vector<8x128xf32>
    %1361 = arith.mulf %1360, %1330 : vector<8x128xf32>
    %1362 = arith.addf %1359, %1361 : vector<8x128xf32>
    %cst_917 = arith.constant 2.989000e-01 : f32
    %1363 = vector.broadcast %cst_917 : f32 to vector<8x128xf32>
    %1364 = arith.mulf %1363, %1274 : vector<8x128xf32>
    %cst_918 = arith.constant 5.870000e-01 : f32
    %1365 = vector.broadcast %cst_918 : f32 to vector<8x128xf32>
    %1366 = arith.mulf %1365, %1306 : vector<8x128xf32>
    %1367 = arith.addf %1364, %1366 : vector<8x128xf32>
    %cst_919 = arith.constant 1.140000e-01 : f32
    %1368 = vector.broadcast %cst_919 : f32 to vector<8x128xf32>
    %1369 = arith.mulf %1368, %1338 : vector<8x128xf32>
    %1370 = arith.addf %1367, %1369 : vector<8x128xf32>
    %cst_920 = arith.constant 2.989000e-01 : f32
    %1371 = vector.broadcast %cst_920 : f32 to vector<8x128xf32>
    %1372 = arith.mulf %1371, %1282 : vector<8x128xf32>
    %cst_921 = arith.constant 5.870000e-01 : f32
    %1373 = vector.broadcast %cst_921 : f32 to vector<8x128xf32>
    %1374 = arith.mulf %1373, %1314 : vector<8x128xf32>
    %1375 = arith.addf %1372, %1374 : vector<8x128xf32>
    %cst_922 = arith.constant 1.140000e-01 : f32
    %1376 = vector.broadcast %cst_922 : f32 to vector<8x128xf32>
    %1377 = arith.mulf %1376, %1346 : vector<8x128xf32>
    %1378 = arith.addf %1375, %1377 : vector<8x128xf32>
    %cst_923 = arith.constant 2.989000e-01 : f32
    %1379 = vector.broadcast %cst_923 : f32 to vector<8x128xf32>
    %1380 = arith.mulf %1379, %1290 : vector<8x128xf32>
    %cst_924 = arith.constant 5.870000e-01 : f32
    %1381 = vector.broadcast %cst_924 : f32 to vector<8x128xf32>
    %1382 = arith.mulf %1381, %1322 : vector<8x128xf32>
    %1383 = arith.addf %1380, %1382 : vector<8x128xf32>
    %cst_925 = arith.constant 1.140000e-01 : f32
    %1384 = vector.broadcast %cst_925 : f32 to vector<8x128xf32>
    %1385 = arith.mulf %1384, %1354 : vector<8x128xf32>
    %1386 = arith.addf %1383, %1385 : vector<8x128xf32>
    %cst_926 = arith.constant -5.000000e-02 : f32
    %1387 = vector.broadcast %cst_926 : f32 to vector<8x128xf32>
    %1388 = arith.mulf %1387, %1362 : vector<8x128xf32>
    %cst_927 = arith.constant -5.000000e-02 : f32
    %1389 = vector.broadcast %cst_927 : f32 to vector<8x128xf32>
    %1390 = arith.mulf %1389, %1370 : vector<8x128xf32>
    %cst_928 = arith.constant -5.000000e-02 : f32
    %1391 = vector.broadcast %cst_928 : f32 to vector<8x128xf32>
    %1392 = arith.mulf %1391, %1378 : vector<8x128xf32>
    %cst_929 = arith.constant -5.000000e-02 : f32
    %1393 = vector.broadcast %cst_929 : f32 to vector<8x128xf32>
    %1394 = arith.mulf %1393, %1386 : vector<8x128xf32>
    %cst_930 = arith.constant 1.050000e+00 : f32
    %1395 = vector.broadcast %cst_930 : f32 to vector<8x128xf32>
    %1396 = arith.mulf %1395, %1266 : vector<8x128xf32>
    %1397 = arith.addf %1396, %1388 : vector<8x128xf32>
    %cst_931 = arith.constant 0.000000e+00 : f32
    %cst_932 = arith.constant 1.000000e+00 : f32
    %1398 = vector.broadcast %cst_931 : f32 to vector<8x128xf32>
    %1399 = arith.maximumf %1398, %1397 : vector<8x128xf32>
    %1400 = vector.broadcast %cst_932 : f32 to vector<8x128xf32>
    %1401 = arith.minimumf %1400, %1399 : vector<8x128xf32>
    %cst_933 = arith.constant 1.050000e+00 : f32
    %1402 = vector.broadcast %cst_933 : f32 to vector<8x128xf32>
    %1403 = arith.mulf %1402, %1274 : vector<8x128xf32>
    %1404 = arith.addf %1403, %1390 : vector<8x128xf32>
    %cst_934 = arith.constant 0.000000e+00 : f32
    %cst_935 = arith.constant 1.000000e+00 : f32
    %1405 = vector.broadcast %cst_934 : f32 to vector<8x128xf32>
    %1406 = arith.maximumf %1405, %1404 : vector<8x128xf32>
    %1407 = vector.broadcast %cst_935 : f32 to vector<8x128xf32>
    %1408 = arith.minimumf %1407, %1406 : vector<8x128xf32>
    %cst_936 = arith.constant 1.050000e+00 : f32
    %1409 = vector.broadcast %cst_936 : f32 to vector<8x128xf32>
    %1410 = arith.mulf %1409, %1282 : vector<8x128xf32>
    %1411 = arith.addf %1410, %1392 : vector<8x128xf32>
    %cst_937 = arith.constant 0.000000e+00 : f32
    %cst_938 = arith.constant 1.000000e+00 : f32
    %1412 = vector.broadcast %cst_937 : f32 to vector<8x128xf32>
    %1413 = arith.maximumf %1412, %1411 : vector<8x128xf32>
    %1414 = vector.broadcast %cst_938 : f32 to vector<8x128xf32>
    %1415 = arith.minimumf %1414, %1413 : vector<8x128xf32>
    %cst_939 = arith.constant 1.050000e+00 : f32
    %1416 = vector.broadcast %cst_939 : f32 to vector<8x128xf32>
    %1417 = arith.mulf %1416, %1290 : vector<8x128xf32>
    %1418 = arith.addf %1417, %1394 : vector<8x128xf32>
    %cst_940 = arith.constant 0.000000e+00 : f32
    %cst_941 = arith.constant 1.000000e+00 : f32
    %1419 = vector.broadcast %cst_940 : f32 to vector<8x128xf32>
    %1420 = arith.maximumf %1419, %1418 : vector<8x128xf32>
    %1421 = vector.broadcast %cst_941 : f32 to vector<8x128xf32>
    %1422 = arith.minimumf %1421, %1420 : vector<8x128xf32>
    %cst_942 = arith.constant 1.050000e+00 : f32
    %1423 = vector.broadcast %cst_942 : f32 to vector<8x128xf32>
    %1424 = arith.mulf %1423, %1298 : vector<8x128xf32>
    %1425 = arith.addf %1424, %1388 : vector<8x128xf32>
    %cst_943 = arith.constant 0.000000e+00 : f32
    %cst_944 = arith.constant 1.000000e+00 : f32
    %1426 = vector.broadcast %cst_943 : f32 to vector<8x128xf32>
    %1427 = arith.maximumf %1426, %1425 : vector<8x128xf32>
    %1428 = vector.broadcast %cst_944 : f32 to vector<8x128xf32>
    %1429 = arith.minimumf %1428, %1427 : vector<8x128xf32>
    %cst_945 = arith.constant 1.050000e+00 : f32
    %1430 = vector.broadcast %cst_945 : f32 to vector<8x128xf32>
    %1431 = arith.mulf %1430, %1306 : vector<8x128xf32>
    %1432 = arith.addf %1431, %1390 : vector<8x128xf32>
    %cst_946 = arith.constant 0.000000e+00 : f32
    %cst_947 = arith.constant 1.000000e+00 : f32
    %1433 = vector.broadcast %cst_946 : f32 to vector<8x128xf32>
    %1434 = arith.maximumf %1433, %1432 : vector<8x128xf32>
    %1435 = vector.broadcast %cst_947 : f32 to vector<8x128xf32>
    %1436 = arith.minimumf %1435, %1434 : vector<8x128xf32>
    %cst_948 = arith.constant 1.050000e+00 : f32
    %1437 = vector.broadcast %cst_948 : f32 to vector<8x128xf32>
    %1438 = arith.mulf %1437, %1314 : vector<8x128xf32>
    %1439 = arith.addf %1438, %1392 : vector<8x128xf32>
    %cst_949 = arith.constant 0.000000e+00 : f32
    %cst_950 = arith.constant 1.000000e+00 : f32
    %1440 = vector.broadcast %cst_949 : f32 to vector<8x128xf32>
    %1441 = arith.maximumf %1440, %1439 : vector<8x128xf32>
    %1442 = vector.broadcast %cst_950 : f32 to vector<8x128xf32>
    %1443 = arith.minimumf %1442, %1441 : vector<8x128xf32>
    %cst_951 = arith.constant 1.050000e+00 : f32
    %1444 = vector.broadcast %cst_951 : f32 to vector<8x128xf32>
    %1445 = arith.mulf %1444, %1322 : vector<8x128xf32>
    %1446 = arith.addf %1445, %1394 : vector<8x128xf32>
    %cst_952 = arith.constant 0.000000e+00 : f32
    %cst_953 = arith.constant 1.000000e+00 : f32
    %1447 = vector.broadcast %cst_952 : f32 to vector<8x128xf32>
    %1448 = arith.maximumf %1447, %1446 : vector<8x128xf32>
    %1449 = vector.broadcast %cst_953 : f32 to vector<8x128xf32>
    %1450 = arith.minimumf %1449, %1448 : vector<8x128xf32>
    %cst_954 = arith.constant 1.050000e+00 : f32
    %1451 = vector.broadcast %cst_954 : f32 to vector<8x128xf32>
    %1452 = arith.mulf %1451, %1330 : vector<8x128xf32>
    %1453 = arith.addf %1452, %1388 : vector<8x128xf32>
    %cst_955 = arith.constant 0.000000e+00 : f32
    %cst_956 = arith.constant 1.000000e+00 : f32
    %1454 = vector.broadcast %cst_955 : f32 to vector<8x128xf32>
    %1455 = arith.maximumf %1454, %1453 : vector<8x128xf32>
    %1456 = vector.broadcast %cst_956 : f32 to vector<8x128xf32>
    %1457 = arith.minimumf %1456, %1455 : vector<8x128xf32>
    %cst_957 = arith.constant 1.050000e+00 : f32
    %1458 = vector.broadcast %cst_957 : f32 to vector<8x128xf32>
    %1459 = arith.mulf %1458, %1338 : vector<8x128xf32>
    %1460 = arith.addf %1459, %1390 : vector<8x128xf32>
    %cst_958 = arith.constant 0.000000e+00 : f32
    %cst_959 = arith.constant 1.000000e+00 : f32
    %1461 = vector.broadcast %cst_958 : f32 to vector<8x128xf32>
    %1462 = arith.maximumf %1461, %1460 : vector<8x128xf32>
    %1463 = vector.broadcast %cst_959 : f32 to vector<8x128xf32>
    %1464 = arith.minimumf %1463, %1462 : vector<8x128xf32>
    %cst_960 = arith.constant 1.050000e+00 : f32
    %1465 = vector.broadcast %cst_960 : f32 to vector<8x128xf32>
    %1466 = arith.mulf %1465, %1346 : vector<8x128xf32>
    %1467 = arith.addf %1466, %1392 : vector<8x128xf32>
    %cst_961 = arith.constant 0.000000e+00 : f32
    %cst_962 = arith.constant 1.000000e+00 : f32
    %1468 = vector.broadcast %cst_961 : f32 to vector<8x128xf32>
    %1469 = arith.maximumf %1468, %1467 : vector<8x128xf32>
    %1470 = vector.broadcast %cst_962 : f32 to vector<8x128xf32>
    %1471 = arith.minimumf %1470, %1469 : vector<8x128xf32>
    %cst_963 = arith.constant 1.050000e+00 : f32
    %1472 = vector.broadcast %cst_963 : f32 to vector<8x128xf32>
    %1473 = arith.mulf %1472, %1354 : vector<8x128xf32>
    %1474 = arith.addf %1473, %1394 : vector<8x128xf32>
    %cst_964 = arith.constant 0.000000e+00 : f32
    %cst_965 = arith.constant 1.000000e+00 : f32
    %1475 = vector.broadcast %cst_964 : f32 to vector<8x128xf32>
    %1476 = arith.maximumf %1475, %1474 : vector<8x128xf32>
    %1477 = vector.broadcast %cst_965 : f32 to vector<8x128xf32>
    %1478 = arith.minimumf %1477, %1476 : vector<8x128xf32>
    %c0_966 = arith.constant 0 : index
    %c0_967 = arith.constant 0 : index
    %c0_968 = arith.constant 0 : index
    %c0_969 = arith.constant 0 : index
    %c0_970 = arith.constant 0 : index
    %1479 = vector.load %arg1[%c0_966, %c0_967, %c0_968, %c0_969, %c0_970] : memref<1x3x4x8x128xf32, #tpu.memory_space<vmem>>, vector<1x1x1x8x128xf32>
    %1480 = vector.shape_cast %1479 : vector<1x1x1x8x128xf32> to vector<8x128xf32>
    %1481 = arith.subf %1480, %1401 : vector<8x128xf32>
    %c0_971 = arith.constant 0 : index
    %c0_972 = arith.constant 0 : index
    %c1_973 = arith.constant 1 : index
    %c0_974 = arith.constant 0 : index
    %c0_975 = arith.constant 0 : index
    %1482 = vector.load %arg1[%c0_971, %c0_972, %c1_973, %c0_974, %c0_975] : memref<1x3x4x8x128xf32, #tpu.memory_space<vmem>>, vector<1x1x1x8x128xf32>
    %1483 = vector.shape_cast %1482 : vector<1x1x1x8x128xf32> to vector<8x128xf32>
    %1484 = arith.subf %1483, %1408 : vector<8x128xf32>
    %c0_976 = arith.constant 0 : index
    %c0_977 = arith.constant 0 : index
    %c2_978 = arith.constant 2 : index
    %c0_979 = arith.constant 0 : index
    %c0_980 = arith.constant 0 : index
    %1485 = vector.load %arg1[%c0_976, %c0_977, %c2_978, %c0_979, %c0_980] : memref<1x3x4x8x128xf32, #tpu.memory_space<vmem>>, vector<1x1x1x8x128xf32>
    %1486 = vector.shape_cast %1485 : vector<1x1x1x8x128xf32> to vector<8x128xf32>
    %1487 = arith.subf %1486, %1415 : vector<8x128xf32>
    %c0_981 = arith.constant 0 : index
    %c0_982 = arith.constant 0 : index
    %c3_983 = arith.constant 3 : index
    %c0_984 = arith.constant 0 : index
    %c0_985 = arith.constant 0 : index
    %1488 = vector.load %arg1[%c0_981, %c0_982, %c3_983, %c0_984, %c0_985] : memref<1x3x4x8x128xf32, #tpu.memory_space<vmem>>, vector<1x1x1x8x128xf32>
    %1489 = vector.shape_cast %1488 : vector<1x1x1x8x128xf32> to vector<8x128xf32>
    %1490 = arith.subf %1489, %1422 : vector<8x128xf32>
    %1491 = arith.addf %1481, %1484 : vector<8x128xf32>
    %1492 = arith.subf %1481, %1484 : vector<8x128xf32>
    %1493 = arith.addf %1487, %1490 : vector<8x128xf32>
    %1494 = arith.subf %1487, %1490 : vector<8x128xf32>
    %1495 = arith.addf %1492, %1494 : vector<8x128xf32>
    %1496 = math.absf %1495 : vector<8x128xf32>
    %1497 = arith.subf %1491, %1493 : vector<8x128xf32>
    %1498 = math.absf %1497 : vector<8x128xf32>
    %1499 = arith.addf %1496, %1498 : vector<8x128xf32>
    %1500 = arith.subf %1492, %1494 : vector<8x128xf32>
    %1501 = math.absf %1500 : vector<8x128xf32>
    %1502 = arith.addf %1499, %1501 : vector<8x128xf32>
    %c0_986 = arith.constant 0 : index
    %c1_987 = arith.constant 1 : index
    %c0_988 = arith.constant 0 : index
    %c0_989 = arith.constant 0 : index
    %c0_990 = arith.constant 0 : index
    %1503 = vector.load %arg1[%c0_986, %c1_987, %c0_988, %c0_989, %c0_990] : memref<1x3x4x8x128xf32, #tpu.memory_space<vmem>>, vector<1x1x1x8x128xf32>
    %1504 = vector.shape_cast %1503 : vector<1x1x1x8x128xf32> to vector<8x128xf32>
    %1505 = arith.subf %1504, %1429 : vector<8x128xf32>
    %c0_991 = arith.constant 0 : index
    %c1_992 = arith.constant 1 : index
    %c1_993 = arith.constant 1 : index
    %c0_994 = arith.constant 0 : index
    %c0_995 = arith.constant 0 : index
    %1506 = vector.load %arg1[%c0_991, %c1_992, %c1_993, %c0_994, %c0_995] : memref<1x3x4x8x128xf32, #tpu.memory_space<vmem>>, vector<1x1x1x8x128xf32>
    %1507 = vector.shape_cast %1506 : vector<1x1x1x8x128xf32> to vector<8x128xf32>
    %1508 = arith.subf %1507, %1436 : vector<8x128xf32>
    %c0_996 = arith.constant 0 : index
    %c1_997 = arith.constant 1 : index
    %c2_998 = arith.constant 2 : index
    %c0_999 = arith.constant 0 : index
    %c0_1000 = arith.constant 0 : index
    %1509 = vector.load %arg1[%c0_996, %c1_997, %c2_998, %c0_999, %c0_1000] : memref<1x3x4x8x128xf32, #tpu.memory_space<vmem>>, vector<1x1x1x8x128xf32>
    %1510 = vector.shape_cast %1509 : vector<1x1x1x8x128xf32> to vector<8x128xf32>
    %1511 = arith.subf %1510, %1443 : vector<8x128xf32>
    %c0_1001 = arith.constant 0 : index
    %c1_1002 = arith.constant 1 : index
    %c3_1003 = arith.constant 3 : index
    %c0_1004 = arith.constant 0 : index
    %c0_1005 = arith.constant 0 : index
    %1512 = vector.load %arg1[%c0_1001, %c1_1002, %c3_1003, %c0_1004, %c0_1005] : memref<1x3x4x8x128xf32, #tpu.memory_space<vmem>>, vector<1x1x1x8x128xf32>
    %1513 = vector.shape_cast %1512 : vector<1x1x1x8x128xf32> to vector<8x128xf32>
    %1514 = arith.subf %1513, %1450 : vector<8x128xf32>
    %1515 = arith.addf %1505, %1508 : vector<8x128xf32>
    %1516 = arith.subf %1505, %1508 : vector<8x128xf32>
    %1517 = arith.addf %1511, %1514 : vector<8x128xf32>
    %1518 = arith.subf %1511, %1514 : vector<8x128xf32>
    %1519 = arith.addf %1516, %1518 : vector<8x128xf32>
    %1520 = math.absf %1519 : vector<8x128xf32>
    %1521 = arith.subf %1515, %1517 : vector<8x128xf32>
    %1522 = math.absf %1521 : vector<8x128xf32>
    %1523 = arith.addf %1520, %1522 : vector<8x128xf32>
    %1524 = arith.subf %1516, %1518 : vector<8x128xf32>
    %1525 = math.absf %1524 : vector<8x128xf32>
    %1526 = arith.addf %1523, %1525 : vector<8x128xf32>
    %1527 = arith.addf %1502, %1526 : vector<8x128xf32>
    %c0_1006 = arith.constant 0 : index
    %c2_1007 = arith.constant 2 : index
    %c0_1008 = arith.constant 0 : index
    %c0_1009 = arith.constant 0 : index
    %c0_1010 = arith.constant 0 : index
    %1528 = vector.load %arg1[%c0_1006, %c2_1007, %c0_1008, %c0_1009, %c0_1010] : memref<1x3x4x8x128xf32, #tpu.memory_space<vmem>>, vector<1x1x1x8x128xf32>
    %1529 = vector.shape_cast %1528 : vector<1x1x1x8x128xf32> to vector<8x128xf32>
    %1530 = arith.subf %1529, %1457 : vector<8x128xf32>
    %c0_1011 = arith.constant 0 : index
    %c2_1012 = arith.constant 2 : index
    %c1_1013 = arith.constant 1 : index
    %c0_1014 = arith.constant 0 : index
    %c0_1015 = arith.constant 0 : index
    %1531 = vector.load %arg1[%c0_1011, %c2_1012, %c1_1013, %c0_1014, %c0_1015] : memref<1x3x4x8x128xf32, #tpu.memory_space<vmem>>, vector<1x1x1x8x128xf32>
    %1532 = vector.shape_cast %1531 : vector<1x1x1x8x128xf32> to vector<8x128xf32>
    %1533 = arith.subf %1532, %1464 : vector<8x128xf32>
    %c0_1016 = arith.constant 0 : index
    %c2_1017 = arith.constant 2 : index
    %c2_1018 = arith.constant 2 : index
    %c0_1019 = arith.constant 0 : index
    %c0_1020 = arith.constant 0 : index
    %1534 = vector.load %arg1[%c0_1016, %c2_1017, %c2_1018, %c0_1019, %c0_1020] : memref<1x3x4x8x128xf32, #tpu.memory_space<vmem>>, vector<1x1x1x8x128xf32>
    %1535 = vector.shape_cast %1534 : vector<1x1x1x8x128xf32> to vector<8x128xf32>
    %1536 = arith.subf %1535, %1471 : vector<8x128xf32>
    %c0_1021 = arith.constant 0 : index
    %c2_1022 = arith.constant 2 : index
    %c3_1023 = arith.constant 3 : index
    %c0_1024 = arith.constant 0 : index
    %c0_1025 = arith.constant 0 : index
    %1537 = vector.load %arg1[%c0_1021, %c2_1022, %c3_1023, %c0_1024, %c0_1025] : memref<1x3x4x8x128xf32, #tpu.memory_space<vmem>>, vector<1x1x1x8x128xf32>
    %1538 = vector.shape_cast %1537 : vector<1x1x1x8x128xf32> to vector<8x128xf32>
    %1539 = arith.subf %1538, %1478 : vector<8x128xf32>
    %1540 = arith.addf %1530, %1533 : vector<8x128xf32>
    %1541 = arith.subf %1530, %1533 : vector<8x128xf32>
    %1542 = arith.addf %1536, %1539 : vector<8x128xf32>
    %1543 = arith.subf %1536, %1539 : vector<8x128xf32>
    %1544 = arith.addf %1541, %1543 : vector<8x128xf32>
    %1545 = math.absf %1544 : vector<8x128xf32>
    %1546 = arith.subf %1540, %1542 : vector<8x128xf32>
    %1547 = math.absf %1546 : vector<8x128xf32>
    %1548 = arith.addf %1545, %1547 : vector<8x128xf32>
    %1549 = arith.subf %1541, %1543 : vector<8x128xf32>
    %1550 = math.absf %1549 : vector<8x128xf32>
    %1551 = arith.addf %1548, %1550 : vector<8x128xf32>
    %1552 = arith.addf %1527, %1551 : vector<8x128xf32>
    %1553 = vector.shape_cast %1552 : vector<8x128xf32> to vector<1x8x128xf32>
    %cst_1026 = arith.constant dense<0.000000e+00> : vector<1xf32>
    %1554 = vector.multi_reduction <add>, %1553, %cst_1026 [1, 2] : vector<1x8x128xf32> to vector<1xf32>
    %1555 = vector.shape_cast %1554 : vector<1xf32> to vector<1x1x1xf32>
    %1556 = vector.extract %1555[0, 0, 0] : f32 from vector<1x1x1xf32>
    %c0_1027 = arith.constant 0 : index
    %c0_1028 = arith.constant 0 : index
    %c0_1029 = arith.constant 0 : index
    %1557 = vector.load %arg5[%c0_1027, %c0_1028, %c0_1029] : memref<2x32x8xbf16, #tpu.memory_space<vmem>>, vector<1x32x8xbf16>
    %1558 = vector.shape_cast %1557 : vector<1x32x8xbf16> to vector<32x8xbf16>
    %c0_1030 = arith.constant 0 : index
    %c0_1031 = arith.constant 0 : index
    %c0_1032 = arith.constant 0 : index
    %c0_1033 = arith.constant 0 : index
    %c0_1034 = arith.constant 0 : index
    %1559 = vector.load %arg4[%c0_1030, %c0_1031, %c0_1032, %c0_1033, %c0_1034] : memref<1x2x2x8x384xf32, #tpu.memory_space<vmem>>, vector<1x1x1x8x384xf32>
    %1560 = vector.shape_cast %1559 : vector<1x1x1x8x384xf32> to vector<8x384xf32>
    %1561 = arith.truncf %1560 : vector<8x384xf32> to vector<8x384xbf16>
    %cst_1035 = arith.constant dense<0.000000e+00> : vector<32x384xf32>
    %1562 = tpu.matmul %1558, %1561, %cst_1035 {dimension_numbers = #tpu.dot_dimension_numbers<[1], [0], [0], [1], [0, 0, 1, 1], [], []>} : vector<32x8xbf16>, vector<8x384xbf16>, vector<32x384xf32> -> vector<32x384xf32>
    %c1_1036 = arith.constant 1 : index
    %c0_1037 = arith.constant 0 : index
    %c0_1038 = arith.constant 0 : index
    %1563 = vector.load %arg5[%c1_1036, %c0_1037, %c0_1038] : memref<2x32x8xbf16, #tpu.memory_space<vmem>>, vector<1x32x8xbf16>
    %1564 = vector.shape_cast %1563 : vector<1x32x8xbf16> to vector<32x8xbf16>
    %c0_1039 = arith.constant 0 : index
    %c1_1040 = arith.constant 1 : index
    %c0_1041 = arith.constant 0 : index
    %c0_1042 = arith.constant 0 : index
    %c0_1043 = arith.constant 0 : index
    %1565 = vector.load %arg4[%c0_1039, %c1_1040, %c0_1041, %c0_1042, %c0_1043] : memref<1x2x2x8x384xf32, #tpu.memory_space<vmem>>, vector<1x1x1x8x384xf32>
    %1566 = vector.shape_cast %1565 : vector<1x1x1x8x384xf32> to vector<8x384xf32>
    %1567 = arith.truncf %1566 : vector<8x384xf32> to vector<8x384xbf16>
    %cst_1044 = arith.constant dense<0.000000e+00> : vector<32x384xf32>
    %1568 = tpu.matmul %1564, %1567, %cst_1044 {dimension_numbers = #tpu.dot_dimension_numbers<[1], [0], [0], [1], [0, 0, 1, 1], [], []>} : vector<32x8xbf16>, vector<8x384xbf16>, vector<32x384xf32> -> vector<32x384xf32>
    %1569 = arith.addf %1562, %1568 : vector<32x384xf32>
    %c0_1045 = arith.constant 0 : index
    %c0_1046 = arith.constant 0 : index
    %c0_1047 = arith.constant 0 : index
    %1570 = vector.load %arg5[%c0_1045, %c0_1046, %c0_1047] : memref<2x32x8xbf16, #tpu.memory_space<vmem>>, vector<1x32x8xbf16>
    %1571 = vector.shape_cast %1570 : vector<1x32x8xbf16> to vector<32x8xbf16>
    %c0_1048 = arith.constant 0 : index
    %c0_1049 = arith.constant 0 : index
    %c1_1050 = arith.constant 1 : index
    %c0_1051 = arith.constant 0 : index
    %c0_1052 = arith.constant 0 : index
    %1572 = vector.load %arg4[%c0_1048, %c0_1049, %c1_1050, %c0_1051, %c0_1052] : memref<1x2x2x8x384xf32, #tpu.memory_space<vmem>>, vector<1x1x1x8x384xf32>
    %1573 = vector.shape_cast %1572 : vector<1x1x1x8x384xf32> to vector<8x384xf32>
    %1574 = arith.truncf %1573 : vector<8x384xf32> to vector<8x384xbf16>
    %cst_1053 = arith.constant dense<0.000000e+00> : vector<32x384xf32>
    %1575 = tpu.matmul %1571, %1574, %cst_1053 {dimension_numbers = #tpu.dot_dimension_numbers<[1], [0], [0], [1], [0, 0, 1, 1], [], []>} : vector<32x8xbf16>, vector<8x384xbf16>, vector<32x384xf32> -> vector<32x384xf32>
    %c1_1054 = arith.constant 1 : index
    %c0_1055 = arith.constant 0 : index
    %c0_1056 = arith.constant 0 : index
    %1576 = vector.load %arg5[%c1_1054, %c0_1055, %c0_1056] : memref<2x32x8xbf16, #tpu.memory_space<vmem>>, vector<1x32x8xbf16>
    %1577 = vector.shape_cast %1576 : vector<1x32x8xbf16> to vector<32x8xbf16>
    %c0_1057 = arith.constant 0 : index
    %c1_1058 = arith.constant 1 : index
    %c1_1059 = arith.constant 1 : index
    %c0_1060 = arith.constant 0 : index
    %c0_1061 = arith.constant 0 : index
    %1578 = vector.load %arg4[%c0_1057, %c1_1058, %c1_1059, %c0_1060, %c0_1061] : memref<1x2x2x8x384xf32, #tpu.memory_space<vmem>>, vector<1x1x1x8x384xf32>
    %1579 = vector.shape_cast %1578 : vector<1x1x1x8x384xf32> to vector<8x384xf32>
    %1580 = arith.truncf %1579 : vector<8x384xf32> to vector<8x384xbf16>
    %cst_1062 = arith.constant dense<0.000000e+00> : vector<32x384xf32>
    %1581 = tpu.matmul %1577, %1580, %cst_1062 {dimension_numbers = #tpu.dot_dimension_numbers<[1], [0], [0], [1], [0, 0, 1, 1], [], []>} : vector<32x8xbf16>, vector<8x384xbf16>, vector<32x384xf32> -> vector<32x384xf32>
    %1582 = arith.addf %1575, %1581 : vector<32x384xf32>
    %1583 = vector.extract_strided_slice %1569 {offsets = [0, 0], sizes = [16, 128], strides = [1, 1]} : vector<32x384xf32> to vector<16x128xf32>
    %1584 = arith.truncf %1583 : vector<16x128xf32> to vector<16x128xbf16>
    %1585 = vector.extract_strided_slice %1582 {offsets = [0, 0], sizes = [16, 128], strides = [1, 1]} : vector<32x384xf32> to vector<16x128xf32>
    %1586 = arith.truncf %1585 : vector<16x128xf32> to vector<16x128xbf16>
    %c0_1063 = arith.constant 0 : index
    %c0_1064 = arith.constant 0 : index
    %c0_1065 = arith.constant 0 : index
    %c0_1066 = arith.constant 0 : index
    %1587 = vector.load %arg6[%c0_1063, %c0_1064, %c0_1065, %c0_1066] : memref<2x2x128x256xbf16, #tpu.memory_space<vmem>>, vector<1x1x128x256xbf16>
    %1588 = vector.shape_cast %1587 : vector<1x1x128x256xbf16> to vector<128x256xbf16>
    %cst_1067 = arith.constant dense<0.000000e+00> : vector<16x256xf32>
    %1589 = tpu.matmul %1584, %1588, %cst_1067 {dimension_numbers = #tpu.dot_dimension_numbers<[1], [0], [0], [1], [0, 0, 1, 1], [], []>} : vector<16x128xbf16>, vector<128x256xbf16>, vector<16x256xf32> -> vector<16x256xf32>
    %c0_1068 = arith.constant 0 : index
    %c1_1069 = arith.constant 1 : index
    %c0_1070 = arith.constant 0 : index
    %c0_1071 = arith.constant 0 : index
    %1590 = vector.load %arg6[%c0_1068, %c1_1069, %c0_1070, %c0_1071] : memref<2x2x128x256xbf16, #tpu.memory_space<vmem>>, vector<1x1x128x256xbf16>
    %1591 = vector.shape_cast %1590 : vector<1x1x128x256xbf16> to vector<128x256xbf16>
    %cst_1072 = arith.constant dense<0.000000e+00> : vector<16x256xf32>
    %1592 = tpu.matmul %1586, %1591, %cst_1072 {dimension_numbers = #tpu.dot_dimension_numbers<[1], [0], [0], [1], [0, 0, 1, 1], [], []>} : vector<16x128xbf16>, vector<128x256xbf16>, vector<16x256xf32> -> vector<16x256xf32>
    %1593 = arith.addf %1589, %1592 : vector<16x256xf32>
    %1594 = vector.extract_strided_slice %1593 {offsets = [0, 0], sizes = [8, 128], strides = [1, 1]} : vector<16x256xf32> to vector<8x128xf32>
    %1595 = vector.extract_strided_slice %1593 {offsets = [0, 128], sizes = [8, 128], strides = [1, 1]} : vector<16x256xf32> to vector<8x128xf32>
    %1596 = vector.extract_strided_slice %1593 {offsets = [8, 0], sizes = [8, 128], strides = [1, 1]} : vector<16x256xf32> to vector<8x128xf32>
    %1597 = vector.extract_strided_slice %1593 {offsets = [8, 128], sizes = [8, 128], strides = [1, 1]} : vector<16x256xf32> to vector<8x128xf32>
    %1598 = vector.extract_strided_slice %1569 {offsets = [0, 128], sizes = [16, 128], strides = [1, 1]} : vector<32x384xf32> to vector<16x128xf32>
    %1599 = arith.truncf %1598 : vector<16x128xf32> to vector<16x128xbf16>
    %1600 = vector.extract_strided_slice %1582 {offsets = [0, 128], sizes = [16, 128], strides = [1, 1]} : vector<32x384xf32> to vector<16x128xf32>
    %1601 = arith.truncf %1600 : vector<16x128xf32> to vector<16x128xbf16>
    %c0_1073 = arith.constant 0 : index
    %c0_1074 = arith.constant 0 : index
    %c0_1075 = arith.constant 0 : index
    %c0_1076 = arith.constant 0 : index
    %1602 = vector.load %arg6[%c0_1073, %c0_1074, %c0_1075, %c0_1076] : memref<2x2x128x256xbf16, #tpu.memory_space<vmem>>, vector<1x1x128x256xbf16>
    %1603 = vector.shape_cast %1602 : vector<1x1x128x256xbf16> to vector<128x256xbf16>
    %cst_1077 = arith.constant dense<0.000000e+00> : vector<16x256xf32>
    %1604 = tpu.matmul %1599, %1603, %cst_1077 {dimension_numbers = #tpu.dot_dimension_numbers<[1], [0], [0], [1], [0, 0, 1, 1], [], []>} : vector<16x128xbf16>, vector<128x256xbf16>, vector<16x256xf32> -> vector<16x256xf32>
    %c0_1078 = arith.constant 0 : index
    %c1_1079 = arith.constant 1 : index
    %c0_1080 = arith.constant 0 : index
    %c0_1081 = arith.constant 0 : index
    %1605 = vector.load %arg6[%c0_1078, %c1_1079, %c0_1080, %c0_1081] : memref<2x2x128x256xbf16, #tpu.memory_space<vmem>>, vector<1x1x128x256xbf16>
    %1606 = vector.shape_cast %1605 : vector<1x1x128x256xbf16> to vector<128x256xbf16>
    %cst_1082 = arith.constant dense<0.000000e+00> : vector<16x256xf32>
    %1607 = tpu.matmul %1601, %1606, %cst_1082 {dimension_numbers = #tpu.dot_dimension_numbers<[1], [0], [0], [1], [0, 0, 1, 1], [], []>} : vector<16x128xbf16>, vector<128x256xbf16>, vector<16x256xf32> -> vector<16x256xf32>
    %1608 = arith.addf %1604, %1607 : vector<16x256xf32>
    %1609 = vector.extract_strided_slice %1608 {offsets = [0, 0], sizes = [8, 128], strides = [1, 1]} : vector<16x256xf32> to vector<8x128xf32>
    %1610 = vector.extract_strided_slice %1608 {offsets = [0, 128], sizes = [8, 128], strides = [1, 1]} : vector<16x256xf32> to vector<8x128xf32>
    %1611 = vector.extract_strided_slice %1608 {offsets = [8, 0], sizes = [8, 128], strides = [1, 1]} : vector<16x256xf32> to vector<8x128xf32>
    %1612 = vector.extract_strided_slice %1608 {offsets = [8, 128], sizes = [8, 128], strides = [1, 1]} : vector<16x256xf32> to vector<8x128xf32>
    %1613 = vector.extract_strided_slice %1569 {offsets = [0, 256], sizes = [16, 128], strides = [1, 1]} : vector<32x384xf32> to vector<16x128xf32>
    %1614 = arith.truncf %1613 : vector<16x128xf32> to vector<16x128xbf16>
    %1615 = vector.extract_strided_slice %1582 {offsets = [0, 256], sizes = [16, 128], strides = [1, 1]} : vector<32x384xf32> to vector<16x128xf32>
    %1616 = arith.truncf %1615 : vector<16x128xf32> to vector<16x128xbf16>
    %c0_1083 = arith.constant 0 : index
    %c0_1084 = arith.constant 0 : index
    %c0_1085 = arith.constant 0 : index
    %c0_1086 = arith.constant 0 : index
    %1617 = vector.load %arg6[%c0_1083, %c0_1084, %c0_1085, %c0_1086] : memref<2x2x128x256xbf16, #tpu.memory_space<vmem>>, vector<1x1x128x256xbf16>
    %1618 = vector.shape_cast %1617 : vector<1x1x128x256xbf16> to vector<128x256xbf16>
    %cst_1087 = arith.constant dense<0.000000e+00> : vector<16x256xf32>
    %1619 = tpu.matmul %1614, %1618, %cst_1087 {dimension_numbers = #tpu.dot_dimension_numbers<[1], [0], [0], [1], [0, 0, 1, 1], [], []>} : vector<16x128xbf16>, vector<128x256xbf16>, vector<16x256xf32> -> vector<16x256xf32>
    %c0_1088 = arith.constant 0 : index
    %c1_1089 = arith.constant 1 : index
    %c0_1090 = arith.constant 0 : index
    %c0_1091 = arith.constant 0 : index
    %1620 = vector.load %arg6[%c0_1088, %c1_1089, %c0_1090, %c0_1091] : memref<2x2x128x256xbf16, #tpu.memory_space<vmem>>, vector<1x1x128x256xbf16>
    %1621 = vector.shape_cast %1620 : vector<1x1x128x256xbf16> to vector<128x256xbf16>
    %cst_1092 = arith.constant dense<0.000000e+00> : vector<16x256xf32>
    %1622 = tpu.matmul %1616, %1621, %cst_1092 {dimension_numbers = #tpu.dot_dimension_numbers<[1], [0], [0], [1], [0, 0, 1, 1], [], []>} : vector<16x128xbf16>, vector<128x256xbf16>, vector<16x256xf32> -> vector<16x256xf32>
    %1623 = arith.addf %1619, %1622 : vector<16x256xf32>
    %1624 = vector.extract_strided_slice %1623 {offsets = [0, 0], sizes = [8, 128], strides = [1, 1]} : vector<16x256xf32> to vector<8x128xf32>
    %1625 = vector.extract_strided_slice %1623 {offsets = [0, 128], sizes = [8, 128], strides = [1, 1]} : vector<16x256xf32> to vector<8x128xf32>
    %1626 = vector.extract_strided_slice %1623 {offsets = [8, 0], sizes = [8, 128], strides = [1, 1]} : vector<16x256xf32> to vector<8x128xf32>
    %1627 = vector.extract_strided_slice %1623 {offsets = [8, 128], sizes = [8, 128], strides = [1, 1]} : vector<16x256xf32> to vector<8x128xf32>
    %1628 = vector.extract_strided_slice %1569 {offsets = [16, 0], sizes = [16, 128], strides = [1, 1]} : vector<32x384xf32> to vector<16x128xf32>
    %1629 = arith.truncf %1628 : vector<16x128xf32> to vector<16x128xbf16>
    %1630 = vector.extract_strided_slice %1582 {offsets = [16, 0], sizes = [16, 128], strides = [1, 1]} : vector<32x384xf32> to vector<16x128xf32>
    %1631 = arith.truncf %1630 : vector<16x128xf32> to vector<16x128xbf16>
    %c1_1093 = arith.constant 1 : index
    %c0_1094 = arith.constant 0 : index
    %c0_1095 = arith.constant 0 : index
    %c0_1096 = arith.constant 0 : index
    %1632 = vector.load %arg6[%c1_1093, %c0_1094, %c0_1095, %c0_1096] : memref<2x2x128x256xbf16, #tpu.memory_space<vmem>>, vector<1x1x128x256xbf16>
    %1633 = vector.shape_cast %1632 : vector<1x1x128x256xbf16> to vector<128x256xbf16>
    %cst_1097 = arith.constant dense<0.000000e+00> : vector<16x256xf32>
    %1634 = tpu.matmul %1629, %1633, %cst_1097 {dimension_numbers = #tpu.dot_dimension_numbers<[1], [0], [0], [1], [0, 0, 1, 1], [], []>} : vector<16x128xbf16>, vector<128x256xbf16>, vector<16x256xf32> -> vector<16x256xf32>
    %c1_1098 = arith.constant 1 : index
    %c1_1099 = arith.constant 1 : index
    %c0_1100 = arith.constant 0 : index
    %c0_1101 = arith.constant 0 : index
    %1635 = vector.load %arg6[%c1_1098, %c1_1099, %c0_1100, %c0_1101] : memref<2x2x128x256xbf16, #tpu.memory_space<vmem>>, vector<1x1x128x256xbf16>
    %1636 = vector.shape_cast %1635 : vector<1x1x128x256xbf16> to vector<128x256xbf16>
    %cst_1102 = arith.constant dense<0.000000e+00> : vector<16x256xf32>
    %1637 = tpu.matmul %1631, %1636, %cst_1102 {dimension_numbers = #tpu.dot_dimension_numbers<[1], [0], [0], [1], [0, 0, 1, 1], [], []>} : vector<16x128xbf16>, vector<128x256xbf16>, vector<16x256xf32> -> vector<16x256xf32>
    %1638 = arith.addf %1634, %1637 : vector<16x256xf32>
    %1639 = vector.extract_strided_slice %1638 {offsets = [0, 0], sizes = [8, 128], strides = [1, 1]} : vector<16x256xf32> to vector<8x128xf32>
    %1640 = vector.extract_strided_slice %1638 {offsets = [0, 128], sizes = [8, 128], strides = [1, 1]} : vector<16x256xf32> to vector<8x128xf32>
    %1641 = vector.extract_strided_slice %1638 {offsets = [8, 0], sizes = [8, 128], strides = [1, 1]} : vector<16x256xf32> to vector<8x128xf32>
    %1642 = vector.extract_strided_slice %1638 {offsets = [8, 128], sizes = [8, 128], strides = [1, 1]} : vector<16x256xf32> to vector<8x128xf32>
    %1643 = vector.extract_strided_slice %1569 {offsets = [16, 128], sizes = [16, 128], strides = [1, 1]} : vector<32x384xf32> to vector<16x128xf32>
    %1644 = arith.truncf %1643 : vector<16x128xf32> to vector<16x128xbf16>
    %1645 = vector.extract_strided_slice %1582 {offsets = [16, 128], sizes = [16, 128], strides = [1, 1]} : vector<32x384xf32> to vector<16x128xf32>
    %1646 = arith.truncf %1645 : vector<16x128xf32> to vector<16x128xbf16>
    %c1_1103 = arith.constant 1 : index
    %c0_1104 = arith.constant 0 : index
    %c0_1105 = arith.constant 0 : index
    %c0_1106 = arith.constant 0 : index
    %1647 = vector.load %arg6[%c1_1103, %c0_1104, %c0_1105, %c0_1106] : memref<2x2x128x256xbf16, #tpu.memory_space<vmem>>, vector<1x1x128x256xbf16>
    %1648 = vector.shape_cast %1647 : vector<1x1x128x256xbf16> to vector<128x256xbf16>
    %cst_1107 = arith.constant dense<0.000000e+00> : vector<16x256xf32>
    %1649 = tpu.matmul %1644, %1648, %cst_1107 {dimension_numbers = #tpu.dot_dimension_numbers<[1], [0], [0], [1], [0, 0, 1, 1], [], []>} : vector<16x128xbf16>, vector<128x256xbf16>, vector<16x256xf32> -> vector<16x256xf32>
    %c1_1108 = arith.constant 1 : index
    %c1_1109 = arith.constant 1 : index
    %c0_1110 = arith.constant 0 : index
    %c0_1111 = arith.constant 0 : index
    %1650 = vector.load %arg6[%c1_1108, %c1_1109, %c0_1110, %c0_1111] : memref<2x2x128x256xbf16, #tpu.memory_space<vmem>>, vector<1x1x128x256xbf16>
    %1651 = vector.shape_cast %1650 : vector<1x1x128x256xbf16> to vector<128x256xbf16>
    %cst_1112 = arith.constant dense<0.000000e+00> : vector<16x256xf32>
    %1652 = tpu.matmul %1646, %1651, %cst_1112 {dimension_numbers = #tpu.dot_dimension_numbers<[1], [0], [0], [1], [0, 0, 1, 1], [], []>} : vector<16x128xbf16>, vector<128x256xbf16>, vector<16x256xf32> -> vector<16x256xf32>
    %1653 = arith.addf %1649, %1652 : vector<16x256xf32>
    %1654 = vector.extract_strided_slice %1653 {offsets = [0, 0], sizes = [8, 128], strides = [1, 1]} : vector<16x256xf32> to vector<8x128xf32>
    %1655 = vector.extract_strided_slice %1653 {offsets = [0, 128], sizes = [8, 128], strides = [1, 1]} : vector<16x256xf32> to vector<8x128xf32>
    %1656 = vector.extract_strided_slice %1653 {offsets = [8, 0], sizes = [8, 128], strides = [1, 1]} : vector<16x256xf32> to vector<8x128xf32>
    %1657 = vector.extract_strided_slice %1653 {offsets = [8, 128], sizes = [8, 128], strides = [1, 1]} : vector<16x256xf32> to vector<8x128xf32>
    %1658 = vector.extract_strided_slice %1569 {offsets = [16, 256], sizes = [16, 128], strides = [1, 1]} : vector<32x384xf32> to vector<16x128xf32>
    %1659 = arith.truncf %1658 : vector<16x128xf32> to vector<16x128xbf16>
    %1660 = vector.extract_strided_slice %1582 {offsets = [16, 256], sizes = [16, 128], strides = [1, 1]} : vector<32x384xf32> to vector<16x128xf32>
    %1661 = arith.truncf %1660 : vector<16x128xf32> to vector<16x128xbf16>
    %c1_1113 = arith.constant 1 : index
    %c0_1114 = arith.constant 0 : index
    %c0_1115 = arith.constant 0 : index
    %c0_1116 = arith.constant 0 : index
    %1662 = vector.load %arg6[%c1_1113, %c0_1114, %c0_1115, %c0_1116] : memref<2x2x128x256xbf16, #tpu.memory_space<vmem>>, vector<1x1x128x256xbf16>
    %1663 = vector.shape_cast %1662 : vector<1x1x128x256xbf16> to vector<128x256xbf16>
    %cst_1117 = arith.constant dense<0.000000e+00> : vector<16x256xf32>
    %1664 = tpu.matmul %1659, %1663, %cst_1117 {dimension_numbers = #tpu.dot_dimension_numbers<[1], [0], [0], [1], [0, 0, 1, 1], [], []>} : vector<16x128xbf16>, vector<128x256xbf16>, vector<16x256xf32> -> vector<16x256xf32>
    %c1_1118 = arith.constant 1 : index
    %c1_1119 = arith.constant 1 : index
    %c0_1120 = arith.constant 0 : index
    %c0_1121 = arith.constant 0 : index
    %1665 = vector.load %arg6[%c1_1118, %c1_1119, %c0_1120, %c0_1121] : memref<2x2x128x256xbf16, #tpu.memory_space<vmem>>, vector<1x1x128x256xbf16>
    %1666 = vector.shape_cast %1665 : vector<1x1x128x256xbf16> to vector<128x256xbf16>
    %cst_1122 = arith.constant dense<0.000000e+00> : vector<16x256xf32>
    %1667 = tpu.matmul %1661, %1666, %cst_1122 {dimension_numbers = #tpu.dot_dimension_numbers<[1], [0], [0], [1], [0, 0, 1, 1], [], []>} : vector<16x128xbf16>, vector<128x256xbf16>, vector<16x256xf32> -> vector<16x256xf32>
    %1668 = arith.addf %1664, %1667 : vector<16x256xf32>
    %1669 = vector.extract_strided_slice %1668 {offsets = [0, 0], sizes = [8, 128], strides = [1, 1]} : vector<16x256xf32> to vector<8x128xf32>
    %1670 = vector.extract_strided_slice %1668 {offsets = [0, 128], sizes = [8, 128], strides = [1, 1]} : vector<16x256xf32> to vector<8x128xf32>
    %1671 = vector.extract_strided_slice %1668 {offsets = [8, 0], sizes = [8, 128], strides = [1, 1]} : vector<16x256xf32> to vector<8x128xf32>
    %1672 = vector.extract_strided_slice %1668 {offsets = [8, 128], sizes = [8, 128], strides = [1, 1]} : vector<16x256xf32> to vector<8x128xf32>
    %1673 = arith.subf %1639, %1594 : vector<8x128xf32>
    %1674 = arith.subf %1640, %1595 : vector<8x128xf32>
    %1675 = arith.subf %1641, %1596 : vector<8x128xf32>
    %1676 = arith.subf %1642, %1597 : vector<8x128xf32>
    %1677 = arith.addf %1673, %1674 : vector<8x128xf32>
    %1678 = arith.subf %1673, %1674 : vector<8x128xf32>
    %1679 = arith.addf %1675, %1676 : vector<8x128xf32>
    %1680 = arith.subf %1675, %1676 : vector<8x128xf32>
    %1681 = arith.addf %1678, %1680 : vector<8x128xf32>
    %1682 = math.absf %1681 : vector<8x128xf32>
    %1683 = arith.subf %1677, %1679 : vector<8x128xf32>
    %1684 = math.absf %1683 : vector<8x128xf32>
    %1685 = arith.addf %1682, %1684 : vector<8x128xf32>
    %1686 = arith.subf %1678, %1680 : vector<8x128xf32>
    %1687 = math.absf %1686 : vector<8x128xf32>
    %1688 = arith.addf %1685, %1687 : vector<8x128xf32>
    %1689 = arith.subf %1654, %1609 : vector<8x128xf32>
    %1690 = arith.subf %1655, %1610 : vector<8x128xf32>
    %1691 = arith.subf %1656, %1611 : vector<8x128xf32>
    %1692 = arith.subf %1657, %1612 : vector<8x128xf32>
    %1693 = arith.addf %1689, %1690 : vector<8x128xf32>
    %1694 = arith.subf %1689, %1690 : vector<8x128xf32>
    %1695 = arith.addf %1691, %1692 : vector<8x128xf32>
    %1696 = arith.subf %1691, %1692 : vector<8x128xf32>
    %1697 = arith.addf %1694, %1696 : vector<8x128xf32>
    %1698 = math.absf %1697 : vector<8x128xf32>
    %1699 = arith.subf %1693, %1695 : vector<8x128xf32>
    %1700 = math.absf %1699 : vector<8x128xf32>
    %1701 = arith.addf %1698, %1700 : vector<8x128xf32>
    %1702 = arith.subf %1694, %1696 : vector<8x128xf32>
    %1703 = math.absf %1702 : vector<8x128xf32>
    %1704 = arith.addf %1701, %1703 : vector<8x128xf32>
    %1705 = arith.addf %1688, %1704 : vector<8x128xf32>
    %1706 = arith.subf %1669, %1624 : vector<8x128xf32>
    %1707 = arith.subf %1670, %1625 : vector<8x128xf32>
    %1708 = arith.subf %1671, %1626 : vector<8x128xf32>
    %1709 = arith.subf %1672, %1627 : vector<8x128xf32>
    %1710 = arith.addf %1706, %1707 : vector<8x128xf32>
    %1711 = arith.subf %1706, %1707 : vector<8x128xf32>
    %1712 = arith.addf %1708, %1709 : vector<8x128xf32>
    %1713 = arith.subf %1708, %1709 : vector<8x128xf32>
    %1714 = arith.addf %1711, %1713 : vector<8x128xf32>
    %1715 = math.absf %1714 : vector<8x128xf32>
    %1716 = arith.subf %1710, %1712 : vector<8x128xf32>
    %1717 = math.absf %1716 : vector<8x128xf32>
    %1718 = arith.addf %1715, %1717 : vector<8x128xf32>
    %1719 = arith.subf %1711, %1713 : vector<8x128xf32>
    %1720 = math.absf %1719 : vector<8x128xf32>
    %1721 = arith.addf %1718, %1720 : vector<8x128xf32>
    %1722 = arith.addf %1705, %1721 : vector<8x128xf32>
    %1723 = vector.shape_cast %1722 : vector<8x128xf32> to vector<1x8x128xf32>
    %cst_1123 = arith.constant dense<0.000000e+00> : vector<1xf32>
    %1724 = vector.multi_reduction <add>, %1723, %cst_1123 [1, 2] : vector<1x8x128xf32> to vector<1xf32>
    %1725 = vector.shape_cast %1724 : vector<1xf32> to vector<1x1x1xf32>
    %1726 = vector.extract %1725[0, 0, 0] : f32 from vector<1x1x1xf32>
    %cst_1124 = arith.constant 1.050000e+00 : f32
    %1727 = vector.broadcast %cst_1124 : f32 to vector<8x128xf32>
    %1728 = arith.mulf %1594, %1727 : vector<8x128xf32>
    %cst_1125 = arith.constant 0.000000e+00 : f32
    %cst_1126 = arith.constant 1.000000e+00 : f32
    %1729 = vector.broadcast %cst_1125 : f32 to vector<8x128xf32>
    %1730 = arith.maximumf %1729, %1728 : vector<8x128xf32>
    %1731 = vector.broadcast %cst_1126 : f32 to vector<8x128xf32>
    %1732 = arith.minimumf %1731, %1730 : vector<8x128xf32>
    %cst_1127 = arith.constant 1.050000e+00 : f32
    %1733 = vector.broadcast %cst_1127 : f32 to vector<8x128xf32>
    %1734 = arith.mulf %1595, %1733 : vector<8x128xf32>
    %cst_1128 = arith.constant 0.000000e+00 : f32
    %cst_1129 = arith.constant 1.000000e+00 : f32
    %1735 = vector.broadcast %cst_1128 : f32 to vector<8x128xf32>
    %1736 = arith.maximumf %1735, %1734 : vector<8x128xf32>
    %1737 = vector.broadcast %cst_1129 : f32 to vector<8x128xf32>
    %1738 = arith.minimumf %1737, %1736 : vector<8x128xf32>
    %cst_1130 = arith.constant 1.050000e+00 : f32
    %1739 = vector.broadcast %cst_1130 : f32 to vector<8x128xf32>
    %1740 = arith.mulf %1596, %1739 : vector<8x128xf32>
    %cst_1131 = arith.constant 0.000000e+00 : f32
    %cst_1132 = arith.constant 1.000000e+00 : f32
    %1741 = vector.broadcast %cst_1131 : f32 to vector<8x128xf32>
    %1742 = arith.maximumf %1741, %1740 : vector<8x128xf32>
    %1743 = vector.broadcast %cst_1132 : f32 to vector<8x128xf32>
    %1744 = arith.minimumf %1743, %1742 : vector<8x128xf32>
    %cst_1133 = arith.constant 1.050000e+00 : f32
    %1745 = vector.broadcast %cst_1133 : f32 to vector<8x128xf32>
    %1746 = arith.mulf %1597, %1745 : vector<8x128xf32>
    %cst_1134 = arith.constant 0.000000e+00 : f32
    %cst_1135 = arith.constant 1.000000e+00 : f32
    %1747 = vector.broadcast %cst_1134 : f32 to vector<8x128xf32>
    %1748 = arith.maximumf %1747, %1746 : vector<8x128xf32>
    %1749 = vector.broadcast %cst_1135 : f32 to vector<8x128xf32>
    %1750 = arith.minimumf %1749, %1748 : vector<8x128xf32>
    %cst_1136 = arith.constant 1.050000e+00 : f32
    %1751 = vector.broadcast %cst_1136 : f32 to vector<8x128xf32>
    %1752 = arith.mulf %1609, %1751 : vector<8x128xf32>
    %cst_1137 = arith.constant 0.000000e+00 : f32
    %cst_1138 = arith.constant 1.000000e+00 : f32
    %1753 = vector.broadcast %cst_1137 : f32 to vector<8x128xf32>
    %1754 = arith.maximumf %1753, %1752 : vector<8x128xf32>
    %1755 = vector.broadcast %cst_1138 : f32 to vector<8x128xf32>
    %1756 = arith.minimumf %1755, %1754 : vector<8x128xf32>
    %cst_1139 = arith.constant 1.050000e+00 : f32
    %1757 = vector.broadcast %cst_1139 : f32 to vector<8x128xf32>
    %1758 = arith.mulf %1610, %1757 : vector<8x128xf32>
    %cst_1140 = arith.constant 0.000000e+00 : f32
    %cst_1141 = arith.constant 1.000000e+00 : f32
    %1759 = vector.broadcast %cst_1140 : f32 to vector<8x128xf32>
    %1760 = arith.maximumf %1759, %1758 : vector<8x128xf32>
    %1761 = vector.broadcast %cst_1141 : f32 to vector<8x128xf32>
    %1762 = arith.minimumf %1761, %1760 : vector<8x128xf32>
    %cst_1142 = arith.constant 1.050000e+00 : f32
    %1763 = vector.broadcast %cst_1142 : f32 to vector<8x128xf32>
    %1764 = arith.mulf %1611, %1763 : vector<8x128xf32>
    %cst_1143 = arith.constant 0.000000e+00 : f32
    %cst_1144 = arith.constant 1.000000e+00 : f32
    %1765 = vector.broadcast %cst_1143 : f32 to vector<8x128xf32>
    %1766 = arith.maximumf %1765, %1764 : vector<8x128xf32>
    %1767 = vector.broadcast %cst_1144 : f32 to vector<8x128xf32>
    %1768 = arith.minimumf %1767, %1766 : vector<8x128xf32>
    %cst_1145 = arith.constant 1.050000e+00 : f32
    %1769 = vector.broadcast %cst_1145 : f32 to vector<8x128xf32>
    %1770 = arith.mulf %1612, %1769 : vector<8x128xf32>
    %cst_1146 = arith.constant 0.000000e+00 : f32
    %cst_1147 = arith.constant 1.000000e+00 : f32
    %1771 = vector.broadcast %cst_1146 : f32 to vector<8x128xf32>
    %1772 = arith.maximumf %1771, %1770 : vector<8x128xf32>
    %1773 = vector.broadcast %cst_1147 : f32 to vector<8x128xf32>
    %1774 = arith.minimumf %1773, %1772 : vector<8x128xf32>
    %cst_1148 = arith.constant 1.050000e+00 : f32
    %1775 = vector.broadcast %cst_1148 : f32 to vector<8x128xf32>
    %1776 = arith.mulf %1624, %1775 : vector<8x128xf32>
    %cst_1149 = arith.constant 0.000000e+00 : f32
    %cst_1150 = arith.constant 1.000000e+00 : f32
    %1777 = vector.broadcast %cst_1149 : f32 to vector<8x128xf32>
    %1778 = arith.maximumf %1777, %1776 : vector<8x128xf32>
    %1779 = vector.broadcast %cst_1150 : f32 to vector<8x128xf32>
    %1780 = arith.minimumf %1779, %1778 : vector<8x128xf32>
    %cst_1151 = arith.constant 1.050000e+00 : f32
    %1781 = vector.broadcast %cst_1151 : f32 to vector<8x128xf32>
    %1782 = arith.mulf %1625, %1781 : vector<8x128xf32>
    %cst_1152 = arith.constant 0.000000e+00 : f32
    %cst_1153 = arith.constant 1.000000e+00 : f32
    %1783 = vector.broadcast %cst_1152 : f32 to vector<8x128xf32>
    %1784 = arith.maximumf %1783, %1782 : vector<8x128xf32>
    %1785 = vector.broadcast %cst_1153 : f32 to vector<8x128xf32>
    %1786 = arith.minimumf %1785, %1784 : vector<8x128xf32>
    %cst_1154 = arith.constant 1.050000e+00 : f32
    %1787 = vector.broadcast %cst_1154 : f32 to vector<8x128xf32>
    %1788 = arith.mulf %1626, %1787 : vector<8x128xf32>
    %cst_1155 = arith.constant 0.000000e+00 : f32
    %cst_1156 = arith.constant 1.000000e+00 : f32
    %1789 = vector.broadcast %cst_1155 : f32 to vector<8x128xf32>
    %1790 = arith.maximumf %1789, %1788 : vector<8x128xf32>
    %1791 = vector.broadcast %cst_1156 : f32 to vector<8x128xf32>
    %1792 = arith.minimumf %1791, %1790 : vector<8x128xf32>
    %cst_1157 = arith.constant 1.050000e+00 : f32
    %1793 = vector.broadcast %cst_1157 : f32 to vector<8x128xf32>
    %1794 = arith.mulf %1627, %1793 : vector<8x128xf32>
    %cst_1158 = arith.constant 0.000000e+00 : f32
    %cst_1159 = arith.constant 1.000000e+00 : f32
    %1795 = vector.broadcast %cst_1158 : f32 to vector<8x128xf32>
    %1796 = arith.maximumf %1795, %1794 : vector<8x128xf32>
    %1797 = vector.broadcast %cst_1159 : f32 to vector<8x128xf32>
    %1798 = arith.minimumf %1797, %1796 : vector<8x128xf32>
    %cst_1160 = arith.constant 2.989000e-01 : f32
    %1799 = vector.broadcast %cst_1160 : f32 to vector<8x128xf32>
    %1800 = arith.mulf %1799, %1732 : vector<8x128xf32>
    %cst_1161 = arith.constant 5.870000e-01 : f32
    %1801 = vector.broadcast %cst_1161 : f32 to vector<8x128xf32>
    %1802 = arith.mulf %1801, %1756 : vector<8x128xf32>
    %1803 = arith.addf %1800, %1802 : vector<8x128xf32>
    %cst_1162 = arith.constant 1.140000e-01 : f32
    %1804 = vector.broadcast %cst_1162 : f32 to vector<8x128xf32>
    %1805 = arith.mulf %1804, %1780 : vector<8x128xf32>
    %1806 = arith.addf %1803, %1805 : vector<8x128xf32>
    %cst_1163 = arith.constant 2.989000e-01 : f32
    %1807 = vector.broadcast %cst_1163 : f32 to vector<8x128xf32>
    %1808 = arith.mulf %1807, %1738 : vector<8x128xf32>
    %cst_1164 = arith.constant 5.870000e-01 : f32
    %1809 = vector.broadcast %cst_1164 : f32 to vector<8x128xf32>
    %1810 = arith.mulf %1809, %1762 : vector<8x128xf32>
    %1811 = arith.addf %1808, %1810 : vector<8x128xf32>
    %cst_1165 = arith.constant 1.140000e-01 : f32
    %1812 = vector.broadcast %cst_1165 : f32 to vector<8x128xf32>
    %1813 = arith.mulf %1812, %1786 : vector<8x128xf32>
    %1814 = arith.addf %1811, %1813 : vector<8x128xf32>
    %cst_1166 = arith.constant 2.989000e-01 : f32
    %1815 = vector.broadcast %cst_1166 : f32 to vector<8x128xf32>
    %1816 = arith.mulf %1815, %1744 : vector<8x128xf32>
    %cst_1167 = arith.constant 5.870000e-01 : f32
    %1817 = vector.broadcast %cst_1167 : f32 to vector<8x128xf32>
    %1818 = arith.mulf %1817, %1768 : vector<8x128xf32>
    %1819 = arith.addf %1816, %1818 : vector<8x128xf32>
    %cst_1168 = arith.constant 1.140000e-01 : f32
    %1820 = vector.broadcast %cst_1168 : f32 to vector<8x128xf32>
    %1821 = arith.mulf %1820, %1792 : vector<8x128xf32>
    %1822 = arith.addf %1819, %1821 : vector<8x128xf32>
    %cst_1169 = arith.constant 2.989000e-01 : f32
    %1823 = vector.broadcast %cst_1169 : f32 to vector<8x128xf32>
    %1824 = arith.mulf %1823, %1750 : vector<8x128xf32>
    %cst_1170 = arith.constant 5.870000e-01 : f32
    %1825 = vector.broadcast %cst_1170 : f32 to vector<8x128xf32>
    %1826 = arith.mulf %1825, %1774 : vector<8x128xf32>
    %1827 = arith.addf %1824, %1826 : vector<8x128xf32>
    %cst_1171 = arith.constant 1.140000e-01 : f32
    %1828 = vector.broadcast %cst_1171 : f32 to vector<8x128xf32>
    %1829 = arith.mulf %1828, %1798 : vector<8x128xf32>
    %1830 = arith.addf %1827, %1829 : vector<8x128xf32>
    %1831 = vector.shape_cast %1806 : vector<8x128xf32> to vector<1x8x128xf32>
    %cst_1172 = arith.constant dense<0.000000e+00> : vector<1xf32>
    %1832 = vector.multi_reduction <add>, %1831, %cst_1172 [1, 2] : vector<1x8x128xf32> to vector<1xf32>
    %1833 = vector.shape_cast %1832 : vector<1xf32> to vector<1x1x1xf32>
    %1834 = vector.extract %1833[0, 0, 0] : f32 from vector<1x1x1xf32>
    %1835 = vector.shape_cast %1814 : vector<8x128xf32> to vector<1x8x128xf32>
    %cst_1173 = arith.constant dense<0.000000e+00> : vector<1xf32>
    %1836 = vector.multi_reduction <add>, %1835, %cst_1173 [1, 2] : vector<1x8x128xf32> to vector<1xf32>
    %1837 = vector.shape_cast %1836 : vector<1xf32> to vector<1x1x1xf32>
    %1838 = vector.extract %1837[0, 0, 0] : f32 from vector<1x1x1xf32>
    %1839 = arith.addf %1834, %1838 : f32
    %1840 = vector.shape_cast %1822 : vector<8x128xf32> to vector<1x8x128xf32>
    %cst_1174 = arith.constant dense<0.000000e+00> : vector<1xf32>
    %1841 = vector.multi_reduction <add>, %1840, %cst_1174 [1, 2] : vector<1x8x128xf32> to vector<1xf32>
    %1842 = vector.shape_cast %1841 : vector<1xf32> to vector<1x1x1xf32>
    %1843 = vector.extract %1842[0, 0, 0] : f32 from vector<1x1x1xf32>
    %1844 = arith.addf %1839, %1843 : f32
    %1845 = vector.shape_cast %1830 : vector<8x128xf32> to vector<1x8x128xf32>
    %cst_1175 = arith.constant dense<0.000000e+00> : vector<1xf32>
    %1846 = vector.multi_reduction <add>, %1845, %cst_1175 [1, 2] : vector<1x8x128xf32> to vector<1xf32>
    %1847 = vector.shape_cast %1846 : vector<1xf32> to vector<1x1x1xf32>
    %1848 = vector.extract %1847[0, 0, 0] : f32 from vector<1x1x1xf32>
    %1849 = arith.addf %1844, %1848 : f32
    %cst_1176 = arith.constant 3.906250e-03 : f32
    %1850 = arith.mulf %1849, %cst_1176 : f32
    %cst_1177 = arith.constant 5.000000e-02 : f32
    %1851 = arith.mulf %cst_1177, %1850 : f32
    %cst_1178 = arith.constant 0.949999988 : f32
    %1852 = vector.broadcast %cst_1178 : f32 to vector<8x128xf32>
    %1853 = arith.mulf %1852, %1732 : vector<8x128xf32>
    %1854 = vector.broadcast %1851 : f32 to vector<8x128xf32>
    %1855 = arith.addf %1853, %1854 : vector<8x128xf32>
    %cst_1179 = arith.constant 0.000000e+00 : f32
    %cst_1180 = arith.constant 1.000000e+00 : f32
    %1856 = vector.broadcast %cst_1179 : f32 to vector<8x128xf32>
    %1857 = arith.maximumf %1856, %1855 : vector<8x128xf32>
    %1858 = vector.broadcast %cst_1180 : f32 to vector<8x128xf32>
    %1859 = arith.minimumf %1858, %1857 : vector<8x128xf32>
    %cst_1181 = arith.constant 0.949999988 : f32
    %1860 = vector.broadcast %cst_1181 : f32 to vector<8x128xf32>
    %1861 = arith.mulf %1860, %1738 : vector<8x128xf32>
    %1862 = vector.broadcast %1851 : f32 to vector<8x128xf32>
    %1863 = arith.addf %1861, %1862 : vector<8x128xf32>
    %cst_1182 = arith.constant 0.000000e+00 : f32
    %cst_1183 = arith.constant 1.000000e+00 : f32
    %1864 = vector.broadcast %cst_1182 : f32 to vector<8x128xf32>
    %1865 = arith.maximumf %1864, %1863 : vector<8x128xf32>
    %1866 = vector.broadcast %cst_1183 : f32 to vector<8x128xf32>
    %1867 = arith.minimumf %1866, %1865 : vector<8x128xf32>
    %cst_1184 = arith.constant 0.949999988 : f32
    %1868 = vector.broadcast %cst_1184 : f32 to vector<8x128xf32>
    %1869 = arith.mulf %1868, %1744 : vector<8x128xf32>
    %1870 = vector.broadcast %1851 : f32 to vector<8x128xf32>
    %1871 = arith.addf %1869, %1870 : vector<8x128xf32>
    %cst_1185 = arith.constant 0.000000e+00 : f32
    %cst_1186 = arith.constant 1.000000e+00 : f32
    %1872 = vector.broadcast %cst_1185 : f32 to vector<8x128xf32>
    %1873 = arith.maximumf %1872, %1871 : vector<8x128xf32>
    %1874 = vector.broadcast %cst_1186 : f32 to vector<8x128xf32>
    %1875 = arith.minimumf %1874, %1873 : vector<8x128xf32>
    %cst_1187 = arith.constant 0.949999988 : f32
    %1876 = vector.broadcast %cst_1187 : f32 to vector<8x128xf32>
    %1877 = arith.mulf %1876, %1750 : vector<8x128xf32>
    %1878 = vector.broadcast %1851 : f32 to vector<8x128xf32>
    %1879 = arith.addf %1877, %1878 : vector<8x128xf32>
    %cst_1188 = arith.constant 0.000000e+00 : f32
    %cst_1189 = arith.constant 1.000000e+00 : f32
    %1880 = vector.broadcast %cst_1188 : f32 to vector<8x128xf32>
    %1881 = arith.maximumf %1880, %1879 : vector<8x128xf32>
    %1882 = vector.broadcast %cst_1189 : f32 to vector<8x128xf32>
    %1883 = arith.minimumf %1882, %1881 : vector<8x128xf32>
    %cst_1190 = arith.constant 0.949999988 : f32
    %1884 = vector.broadcast %cst_1190 : f32 to vector<8x128xf32>
    %1885 = arith.mulf %1884, %1756 : vector<8x128xf32>
    %1886 = vector.broadcast %1851 : f32 to vector<8x128xf32>
    %1887 = arith.addf %1885, %1886 : vector<8x128xf32>
    %cst_1191 = arith.constant 0.000000e+00 : f32
    %cst_1192 = arith.constant 1.000000e+00 : f32
    %1888 = vector.broadcast %cst_1191 : f32 to vector<8x128xf32>
    %1889 = arith.maximumf %1888, %1887 : vector<8x128xf32>
    %1890 = vector.broadcast %cst_1192 : f32 to vector<8x128xf32>
    %1891 = arith.minimumf %1890, %1889 : vector<8x128xf32>
    %cst_1193 = arith.constant 0.949999988 : f32
    %1892 = vector.broadcast %cst_1193 : f32 to vector<8x128xf32>
    %1893 = arith.mulf %1892, %1762 : vector<8x128xf32>
    %1894 = vector.broadcast %1851 : f32 to vector<8x128xf32>
    %1895 = arith.addf %1893, %1894 : vector<8x128xf32>
    %cst_1194 = arith.constant 0.000000e+00 : f32
    %cst_1195 = arith.constant 1.000000e+00 : f32
    %1896 = vector.broadcast %cst_1194 : f32 to vector<8x128xf32>
    %1897 = arith.maximumf %1896, %1895 : vector<8x128xf32>
    %1898 = vector.broadcast %cst_1195 : f32 to vector<8x128xf32>
    %1899 = arith.minimumf %1898, %1897 : vector<8x128xf32>
    %cst_1196 = arith.constant 0.949999988 : f32
    %1900 = vector.broadcast %cst_1196 : f32 to vector<8x128xf32>
    %1901 = arith.mulf %1900, %1768 : vector<8x128xf32>
    %1902 = vector.broadcast %1851 : f32 to vector<8x128xf32>
    %1903 = arith.addf %1901, %1902 : vector<8x128xf32>
    %cst_1197 = arith.constant 0.000000e+00 : f32
    %cst_1198 = arith.constant 1.000000e+00 : f32
    %1904 = vector.broadcast %cst_1197 : f32 to vector<8x128xf32>
    %1905 = arith.maximumf %1904, %1903 : vector<8x128xf32>
    %1906 = vector.broadcast %cst_1198 : f32 to vector<8x128xf32>
    %1907 = arith.minimumf %1906, %1905 : vector<8x128xf32>
    %cst_1199 = arith.constant 0.949999988 : f32
    %1908 = vector.broadcast %cst_1199 : f32 to vector<8x128xf32>
    %1909 = arith.mulf %1908, %1774 : vector<8x128xf32>
    %1910 = vector.broadcast %1851 : f32 to vector<8x128xf32>
    %1911 = arith.addf %1909, %1910 : vector<8x128xf32>
    %cst_1200 = arith.constant 0.000000e+00 : f32
    %cst_1201 = arith.constant 1.000000e+00 : f32
    %1912 = vector.broadcast %cst_1200 : f32 to vector<8x128xf32>
    %1913 = arith.maximumf %1912, %1911 : vector<8x128xf32>
    %1914 = vector.broadcast %cst_1201 : f32 to vector<8x128xf32>
    %1915 = arith.minimumf %1914, %1913 : vector<8x128xf32>
    %cst_1202 = arith.constant 0.949999988 : f32
    %1916 = vector.broadcast %cst_1202 : f32 to vector<8x128xf32>
    %1917 = arith.mulf %1916, %1780 : vector<8x128xf32>
    %1918 = vector.broadcast %1851 : f32 to vector<8x128xf32>
    %1919 = arith.addf %1917, %1918 : vector<8x128xf32>
    %cst_1203 = arith.constant 0.000000e+00 : f32
    %cst_1204 = arith.constant 1.000000e+00 : f32
    %1920 = vector.broadcast %cst_1203 : f32 to vector<8x128xf32>
    %1921 = arith.maximumf %1920, %1919 : vector<8x128xf32>
    %1922 = vector.broadcast %cst_1204 : f32 to vector<8x128xf32>
    %1923 = arith.minimumf %1922, %1921 : vector<8x128xf32>
    %cst_1205 = arith.constant 0.949999988 : f32
    %1924 = vector.broadcast %cst_1205 : f32 to vector<8x128xf32>
    %1925 = arith.mulf %1924, %1786 : vector<8x128xf32>
    %1926 = vector.broadcast %1851 : f32 to vector<8x128xf32>
    %1927 = arith.addf %1925, %1926 : vector<8x128xf32>
    %cst_1206 = arith.constant 0.000000e+00 : f32
    %cst_1207 = arith.constant 1.000000e+00 : f32
    %1928 = vector.broadcast %cst_1206 : f32 to vector<8x128xf32>
    %1929 = arith.maximumf %1928, %1927 : vector<8x128xf32>
    %1930 = vector.broadcast %cst_1207 : f32 to vector<8x128xf32>
    %1931 = arith.minimumf %1930, %1929 : vector<8x128xf32>
    %cst_1208 = arith.constant 0.949999988 : f32
    %1932 = vector.broadcast %cst_1208 : f32 to vector<8x128xf32>
    %1933 = arith.mulf %1932, %1792 : vector<8x128xf32>
    %1934 = vector.broadcast %1851 : f32 to vector<8x128xf32>
    %1935 = arith.addf %1933, %1934 : vector<8x128xf32>
    %cst_1209 = arith.constant 0.000000e+00 : f32
    %cst_1210 = arith.constant 1.000000e+00 : f32
    %1936 = vector.broadcast %cst_1209 : f32 to vector<8x128xf32>
    %1937 = arith.maximumf %1936, %1935 : vector<8x128xf32>
    %1938 = vector.broadcast %cst_1210 : f32 to vector<8x128xf32>
    %1939 = arith.minimumf %1938, %1937 : vector<8x128xf32>
    %cst_1211 = arith.constant 0.949999988 : f32
    %1940 = vector.broadcast %cst_1211 : f32 to vector<8x128xf32>
    %1941 = arith.mulf %1940, %1798 : vector<8x128xf32>
    %1942 = vector.broadcast %1851 : f32 to vector<8x128xf32>
    %1943 = arith.addf %1941, %1942 : vector<8x128xf32>
    %cst_1212 = arith.constant 0.000000e+00 : f32
    %cst_1213 = arith.constant 1.000000e+00 : f32
    %1944 = vector.broadcast %cst_1212 : f32 to vector<8x128xf32>
    %1945 = arith.maximumf %1944, %1943 : vector<8x128xf32>
    %1946 = vector.broadcast %cst_1213 : f32 to vector<8x128xf32>
    %1947 = arith.minimumf %1946, %1945 : vector<8x128xf32>
    %cst_1214 = arith.constant 2.989000e-01 : f32
    %1948 = vector.broadcast %cst_1214 : f32 to vector<8x128xf32>
    %1949 = arith.mulf %1948, %1859 : vector<8x128xf32>
    %cst_1215 = arith.constant 5.870000e-01 : f32
    %1950 = vector.broadcast %cst_1215 : f32 to vector<8x128xf32>
    %1951 = arith.mulf %1950, %1891 : vector<8x128xf32>
    %1952 = arith.addf %1949, %1951 : vector<8x128xf32>
    %cst_1216 = arith.constant 1.140000e-01 : f32
    %1953 = vector.broadcast %cst_1216 : f32 to vector<8x128xf32>
    %1954 = arith.mulf %1953, %1923 : vector<8x128xf32>
    %1955 = arith.addf %1952, %1954 : vector<8x128xf32>
    %cst_1217 = arith.constant 2.989000e-01 : f32
    %1956 = vector.broadcast %cst_1217 : f32 to vector<8x128xf32>
    %1957 = arith.mulf %1956, %1867 : vector<8x128xf32>
    %cst_1218 = arith.constant 5.870000e-01 : f32
    %1958 = vector.broadcast %cst_1218 : f32 to vector<8x128xf32>
    %1959 = arith.mulf %1958, %1899 : vector<8x128xf32>
    %1960 = arith.addf %1957, %1959 : vector<8x128xf32>
    %cst_1219 = arith.constant 1.140000e-01 : f32
    %1961 = vector.broadcast %cst_1219 : f32 to vector<8x128xf32>
    %1962 = arith.mulf %1961, %1931 : vector<8x128xf32>
    %1963 = arith.addf %1960, %1962 : vector<8x128xf32>
    %cst_1220 = arith.constant 2.989000e-01 : f32
    %1964 = vector.broadcast %cst_1220 : f32 to vector<8x128xf32>
    %1965 = arith.mulf %1964, %1875 : vector<8x128xf32>
    %cst_1221 = arith.constant 5.870000e-01 : f32
    %1966 = vector.broadcast %cst_1221 : f32 to vector<8x128xf32>
    %1967 = arith.mulf %1966, %1907 : vector<8x128xf32>
    %1968 = arith.addf %1965, %1967 : vector<8x128xf32>
    %cst_1222 = arith.constant 1.140000e-01 : f32
    %1969 = vector.broadcast %cst_1222 : f32 to vector<8x128xf32>
    %1970 = arith.mulf %1969, %1939 : vector<8x128xf32>
    %1971 = arith.addf %1968, %1970 : vector<8x128xf32>
    %cst_1223 = arith.constant 2.989000e-01 : f32
    %1972 = vector.broadcast %cst_1223 : f32 to vector<8x128xf32>
    %1973 = arith.mulf %1972, %1883 : vector<8x128xf32>
    %cst_1224 = arith.constant 5.870000e-01 : f32
    %1974 = vector.broadcast %cst_1224 : f32 to vector<8x128xf32>
    %1975 = arith.mulf %1974, %1915 : vector<8x128xf32>
    %1976 = arith.addf %1973, %1975 : vector<8x128xf32>
    %cst_1225 = arith.constant 1.140000e-01 : f32
    %1977 = vector.broadcast %cst_1225 : f32 to vector<8x128xf32>
    %1978 = arith.mulf %1977, %1947 : vector<8x128xf32>
    %1979 = arith.addf %1976, %1978 : vector<8x128xf32>
    %cst_1226 = arith.constant -1.000000e-01 : f32
    %1980 = vector.broadcast %cst_1226 : f32 to vector<8x128xf32>
    %1981 = arith.mulf %1980, %1955 : vector<8x128xf32>
    %cst_1227 = arith.constant -1.000000e-01 : f32
    %1982 = vector.broadcast %cst_1227 : f32 to vector<8x128xf32>
    %1983 = arith.mulf %1982, %1963 : vector<8x128xf32>
    %cst_1228 = arith.constant -1.000000e-01 : f32
    %1984 = vector.broadcast %cst_1228 : f32 to vector<8x128xf32>
    %1985 = arith.mulf %1984, %1971 : vector<8x128xf32>
    %cst_1229 = arith.constant -1.000000e-01 : f32
    %1986 = vector.broadcast %cst_1229 : f32 to vector<8x128xf32>
    %1987 = arith.mulf %1986, %1979 : vector<8x128xf32>
    %cst_1230 = arith.constant 1.100000e+00 : f32
    %1988 = vector.broadcast %cst_1230 : f32 to vector<8x128xf32>
    %1989 = arith.mulf %1988, %1859 : vector<8x128xf32>
    %1990 = arith.addf %1989, %1981 : vector<8x128xf32>
    %cst_1231 = arith.constant 0.000000e+00 : f32
    %cst_1232 = arith.constant 1.000000e+00 : f32
    %1991 = vector.broadcast %cst_1231 : f32 to vector<8x128xf32>
    %1992 = arith.maximumf %1991, %1990 : vector<8x128xf32>
    %1993 = vector.broadcast %cst_1232 : f32 to vector<8x128xf32>
    %1994 = arith.minimumf %1993, %1992 : vector<8x128xf32>
    %cst_1233 = arith.constant 1.100000e+00 : f32
    %1995 = vector.broadcast %cst_1233 : f32 to vector<8x128xf32>
    %1996 = arith.mulf %1995, %1867 : vector<8x128xf32>
    %1997 = arith.addf %1996, %1983 : vector<8x128xf32>
    %cst_1234 = arith.constant 0.000000e+00 : f32
    %cst_1235 = arith.constant 1.000000e+00 : f32
    %1998 = vector.broadcast %cst_1234 : f32 to vector<8x128xf32>
    %1999 = arith.maximumf %1998, %1997 : vector<8x128xf32>
    %2000 = vector.broadcast %cst_1235 : f32 to vector<8x128xf32>
    %2001 = arith.minimumf %2000, %1999 : vector<8x128xf32>
    %cst_1236 = arith.constant 1.100000e+00 : f32
    %2002 = vector.broadcast %cst_1236 : f32 to vector<8x128xf32>
    %2003 = arith.mulf %2002, %1875 : vector<8x128xf32>
    %2004 = arith.addf %2003, %1985 : vector<8x128xf32>
    %cst_1237 = arith.constant 0.000000e+00 : f32
    %cst_1238 = arith.constant 1.000000e+00 : f32
    %2005 = vector.broadcast %cst_1237 : f32 to vector<8x128xf32>
    %2006 = arith.maximumf %2005, %2004 : vector<8x128xf32>
    %2007 = vector.broadcast %cst_1238 : f32 to vector<8x128xf32>
    %2008 = arith.minimumf %2007, %2006 : vector<8x128xf32>
    %cst_1239 = arith.constant 1.100000e+00 : f32
    %2009 = vector.broadcast %cst_1239 : f32 to vector<8x128xf32>
    %2010 = arith.mulf %2009, %1883 : vector<8x128xf32>
    %2011 = arith.addf %2010, %1987 : vector<8x128xf32>
    %cst_1240 = arith.constant 0.000000e+00 : f32
    %cst_1241 = arith.constant 1.000000e+00 : f32
    %2012 = vector.broadcast %cst_1240 : f32 to vector<8x128xf32>
    %2013 = arith.maximumf %2012, %2011 : vector<8x128xf32>
    %2014 = vector.broadcast %cst_1241 : f32 to vector<8x128xf32>
    %2015 = arith.minimumf %2014, %2013 : vector<8x128xf32>
    %cst_1242 = arith.constant 1.100000e+00 : f32
    %2016 = vector.broadcast %cst_1242 : f32 to vector<8x128xf32>
    %2017 = arith.mulf %2016, %1891 : vector<8x128xf32>
    %2018 = arith.addf %2017, %1981 : vector<8x128xf32>
    %cst_1243 = arith.constant 0.000000e+00 : f32
    %cst_1244 = arith.constant 1.000000e+00 : f32
    %2019 = vector.broadcast %cst_1243 : f32 to vector<8x128xf32>
    %2020 = arith.maximumf %2019, %2018 : vector<8x128xf32>
    %2021 = vector.broadcast %cst_1244 : f32 to vector<8x128xf32>
    %2022 = arith.minimumf %2021, %2020 : vector<8x128xf32>
    %cst_1245 = arith.constant 1.100000e+00 : f32
    %2023 = vector.broadcast %cst_1245 : f32 to vector<8x128xf32>
    %2024 = arith.mulf %2023, %1899 : vector<8x128xf32>
    %2025 = arith.addf %2024, %1983 : vector<8x128xf32>
    %cst_1246 = arith.constant 0.000000e+00 : f32
    %cst_1247 = arith.constant 1.000000e+00 : f32
    %2026 = vector.broadcast %cst_1246 : f32 to vector<8x128xf32>
    %2027 = arith.maximumf %2026, %2025 : vector<8x128xf32>
    %2028 = vector.broadcast %cst_1247 : f32 to vector<8x128xf32>
    %2029 = arith.minimumf %2028, %2027 : vector<8x128xf32>
    %cst_1248 = arith.constant 1.100000e+00 : f32
    %2030 = vector.broadcast %cst_1248 : f32 to vector<8x128xf32>
    %2031 = arith.mulf %2030, %1907 : vector<8x128xf32>
    %2032 = arith.addf %2031, %1985 : vector<8x128xf32>
    %cst_1249 = arith.constant 0.000000e+00 : f32
    %cst_1250 = arith.constant 1.000000e+00 : f32
    %2033 = vector.broadcast %cst_1249 : f32 to vector<8x128xf32>
    %2034 = arith.maximumf %2033, %2032 : vector<8x128xf32>
    %2035 = vector.broadcast %cst_1250 : f32 to vector<8x128xf32>
    %2036 = arith.minimumf %2035, %2034 : vector<8x128xf32>
    %cst_1251 = arith.constant 1.100000e+00 : f32
    %2037 = vector.broadcast %cst_1251 : f32 to vector<8x128xf32>
    %2038 = arith.mulf %2037, %1915 : vector<8x128xf32>
    %2039 = arith.addf %2038, %1987 : vector<8x128xf32>
    %cst_1252 = arith.constant 0.000000e+00 : f32
    %cst_1253 = arith.constant 1.000000e+00 : f32
    %2040 = vector.broadcast %cst_1252 : f32 to vector<8x128xf32>
    %2041 = arith.maximumf %2040, %2039 : vector<8x128xf32>
    %2042 = vector.broadcast %cst_1253 : f32 to vector<8x128xf32>
    %2043 = arith.minimumf %2042, %2041 : vector<8x128xf32>
    %cst_1254 = arith.constant 1.100000e+00 : f32
    %2044 = vector.broadcast %cst_1254 : f32 to vector<8x128xf32>
    %2045 = arith.mulf %2044, %1923 : vector<8x128xf32>
    %2046 = arith.addf %2045, %1981 : vector<8x128xf32>
    %cst_1255 = arith.constant 0.000000e+00 : f32
    %cst_1256 = arith.constant 1.000000e+00 : f32
    %2047 = vector.broadcast %cst_1255 : f32 to vector<8x128xf32>
    %2048 = arith.maximumf %2047, %2046 : vector<8x128xf32>
    %2049 = vector.broadcast %cst_1256 : f32 to vector<8x128xf32>
    %2050 = arith.minimumf %2049, %2048 : vector<8x128xf32>
    %cst_1257 = arith.constant 1.100000e+00 : f32
    %2051 = vector.broadcast %cst_1257 : f32 to vector<8x128xf32>
    %2052 = arith.mulf %2051, %1931 : vector<8x128xf32>
    %2053 = arith.addf %2052, %1983 : vector<8x128xf32>
    %cst_1258 = arith.constant 0.000000e+00 : f32
    %cst_1259 = arith.constant 1.000000e+00 : f32
    %2054 = vector.broadcast %cst_1258 : f32 to vector<8x128xf32>
    %2055 = arith.maximumf %2054, %2053 : vector<8x128xf32>
    %2056 = vector.broadcast %cst_1259 : f32 to vector<8x128xf32>
    %2057 = arith.minimumf %2056, %2055 : vector<8x128xf32>
    %cst_1260 = arith.constant 1.100000e+00 : f32
    %2058 = vector.broadcast %cst_1260 : f32 to vector<8x128xf32>
    %2059 = arith.mulf %2058, %1939 : vector<8x128xf32>
    %2060 = arith.addf %2059, %1985 : vector<8x128xf32>
    %cst_1261 = arith.constant 0.000000e+00 : f32
    %cst_1262 = arith.constant 1.000000e+00 : f32
    %2061 = vector.broadcast %cst_1261 : f32 to vector<8x128xf32>
    %2062 = arith.maximumf %2061, %2060 : vector<8x128xf32>
    %2063 = vector.broadcast %cst_1262 : f32 to vector<8x128xf32>
    %2064 = arith.minimumf %2063, %2062 : vector<8x128xf32>
    %cst_1263 = arith.constant 1.100000e+00 : f32
    %2065 = vector.broadcast %cst_1263 : f32 to vector<8x128xf32>
    %2066 = arith.mulf %2065, %1947 : vector<8x128xf32>
    %2067 = arith.addf %2066, %1987 : vector<8x128xf32>
    %cst_1264 = arith.constant 0.000000e+00 : f32
    %cst_1265 = arith.constant 1.000000e+00 : f32
    %2068 = vector.broadcast %cst_1264 : f32 to vector<8x128xf32>
    %2069 = arith.maximumf %2068, %2067 : vector<8x128xf32>
    %2070 = vector.broadcast %cst_1265 : f32 to vector<8x128xf32>
    %2071 = arith.minimumf %2070, %2069 : vector<8x128xf32>
    %2072 = arith.addf %1594, %1994 : vector<8x128xf32>
    %2073 = arith.addf %1595, %2001 : vector<8x128xf32>
    %2074 = arith.addf %1596, %2008 : vector<8x128xf32>
    %2075 = arith.addf %1597, %2015 : vector<8x128xf32>
    %2076 = arith.addf %1609, %2022 : vector<8x128xf32>
    %2077 = arith.addf %1610, %2029 : vector<8x128xf32>
    %2078 = arith.addf %1611, %2036 : vector<8x128xf32>
    %2079 = arith.addf %1612, %2043 : vector<8x128xf32>
    %2080 = arith.addf %1624, %2050 : vector<8x128xf32>
    %2081 = arith.addf %1625, %2057 : vector<8x128xf32>
    %2082 = arith.addf %1626, %2064 : vector<8x128xf32>
    %2083 = arith.addf %1627, %2071 : vector<8x128xf32>
    %2084 = arith.subf %1639, %1994 : vector<8x128xf32>
    %2085 = arith.subf %1640, %2001 : vector<8x128xf32>
    %2086 = arith.subf %1641, %2008 : vector<8x128xf32>
    %2087 = arith.subf %1642, %2015 : vector<8x128xf32>
    %2088 = arith.addf %2084, %2085 : vector<8x128xf32>
    %2089 = arith.subf %2084, %2085 : vector<8x128xf32>
    %2090 = arith.addf %2086, %2087 : vector<8x128xf32>
    %2091 = arith.subf %2086, %2087 : vector<8x128xf32>
    %2092 = arith.addf %2089, %2091 : vector<8x128xf32>
    %2093 = math.absf %2092 : vector<8x128xf32>
    %2094 = arith.subf %2088, %2090 : vector<8x128xf32>
    %2095 = math.absf %2094 : vector<8x128xf32>
    %2096 = arith.addf %2093, %2095 : vector<8x128xf32>
    %2097 = arith.subf %2089, %2091 : vector<8x128xf32>
    %2098 = math.absf %2097 : vector<8x128xf32>
    %2099 = arith.addf %2096, %2098 : vector<8x128xf32>
    %2100 = arith.subf %1654, %2022 : vector<8x128xf32>
    %2101 = arith.subf %1655, %2029 : vector<8x128xf32>
    %2102 = arith.subf %1656, %2036 : vector<8x128xf32>
    %2103 = arith.subf %1657, %2043 : vector<8x128xf32>
    %2104 = arith.addf %2100, %2101 : vector<8x128xf32>
    %2105 = arith.subf %2100, %2101 : vector<8x128xf32>
    %2106 = arith.addf %2102, %2103 : vector<8x128xf32>
    %2107 = arith.subf %2102, %2103 : vector<8x128xf32>
    %2108 = arith.addf %2105, %2107 : vector<8x128xf32>
    %2109 = math.absf %2108 : vector<8x128xf32>
    %2110 = arith.subf %2104, %2106 : vector<8x128xf32>
    %2111 = math.absf %2110 : vector<8x128xf32>
    %2112 = arith.addf %2109, %2111 : vector<8x128xf32>
    %2113 = arith.subf %2105, %2107 : vector<8x128xf32>
    %2114 = math.absf %2113 : vector<8x128xf32>
    %2115 = arith.addf %2112, %2114 : vector<8x128xf32>
    %2116 = arith.addf %2099, %2115 : vector<8x128xf32>
    %2117 = arith.subf %1669, %2050 : vector<8x128xf32>
    %2118 = arith.subf %1670, %2057 : vector<8x128xf32>
    %2119 = arith.subf %1671, %2064 : vector<8x128xf32>
    %2120 = arith.subf %1672, %2071 : vector<8x128xf32>
    %2121 = arith.addf %2117, %2118 : vector<8x128xf32>
    %2122 = arith.subf %2117, %2118 : vector<8x128xf32>
    %2123 = arith.addf %2119, %2120 : vector<8x128xf32>
    %2124 = arith.subf %2119, %2120 : vector<8x128xf32>
    %2125 = arith.addf %2122, %2124 : vector<8x128xf32>
    %2126 = math.absf %2125 : vector<8x128xf32>
    %2127 = arith.subf %2121, %2123 : vector<8x128xf32>
    %2128 = math.absf %2127 : vector<8x128xf32>
    %2129 = arith.addf %2126, %2128 : vector<8x128xf32>
    %2130 = arith.subf %2122, %2124 : vector<8x128xf32>
    %2131 = math.absf %2130 : vector<8x128xf32>
    %2132 = arith.addf %2129, %2131 : vector<8x128xf32>
    %2133 = arith.addf %2116, %2132 : vector<8x128xf32>
    %2134 = vector.shape_cast %2133 : vector<8x128xf32> to vector<1x8x128xf32>
    %cst_1266 = arith.constant dense<0.000000e+00> : vector<1xf32>
    %2135 = vector.multi_reduction <add>, %2134, %cst_1266 [1, 2] : vector<1x8x128xf32> to vector<1xf32>
    %2136 = vector.shape_cast %2135 : vector<1xf32> to vector<1x1x1xf32>
    %2137 = vector.extract %2136[0, 0, 0] : f32 from vector<1x1x1xf32>
    %cst_1267 = arith.constant 0.949999988 : f32
    %2138 = vector.broadcast %cst_1267 : f32 to vector<8x128xf32>
    %2139 = arith.mulf %1594, %2138 : vector<8x128xf32>
    %cst_1268 = arith.constant 0.000000e+00 : f32
    %cst_1269 = arith.constant 1.000000e+00 : f32
    %2140 = vector.broadcast %cst_1268 : f32 to vector<8x128xf32>
    %2141 = arith.maximumf %2140, %2139 : vector<8x128xf32>
    %2142 = vector.broadcast %cst_1269 : f32 to vector<8x128xf32>
    %2143 = arith.minimumf %2142, %2141 : vector<8x128xf32>
    %cst_1270 = arith.constant 0.949999988 : f32
    %2144 = vector.broadcast %cst_1270 : f32 to vector<8x128xf32>
    %2145 = arith.mulf %1595, %2144 : vector<8x128xf32>
    %cst_1271 = arith.constant 0.000000e+00 : f32
    %cst_1272 = arith.constant 1.000000e+00 : f32
    %2146 = vector.broadcast %cst_1271 : f32 to vector<8x128xf32>
    %2147 = arith.maximumf %2146, %2145 : vector<8x128xf32>
    %2148 = vector.broadcast %cst_1272 : f32 to vector<8x128xf32>
    %2149 = arith.minimumf %2148, %2147 : vector<8x128xf32>
    %cst_1273 = arith.constant 0.949999988 : f32
    %2150 = vector.broadcast %cst_1273 : f32 to vector<8x128xf32>
    %2151 = arith.mulf %1596, %2150 : vector<8x128xf32>
    %cst_1274 = arith.constant 0.000000e+00 : f32
    %cst_1275 = arith.constant 1.000000e+00 : f32
    %2152 = vector.broadcast %cst_1274 : f32 to vector<8x128xf32>
    %2153 = arith.maximumf %2152, %2151 : vector<8x128xf32>
    %2154 = vector.broadcast %cst_1275 : f32 to vector<8x128xf32>
    %2155 = arith.minimumf %2154, %2153 : vector<8x128xf32>
    %cst_1276 = arith.constant 0.949999988 : f32
    %2156 = vector.broadcast %cst_1276 : f32 to vector<8x128xf32>
    %2157 = arith.mulf %1597, %2156 : vector<8x128xf32>
    %cst_1277 = arith.constant 0.000000e+00 : f32
    %cst_1278 = arith.constant 1.000000e+00 : f32
    %2158 = vector.broadcast %cst_1277 : f32 to vector<8x128xf32>
    %2159 = arith.maximumf %2158, %2157 : vector<8x128xf32>
    %2160 = vector.broadcast %cst_1278 : f32 to vector<8x128xf32>
    %2161 = arith.minimumf %2160, %2159 : vector<8x128xf32>
    %cst_1279 = arith.constant 0.949999988 : f32
    %2162 = vector.broadcast %cst_1279 : f32 to vector<8x128xf32>
    %2163 = arith.mulf %1609, %2162 : vector<8x128xf32>
    %cst_1280 = arith.constant 0.000000e+00 : f32
    %cst_1281 = arith.constant 1.000000e+00 : f32
    %2164 = vector.broadcast %cst_1280 : f32 to vector<8x128xf32>
    %2165 = arith.maximumf %2164, %2163 : vector<8x128xf32>
    %2166 = vector.broadcast %cst_1281 : f32 to vector<8x128xf32>
    %2167 = arith.minimumf %2166, %2165 : vector<8x128xf32>
    %cst_1282 = arith.constant 0.949999988 : f32
    %2168 = vector.broadcast %cst_1282 : f32 to vector<8x128xf32>
    %2169 = arith.mulf %1610, %2168 : vector<8x128xf32>
    %cst_1283 = arith.constant 0.000000e+00 : f32
    %cst_1284 = arith.constant 1.000000e+00 : f32
    %2170 = vector.broadcast %cst_1283 : f32 to vector<8x128xf32>
    %2171 = arith.maximumf %2170, %2169 : vector<8x128xf32>
    %2172 = vector.broadcast %cst_1284 : f32 to vector<8x128xf32>
    %2173 = arith.minimumf %2172, %2171 : vector<8x128xf32>
    %cst_1285 = arith.constant 0.949999988 : f32
    %2174 = vector.broadcast %cst_1285 : f32 to vector<8x128xf32>
    %2175 = arith.mulf %1611, %2174 : vector<8x128xf32>
    %cst_1286 = arith.constant 0.000000e+00 : f32
    %cst_1287 = arith.constant 1.000000e+00 : f32
    %2176 = vector.broadcast %cst_1286 : f32 to vector<8x128xf32>
    %2177 = arith.maximumf %2176, %2175 : vector<8x128xf32>
    %2178 = vector.broadcast %cst_1287 : f32 to vector<8x128xf32>
    %2179 = arith.minimumf %2178, %2177 : vector<8x128xf32>
    %cst_1288 = arith.constant 0.949999988 : f32
    %2180 = vector.broadcast %cst_1288 : f32 to vector<8x128xf32>
    %2181 = arith.mulf %1612, %2180 : vector<8x128xf32>
    %cst_1289 = arith.constant 0.000000e+00 : f32
    %cst_1290 = arith.constant 1.000000e+00 : f32
    %2182 = vector.broadcast %cst_1289 : f32 to vector<8x128xf32>
    %2183 = arith.maximumf %2182, %2181 : vector<8x128xf32>
    %2184 = vector.broadcast %cst_1290 : f32 to vector<8x128xf32>
    %2185 = arith.minimumf %2184, %2183 : vector<8x128xf32>
    %cst_1291 = arith.constant 0.949999988 : f32
    %2186 = vector.broadcast %cst_1291 : f32 to vector<8x128xf32>
    %2187 = arith.mulf %1624, %2186 : vector<8x128xf32>
    %cst_1292 = arith.constant 0.000000e+00 : f32
    %cst_1293 = arith.constant 1.000000e+00 : f32
    %2188 = vector.broadcast %cst_1292 : f32 to vector<8x128xf32>
    %2189 = arith.maximumf %2188, %2187 : vector<8x128xf32>
    %2190 = vector.broadcast %cst_1293 : f32 to vector<8x128xf32>
    %2191 = arith.minimumf %2190, %2189 : vector<8x128xf32>
    %cst_1294 = arith.constant 0.949999988 : f32
    %2192 = vector.broadcast %cst_1294 : f32 to vector<8x128xf32>
    %2193 = arith.mulf %1625, %2192 : vector<8x128xf32>
    %cst_1295 = arith.constant 0.000000e+00 : f32
    %cst_1296 = arith.constant 1.000000e+00 : f32
    %2194 = vector.broadcast %cst_1295 : f32 to vector<8x128xf32>
    %2195 = arith.maximumf %2194, %2193 : vector<8x128xf32>
    %2196 = vector.broadcast %cst_1296 : f32 to vector<8x128xf32>
    %2197 = arith.minimumf %2196, %2195 : vector<8x128xf32>
    %cst_1297 = arith.constant 0.949999988 : f32
    %2198 = vector.broadcast %cst_1297 : f32 to vector<8x128xf32>
    %2199 = arith.mulf %1626, %2198 : vector<8x128xf32>
    %cst_1298 = arith.constant 0.000000e+00 : f32
    %cst_1299 = arith.constant 1.000000e+00 : f32
    %2200 = vector.broadcast %cst_1298 : f32 to vector<8x128xf32>
    %2201 = arith.maximumf %2200, %2199 : vector<8x128xf32>
    %2202 = vector.broadcast %cst_1299 : f32 to vector<8x128xf32>
    %2203 = arith.minimumf %2202, %2201 : vector<8x128xf32>
    %cst_1300 = arith.constant 0.949999988 : f32
    %2204 = vector.broadcast %cst_1300 : f32 to vector<8x128xf32>
    %2205 = arith.mulf %1627, %2204 : vector<8x128xf32>
    %cst_1301 = arith.constant 0.000000e+00 : f32
    %cst_1302 = arith.constant 1.000000e+00 : f32
    %2206 = vector.broadcast %cst_1301 : f32 to vector<8x128xf32>
    %2207 = arith.maximumf %2206, %2205 : vector<8x128xf32>
    %2208 = vector.broadcast %cst_1302 : f32 to vector<8x128xf32>
    %2209 = arith.minimumf %2208, %2207 : vector<8x128xf32>
    %cst_1303 = arith.constant 2.989000e-01 : f32
    %2210 = vector.broadcast %cst_1303 : f32 to vector<8x128xf32>
    %2211 = arith.mulf %2210, %2143 : vector<8x128xf32>
    %cst_1304 = arith.constant 5.870000e-01 : f32
    %2212 = vector.broadcast %cst_1304 : f32 to vector<8x128xf32>
    %2213 = arith.mulf %2212, %2167 : vector<8x128xf32>
    %2214 = arith.addf %2211, %2213 : vector<8x128xf32>
    %cst_1305 = arith.constant 1.140000e-01 : f32
    %2215 = vector.broadcast %cst_1305 : f32 to vector<8x128xf32>
    %2216 = arith.mulf %2215, %2191 : vector<8x128xf32>
    %2217 = arith.addf %2214, %2216 : vector<8x128xf32>
    %cst_1306 = arith.constant 2.989000e-01 : f32
    %2218 = vector.broadcast %cst_1306 : f32 to vector<8x128xf32>
    %2219 = arith.mulf %2218, %2149 : vector<8x128xf32>
    %cst_1307 = arith.constant 5.870000e-01 : f32
    %2220 = vector.broadcast %cst_1307 : f32 to vector<8x128xf32>
    %2221 = arith.mulf %2220, %2173 : vector<8x128xf32>
    %2222 = arith.addf %2219, %2221 : vector<8x128xf32>
    %cst_1308 = arith.constant 1.140000e-01 : f32
    %2223 = vector.broadcast %cst_1308 : f32 to vector<8x128xf32>
    %2224 = arith.mulf %2223, %2197 : vector<8x128xf32>
    %2225 = arith.addf %2222, %2224 : vector<8x128xf32>
    %cst_1309 = arith.constant 2.989000e-01 : f32
    %2226 = vector.broadcast %cst_1309 : f32 to vector<8x128xf32>
    %2227 = arith.mulf %2226, %2155 : vector<8x128xf32>
    %cst_1310 = arith.constant 5.870000e-01 : f32
    %2228 = vector.broadcast %cst_1310 : f32 to vector<8x128xf32>
    %2229 = arith.mulf %2228, %2179 : vector<8x128xf32>
    %2230 = arith.addf %2227, %2229 : vector<8x128xf32>
    %cst_1311 = arith.constant 1.140000e-01 : f32
    %2231 = vector.broadcast %cst_1311 : f32 to vector<8x128xf32>
    %2232 = arith.mulf %2231, %2203 : vector<8x128xf32>
    %2233 = arith.addf %2230, %2232 : vector<8x128xf32>
    %cst_1312 = arith.constant 2.989000e-01 : f32
    %2234 = vector.broadcast %cst_1312 : f32 to vector<8x128xf32>
    %2235 = arith.mulf %2234, %2161 : vector<8x128xf32>
    %cst_1313 = arith.constant 5.870000e-01 : f32
    %2236 = vector.broadcast %cst_1313 : f32 to vector<8x128xf32>
    %2237 = arith.mulf %2236, %2185 : vector<8x128xf32>
    %2238 = arith.addf %2235, %2237 : vector<8x128xf32>
    %cst_1314 = arith.constant 1.140000e-01 : f32
    %2239 = vector.broadcast %cst_1314 : f32 to vector<8x128xf32>
    %2240 = arith.mulf %2239, %2209 : vector<8x128xf32>
    %2241 = arith.addf %2238, %2240 : vector<8x128xf32>
    %2242 = vector.shape_cast %2217 : vector<8x128xf32> to vector<1x8x128xf32>
    %cst_1315 = arith.constant dense<0.000000e+00> : vector<1xf32>
    %2243 = vector.multi_reduction <add>, %2242, %cst_1315 [1, 2] : vector<1x8x128xf32> to vector<1xf32>
    %2244 = vector.shape_cast %2243 : vector<1xf32> to vector<1x1x1xf32>
    %2245 = vector.extract %2244[0, 0, 0] : f32 from vector<1x1x1xf32>
    %2246 = vector.shape_cast %2225 : vector<8x128xf32> to vector<1x8x128xf32>
    %cst_1316 = arith.constant dense<0.000000e+00> : vector<1xf32>
    %2247 = vector.multi_reduction <add>, %2246, %cst_1316 [1, 2] : vector<1x8x128xf32> to vector<1xf32>
    %2248 = vector.shape_cast %2247 : vector<1xf32> to vector<1x1x1xf32>
    %2249 = vector.extract %2248[0, 0, 0] : f32 from vector<1x1x1xf32>
    %2250 = arith.addf %2245, %2249 : f32
    %2251 = vector.shape_cast %2233 : vector<8x128xf32> to vector<1x8x128xf32>
    %cst_1317 = arith.constant dense<0.000000e+00> : vector<1xf32>
    %2252 = vector.multi_reduction <add>, %2251, %cst_1317 [1, 2] : vector<1x8x128xf32> to vector<1xf32>
    %2253 = vector.shape_cast %2252 : vector<1xf32> to vector<1x1x1xf32>
    %2254 = vector.extract %2253[0, 0, 0] : f32 from vector<1x1x1xf32>
    %2255 = arith.addf %2250, %2254 : f32
    %2256 = vector.shape_cast %2241 : vector<8x128xf32> to vector<1x8x128xf32>
    %cst_1318 = arith.constant dense<0.000000e+00> : vector<1xf32>
    %2257 = vector.multi_reduction <add>, %2256, %cst_1318 [1, 2] : vector<1x8x128xf32> to vector<1xf32>
    %2258 = vector.shape_cast %2257 : vector<1xf32> to vector<1x1x1xf32>
    %2259 = vector.extract %2258[0, 0, 0] : f32 from vector<1x1x1xf32>
    %2260 = arith.addf %2255, %2259 : f32
    %cst_1319 = arith.constant 3.906250e-03 : f32
    %2261 = arith.mulf %2260, %cst_1319 : f32
    %cst_1320 = arith.constant -5.000000e-02 : f32
    %2262 = arith.mulf %cst_1320, %2261 : f32
    %cst_1321 = arith.constant 1.050000e+00 : f32
    %2263 = vector.broadcast %cst_1321 : f32 to vector<8x128xf32>
    %2264 = arith.mulf %2263, %2143 : vector<8x128xf32>
    %2265 = vector.broadcast %2262 : f32 to vector<8x128xf32>
    %2266 = arith.addf %2264, %2265 : vector<8x128xf32>
    %cst_1322 = arith.constant 0.000000e+00 : f32
    %cst_1323 = arith.constant 1.000000e+00 : f32
    %2267 = vector.broadcast %cst_1322 : f32 to vector<8x128xf32>
    %2268 = arith.maximumf %2267, %2266 : vector<8x128xf32>
    %2269 = vector.broadcast %cst_1323 : f32 to vector<8x128xf32>
    %2270 = arith.minimumf %2269, %2268 : vector<8x128xf32>
    %cst_1324 = arith.constant 1.050000e+00 : f32
    %2271 = vector.broadcast %cst_1324 : f32 to vector<8x128xf32>
    %2272 = arith.mulf %2271, %2149 : vector<8x128xf32>
    %2273 = vector.broadcast %2262 : f32 to vector<8x128xf32>
    %2274 = arith.addf %2272, %2273 : vector<8x128xf32>
    %cst_1325 = arith.constant 0.000000e+00 : f32
    %cst_1326 = arith.constant 1.000000e+00 : f32
    %2275 = vector.broadcast %cst_1325 : f32 to vector<8x128xf32>
    %2276 = arith.maximumf %2275, %2274 : vector<8x128xf32>
    %2277 = vector.broadcast %cst_1326 : f32 to vector<8x128xf32>
    %2278 = arith.minimumf %2277, %2276 : vector<8x128xf32>
    %cst_1327 = arith.constant 1.050000e+00 : f32
    %2279 = vector.broadcast %cst_1327 : f32 to vector<8x128xf32>
    %2280 = arith.mulf %2279, %2155 : vector<8x128xf32>
    %2281 = vector.broadcast %2262 : f32 to vector<8x128xf32>
    %2282 = arith.addf %2280, %2281 : vector<8x128xf32>
    %cst_1328 = arith.constant 0.000000e+00 : f32
    %cst_1329 = arith.constant 1.000000e+00 : f32
    %2283 = vector.broadcast %cst_1328 : f32 to vector<8x128xf32>
    %2284 = arith.maximumf %2283, %2282 : vector<8x128xf32>
    %2285 = vector.broadcast %cst_1329 : f32 to vector<8x128xf32>
    %2286 = arith.minimumf %2285, %2284 : vector<8x128xf32>
    %cst_1330 = arith.constant 1.050000e+00 : f32
    %2287 = vector.broadcast %cst_1330 : f32 to vector<8x128xf32>
    %2288 = arith.mulf %2287, %2161 : vector<8x128xf32>
    %2289 = vector.broadcast %2262 : f32 to vector<8x128xf32>
    %2290 = arith.addf %2288, %2289 : vector<8x128xf32>
    %cst_1331 = arith.constant 0.000000e+00 : f32
    %cst_1332 = arith.constant 1.000000e+00 : f32
    %2291 = vector.broadcast %cst_1331 : f32 to vector<8x128xf32>
    %2292 = arith.maximumf %2291, %2290 : vector<8x128xf32>
    %2293 = vector.broadcast %cst_1332 : f32 to vector<8x128xf32>
    %2294 = arith.minimumf %2293, %2292 : vector<8x128xf32>
    %cst_1333 = arith.constant 1.050000e+00 : f32
    %2295 = vector.broadcast %cst_1333 : f32 to vector<8x128xf32>
    %2296 = arith.mulf %2295, %2167 : vector<8x128xf32>
    %2297 = vector.broadcast %2262 : f32 to vector<8x128xf32>
    %2298 = arith.addf %2296, %2297 : vector<8x128xf32>
    %cst_1334 = arith.constant 0.000000e+00 : f32
    %cst_1335 = arith.constant 1.000000e+00 : f32
    %2299 = vector.broadcast %cst_1334 : f32 to vector<8x128xf32>
    %2300 = arith.maximumf %2299, %2298 : vector<8x128xf32>
    %2301 = vector.broadcast %cst_1335 : f32 to vector<8x128xf32>
    %2302 = arith.minimumf %2301, %2300 : vector<8x128xf32>
    %cst_1336 = arith.constant 1.050000e+00 : f32
    %2303 = vector.broadcast %cst_1336 : f32 to vector<8x128xf32>
    %2304 = arith.mulf %2303, %2173 : vector<8x128xf32>
    %2305 = vector.broadcast %2262 : f32 to vector<8x128xf32>
    %2306 = arith.addf %2304, %2305 : vector<8x128xf32>
    %cst_1337 = arith.constant 0.000000e+00 : f32
    %cst_1338 = arith.constant 1.000000e+00 : f32
    %2307 = vector.broadcast %cst_1337 : f32 to vector<8x128xf32>
    %2308 = arith.maximumf %2307, %2306 : vector<8x128xf32>
    %2309 = vector.broadcast %cst_1338 : f32 to vector<8x128xf32>
    %2310 = arith.minimumf %2309, %2308 : vector<8x128xf32>
    %cst_1339 = arith.constant 1.050000e+00 : f32
    %2311 = vector.broadcast %cst_1339 : f32 to vector<8x128xf32>
    %2312 = arith.mulf %2311, %2179 : vector<8x128xf32>
    %2313 = vector.broadcast %2262 : f32 to vector<8x128xf32>
    %2314 = arith.addf %2312, %2313 : vector<8x128xf32>
    %cst_1340 = arith.constant 0.000000e+00 : f32
    %cst_1341 = arith.constant 1.000000e+00 : f32
    %2315 = vector.broadcast %cst_1340 : f32 to vector<8x128xf32>
    %2316 = arith.maximumf %2315, %2314 : vector<8x128xf32>
    %2317 = vector.broadcast %cst_1341 : f32 to vector<8x128xf32>
    %2318 = arith.minimumf %2317, %2316 : vector<8x128xf32>
    %cst_1342 = arith.constant 1.050000e+00 : f32
    %2319 = vector.broadcast %cst_1342 : f32 to vector<8x128xf32>
    %2320 = arith.mulf %2319, %2185 : vector<8x128xf32>
    %2321 = vector.broadcast %2262 : f32 to vector<8x128xf32>
    %2322 = arith.addf %2320, %2321 : vector<8x128xf32>
    %cst_1343 = arith.constant 0.000000e+00 : f32
    %cst_1344 = arith.constant 1.000000e+00 : f32
    %2323 = vector.broadcast %cst_1343 : f32 to vector<8x128xf32>
    %2324 = arith.maximumf %2323, %2322 : vector<8x128xf32>
    %2325 = vector.broadcast %cst_1344 : f32 to vector<8x128xf32>
    %2326 = arith.minimumf %2325, %2324 : vector<8x128xf32>
    %cst_1345 = arith.constant 1.050000e+00 : f32
    %2327 = vector.broadcast %cst_1345 : f32 to vector<8x128xf32>
    %2328 = arith.mulf %2327, %2191 : vector<8x128xf32>
    %2329 = vector.broadcast %2262 : f32 to vector<8x128xf32>
    %2330 = arith.addf %2328, %2329 : vector<8x128xf32>
    %cst_1346 = arith.constant 0.000000e+00 : f32
    %cst_1347 = arith.constant 1.000000e+00 : f32
    %2331 = vector.broadcast %cst_1346 : f32 to vector<8x128xf32>
    %2332 = arith.maximumf %2331, %2330 : vector<8x128xf32>
    %2333 = vector.broadcast %cst_1347 : f32 to vector<8x128xf32>
    %2334 = arith.minimumf %2333, %2332 : vector<8x128xf32>
    %cst_1348 = arith.constant 1.050000e+00 : f32
    %2335 = vector.broadcast %cst_1348 : f32 to vector<8x128xf32>
    %2336 = arith.mulf %2335, %2197 : vector<8x128xf32>
    %2337 = vector.broadcast %2262 : f32 to vector<8x128xf32>
    %2338 = arith.addf %2336, %2337 : vector<8x128xf32>
    %cst_1349 = arith.constant 0.000000e+00 : f32
    %cst_1350 = arith.constant 1.000000e+00 : f32
    %2339 = vector.broadcast %cst_1349 : f32 to vector<8x128xf32>
    %2340 = arith.maximumf %2339, %2338 : vector<8x128xf32>
    %2341 = vector.broadcast %cst_1350 : f32 to vector<8x128xf32>
    %2342 = arith.minimumf %2341, %2340 : vector<8x128xf32>
    %cst_1351 = arith.constant 1.050000e+00 : f32
    %2343 = vector.broadcast %cst_1351 : f32 to vector<8x128xf32>
    %2344 = arith.mulf %2343, %2203 : vector<8x128xf32>
    %2345 = vector.broadcast %2262 : f32 to vector<8x128xf32>
    %2346 = arith.addf %2344, %2345 : vector<8x128xf32>
    %cst_1352 = arith.constant 0.000000e+00 : f32
    %cst_1353 = arith.constant 1.000000e+00 : f32
    %2347 = vector.broadcast %cst_1352 : f32 to vector<8x128xf32>
    %2348 = arith.maximumf %2347, %2346 : vector<8x128xf32>
    %2349 = vector.broadcast %cst_1353 : f32 to vector<8x128xf32>
    %2350 = arith.minimumf %2349, %2348 : vector<8x128xf32>
    %cst_1354 = arith.constant 1.050000e+00 : f32
    %2351 = vector.broadcast %cst_1354 : f32 to vector<8x128xf32>
    %2352 = arith.mulf %2351, %2209 : vector<8x128xf32>
    %2353 = vector.broadcast %2262 : f32 to vector<8x128xf32>
    %2354 = arith.addf %2352, %2353 : vector<8x128xf32>
    %cst_1355 = arith.constant 0.000000e+00 : f32
    %cst_1356 = arith.constant 1.000000e+00 : f32
    %2355 = vector.broadcast %cst_1355 : f32 to vector<8x128xf32>
    %2356 = arith.maximumf %2355, %2354 : vector<8x128xf32>
    %2357 = vector.broadcast %cst_1356 : f32 to vector<8x128xf32>
    %2358 = arith.minimumf %2357, %2356 : vector<8x128xf32>
    %cst_1357 = arith.constant 2.989000e-01 : f32
    %2359 = vector.broadcast %cst_1357 : f32 to vector<8x128xf32>
    %2360 = arith.mulf %2359, %2270 : vector<8x128xf32>
    %cst_1358 = arith.constant 5.870000e-01 : f32
    %2361 = vector.broadcast %cst_1358 : f32 to vector<8x128xf32>
    %2362 = arith.mulf %2361, %2302 : vector<8x128xf32>
    %2363 = arith.addf %2360, %2362 : vector<8x128xf32>
    %cst_1359 = arith.constant 1.140000e-01 : f32
    %2364 = vector.broadcast %cst_1359 : f32 to vector<8x128xf32>
    %2365 = arith.mulf %2364, %2334 : vector<8x128xf32>
    %2366 = arith.addf %2363, %2365 : vector<8x128xf32>
    %cst_1360 = arith.constant 2.989000e-01 : f32
    %2367 = vector.broadcast %cst_1360 : f32 to vector<8x128xf32>
    %2368 = arith.mulf %2367, %2278 : vector<8x128xf32>
    %cst_1361 = arith.constant 5.870000e-01 : f32
    %2369 = vector.broadcast %cst_1361 : f32 to vector<8x128xf32>
    %2370 = arith.mulf %2369, %2310 : vector<8x128xf32>
    %2371 = arith.addf %2368, %2370 : vector<8x128xf32>
    %cst_1362 = arith.constant 1.140000e-01 : f32
    %2372 = vector.broadcast %cst_1362 : f32 to vector<8x128xf32>
    %2373 = arith.mulf %2372, %2342 : vector<8x128xf32>
    %2374 = arith.addf %2371, %2373 : vector<8x128xf32>
    %cst_1363 = arith.constant 2.989000e-01 : f32
    %2375 = vector.broadcast %cst_1363 : f32 to vector<8x128xf32>
    %2376 = arith.mulf %2375, %2286 : vector<8x128xf32>
    %cst_1364 = arith.constant 5.870000e-01 : f32
    %2377 = vector.broadcast %cst_1364 : f32 to vector<8x128xf32>
    %2378 = arith.mulf %2377, %2318 : vector<8x128xf32>
    %2379 = arith.addf %2376, %2378 : vector<8x128xf32>
    %cst_1365 = arith.constant 1.140000e-01 : f32
    %2380 = vector.broadcast %cst_1365 : f32 to vector<8x128xf32>
    %2381 = arith.mulf %2380, %2350 : vector<8x128xf32>
    %2382 = arith.addf %2379, %2381 : vector<8x128xf32>
    %cst_1366 = arith.constant 2.989000e-01 : f32
    %2383 = vector.broadcast %cst_1366 : f32 to vector<8x128xf32>
    %2384 = arith.mulf %2383, %2294 : vector<8x128xf32>
    %cst_1367 = arith.constant 5.870000e-01 : f32
    %2385 = vector.broadcast %cst_1367 : f32 to vector<8x128xf32>
    %2386 = arith.mulf %2385, %2326 : vector<8x128xf32>
    %2387 = arith.addf %2384, %2386 : vector<8x128xf32>
    %cst_1368 = arith.constant 1.140000e-01 : f32
    %2388 = vector.broadcast %cst_1368 : f32 to vector<8x128xf32>
    %2389 = arith.mulf %2388, %2358 : vector<8x128xf32>
    %2390 = arith.addf %2387, %2389 : vector<8x128xf32>
    %cst_1369 = arith.constant 1.000000e-01 : f32
    %2391 = vector.broadcast %cst_1369 : f32 to vector<8x128xf32>
    %2392 = arith.mulf %2391, %2366 : vector<8x128xf32>
    %cst_1370 = arith.constant 1.000000e-01 : f32
    %2393 = vector.broadcast %cst_1370 : f32 to vector<8x128xf32>
    %2394 = arith.mulf %2393, %2374 : vector<8x128xf32>
    %cst_1371 = arith.constant 1.000000e-01 : f32
    %2395 = vector.broadcast %cst_1371 : f32 to vector<8x128xf32>
    %2396 = arith.mulf %2395, %2382 : vector<8x128xf32>
    %cst_1372 = arith.constant 1.000000e-01 : f32
    %2397 = vector.broadcast %cst_1372 : f32 to vector<8x128xf32>
    %2398 = arith.mulf %2397, %2390 : vector<8x128xf32>
    %cst_1373 = arith.constant 0.899999976 : f32
    %2399 = vector.broadcast %cst_1373 : f32 to vector<8x128xf32>
    %2400 = arith.mulf %2399, %2270 : vector<8x128xf32>
    %2401 = arith.addf %2400, %2392 : vector<8x128xf32>
    %cst_1374 = arith.constant 0.000000e+00 : f32
    %cst_1375 = arith.constant 1.000000e+00 : f32
    %2402 = vector.broadcast %cst_1374 : f32 to vector<8x128xf32>
    %2403 = arith.maximumf %2402, %2401 : vector<8x128xf32>
    %2404 = vector.broadcast %cst_1375 : f32 to vector<8x128xf32>
    %2405 = arith.minimumf %2404, %2403 : vector<8x128xf32>
    %cst_1376 = arith.constant 0.899999976 : f32
    %2406 = vector.broadcast %cst_1376 : f32 to vector<8x128xf32>
    %2407 = arith.mulf %2406, %2278 : vector<8x128xf32>
    %2408 = arith.addf %2407, %2394 : vector<8x128xf32>
    %cst_1377 = arith.constant 0.000000e+00 : f32
    %cst_1378 = arith.constant 1.000000e+00 : f32
    %2409 = vector.broadcast %cst_1377 : f32 to vector<8x128xf32>
    %2410 = arith.maximumf %2409, %2408 : vector<8x128xf32>
    %2411 = vector.broadcast %cst_1378 : f32 to vector<8x128xf32>
    %2412 = arith.minimumf %2411, %2410 : vector<8x128xf32>
    %cst_1379 = arith.constant 0.899999976 : f32
    %2413 = vector.broadcast %cst_1379 : f32 to vector<8x128xf32>
    %2414 = arith.mulf %2413, %2286 : vector<8x128xf32>
    %2415 = arith.addf %2414, %2396 : vector<8x128xf32>
    %cst_1380 = arith.constant 0.000000e+00 : f32
    %cst_1381 = arith.constant 1.000000e+00 : f32
    %2416 = vector.broadcast %cst_1380 : f32 to vector<8x128xf32>
    %2417 = arith.maximumf %2416, %2415 : vector<8x128xf32>
    %2418 = vector.broadcast %cst_1381 : f32 to vector<8x128xf32>
    %2419 = arith.minimumf %2418, %2417 : vector<8x128xf32>
    %cst_1382 = arith.constant 0.899999976 : f32
    %2420 = vector.broadcast %cst_1382 : f32 to vector<8x128xf32>
    %2421 = arith.mulf %2420, %2294 : vector<8x128xf32>
    %2422 = arith.addf %2421, %2398 : vector<8x128xf32>
    %cst_1383 = arith.constant 0.000000e+00 : f32
    %cst_1384 = arith.constant 1.000000e+00 : f32
    %2423 = vector.broadcast %cst_1383 : f32 to vector<8x128xf32>
    %2424 = arith.maximumf %2423, %2422 : vector<8x128xf32>
    %2425 = vector.broadcast %cst_1384 : f32 to vector<8x128xf32>
    %2426 = arith.minimumf %2425, %2424 : vector<8x128xf32>
    %cst_1385 = arith.constant 0.899999976 : f32
    %2427 = vector.broadcast %cst_1385 : f32 to vector<8x128xf32>
    %2428 = arith.mulf %2427, %2302 : vector<8x128xf32>
    %2429 = arith.addf %2428, %2392 : vector<8x128xf32>
    %cst_1386 = arith.constant 0.000000e+00 : f32
    %cst_1387 = arith.constant 1.000000e+00 : f32
    %2430 = vector.broadcast %cst_1386 : f32 to vector<8x128xf32>
    %2431 = arith.maximumf %2430, %2429 : vector<8x128xf32>
    %2432 = vector.broadcast %cst_1387 : f32 to vector<8x128xf32>
    %2433 = arith.minimumf %2432, %2431 : vector<8x128xf32>
    %cst_1388 = arith.constant 0.899999976 : f32
    %2434 = vector.broadcast %cst_1388 : f32 to vector<8x128xf32>
    %2435 = arith.mulf %2434, %2310 : vector<8x128xf32>
    %2436 = arith.addf %2435, %2394 : vector<8x128xf32>
    %cst_1389 = arith.constant 0.000000e+00 : f32
    %cst_1390 = arith.constant 1.000000e+00 : f32
    %2437 = vector.broadcast %cst_1389 : f32 to vector<8x128xf32>
    %2438 = arith.maximumf %2437, %2436 : vector<8x128xf32>
    %2439 = vector.broadcast %cst_1390 : f32 to vector<8x128xf32>
    %2440 = arith.minimumf %2439, %2438 : vector<8x128xf32>
    %cst_1391 = arith.constant 0.899999976 : f32
    %2441 = vector.broadcast %cst_1391 : f32 to vector<8x128xf32>
    %2442 = arith.mulf %2441, %2318 : vector<8x128xf32>
    %2443 = arith.addf %2442, %2396 : vector<8x128xf32>
    %cst_1392 = arith.constant 0.000000e+00 : f32
    %cst_1393 = arith.constant 1.000000e+00 : f32
    %2444 = vector.broadcast %cst_1392 : f32 to vector<8x128xf32>
    %2445 = arith.maximumf %2444, %2443 : vector<8x128xf32>
    %2446 = vector.broadcast %cst_1393 : f32 to vector<8x128xf32>
    %2447 = arith.minimumf %2446, %2445 : vector<8x128xf32>
    %cst_1394 = arith.constant 0.899999976 : f32
    %2448 = vector.broadcast %cst_1394 : f32 to vector<8x128xf32>
    %2449 = arith.mulf %2448, %2326 : vector<8x128xf32>
    %2450 = arith.addf %2449, %2398 : vector<8x128xf32>
    %cst_1395 = arith.constant 0.000000e+00 : f32
    %cst_1396 = arith.constant 1.000000e+00 : f32
    %2451 = vector.broadcast %cst_1395 : f32 to vector<8x128xf32>
    %2452 = arith.maximumf %2451, %2450 : vector<8x128xf32>
    %2453 = vector.broadcast %cst_1396 : f32 to vector<8x128xf32>
    %2454 = arith.minimumf %2453, %2452 : vector<8x128xf32>
    %cst_1397 = arith.constant 0.899999976 : f32
    %2455 = vector.broadcast %cst_1397 : f32 to vector<8x128xf32>
    %2456 = arith.mulf %2455, %2334 : vector<8x128xf32>
    %2457 = arith.addf %2456, %2392 : vector<8x128xf32>
    %cst_1398 = arith.constant 0.000000e+00 : f32
    %cst_1399 = arith.constant 1.000000e+00 : f32
    %2458 = vector.broadcast %cst_1398 : f32 to vector<8x128xf32>
    %2459 = arith.maximumf %2458, %2457 : vector<8x128xf32>
    %2460 = vector.broadcast %cst_1399 : f32 to vector<8x128xf32>
    %2461 = arith.minimumf %2460, %2459 : vector<8x128xf32>
    %cst_1400 = arith.constant 0.899999976 : f32
    %2462 = vector.broadcast %cst_1400 : f32 to vector<8x128xf32>
    %2463 = arith.mulf %2462, %2342 : vector<8x128xf32>
    %2464 = arith.addf %2463, %2394 : vector<8x128xf32>
    %cst_1401 = arith.constant 0.000000e+00 : f32
    %cst_1402 = arith.constant 1.000000e+00 : f32
    %2465 = vector.broadcast %cst_1401 : f32 to vector<8x128xf32>
    %2466 = arith.maximumf %2465, %2464 : vector<8x128xf32>
    %2467 = vector.broadcast %cst_1402 : f32 to vector<8x128xf32>
    %2468 = arith.minimumf %2467, %2466 : vector<8x128xf32>
    %cst_1403 = arith.constant 0.899999976 : f32
    %2469 = vector.broadcast %cst_1403 : f32 to vector<8x128xf32>
    %2470 = arith.mulf %2469, %2350 : vector<8x128xf32>
    %2471 = arith.addf %2470, %2396 : vector<8x128xf32>
    %cst_1404 = arith.constant 0.000000e+00 : f32
    %cst_1405 = arith.constant 1.000000e+00 : f32
    %2472 = vector.broadcast %cst_1404 : f32 to vector<8x128xf32>
    %2473 = arith.maximumf %2472, %2471 : vector<8x128xf32>
    %2474 = vector.broadcast %cst_1405 : f32 to vector<8x128xf32>
    %2475 = arith.minimumf %2474, %2473 : vector<8x128xf32>
    %cst_1406 = arith.constant 0.899999976 : f32
    %2476 = vector.broadcast %cst_1406 : f32 to vector<8x128xf32>
    %2477 = arith.mulf %2476, %2358 : vector<8x128xf32>
    %2478 = arith.addf %2477, %2398 : vector<8x128xf32>
    %cst_1407 = arith.constant 0.000000e+00 : f32
    %cst_1408 = arith.constant 1.000000e+00 : f32
    %2479 = vector.broadcast %cst_1407 : f32 to vector<8x128xf32>
    %2480 = arith.maximumf %2479, %2478 : vector<8x128xf32>
    %2481 = vector.broadcast %cst_1408 : f32 to vector<8x128xf32>
    %2482 = arith.minimumf %2481, %2480 : vector<8x128xf32>
    %2483 = arith.addf %2072, %2405 : vector<8x128xf32>
    %2484 = arith.addf %2073, %2412 : vector<8x128xf32>
    %2485 = arith.addf %2074, %2419 : vector<8x128xf32>
    %2486 = arith.addf %2075, %2426 : vector<8x128xf32>
    %2487 = arith.addf %2076, %2433 : vector<8x128xf32>
    %2488 = arith.addf %2077, %2440 : vector<8x128xf32>
    %2489 = arith.addf %2078, %2447 : vector<8x128xf32>
    %2490 = arith.addf %2079, %2454 : vector<8x128xf32>
    %2491 = arith.addf %2080, %2461 : vector<8x128xf32>
    %2492 = arith.addf %2081, %2468 : vector<8x128xf32>
    %2493 = arith.addf %2082, %2475 : vector<8x128xf32>
    %2494 = arith.addf %2083, %2482 : vector<8x128xf32>
    %2495 = arith.subf %1639, %2405 : vector<8x128xf32>
    %2496 = arith.subf %1640, %2412 : vector<8x128xf32>
    %2497 = arith.subf %1641, %2419 : vector<8x128xf32>
    %2498 = arith.subf %1642, %2426 : vector<8x128xf32>
    %2499 = arith.addf %2495, %2496 : vector<8x128xf32>
    %2500 = arith.subf %2495, %2496 : vector<8x128xf32>
    %2501 = arith.addf %2497, %2498 : vector<8x128xf32>
    %2502 = arith.subf %2497, %2498 : vector<8x128xf32>
    %2503 = arith.addf %2500, %2502 : vector<8x128xf32>
    %2504 = math.absf %2503 : vector<8x128xf32>
    %2505 = arith.subf %2499, %2501 : vector<8x128xf32>
    %2506 = math.absf %2505 : vector<8x128xf32>
    %2507 = arith.addf %2504, %2506 : vector<8x128xf32>
    %2508 = arith.subf %2500, %2502 : vector<8x128xf32>
    %2509 = math.absf %2508 : vector<8x128xf32>
    %2510 = arith.addf %2507, %2509 : vector<8x128xf32>
    %2511 = arith.subf %1654, %2433 : vector<8x128xf32>
    %2512 = arith.subf %1655, %2440 : vector<8x128xf32>
    %2513 = arith.subf %1656, %2447 : vector<8x128xf32>
    %2514 = arith.subf %1657, %2454 : vector<8x128xf32>
    %2515 = arith.addf %2511, %2512 : vector<8x128xf32>
    %2516 = arith.subf %2511, %2512 : vector<8x128xf32>
    %2517 = arith.addf %2513, %2514 : vector<8x128xf32>
    %2518 = arith.subf %2513, %2514 : vector<8x128xf32>
    %2519 = arith.addf %2516, %2518 : vector<8x128xf32>
    %2520 = math.absf %2519 : vector<8x128xf32>
    %2521 = arith.subf %2515, %2517 : vector<8x128xf32>
    %2522 = math.absf %2521 : vector<8x128xf32>
    %2523 = arith.addf %2520, %2522 : vector<8x128xf32>
    %2524 = arith.subf %2516, %2518 : vector<8x128xf32>
    %2525 = math.absf %2524 : vector<8x128xf32>
    %2526 = arith.addf %2523, %2525 : vector<8x128xf32>
    %2527 = arith.addf %2510, %2526 : vector<8x128xf32>
    %2528 = arith.subf %1669, %2461 : vector<8x128xf32>
    %2529 = arith.subf %1670, %2468 : vector<8x128xf32>
    %2530 = arith.subf %1671, %2475 : vector<8x128xf32>
    %2531 = arith.subf %1672, %2482 : vector<8x128xf32>
    %2532 = arith.addf %2528, %2529 : vector<8x128xf32>
    %2533 = arith.subf %2528, %2529 : vector<8x128xf32>
    %2534 = arith.addf %2530, %2531 : vector<8x128xf32>
    %2535 = arith.subf %2530, %2531 : vector<8x128xf32>
    %2536 = arith.addf %2533, %2535 : vector<8x128xf32>
    %2537 = math.absf %2536 : vector<8x128xf32>
    %2538 = arith.subf %2532, %2534 : vector<8x128xf32>
    %2539 = math.absf %2538 : vector<8x128xf32>
    %2540 = arith.addf %2537, %2539 : vector<8x128xf32>
    %2541 = arith.subf %2533, %2535 : vector<8x128xf32>
    %2542 = math.absf %2541 : vector<8x128xf32>
    %2543 = arith.addf %2540, %2542 : vector<8x128xf32>
    %2544 = arith.addf %2527, %2543 : vector<8x128xf32>
    %2545 = vector.shape_cast %2544 : vector<8x128xf32> to vector<1x8x128xf32>
    %cst_1409 = arith.constant dense<0.000000e+00> : vector<1xf32>
    %2546 = vector.multi_reduction <add>, %2545, %cst_1409 [1, 2] : vector<1x8x128xf32> to vector<1xf32>
    %2547 = vector.shape_cast %2546 : vector<1xf32> to vector<1x1x1xf32>
    %2548 = vector.extract %2547[0, 0, 0] : f32 from vector<1x1x1xf32>
    %cst_1410 = arith.constant 1.100000e+00 : f32
    %2549 = vector.broadcast %cst_1410 : f32 to vector<8x128xf32>
    %2550 = arith.mulf %1594, %2549 : vector<8x128xf32>
    %cst_1411 = arith.constant 0.000000e+00 : f32
    %cst_1412 = arith.constant 1.000000e+00 : f32
    %2551 = vector.broadcast %cst_1411 : f32 to vector<8x128xf32>
    %2552 = arith.maximumf %2551, %2550 : vector<8x128xf32>
    %2553 = vector.broadcast %cst_1412 : f32 to vector<8x128xf32>
    %2554 = arith.minimumf %2553, %2552 : vector<8x128xf32>
    %cst_1413 = arith.constant 1.100000e+00 : f32
    %2555 = vector.broadcast %cst_1413 : f32 to vector<8x128xf32>
    %2556 = arith.mulf %1595, %2555 : vector<8x128xf32>
    %cst_1414 = arith.constant 0.000000e+00 : f32
    %cst_1415 = arith.constant 1.000000e+00 : f32
    %2557 = vector.broadcast %cst_1414 : f32 to vector<8x128xf32>
    %2558 = arith.maximumf %2557, %2556 : vector<8x128xf32>
    %2559 = vector.broadcast %cst_1415 : f32 to vector<8x128xf32>
    %2560 = arith.minimumf %2559, %2558 : vector<8x128xf32>
    %cst_1416 = arith.constant 1.100000e+00 : f32
    %2561 = vector.broadcast %cst_1416 : f32 to vector<8x128xf32>
    %2562 = arith.mulf %1596, %2561 : vector<8x128xf32>
    %cst_1417 = arith.constant 0.000000e+00 : f32
    %cst_1418 = arith.constant 1.000000e+00 : f32
    %2563 = vector.broadcast %cst_1417 : f32 to vector<8x128xf32>
    %2564 = arith.maximumf %2563, %2562 : vector<8x128xf32>
    %2565 = vector.broadcast %cst_1418 : f32 to vector<8x128xf32>
    %2566 = arith.minimumf %2565, %2564 : vector<8x128xf32>
    %cst_1419 = arith.constant 1.100000e+00 : f32
    %2567 = vector.broadcast %cst_1419 : f32 to vector<8x128xf32>
    %2568 = arith.mulf %1597, %2567 : vector<8x128xf32>
    %cst_1420 = arith.constant 0.000000e+00 : f32
    %cst_1421 = arith.constant 1.000000e+00 : f32
    %2569 = vector.broadcast %cst_1420 : f32 to vector<8x128xf32>
    %2570 = arith.maximumf %2569, %2568 : vector<8x128xf32>
    %2571 = vector.broadcast %cst_1421 : f32 to vector<8x128xf32>
    %2572 = arith.minimumf %2571, %2570 : vector<8x128xf32>
    %cst_1422 = arith.constant 1.100000e+00 : f32
    %2573 = vector.broadcast %cst_1422 : f32 to vector<8x128xf32>
    %2574 = arith.mulf %1609, %2573 : vector<8x128xf32>
    %cst_1423 = arith.constant 0.000000e+00 : f32
    %cst_1424 = arith.constant 1.000000e+00 : f32
    %2575 = vector.broadcast %cst_1423 : f32 to vector<8x128xf32>
    %2576 = arith.maximumf %2575, %2574 : vector<8x128xf32>
    %2577 = vector.broadcast %cst_1424 : f32 to vector<8x128xf32>
    %2578 = arith.minimumf %2577, %2576 : vector<8x128xf32>
    %cst_1425 = arith.constant 1.100000e+00 : f32
    %2579 = vector.broadcast %cst_1425 : f32 to vector<8x128xf32>
    %2580 = arith.mulf %1610, %2579 : vector<8x128xf32>
    %cst_1426 = arith.constant 0.000000e+00 : f32
    %cst_1427 = arith.constant 1.000000e+00 : f32
    %2581 = vector.broadcast %cst_1426 : f32 to vector<8x128xf32>
    %2582 = arith.maximumf %2581, %2580 : vector<8x128xf32>
    %2583 = vector.broadcast %cst_1427 : f32 to vector<8x128xf32>
    %2584 = arith.minimumf %2583, %2582 : vector<8x128xf32>
    %cst_1428 = arith.constant 1.100000e+00 : f32
    %2585 = vector.broadcast %cst_1428 : f32 to vector<8x128xf32>
    %2586 = arith.mulf %1611, %2585 : vector<8x128xf32>
    %cst_1429 = arith.constant 0.000000e+00 : f32
    %cst_1430 = arith.constant 1.000000e+00 : f32
    %2587 = vector.broadcast %cst_1429 : f32 to vector<8x128xf32>
    %2588 = arith.maximumf %2587, %2586 : vector<8x128xf32>
    %2589 = vector.broadcast %cst_1430 : f32 to vector<8x128xf32>
    %2590 = arith.minimumf %2589, %2588 : vector<8x128xf32>
    %cst_1431 = arith.constant 1.100000e+00 : f32
    %2591 = vector.broadcast %cst_1431 : f32 to vector<8x128xf32>
    %2592 = arith.mulf %1612, %2591 : vector<8x128xf32>
    %cst_1432 = arith.constant 0.000000e+00 : f32
    %cst_1433 = arith.constant 1.000000e+00 : f32
    %2593 = vector.broadcast %cst_1432 : f32 to vector<8x128xf32>
    %2594 = arith.maximumf %2593, %2592 : vector<8x128xf32>
    %2595 = vector.broadcast %cst_1433 : f32 to vector<8x128xf32>
    %2596 = arith.minimumf %2595, %2594 : vector<8x128xf32>
    %cst_1434 = arith.constant 1.100000e+00 : f32
    %2597 = vector.broadcast %cst_1434 : f32 to vector<8x128xf32>
    %2598 = arith.mulf %1624, %2597 : vector<8x128xf32>
    %cst_1435 = arith.constant 0.000000e+00 : f32
    %cst_1436 = arith.constant 1.000000e+00 : f32
    %2599 = vector.broadcast %cst_1435 : f32 to vector<8x128xf32>
    %2600 = arith.maximumf %2599, %2598 : vector<8x128xf32>
    %2601 = vector.broadcast %cst_1436 : f32 to vector<8x128xf32>
    %2602 = arith.minimumf %2601, %2600 : vector<8x128xf32>
    %cst_1437 = arith.constant 1.100000e+00 : f32
    %2603 = vector.broadcast %cst_1437 : f32 to vector<8x128xf32>
    %2604 = arith.mulf %1625, %2603 : vector<8x128xf32>
    %cst_1438 = arith.constant 0.000000e+00 : f32
    %cst_1439 = arith.constant 1.000000e+00 : f32
    %2605 = vector.broadcast %cst_1438 : f32 to vector<8x128xf32>
    %2606 = arith.maximumf %2605, %2604 : vector<8x128xf32>
    %2607 = vector.broadcast %cst_1439 : f32 to vector<8x128xf32>
    %2608 = arith.minimumf %2607, %2606 : vector<8x128xf32>
    %cst_1440 = arith.constant 1.100000e+00 : f32
    %2609 = vector.broadcast %cst_1440 : f32 to vector<8x128xf32>
    %2610 = arith.mulf %1626, %2609 : vector<8x128xf32>
    %cst_1441 = arith.constant 0.000000e+00 : f32
    %cst_1442 = arith.constant 1.000000e+00 : f32
    %2611 = vector.broadcast %cst_1441 : f32 to vector<8x128xf32>
    %2612 = arith.maximumf %2611, %2610 : vector<8x128xf32>
    %2613 = vector.broadcast %cst_1442 : f32 to vector<8x128xf32>
    %2614 = arith.minimumf %2613, %2612 : vector<8x128xf32>
    %cst_1443 = arith.constant 1.100000e+00 : f32
    %2615 = vector.broadcast %cst_1443 : f32 to vector<8x128xf32>
    %2616 = arith.mulf %1627, %2615 : vector<8x128xf32>
    %cst_1444 = arith.constant 0.000000e+00 : f32
    %cst_1445 = arith.constant 1.000000e+00 : f32
    %2617 = vector.broadcast %cst_1444 : f32 to vector<8x128xf32>
    %2618 = arith.maximumf %2617, %2616 : vector<8x128xf32>
    %2619 = vector.broadcast %cst_1445 : f32 to vector<8x128xf32>
    %2620 = arith.minimumf %2619, %2618 : vector<8x128xf32>
    %cst_1446 = arith.constant 2.989000e-01 : f32
    %2621 = vector.broadcast %cst_1446 : f32 to vector<8x128xf32>
    %2622 = arith.mulf %2621, %2554 : vector<8x128xf32>
    %cst_1447 = arith.constant 5.870000e-01 : f32
    %2623 = vector.broadcast %cst_1447 : f32 to vector<8x128xf32>
    %2624 = arith.mulf %2623, %2578 : vector<8x128xf32>
    %2625 = arith.addf %2622, %2624 : vector<8x128xf32>
    %cst_1448 = arith.constant 1.140000e-01 : f32
    %2626 = vector.broadcast %cst_1448 : f32 to vector<8x128xf32>
    %2627 = arith.mulf %2626, %2602 : vector<8x128xf32>
    %2628 = arith.addf %2625, %2627 : vector<8x128xf32>
    %cst_1449 = arith.constant 2.989000e-01 : f32
    %2629 = vector.broadcast %cst_1449 : f32 to vector<8x128xf32>
    %2630 = arith.mulf %2629, %2560 : vector<8x128xf32>
    %cst_1450 = arith.constant 5.870000e-01 : f32
    %2631 = vector.broadcast %cst_1450 : f32 to vector<8x128xf32>
    %2632 = arith.mulf %2631, %2584 : vector<8x128xf32>
    %2633 = arith.addf %2630, %2632 : vector<8x128xf32>
    %cst_1451 = arith.constant 1.140000e-01 : f32
    %2634 = vector.broadcast %cst_1451 : f32 to vector<8x128xf32>
    %2635 = arith.mulf %2634, %2608 : vector<8x128xf32>
    %2636 = arith.addf %2633, %2635 : vector<8x128xf32>
    %cst_1452 = arith.constant 2.989000e-01 : f32
    %2637 = vector.broadcast %cst_1452 : f32 to vector<8x128xf32>
    %2638 = arith.mulf %2637, %2566 : vector<8x128xf32>
    %cst_1453 = arith.constant 5.870000e-01 : f32
    %2639 = vector.broadcast %cst_1453 : f32 to vector<8x128xf32>
    %2640 = arith.mulf %2639, %2590 : vector<8x128xf32>
    %2641 = arith.addf %2638, %2640 : vector<8x128xf32>
    %cst_1454 = arith.constant 1.140000e-01 : f32
    %2642 = vector.broadcast %cst_1454 : f32 to vector<8x128xf32>
    %2643 = arith.mulf %2642, %2614 : vector<8x128xf32>
    %2644 = arith.addf %2641, %2643 : vector<8x128xf32>
    %cst_1455 = arith.constant 2.989000e-01 : f32
    %2645 = vector.broadcast %cst_1455 : f32 to vector<8x128xf32>
    %2646 = arith.mulf %2645, %2572 : vector<8x128xf32>
    %cst_1456 = arith.constant 5.870000e-01 : f32
    %2647 = vector.broadcast %cst_1456 : f32 to vector<8x128xf32>
    %2648 = arith.mulf %2647, %2596 : vector<8x128xf32>
    %2649 = arith.addf %2646, %2648 : vector<8x128xf32>
    %cst_1457 = arith.constant 1.140000e-01 : f32
    %2650 = vector.broadcast %cst_1457 : f32 to vector<8x128xf32>
    %2651 = arith.mulf %2650, %2620 : vector<8x128xf32>
    %2652 = arith.addf %2649, %2651 : vector<8x128xf32>
    %2653 = vector.shape_cast %2628 : vector<8x128xf32> to vector<1x8x128xf32>
    %cst_1458 = arith.constant dense<0.000000e+00> : vector<1xf32>
    %2654 = vector.multi_reduction <add>, %2653, %cst_1458 [1, 2] : vector<1x8x128xf32> to vector<1xf32>
    %2655 = vector.shape_cast %2654 : vector<1xf32> to vector<1x1x1xf32>
    %2656 = vector.extract %2655[0, 0, 0] : f32 from vector<1x1x1xf32>
    %2657 = vector.shape_cast %2636 : vector<8x128xf32> to vector<1x8x128xf32>
    %cst_1459 = arith.constant dense<0.000000e+00> : vector<1xf32>
    %2658 = vector.multi_reduction <add>, %2657, %cst_1459 [1, 2] : vector<1x8x128xf32> to vector<1xf32>
    %2659 = vector.shape_cast %2658 : vector<1xf32> to vector<1x1x1xf32>
    %2660 = vector.extract %2659[0, 0, 0] : f32 from vector<1x1x1xf32>
    %2661 = arith.addf %2656, %2660 : f32
    %2662 = vector.shape_cast %2644 : vector<8x128xf32> to vector<1x8x128xf32>
    %cst_1460 = arith.constant dense<0.000000e+00> : vector<1xf32>
    %2663 = vector.multi_reduction <add>, %2662, %cst_1460 [1, 2] : vector<1x8x128xf32> to vector<1xf32>
    %2664 = vector.shape_cast %2663 : vector<1xf32> to vector<1x1x1xf32>
    %2665 = vector.extract %2664[0, 0, 0] : f32 from vector<1x1x1xf32>
    %2666 = arith.addf %2661, %2665 : f32
    %2667 = vector.shape_cast %2652 : vector<8x128xf32> to vector<1x8x128xf32>
    %cst_1461 = arith.constant dense<0.000000e+00> : vector<1xf32>
    %2668 = vector.multi_reduction <add>, %2667, %cst_1461 [1, 2] : vector<1x8x128xf32> to vector<1xf32>
    %2669 = vector.shape_cast %2668 : vector<1xf32> to vector<1x1x1xf32>
    %2670 = vector.extract %2669[0, 0, 0] : f32 from vector<1x1x1xf32>
    %2671 = arith.addf %2666, %2670 : f32
    %cst_1462 = arith.constant 3.906250e-03 : f32
    %2672 = arith.mulf %2671, %cst_1462 : f32
    %cst_1463 = arith.constant 1.000000e-01 : f32
    %2673 = arith.mulf %cst_1463, %2672 : f32
    %cst_1464 = arith.constant 0.899999976 : f32
    %2674 = vector.broadcast %cst_1464 : f32 to vector<8x128xf32>
    %2675 = arith.mulf %2674, %2554 : vector<8x128xf32>
    %2676 = vector.broadcast %2673 : f32 to vector<8x128xf32>
    %2677 = arith.addf %2675, %2676 : vector<8x128xf32>
    %cst_1465 = arith.constant 0.000000e+00 : f32
    %cst_1466 = arith.constant 1.000000e+00 : f32
    %2678 = vector.broadcast %cst_1465 : f32 to vector<8x128xf32>
    %2679 = arith.maximumf %2678, %2677 : vector<8x128xf32>
    %2680 = vector.broadcast %cst_1466 : f32 to vector<8x128xf32>
    %2681 = arith.minimumf %2680, %2679 : vector<8x128xf32>
    %cst_1467 = arith.constant 0.899999976 : f32
    %2682 = vector.broadcast %cst_1467 : f32 to vector<8x128xf32>
    %2683 = arith.mulf %2682, %2560 : vector<8x128xf32>
    %2684 = vector.broadcast %2673 : f32 to vector<8x128xf32>
    %2685 = arith.addf %2683, %2684 : vector<8x128xf32>
    %cst_1468 = arith.constant 0.000000e+00 : f32
    %cst_1469 = arith.constant 1.000000e+00 : f32
    %2686 = vector.broadcast %cst_1468 : f32 to vector<8x128xf32>
    %2687 = arith.maximumf %2686, %2685 : vector<8x128xf32>
    %2688 = vector.broadcast %cst_1469 : f32 to vector<8x128xf32>
    %2689 = arith.minimumf %2688, %2687 : vector<8x128xf32>
    %cst_1470 = arith.constant 0.899999976 : f32
    %2690 = vector.broadcast %cst_1470 : f32 to vector<8x128xf32>
    %2691 = arith.mulf %2690, %2566 : vector<8x128xf32>
    %2692 = vector.broadcast %2673 : f32 to vector<8x128xf32>
    %2693 = arith.addf %2691, %2692 : vector<8x128xf32>
    %cst_1471 = arith.constant 0.000000e+00 : f32
    %cst_1472 = arith.constant 1.000000e+00 : f32
    %2694 = vector.broadcast %cst_1471 : f32 to vector<8x128xf32>
    %2695 = arith.maximumf %2694, %2693 : vector<8x128xf32>
    %2696 = vector.broadcast %cst_1472 : f32 to vector<8x128xf32>
    %2697 = arith.minimumf %2696, %2695 : vector<8x128xf32>
    %cst_1473 = arith.constant 0.899999976 : f32
    %2698 = vector.broadcast %cst_1473 : f32 to vector<8x128xf32>
    %2699 = arith.mulf %2698, %2572 : vector<8x128xf32>
    %2700 = vector.broadcast %2673 : f32 to vector<8x128xf32>
    %2701 = arith.addf %2699, %2700 : vector<8x128xf32>
    %cst_1474 = arith.constant 0.000000e+00 : f32
    %cst_1475 = arith.constant 1.000000e+00 : f32
    %2702 = vector.broadcast %cst_1474 : f32 to vector<8x128xf32>
    %2703 = arith.maximumf %2702, %2701 : vector<8x128xf32>
    %2704 = vector.broadcast %cst_1475 : f32 to vector<8x128xf32>
    %2705 = arith.minimumf %2704, %2703 : vector<8x128xf32>
    %cst_1476 = arith.constant 0.899999976 : f32
    %2706 = vector.broadcast %cst_1476 : f32 to vector<8x128xf32>
    %2707 = arith.mulf %2706, %2578 : vector<8x128xf32>
    %2708 = vector.broadcast %2673 : f32 to vector<8x128xf32>
    %2709 = arith.addf %2707, %2708 : vector<8x128xf32>
    %cst_1477 = arith.constant 0.000000e+00 : f32
    %cst_1478 = arith.constant 1.000000e+00 : f32
    %2710 = vector.broadcast %cst_1477 : f32 to vector<8x128xf32>
    %2711 = arith.maximumf %2710, %2709 : vector<8x128xf32>
    %2712 = vector.broadcast %cst_1478 : f32 to vector<8x128xf32>
    %2713 = arith.minimumf %2712, %2711 : vector<8x128xf32>
    %cst_1479 = arith.constant 0.899999976 : f32
    %2714 = vector.broadcast %cst_1479 : f32 to vector<8x128xf32>
    %2715 = arith.mulf %2714, %2584 : vector<8x128xf32>
    %2716 = vector.broadcast %2673 : f32 to vector<8x128xf32>
    %2717 = arith.addf %2715, %2716 : vector<8x128xf32>
    %cst_1480 = arith.constant 0.000000e+00 : f32
    %cst_1481 = arith.constant 1.000000e+00 : f32
    %2718 = vector.broadcast %cst_1480 : f32 to vector<8x128xf32>
    %2719 = arith.maximumf %2718, %2717 : vector<8x128xf32>
    %2720 = vector.broadcast %cst_1481 : f32 to vector<8x128xf32>
    %2721 = arith.minimumf %2720, %2719 : vector<8x128xf32>
    %cst_1482 = arith.constant 0.899999976 : f32
    %2722 = vector.broadcast %cst_1482 : f32 to vector<8x128xf32>
    %2723 = arith.mulf %2722, %2590 : vector<8x128xf32>
    %2724 = vector.broadcast %2673 : f32 to vector<8x128xf32>
    %2725 = arith.addf %2723, %2724 : vector<8x128xf32>
    %cst_1483 = arith.constant 0.000000e+00 : f32
    %cst_1484 = arith.constant 1.000000e+00 : f32
    %2726 = vector.broadcast %cst_1483 : f32 to vector<8x128xf32>
    %2727 = arith.maximumf %2726, %2725 : vector<8x128xf32>
    %2728 = vector.broadcast %cst_1484 : f32 to vector<8x128xf32>
    %2729 = arith.minimumf %2728, %2727 : vector<8x128xf32>
    %cst_1485 = arith.constant 0.899999976 : f32
    %2730 = vector.broadcast %cst_1485 : f32 to vector<8x128xf32>
    %2731 = arith.mulf %2730, %2596 : vector<8x128xf32>
    %2732 = vector.broadcast %2673 : f32 to vector<8x128xf32>
    %2733 = arith.addf %2731, %2732 : vector<8x128xf32>
    %cst_1486 = arith.constant 0.000000e+00 : f32
    %cst_1487 = arith.constant 1.000000e+00 : f32
    %2734 = vector.broadcast %cst_1486 : f32 to vector<8x128xf32>
    %2735 = arith.maximumf %2734, %2733 : vector<8x128xf32>
    %2736 = vector.broadcast %cst_1487 : f32 to vector<8x128xf32>
    %2737 = arith.minimumf %2736, %2735 : vector<8x128xf32>
    %cst_1488 = arith.constant 0.899999976 : f32
    %2738 = vector.broadcast %cst_1488 : f32 to vector<8x128xf32>
    %2739 = arith.mulf %2738, %2602 : vector<8x128xf32>
    %2740 = vector.broadcast %2673 : f32 to vector<8x128xf32>
    %2741 = arith.addf %2739, %2740 : vector<8x128xf32>
    %cst_1489 = arith.constant 0.000000e+00 : f32
    %cst_1490 = arith.constant 1.000000e+00 : f32
    %2742 = vector.broadcast %cst_1489 : f32 to vector<8x128xf32>
    %2743 = arith.maximumf %2742, %2741 : vector<8x128xf32>
    %2744 = vector.broadcast %cst_1490 : f32 to vector<8x128xf32>
    %2745 = arith.minimumf %2744, %2743 : vector<8x128xf32>
    %cst_1491 = arith.constant 0.899999976 : f32
    %2746 = vector.broadcast %cst_1491 : f32 to vector<8x128xf32>
    %2747 = arith.mulf %2746, %2608 : vector<8x128xf32>
    %2748 = vector.broadcast %2673 : f32 to vector<8x128xf32>
    %2749 = arith.addf %2747, %2748 : vector<8x128xf32>
    %cst_1492 = arith.constant 0.000000e+00 : f32
    %cst_1493 = arith.constant 1.000000e+00 : f32
    %2750 = vector.broadcast %cst_1492 : f32 to vector<8x128xf32>
    %2751 = arith.maximumf %2750, %2749 : vector<8x128xf32>
    %2752 = vector.broadcast %cst_1493 : f32 to vector<8x128xf32>
    %2753 = arith.minimumf %2752, %2751 : vector<8x128xf32>
    %cst_1494 = arith.constant 0.899999976 : f32
    %2754 = vector.broadcast %cst_1494 : f32 to vector<8x128xf32>
    %2755 = arith.mulf %2754, %2614 : vector<8x128xf32>
    %2756 = vector.broadcast %2673 : f32 to vector<8x128xf32>
    %2757 = arith.addf %2755, %2756 : vector<8x128xf32>
    %cst_1495 = arith.constant 0.000000e+00 : f32
    %cst_1496 = arith.constant 1.000000e+00 : f32
    %2758 = vector.broadcast %cst_1495 : f32 to vector<8x128xf32>
    %2759 = arith.maximumf %2758, %2757 : vector<8x128xf32>
    %2760 = vector.broadcast %cst_1496 : f32 to vector<8x128xf32>
    %2761 = arith.minimumf %2760, %2759 : vector<8x128xf32>
    %cst_1497 = arith.constant 0.899999976 : f32
    %2762 = vector.broadcast %cst_1497 : f32 to vector<8x128xf32>
    %2763 = arith.mulf %2762, %2620 : vector<8x128xf32>
    %2764 = vector.broadcast %2673 : f32 to vector<8x128xf32>
    %2765 = arith.addf %2763, %2764 : vector<8x128xf32>
    %cst_1498 = arith.constant 0.000000e+00 : f32
    %cst_1499 = arith.constant 1.000000e+00 : f32
    %2766 = vector.broadcast %cst_1498 : f32 to vector<8x128xf32>
    %2767 = arith.maximumf %2766, %2765 : vector<8x128xf32>
    %2768 = vector.broadcast %cst_1499 : f32 to vector<8x128xf32>
    %2769 = arith.minimumf %2768, %2767 : vector<8x128xf32>
    %cst_1500 = arith.constant 2.989000e-01 : f32
    %2770 = vector.broadcast %cst_1500 : f32 to vector<8x128xf32>
    %2771 = arith.mulf %2770, %2681 : vector<8x128xf32>
    %cst_1501 = arith.constant 5.870000e-01 : f32
    %2772 = vector.broadcast %cst_1501 : f32 to vector<8x128xf32>
    %2773 = arith.mulf %2772, %2713 : vector<8x128xf32>
    %2774 = arith.addf %2771, %2773 : vector<8x128xf32>
    %cst_1502 = arith.constant 1.140000e-01 : f32
    %2775 = vector.broadcast %cst_1502 : f32 to vector<8x128xf32>
    %2776 = arith.mulf %2775, %2745 : vector<8x128xf32>
    %2777 = arith.addf %2774, %2776 : vector<8x128xf32>
    %cst_1503 = arith.constant 2.989000e-01 : f32
    %2778 = vector.broadcast %cst_1503 : f32 to vector<8x128xf32>
    %2779 = arith.mulf %2778, %2689 : vector<8x128xf32>
    %cst_1504 = arith.constant 5.870000e-01 : f32
    %2780 = vector.broadcast %cst_1504 : f32 to vector<8x128xf32>
    %2781 = arith.mulf %2780, %2721 : vector<8x128xf32>
    %2782 = arith.addf %2779, %2781 : vector<8x128xf32>
    %cst_1505 = arith.constant 1.140000e-01 : f32
    %2783 = vector.broadcast %cst_1505 : f32 to vector<8x128xf32>
    %2784 = arith.mulf %2783, %2753 : vector<8x128xf32>
    %2785 = arith.addf %2782, %2784 : vector<8x128xf32>
    %cst_1506 = arith.constant 2.989000e-01 : f32
    %2786 = vector.broadcast %cst_1506 : f32 to vector<8x128xf32>
    %2787 = arith.mulf %2786, %2697 : vector<8x128xf32>
    %cst_1507 = arith.constant 5.870000e-01 : f32
    %2788 = vector.broadcast %cst_1507 : f32 to vector<8x128xf32>
    %2789 = arith.mulf %2788, %2729 : vector<8x128xf32>
    %2790 = arith.addf %2787, %2789 : vector<8x128xf32>
    %cst_1508 = arith.constant 1.140000e-01 : f32
    %2791 = vector.broadcast %cst_1508 : f32 to vector<8x128xf32>
    %2792 = arith.mulf %2791, %2761 : vector<8x128xf32>
    %2793 = arith.addf %2790, %2792 : vector<8x128xf32>
    %cst_1509 = arith.constant 2.989000e-01 : f32
    %2794 = vector.broadcast %cst_1509 : f32 to vector<8x128xf32>
    %2795 = arith.mulf %2794, %2705 : vector<8x128xf32>
    %cst_1510 = arith.constant 5.870000e-01 : f32
    %2796 = vector.broadcast %cst_1510 : f32 to vector<8x128xf32>
    %2797 = arith.mulf %2796, %2737 : vector<8x128xf32>
    %2798 = arith.addf %2795, %2797 : vector<8x128xf32>
    %cst_1511 = arith.constant 1.140000e-01 : f32
    %2799 = vector.broadcast %cst_1511 : f32 to vector<8x128xf32>
    %2800 = arith.mulf %2799, %2769 : vector<8x128xf32>
    %2801 = arith.addf %2798, %2800 : vector<8x128xf32>
    %cst_1512 = arith.constant -5.000000e-02 : f32
    %2802 = vector.broadcast %cst_1512 : f32 to vector<8x128xf32>
    %2803 = arith.mulf %2802, %2777 : vector<8x128xf32>
    %cst_1513 = arith.constant -5.000000e-02 : f32
    %2804 = vector.broadcast %cst_1513 : f32 to vector<8x128xf32>
    %2805 = arith.mulf %2804, %2785 : vector<8x128xf32>
    %cst_1514 = arith.constant -5.000000e-02 : f32
    %2806 = vector.broadcast %cst_1514 : f32 to vector<8x128xf32>
    %2807 = arith.mulf %2806, %2793 : vector<8x128xf32>
    %cst_1515 = arith.constant -5.000000e-02 : f32
    %2808 = vector.broadcast %cst_1515 : f32 to vector<8x128xf32>
    %2809 = arith.mulf %2808, %2801 : vector<8x128xf32>
    %cst_1516 = arith.constant 1.050000e+00 : f32
    %2810 = vector.broadcast %cst_1516 : f32 to vector<8x128xf32>
    %2811 = arith.mulf %2810, %2681 : vector<8x128xf32>
    %2812 = arith.addf %2811, %2803 : vector<8x128xf32>
    %cst_1517 = arith.constant 0.000000e+00 : f32
    %cst_1518 = arith.constant 1.000000e+00 : f32
    %2813 = vector.broadcast %cst_1517 : f32 to vector<8x128xf32>
    %2814 = arith.maximumf %2813, %2812 : vector<8x128xf32>
    %2815 = vector.broadcast %cst_1518 : f32 to vector<8x128xf32>
    %2816 = arith.minimumf %2815, %2814 : vector<8x128xf32>
    %cst_1519 = arith.constant 1.050000e+00 : f32
    %2817 = vector.broadcast %cst_1519 : f32 to vector<8x128xf32>
    %2818 = arith.mulf %2817, %2689 : vector<8x128xf32>
    %2819 = arith.addf %2818, %2805 : vector<8x128xf32>
    %cst_1520 = arith.constant 0.000000e+00 : f32
    %cst_1521 = arith.constant 1.000000e+00 : f32
    %2820 = vector.broadcast %cst_1520 : f32 to vector<8x128xf32>
    %2821 = arith.maximumf %2820, %2819 : vector<8x128xf32>
    %2822 = vector.broadcast %cst_1521 : f32 to vector<8x128xf32>
    %2823 = arith.minimumf %2822, %2821 : vector<8x128xf32>
    %cst_1522 = arith.constant 1.050000e+00 : f32
    %2824 = vector.broadcast %cst_1522 : f32 to vector<8x128xf32>
    %2825 = arith.mulf %2824, %2697 : vector<8x128xf32>
    %2826 = arith.addf %2825, %2807 : vector<8x128xf32>
    %cst_1523 = arith.constant 0.000000e+00 : f32
    %cst_1524 = arith.constant 1.000000e+00 : f32
    %2827 = vector.broadcast %cst_1523 : f32 to vector<8x128xf32>
    %2828 = arith.maximumf %2827, %2826 : vector<8x128xf32>
    %2829 = vector.broadcast %cst_1524 : f32 to vector<8x128xf32>
    %2830 = arith.minimumf %2829, %2828 : vector<8x128xf32>
    %cst_1525 = arith.constant 1.050000e+00 : f32
    %2831 = vector.broadcast %cst_1525 : f32 to vector<8x128xf32>
    %2832 = arith.mulf %2831, %2705 : vector<8x128xf32>
    %2833 = arith.addf %2832, %2809 : vector<8x128xf32>
    %cst_1526 = arith.constant 0.000000e+00 : f32
    %cst_1527 = arith.constant 1.000000e+00 : f32
    %2834 = vector.broadcast %cst_1526 : f32 to vector<8x128xf32>
    %2835 = arith.maximumf %2834, %2833 : vector<8x128xf32>
    %2836 = vector.broadcast %cst_1527 : f32 to vector<8x128xf32>
    %2837 = arith.minimumf %2836, %2835 : vector<8x128xf32>
    %cst_1528 = arith.constant 1.050000e+00 : f32
    %2838 = vector.broadcast %cst_1528 : f32 to vector<8x128xf32>
    %2839 = arith.mulf %2838, %2713 : vector<8x128xf32>
    %2840 = arith.addf %2839, %2803 : vector<8x128xf32>
    %cst_1529 = arith.constant 0.000000e+00 : f32
    %cst_1530 = arith.constant 1.000000e+00 : f32
    %2841 = vector.broadcast %cst_1529 : f32 to vector<8x128xf32>
    %2842 = arith.maximumf %2841, %2840 : vector<8x128xf32>
    %2843 = vector.broadcast %cst_1530 : f32 to vector<8x128xf32>
    %2844 = arith.minimumf %2843, %2842 : vector<8x128xf32>
    %cst_1531 = arith.constant 1.050000e+00 : f32
    %2845 = vector.broadcast %cst_1531 : f32 to vector<8x128xf32>
    %2846 = arith.mulf %2845, %2721 : vector<8x128xf32>
    %2847 = arith.addf %2846, %2805 : vector<8x128xf32>
    %cst_1532 = arith.constant 0.000000e+00 : f32
    %cst_1533 = arith.constant 1.000000e+00 : f32
    %2848 = vector.broadcast %cst_1532 : f32 to vector<8x128xf32>
    %2849 = arith.maximumf %2848, %2847 : vector<8x128xf32>
    %2850 = vector.broadcast %cst_1533 : f32 to vector<8x128xf32>
    %2851 = arith.minimumf %2850, %2849 : vector<8x128xf32>
    %cst_1534 = arith.constant 1.050000e+00 : f32
    %2852 = vector.broadcast %cst_1534 : f32 to vector<8x128xf32>
    %2853 = arith.mulf %2852, %2729 : vector<8x128xf32>
    %2854 = arith.addf %2853, %2807 : vector<8x128xf32>
    %cst_1535 = arith.constant 0.000000e+00 : f32
    %cst_1536 = arith.constant 1.000000e+00 : f32
    %2855 = vector.broadcast %cst_1535 : f32 to vector<8x128xf32>
    %2856 = arith.maximumf %2855, %2854 : vector<8x128xf32>
    %2857 = vector.broadcast %cst_1536 : f32 to vector<8x128xf32>
    %2858 = arith.minimumf %2857, %2856 : vector<8x128xf32>
    %cst_1537 = arith.constant 1.050000e+00 : f32
    %2859 = vector.broadcast %cst_1537 : f32 to vector<8x128xf32>
    %2860 = arith.mulf %2859, %2737 : vector<8x128xf32>
    %2861 = arith.addf %2860, %2809 : vector<8x128xf32>
    %cst_1538 = arith.constant 0.000000e+00 : f32
    %cst_1539 = arith.constant 1.000000e+00 : f32
    %2862 = vector.broadcast %cst_1538 : f32 to vector<8x128xf32>
    %2863 = arith.maximumf %2862, %2861 : vector<8x128xf32>
    %2864 = vector.broadcast %cst_1539 : f32 to vector<8x128xf32>
    %2865 = arith.minimumf %2864, %2863 : vector<8x128xf32>
    %cst_1540 = arith.constant 1.050000e+00 : f32
    %2866 = vector.broadcast %cst_1540 : f32 to vector<8x128xf32>
    %2867 = arith.mulf %2866, %2745 : vector<8x128xf32>
    %2868 = arith.addf %2867, %2803 : vector<8x128xf32>
    %cst_1541 = arith.constant 0.000000e+00 : f32
    %cst_1542 = arith.constant 1.000000e+00 : f32
    %2869 = vector.broadcast %cst_1541 : f32 to vector<8x128xf32>
    %2870 = arith.maximumf %2869, %2868 : vector<8x128xf32>
    %2871 = vector.broadcast %cst_1542 : f32 to vector<8x128xf32>
    %2872 = arith.minimumf %2871, %2870 : vector<8x128xf32>
    %cst_1543 = arith.constant 1.050000e+00 : f32
    %2873 = vector.broadcast %cst_1543 : f32 to vector<8x128xf32>
    %2874 = arith.mulf %2873, %2753 : vector<8x128xf32>
    %2875 = arith.addf %2874, %2805 : vector<8x128xf32>
    %cst_1544 = arith.constant 0.000000e+00 : f32
    %cst_1545 = arith.constant 1.000000e+00 : f32
    %2876 = vector.broadcast %cst_1544 : f32 to vector<8x128xf32>
    %2877 = arith.maximumf %2876, %2875 : vector<8x128xf32>
    %2878 = vector.broadcast %cst_1545 : f32 to vector<8x128xf32>
    %2879 = arith.minimumf %2878, %2877 : vector<8x128xf32>
    %cst_1546 = arith.constant 1.050000e+00 : f32
    %2880 = vector.broadcast %cst_1546 : f32 to vector<8x128xf32>
    %2881 = arith.mulf %2880, %2761 : vector<8x128xf32>
    %2882 = arith.addf %2881, %2807 : vector<8x128xf32>
    %cst_1547 = arith.constant 0.000000e+00 : f32
    %cst_1548 = arith.constant 1.000000e+00 : f32
    %2883 = vector.broadcast %cst_1547 : f32 to vector<8x128xf32>
    %2884 = arith.maximumf %2883, %2882 : vector<8x128xf32>
    %2885 = vector.broadcast %cst_1548 : f32 to vector<8x128xf32>
    %2886 = arith.minimumf %2885, %2884 : vector<8x128xf32>
    %cst_1549 = arith.constant 1.050000e+00 : f32
    %2887 = vector.broadcast %cst_1549 : f32 to vector<8x128xf32>
    %2888 = arith.mulf %2887, %2769 : vector<8x128xf32>
    %2889 = arith.addf %2888, %2809 : vector<8x128xf32>
    %cst_1550 = arith.constant 0.000000e+00 : f32
    %cst_1551 = arith.constant 1.000000e+00 : f32
    %2890 = vector.broadcast %cst_1550 : f32 to vector<8x128xf32>
    %2891 = arith.maximumf %2890, %2889 : vector<8x128xf32>
    %2892 = vector.broadcast %cst_1551 : f32 to vector<8x128xf32>
    %2893 = arith.minimumf %2892, %2891 : vector<8x128xf32>
    %2894 = arith.addf %2483, %2816 : vector<8x128xf32>
    %2895 = arith.addf %2484, %2823 : vector<8x128xf32>
    %2896 = arith.addf %2485, %2830 : vector<8x128xf32>
    %2897 = arith.addf %2486, %2837 : vector<8x128xf32>
    %2898 = arith.addf %2487, %2844 : vector<8x128xf32>
    %2899 = arith.addf %2488, %2851 : vector<8x128xf32>
    %2900 = arith.addf %2489, %2858 : vector<8x128xf32>
    %2901 = arith.addf %2490, %2865 : vector<8x128xf32>
    %2902 = arith.addf %2491, %2872 : vector<8x128xf32>
    %2903 = arith.addf %2492, %2879 : vector<8x128xf32>
    %2904 = arith.addf %2493, %2886 : vector<8x128xf32>
    %2905 = arith.addf %2494, %2893 : vector<8x128xf32>
    %2906 = arith.subf %1639, %2816 : vector<8x128xf32>
    %2907 = arith.subf %1640, %2823 : vector<8x128xf32>
    %2908 = arith.subf %1641, %2830 : vector<8x128xf32>
    %2909 = arith.subf %1642, %2837 : vector<8x128xf32>
    %2910 = arith.addf %2906, %2907 : vector<8x128xf32>
    %2911 = arith.subf %2906, %2907 : vector<8x128xf32>
    %2912 = arith.addf %2908, %2909 : vector<8x128xf32>
    %2913 = arith.subf %2908, %2909 : vector<8x128xf32>
    %2914 = arith.addf %2911, %2913 : vector<8x128xf32>
    %2915 = math.absf %2914 : vector<8x128xf32>
    %2916 = arith.subf %2910, %2912 : vector<8x128xf32>
    %2917 = math.absf %2916 : vector<8x128xf32>
    %2918 = arith.addf %2915, %2917 : vector<8x128xf32>
    %2919 = arith.subf %2911, %2913 : vector<8x128xf32>
    %2920 = math.absf %2919 : vector<8x128xf32>
    %2921 = arith.addf %2918, %2920 : vector<8x128xf32>
    %2922 = arith.subf %1654, %2844 : vector<8x128xf32>
    %2923 = arith.subf %1655, %2851 : vector<8x128xf32>
    %2924 = arith.subf %1656, %2858 : vector<8x128xf32>
    %2925 = arith.subf %1657, %2865 : vector<8x128xf32>
    %2926 = arith.addf %2922, %2923 : vector<8x128xf32>
    %2927 = arith.subf %2922, %2923 : vector<8x128xf32>
    %2928 = arith.addf %2924, %2925 : vector<8x128xf32>
    %2929 = arith.subf %2924, %2925 : vector<8x128xf32>
    %2930 = arith.addf %2927, %2929 : vector<8x128xf32>
    %2931 = math.absf %2930 : vector<8x128xf32>
    %2932 = arith.subf %2926, %2928 : vector<8x128xf32>
    %2933 = math.absf %2932 : vector<8x128xf32>
    %2934 = arith.addf %2931, %2933 : vector<8x128xf32>
    %2935 = arith.subf %2927, %2929 : vector<8x128xf32>
    %2936 = math.absf %2935 : vector<8x128xf32>
    %2937 = arith.addf %2934, %2936 : vector<8x128xf32>
    %2938 = arith.addf %2921, %2937 : vector<8x128xf32>
    %2939 = arith.subf %1669, %2872 : vector<8x128xf32>
    %2940 = arith.subf %1670, %2879 : vector<8x128xf32>
    %2941 = arith.subf %1671, %2886 : vector<8x128xf32>
    %2942 = arith.subf %1672, %2893 : vector<8x128xf32>
    %2943 = arith.addf %2939, %2940 : vector<8x128xf32>
    %2944 = arith.subf %2939, %2940 : vector<8x128xf32>
    %2945 = arith.addf %2941, %2942 : vector<8x128xf32>
    %2946 = arith.subf %2941, %2942 : vector<8x128xf32>
    %2947 = arith.addf %2944, %2946 : vector<8x128xf32>
    %2948 = math.absf %2947 : vector<8x128xf32>
    %2949 = arith.subf %2943, %2945 : vector<8x128xf32>
    %2950 = math.absf %2949 : vector<8x128xf32>
    %2951 = arith.addf %2948, %2950 : vector<8x128xf32>
    %2952 = arith.subf %2944, %2946 : vector<8x128xf32>
    %2953 = math.absf %2952 : vector<8x128xf32>
    %2954 = arith.addf %2951, %2953 : vector<8x128xf32>
    %2955 = arith.addf %2938, %2954 : vector<8x128xf32>
    %2956 = vector.shape_cast %2955 : vector<8x128xf32> to vector<1x8x128xf32>
    %cst_1552 = arith.constant dense<0.000000e+00> : vector<1xf32>
    %2957 = vector.multi_reduction <add>, %2956, %cst_1552 [1, 2] : vector<1x8x128xf32> to vector<1xf32>
    %2958 = vector.shape_cast %2957 : vector<1xf32> to vector<1x1x1xf32>
    %2959 = vector.extract %2958[0, 0, 0] : f32 from vector<1x1x1xf32>
    %cst_1553 = arith.constant 2.500000e-01 : f32
    %2960 = vector.broadcast %cst_1553 : f32 to vector<8x128xf32>
    %2961 = arith.mulf %2894, %2960 : vector<8x128xf32>
    %c0_1554 = arith.constant 0 : index
    %c0_1555 = arith.constant 0 : index
    %c0_1556 = arith.constant 0 : index
    %c0_1557 = arith.constant 0 : index
    %c0_1558 = arith.constant 0 : index
    %2962 = vector.load %arg4[%c0_1554, %c0_1555, %c0_1556, %c0_1557, %c0_1558] : memref<1x2x2x8x384xf32, #tpu.memory_space<vmem>>, vector<1x1x1x8x384xf32>
    %2963 = vector.shape_cast %2962 : vector<1x1x1x8x384xf32> to vector<8x384xf32>
    %2964 = vector.extract_strided_slice %2963 {offsets = [0, 0], sizes = [8, 128], strides = [1, 1]} : vector<8x384xf32> to vector<8x128xf32>
    %2965 = arith.subf %2961, %2964 : vector<8x128xf32>
    %cst_1559 = arith.constant 2.500000e-01 : f32
    %2966 = vector.broadcast %cst_1559 : f32 to vector<8x128xf32>
    %2967 = arith.mulf %2895, %2966 : vector<8x128xf32>
    %c0_1560 = arith.constant 0 : index
    %c0_1561 = arith.constant 0 : index
    %c1_1562 = arith.constant 1 : index
    %c0_1563 = arith.constant 0 : index
    %c0_1564 = arith.constant 0 : index
    %2968 = vector.load %arg4[%c0_1560, %c0_1561, %c1_1562, %c0_1563, %c0_1564] : memref<1x2x2x8x384xf32, #tpu.memory_space<vmem>>, vector<1x1x1x8x384xf32>
    %2969 = vector.shape_cast %2968 : vector<1x1x1x8x384xf32> to vector<8x384xf32>
    %2970 = vector.extract_strided_slice %2969 {offsets = [0, 0], sizes = [8, 128], strides = [1, 1]} : vector<8x384xf32> to vector<8x128xf32>
    %2971 = arith.subf %2967, %2970 : vector<8x128xf32>
    %cst_1565 = arith.constant 2.500000e-01 : f32
    %2972 = vector.broadcast %cst_1565 : f32 to vector<8x128xf32>
    %2973 = arith.mulf %2896, %2972 : vector<8x128xf32>
    %c0_1566 = arith.constant 0 : index
    %c1_1567 = arith.constant 1 : index
    %c0_1568 = arith.constant 0 : index
    %c0_1569 = arith.constant 0 : index
    %c0_1570 = arith.constant 0 : index
    %2974 = vector.load %arg4[%c0_1566, %c1_1567, %c0_1568, %c0_1569, %c0_1570] : memref<1x2x2x8x384xf32, #tpu.memory_space<vmem>>, vector<1x1x1x8x384xf32>
    %2975 = vector.shape_cast %2974 : vector<1x1x1x8x384xf32> to vector<8x384xf32>
    %2976 = vector.extract_strided_slice %2975 {offsets = [0, 0], sizes = [8, 128], strides = [1, 1]} : vector<8x384xf32> to vector<8x128xf32>
    %2977 = arith.subf %2973, %2976 : vector<8x128xf32>
    %cst_1571 = arith.constant 2.500000e-01 : f32
    %2978 = vector.broadcast %cst_1571 : f32 to vector<8x128xf32>
    %2979 = arith.mulf %2897, %2978 : vector<8x128xf32>
    %c0_1572 = arith.constant 0 : index
    %c1_1573 = arith.constant 1 : index
    %c1_1574 = arith.constant 1 : index
    %c0_1575 = arith.constant 0 : index
    %c0_1576 = arith.constant 0 : index
    %2980 = vector.load %arg4[%c0_1572, %c1_1573, %c1_1574, %c0_1575, %c0_1576] : memref<1x2x2x8x384xf32, #tpu.memory_space<vmem>>, vector<1x1x1x8x384xf32>
    %2981 = vector.shape_cast %2980 : vector<1x1x1x8x384xf32> to vector<8x384xf32>
    %2982 = vector.extract_strided_slice %2981 {offsets = [0, 0], sizes = [8, 128], strides = [1, 1]} : vector<8x384xf32> to vector<8x128xf32>
    %2983 = arith.subf %2979, %2982 : vector<8x128xf32>
    %2984 = arith.addf %2965, %2971 : vector<8x128xf32>
    %2985 = arith.subf %2965, %2971 : vector<8x128xf32>
    %2986 = arith.addf %2977, %2983 : vector<8x128xf32>
    %2987 = arith.subf %2977, %2983 : vector<8x128xf32>
    %2988 = arith.addf %2985, %2987 : vector<8x128xf32>
    %2989 = math.absf %2988 : vector<8x128xf32>
    %2990 = arith.subf %2984, %2986 : vector<8x128xf32>
    %2991 = math.absf %2990 : vector<8x128xf32>
    %2992 = arith.addf %2989, %2991 : vector<8x128xf32>
    %2993 = arith.subf %2985, %2987 : vector<8x128xf32>
    %2994 = math.absf %2993 : vector<8x128xf32>
    %2995 = arith.addf %2992, %2994 : vector<8x128xf32>
    %cst_1577 = arith.constant 2.500000e-01 : f32
    %2996 = vector.broadcast %cst_1577 : f32 to vector<8x128xf32>
    %2997 = arith.mulf %2898, %2996 : vector<8x128xf32>
    %c0_1578 = arith.constant 0 : index
    %c0_1579 = arith.constant 0 : index
    %c0_1580 = arith.constant 0 : index
    %c0_1581 = arith.constant 0 : index
    %c0_1582 = arith.constant 0 : index
    %2998 = vector.load %arg4[%c0_1578, %c0_1579, %c0_1580, %c0_1581, %c0_1582] : memref<1x2x2x8x384xf32, #tpu.memory_space<vmem>>, vector<1x1x1x8x384xf32>
    %2999 = vector.shape_cast %2998 : vector<1x1x1x8x384xf32> to vector<8x384xf32>
    %3000 = vector.extract_strided_slice %2999 {offsets = [0, 128], sizes = [8, 128], strides = [1, 1]} : vector<8x384xf32> to vector<8x128xf32>
    %3001 = arith.subf %2997, %3000 : vector<8x128xf32>
    %cst_1583 = arith.constant 2.500000e-01 : f32
    %3002 = vector.broadcast %cst_1583 : f32 to vector<8x128xf32>
    %3003 = arith.mulf %2899, %3002 : vector<8x128xf32>
    %c0_1584 = arith.constant 0 : index
    %c0_1585 = arith.constant 0 : index
    %c1_1586 = arith.constant 1 : index
    %c0_1587 = arith.constant 0 : index
    %c0_1588 = arith.constant 0 : index
    %3004 = vector.load %arg4[%c0_1584, %c0_1585, %c1_1586, %c0_1587, %c0_1588] : memref<1x2x2x8x384xf32, #tpu.memory_space<vmem>>, vector<1x1x1x8x384xf32>
    %3005 = vector.shape_cast %3004 : vector<1x1x1x8x384xf32> to vector<8x384xf32>
    %3006 = vector.extract_strided_slice %3005 {offsets = [0, 128], sizes = [8, 128], strides = [1, 1]} : vector<8x384xf32> to vector<8x128xf32>
    %3007 = arith.subf %3003, %3006 : vector<8x128xf32>
    %cst_1589 = arith.constant 2.500000e-01 : f32
    %3008 = vector.broadcast %cst_1589 : f32 to vector<8x128xf32>
    %3009 = arith.mulf %2900, %3008 : vector<8x128xf32>
    %c0_1590 = arith.constant 0 : index
    %c1_1591 = arith.constant 1 : index
    %c0_1592 = arith.constant 0 : index
    %c0_1593 = arith.constant 0 : index
    %c0_1594 = arith.constant 0 : index
    %3010 = vector.load %arg4[%c0_1590, %c1_1591, %c0_1592, %c0_1593, %c0_1594] : memref<1x2x2x8x384xf32, #tpu.memory_space<vmem>>, vector<1x1x1x8x384xf32>
    %3011 = vector.shape_cast %3010 : vector<1x1x1x8x384xf32> to vector<8x384xf32>
    %3012 = vector.extract_strided_slice %3011 {offsets = [0, 128], sizes = [8, 128], strides = [1, 1]} : vector<8x384xf32> to vector<8x128xf32>
    %3013 = arith.subf %3009, %3012 : vector<8x128xf32>
    %cst_1595 = arith.constant 2.500000e-01 : f32
    %3014 = vector.broadcast %cst_1595 : f32 to vector<8x128xf32>
    %3015 = arith.mulf %2901, %3014 : vector<8x128xf32>
    %c0_1596 = arith.constant 0 : index
    %c1_1597 = arith.constant 1 : index
    %c1_1598 = arith.constant 1 : index
    %c0_1599 = arith.constant 0 : index
    %c0_1600 = arith.constant 0 : index
    %3016 = vector.load %arg4[%c0_1596, %c1_1597, %c1_1598, %c0_1599, %c0_1600] : memref<1x2x2x8x384xf32, #tpu.memory_space<vmem>>, vector<1x1x1x8x384xf32>
    %3017 = vector.shape_cast %3016 : vector<1x1x1x8x384xf32> to vector<8x384xf32>
    %3018 = vector.extract_strided_slice %3017 {offsets = [0, 128], sizes = [8, 128], strides = [1, 1]} : vector<8x384xf32> to vector<8x128xf32>
    %3019 = arith.subf %3015, %3018 : vector<8x128xf32>
    %3020 = arith.addf %3001, %3007 : vector<8x128xf32>
    %3021 = arith.subf %3001, %3007 : vector<8x128xf32>
    %3022 = arith.addf %3013, %3019 : vector<8x128xf32>
    %3023 = arith.subf %3013, %3019 : vector<8x128xf32>
    %3024 = arith.addf %3021, %3023 : vector<8x128xf32>
    %3025 = math.absf %3024 : vector<8x128xf32>
    %3026 = arith.subf %3020, %3022 : vector<8x128xf32>
    %3027 = math.absf %3026 : vector<8x128xf32>
    %3028 = arith.addf %3025, %3027 : vector<8x128xf32>
    %3029 = arith.subf %3021, %3023 : vector<8x128xf32>
    %3030 = math.absf %3029 : vector<8x128xf32>
    %3031 = arith.addf %3028, %3030 : vector<8x128xf32>
    %3032 = arith.addf %2995, %3031 : vector<8x128xf32>
    %cst_1601 = arith.constant 2.500000e-01 : f32
    %3033 = vector.broadcast %cst_1601 : f32 to vector<8x128xf32>
    %3034 = arith.mulf %2902, %3033 : vector<8x128xf32>
    %c0_1602 = arith.constant 0 : index
    %c0_1603 = arith.constant 0 : index
    %c0_1604 = arith.constant 0 : index
    %c0_1605 = arith.constant 0 : index
    %c0_1606 = arith.constant 0 : index
    %3035 = vector.load %arg4[%c0_1602, %c0_1603, %c0_1604, %c0_1605, %c0_1606] : memref<1x2x2x8x384xf32, #tpu.memory_space<vmem>>, vector<1x1x1x8x384xf32>
    %3036 = vector.shape_cast %3035 : vector<1x1x1x8x384xf32> to vector<8x384xf32>
    %3037 = vector.extract_strided_slice %3036 {offsets = [0, 256], sizes = [8, 128], strides = [1, 1]} : vector<8x384xf32> to vector<8x128xf32>
    %3038 = arith.subf %3034, %3037 : vector<8x128xf32>
    %cst_1607 = arith.constant 2.500000e-01 : f32
    %3039 = vector.broadcast %cst_1607 : f32 to vector<8x128xf32>
    %3040 = arith.mulf %2903, %3039 : vector<8x128xf32>
    %c0_1608 = arith.constant 0 : index
    %c0_1609 = arith.constant 0 : index
    %c1_1610 = arith.constant 1 : index
    %c0_1611 = arith.constant 0 : index
    %c0_1612 = arith.constant 0 : index
    %3041 = vector.load %arg4[%c0_1608, %c0_1609, %c1_1610, %c0_1611, %c0_1612] : memref<1x2x2x8x384xf32, #tpu.memory_space<vmem>>, vector<1x1x1x8x384xf32>
    %3042 = vector.shape_cast %3041 : vector<1x1x1x8x384xf32> to vector<8x384xf32>
    %3043 = vector.extract_strided_slice %3042 {offsets = [0, 256], sizes = [8, 128], strides = [1, 1]} : vector<8x384xf32> to vector<8x128xf32>
    %3044 = arith.subf %3040, %3043 : vector<8x128xf32>
    %cst_1613 = arith.constant 2.500000e-01 : f32
    %3045 = vector.broadcast %cst_1613 : f32 to vector<8x128xf32>
    %3046 = arith.mulf %2904, %3045 : vector<8x128xf32>
    %c0_1614 = arith.constant 0 : index
    %c1_1615 = arith.constant 1 : index
    %c0_1616 = arith.constant 0 : index
    %c0_1617 = arith.constant 0 : index
    %c0_1618 = arith.constant 0 : index
    %3047 = vector.load %arg4[%c0_1614, %c1_1615, %c0_1616, %c0_1617, %c0_1618] : memref<1x2x2x8x384xf32, #tpu.memory_space<vmem>>, vector<1x1x1x8x384xf32>
    %3048 = vector.shape_cast %3047 : vector<1x1x1x8x384xf32> to vector<8x384xf32>
    %3049 = vector.extract_strided_slice %3048 {offsets = [0, 256], sizes = [8, 128], strides = [1, 1]} : vector<8x384xf32> to vector<8x128xf32>
    %3050 = arith.subf %3046, %3049 : vector<8x128xf32>
    %cst_1619 = arith.constant 2.500000e-01 : f32
    %3051 = vector.broadcast %cst_1619 : f32 to vector<8x128xf32>
    %3052 = arith.mulf %2905, %3051 : vector<8x128xf32>
    %c0_1620 = arith.constant 0 : index
    %c1_1621 = arith.constant 1 : index
    %c1_1622 = arith.constant 1 : index
    %c0_1623 = arith.constant 0 : index
    %c0_1624 = arith.constant 0 : index
    %3053 = vector.load %arg4[%c0_1620, %c1_1621, %c1_1622, %c0_1623, %c0_1624] : memref<1x2x2x8x384xf32, #tpu.memory_space<vmem>>, vector<1x1x1x8x384xf32>
    %3054 = vector.shape_cast %3053 : vector<1x1x1x8x384xf32> to vector<8x384xf32>
    %3055 = vector.extract_strided_slice %3054 {offsets = [0, 256], sizes = [8, 128], strides = [1, 1]} : vector<8x384xf32> to vector<8x128xf32>
    %3056 = arith.subf %3052, %3055 : vector<8x128xf32>
    %3057 = arith.addf %3038, %3044 : vector<8x128xf32>
    %3058 = arith.subf %3038, %3044 : vector<8x128xf32>
    %3059 = arith.addf %3050, %3056 : vector<8x128xf32>
    %3060 = arith.subf %3050, %3056 : vector<8x128xf32>
    %3061 = arith.addf %3058, %3060 : vector<8x128xf32>
    %3062 = math.absf %3061 : vector<8x128xf32>
    %3063 = arith.subf %3057, %3059 : vector<8x128xf32>
    %3064 = math.absf %3063 : vector<8x128xf32>
    %3065 = arith.addf %3062, %3064 : vector<8x128xf32>
    %3066 = arith.subf %3058, %3060 : vector<8x128xf32>
    %3067 = math.absf %3066 : vector<8x128xf32>
    %3068 = arith.addf %3065, %3067 : vector<8x128xf32>
    %3069 = arith.addf %3032, %3068 : vector<8x128xf32>
    %3070 = vector.shape_cast %3069 : vector<8x128xf32> to vector<1x8x128xf32>
    %cst_1625 = arith.constant dense<0.000000e+00> : vector<1xf32>
    %3071 = vector.multi_reduction <add>, %3070, %cst_1625 [1, 2] : vector<1x8x128xf32> to vector<1xf32>
    %3072 = vector.shape_cast %3071 : vector<1xf32> to vector<1x1x1xf32>
    %3073 = vector.extract %3072[0, 0, 0] : f32 from vector<1x1x1xf32>
    %3074 = tpu.iota {dimensions = array<i32: 1>} : vector<8x128xi32>
    %cst_1626 = arith.constant 0.000000e+00 : f32
    %3075 = vector.broadcast %cst_1626 : f32 to vector<8x128xf32>
    %c0_i32 = arith.constant 0 : i32
    %3076 = vector.broadcast %c0_i32 : i32 to vector<8x128xi32>
    %3077 = arith.cmpi eq, %3074, %3076 : vector<8x128xi32>
    %cst_1627 = arith.constant 0.000000e+00 : f32
    %3078 = vector.broadcast %109 : f32 to vector<8x128xf32>
    %3079 = vector.broadcast %cst_1627 : f32 to vector<8x128xf32>
    %3080 = arith.select %3077, %3078, %3079 : vector<8x128xi1>, vector<8x128xf32>
    %3081 = arith.addf %3075, %3080 : vector<8x128xf32>
    %c1_i32 = arith.constant 1 : i32
    %3082 = vector.broadcast %c1_i32 : i32 to vector<8x128xi32>
    %3083 = arith.cmpi eq, %3074, %3082 : vector<8x128xi32>
    %cst_1628 = arith.constant 0.000000e+00 : f32
    %3084 = vector.broadcast %113 : f32 to vector<8x128xf32>
    %3085 = vector.broadcast %cst_1628 : f32 to vector<8x128xf32>
    %3086 = arith.select %3083, %3084, %3085 : vector<8x128xi1>, vector<8x128xf32>
    %3087 = arith.addf %3081, %3086 : vector<8x128xf32>
    %c2_i32 = arith.constant 2 : i32
    %3088 = vector.broadcast %c2_i32 : i32 to vector<8x128xi32>
    %3089 = arith.cmpi eq, %3074, %3088 : vector<8x128xi32>
    %cst_1629 = arith.constant 0.000000e+00 : f32
    %3090 = vector.broadcast %215 : f32 to vector<8x128xf32>
    %3091 = vector.broadcast %cst_1629 : f32 to vector<8x128xf32>
    %3092 = arith.select %3089, %3090, %3091 : vector<8x128xi1>, vector<8x128xf32>
    %3093 = arith.addf %3087, %3092 : vector<8x128xf32>
    %c3_i32 = arith.constant 3 : i32
    %3094 = vector.broadcast %c3_i32 : i32 to vector<8x128xi32>
    %3095 = arith.cmpi eq, %3074, %3094 : vector<8x128xi32>
    %cst_1630 = arith.constant 0.000000e+00 : f32
    %3096 = vector.broadcast %662 : f32 to vector<8x128xf32>
    %3097 = vector.broadcast %cst_1630 : f32 to vector<8x128xf32>
    %3098 = arith.select %3095, %3096, %3097 : vector<8x128xi1>, vector<8x128xf32>
    %3099 = arith.addf %3093, %3098 : vector<8x128xf32>
    %c4_i32 = arith.constant 4 : i32
    %3100 = vector.broadcast %c4_i32 : i32 to vector<8x128xi32>
    %3101 = arith.cmpi eq, %3074, %3100 : vector<8x128xi32>
    %cst_1631 = arith.constant 0.000000e+00 : f32
    %3102 = vector.broadcast %1109 : f32 to vector<8x128xf32>
    %3103 = vector.broadcast %cst_1631 : f32 to vector<8x128xf32>
    %3104 = arith.select %3101, %3102, %3103 : vector<8x128xi1>, vector<8x128xf32>
    %3105 = arith.addf %3099, %3104 : vector<8x128xf32>
    %c5_i32 = arith.constant 5 : i32
    %3106 = vector.broadcast %c5_i32 : i32 to vector<8x128xi32>
    %3107 = arith.cmpi eq, %3074, %3106 : vector<8x128xi32>
    %cst_1632 = arith.constant 0.000000e+00 : f32
    %3108 = vector.broadcast %1556 : f32 to vector<8x128xf32>
    %3109 = vector.broadcast %cst_1632 : f32 to vector<8x128xf32>
    %3110 = arith.select %3107, %3108, %3109 : vector<8x128xi1>, vector<8x128xf32>
    %3111 = arith.addf %3105, %3110 : vector<8x128xf32>
    %c6_i32 = arith.constant 6 : i32
    %3112 = vector.broadcast %c6_i32 : i32 to vector<8x128xi32>
    %3113 = arith.cmpi eq, %3074, %3112 : vector<8x128xi32>
    %cst_1633 = arith.constant 0.000000e+00 : f32
    %3114 = vector.broadcast %3073 : f32 to vector<8x128xf32>
    %3115 = vector.broadcast %cst_1633 : f32 to vector<8x128xf32>
    %3116 = arith.select %3113, %3114, %3115 : vector<8x128xi1>, vector<8x128xf32>
    %3117 = arith.addf %3111, %3116 : vector<8x128xf32>
    %c7_i32 = arith.constant 7 : i32
    %3118 = vector.broadcast %c7_i32 : i32 to vector<8x128xi32>
    %3119 = arith.cmpi eq, %3074, %3118 : vector<8x128xi32>
    %cst_1634 = arith.constant 0.000000e+00 : f32
    %3120 = vector.broadcast %1726 : f32 to vector<8x128xf32>
    %3121 = vector.broadcast %cst_1634 : f32 to vector<8x128xf32>
    %3122 = arith.select %3119, %3120, %3121 : vector<8x128xi1>, vector<8x128xf32>
    %3123 = arith.addf %3117, %3122 : vector<8x128xf32>
    %c8_i32 = arith.constant 8 : i32
    %3124 = vector.broadcast %c8_i32 : i32 to vector<8x128xi32>
    %3125 = arith.cmpi eq, %3074, %3124 : vector<8x128xi32>
    %cst_1635 = arith.constant 0.000000e+00 : f32
    %3126 = vector.broadcast %2137 : f32 to vector<8x128xf32>
    %3127 = vector.broadcast %cst_1635 : f32 to vector<8x128xf32>
    %3128 = arith.select %3125, %3126, %3127 : vector<8x128xi1>, vector<8x128xf32>
    %3129 = arith.addf %3123, %3128 : vector<8x128xf32>
    %c9_i32 = arith.constant 9 : i32
    %3130 = vector.broadcast %c9_i32 : i32 to vector<8x128xi32>
    %3131 = arith.cmpi eq, %3074, %3130 : vector<8x128xi32>
    %cst_1636 = arith.constant 0.000000e+00 : f32
    %3132 = vector.broadcast %2548 : f32 to vector<8x128xf32>
    %3133 = vector.broadcast %cst_1636 : f32 to vector<8x128xf32>
    %3134 = arith.select %3131, %3132, %3133 : vector<8x128xi1>, vector<8x128xf32>
    %3135 = arith.addf %3129, %3134 : vector<8x128xf32>
    %c10_i32 = arith.constant 10 : i32
    %3136 = vector.broadcast %c10_i32 : i32 to vector<8x128xi32>
    %3137 = arith.cmpi eq, %3074, %3136 : vector<8x128xi32>
    %cst_1637 = arith.constant 0.000000e+00 : f32
    %3138 = vector.broadcast %2959 : f32 to vector<8x128xf32>
    %3139 = vector.broadcast %cst_1637 : f32 to vector<8x128xf32>
    %3140 = arith.select %3137, %3138, %3139 : vector<8x128xi1>, vector<8x128xf32>
    %3141 = arith.addf %3135, %3140 : vector<8x128xf32>
    %c0_1638 = arith.constant 0 : index
    %c0_1639 = arith.constant 0 : index
    %c0_1640 = arith.constant 0 : index
    %3142 = vector.load %arg7[%c0_1638, %c0_1639, %c0_1640] : memref<1x8x128xf32, #tpu.memory_space<vmem>>, vector<1x8x128xf32>
    %3143 = vector.shape_cast %3142 : vector<1x8x128xf32> to vector<8x128xf32>
    %3144 = vector.shape_cast %3141 : vector<8x128xf32> to vector<1x8x128xf32>
    tpu.vector_store %arg7[%c0_1638, %c0_1639, %c0_1640], %3144 {strides = array<i32>} : memref<1x8x128xf32, #tpu.memory_space<vmem>>, vector<1x8x128xf32>,
    return
  }
  func.func @transform_0(%arg0: i32) -> (i32, i32, i32, i32, i32) {
    %c0_i32 = arith.constant 0 : i32
    %c0_i32_0 = arith.constant 0 : i32
    %c0_i32_1 = arith.constant 0 : i32
    %c0_i32_2 = arith.constant 0 : i32
    %c0_i32_3 = arith.constant 0 : i32
    return %arg0, %c0_i32, %c0_i32_0, %c0_i32_1, %c0_i32_2 : i32, i32, i32, i32, i32
  }
  func.func @transform_1(%arg0: i32) -> (i32, i32, i32, i32, i32) {
    %c0_i32 = arith.constant 0 : i32
    %c0_i32_0 = arith.constant 0 : i32
    %c0_i32_1 = arith.constant 0 : i32
    %c0_i32_2 = arith.constant 0 : i32
    %c0_i32_3 = arith.constant 0 : i32
    return %arg0, %c0_i32, %c0_i32_0, %c0_i32_1, %c0_i32_2 : i32, i32, i32, i32, i32
  }
  func.func @transform_2(%arg0: i32) -> (i32, i32, i32, i32, i32) {
    %c0_i32 = arith.constant 0 : i32
    %c0_i32_0 = arith.constant 0 : i32
    %c0_i32_1 = arith.constant 0 : i32
    %c0_i32_2 = arith.constant 0 : i32
    %c0_i32_3 = arith.constant 0 : i32
    return %arg0, %c0_i32, %c0_i32_0, %c0_i32_1, %c0_i32_2 : i32, i32, i32, i32, i32
  }
  func.func @transform_3(%arg0: i32) -> (i32, i32, i32, i32, i32) {
    %c0_i32 = arith.constant 0 : i32
    %c0_i32_0 = arith.constant 0 : i32
    %c0_i32_1 = arith.constant 0 : i32
    %c0_i32_2 = arith.constant 0 : i32
    %c0_i32_3 = arith.constant 0 : i32
    return %arg0, %c0_i32, %c0_i32_0, %c0_i32_1, %c0_i32_2 : i32, i32, i32, i32, i32
  }
  func.func @transform_4(%arg0: i32) -> (i32, i32, i32) {
    %c0_i32 = arith.constant 0 : i32
    %c0_i32_0 = arith.constant 0 : i32
    %c0_i32_1 = arith.constant 0 : i32
    %c0_i32_2 = arith.constant 0 : i32
    return %c0_i32, %c0_i32_0, %c0_i32_1 : i32, i32, i32
  }
  func.func @transform_5(%arg0: i32) -> (i32, i32, i32, i32) {
    %c0_i32 = arith.constant 0 : i32
    %c0_i32_0 = arith.constant 0 : i32
    %c0_i32_1 = arith.constant 0 : i32
    %c0_i32_2 = arith.constant 0 : i32
    %c0_i32_3 = arith.constant 0 : i32
    return %c0_i32, %c0_i32_0, %c0_i32_1, %c0_i32_2 : i32, i32, i32, i32
  }
  func.func @transform_6(%arg0: i32) -> (i32, i32, i32) {
    %c0_i32 = arith.constant 0 : i32
    %c0_i32_0 = arith.constant 0 : i32
    %c0_i32_1 = arith.constant 0 : i32
    return %arg0, %c0_i32, %c0_i32_0 : i32, i32, i32
  }
}

</mosaic_0001>

<bundles_post_ra>
// kernel: fraclexmb_loss.1
= control target key start
LH: loop header
LB: loop body
LE: loop exit
PB: predicated region body
PF: predicated region fallthrough
CT: control target
= control target key end

     0   :  { %s4415_s21 = smov 0   ;;  %s6169_s0 = inlined_call_operand.vmem [shape: f32[2,3,4,8,128], index: 0, kind: input, shape index: {}]   ;;  %s6170_s1 = inlined_call_operand.vmem [shape: f32[2,3,4,8,128], index: 1, kind: input, shape index: {}]   ;;  %s6171_s2 = inlined_call_operand.vmem [shape: f32[2,3,4,8,128], index: 2, kind: input, shape index: {}]   ;;  %s6172_s3 = inlined_call_operand.vmem [shape: f32[2,2,2,8,384], index: 3, kind: input, shape index: {}]   ;;  %s6173_s4 = inlined_call_operand.vmem [shape: bf16[2,32,8], index: 4, kind: input, shape index: {}]   ;;  %s6174_s5 = inlined_call_operand.vmem [shape: bf16[2,2,128,256], index: 5, kind: input, shape index: {}]   ;;  %s6175_s6 = inlined_call_operand.vmem [shape: f32[2,8,128], index: 6, kind: output, shape index: {}]  }
   0x1 LB: > { %s3908_s22 = sadd.s32 4294967295, %s4377_s21   ;;  %p3912_p0 = scmp.ge.s32.totalorder %s4377_s21, 1  ;;  %s4377_s21 = sphi %s4415_s21, %s16_s21  }
   0x2   : > { %p242_p1 = scmp.lt.s32.totalorder %s4377_s21, 3 }
   0x4   : > { %p243_p2 = pnand %p3912_p0, %p242_p1 }
   0x6   : > { %246 = sbr.rel (%p243_p2) target bundleno = 1876 (0x754), region = 44 }
   0xb   : > { %p286_p3 = scmp.lt.s32.totalorder %s3908_s22, 1  ;;  %v4426_v0 = vld [vmem:[%s6173_s4 + $0x10] sm:$0xff]   ;;  %vm1378_vm0 = vcmask 64512   ;;  %v6176_v1 = vmov 0   ;;  %vm1385_vm1 = vcmask 1043456   ;;  %v4460_v6 = vld [vmem:[%s6173_s4 + $0x18] sm:$0xff]  }
   0xc   : > { %4116 = vmatprep.mubr.msk.bf16.mxu1 %vm1378_vm0, %v4426_v0  ;;  %1427 = vmatprep.mubr.bf16.mxu0 %v6176_v1  ;;  %v4540_v56 = vld [vmem:[%s6173_s4] sm:$0xff]  }
   0xd   : > { %s6434_s22 = smov (!%p286_p3, %s3908_s22), 1 }
   0xe   : > { %s4142_s25 = smul.u32 96, %s6434_s22 }
  0x10   : > { %s4437_s28 = scalar_lea.vmem %s6172_s3, %s4142_s25  ;;  %s4442_s7 = scalar_lea.vmem %s6171_s2, %s4142_s25 }
  0x11   : > { %v3957_v2 = vld [vmem:[%s4437_s28 + $0x40] sm:$0xff]  ;;  %v3956_v3 = vld [vmem:[%s4437_s28 + $0x38] sm:$0xff]  ;;  %v1351_v4 = vld [vmem:[%s4437_s28 + $0x8] sm:$0xff]  ;;  %s4450_s10 = scalar_lea.vmem %s6169_s0, %s4142_s25  ;;  %s4455_s13 = scalar_lea.vmem %s6170_s1, %s4142_s25 }
  0x12   : > { %v1367_v5 = vpack.c.bf16 %v3957_v2, %v3957_v2  ;;  %v1366_v7 = vpack.c.bf16 %v3956_v3, %v3956_v3  ;;  %v1354_v8 = vpack.c.bf16 %v1351_v4, %v1351_v4  ;;  %v3955_v9 = vld [vmem:[%s4437_s28 + $0x30] sm:$0xff]  ;;  %v1350_v10 = vld [vmem:[%s4437_s28] sm:$0xff]  ;;  %v3918_v25 = vld [vmem:[%s4450_s10 + $0x8] sm:$0xff] }
  0x13   : > { %v4465_v11 = vld [vmem:[%s4442_s7] sm:$0xff]  ;;  %v1365_v12 = vpack.c.bf16 %v3955_v9, %v3955_v9  ;;  %v1353_v13 = vpack.c.bf16 %v1350_v10, %v1350_v10  ;;  %v3919_v26 = vld [vmem:[%s4455_s13 + $0x8] sm:$0xff]  ;;  %v4487_v27 = vld [vmem:[%s4450_s10 + $0x10] sm:$0xff] }
  0x14   : > { %v4468_v14 = vld [vmem:[%s4442_s7 + $0x20] sm:$0xff]  ;;  %v515_v16 = vmul.f32 1.05, %v4465_v11  ;;  %4138 = vmatprep.subr.msk.bf16.mxu1 %vm1385_vm1, %v1367_v5  ;;  %v1393_v18 = vsel %vm1385_vm1, %v1367_v5, 0  ;;  %3960 = vmatprep.subr.msk.bf16.mxu0 %vm1385_vm1, %v1366_v7  ;;  %v4491_v31 = vsub.f32 %v3918_v25, %v3919_v26  ;;  %v3921_v32 = vld [vmem:[%s4455_s13 + $0x10] sm:$0xff]  ;;  %v3922_v33 = vld [vmem:[%s4450_s10 + $0x18] sm:$0xff] }
  0x15   : > { %6265 = vst [vmem:[#allocation2_spill] sm:$0xff] %v4468_v14  ;;  %v4471_v15 = vld [vmem:[%s4442_s7 + $0x40] sm:$0xff]  ;;  %v527_v19 = vmul.f32 1.05, %v4468_v14  ;;  %4115 = vmatpush3.bf16.msra.mxu1 %v1393_v18  ;;  %v1387_v22 = vsel %vm1385_vm1, %v1365_v12, 0  ;;  %v1514_v28 = vsel %vm1385_vm1, %v1353_v13, 0  ;;  %v4499_v36 = vsub.f32 %v4487_v27, %v3921_v32 }
  0x16   : > { %v311_v17 = vld [vmem:[%s4450_s10] sm:$0xff]  ;;  %v539_v20 = vmul.f32 1.05, %v4471_v15  ;;  %v516_v23 = vmax.f32 %v515_v16, 0.0  ;;  %3967 = vmatprep.subr.msk.bf16.mxu1 %vm1385_vm1, %v1354_v8  ;;  %1410 = vmatpush1.bf16.msra.mxu0 %v1387_v22  ;;  %v3923_v34 = vld [vmem:[%s4455_s13 + $0x18] sm:$0xff]  ;;  %v3926_v40 = vld [vmem:[%s4450_s10 + $0x28] sm:$0xff] }
  0x17   : > { %v312_v21 = vld [vmem:[%s4455_s13] sm:$0xff]  ;;  %v528_v29 = vmax.f32 %v527_v19, 0.0  ;;  %v4501_v37 = vsub.f32 %v3922_v33, %v3923_v34  ;;  %v3927_v45 = vld [vmem:[%s4455_s13 + $0x28] sm:$0xff]  ;;  %v3928_v46 = vld [vmem:[%s4450_s10 + $0x30] sm:$0xff]  ;;  %v434_v7 = vsub.f32 %v311_v17, %v4465_v11 }
  0x18   : > { %v4482_v24 = vsub.f32 %v311_v17, %v312_v21  ;;  %v540_v30 = vmax.f32 %v539_v20, 0.0  ;;  %v4496_v35 = vmin.f32 %v516_v23, 1.0  ;;  %v3924_v38 = vld [vmem:[%s4450_s10 + $0x20] sm:$0xff]  ;;  %4117 = vmatmul.mubr.msk.bf16.vlgmr.msra.gmra.mxu1 %vm1378_vm0, %v4460_v6  ;;  %v3929_v47 = vld [vmem:[%s4455_s13 + $0x30] sm:$0xff]  ;;  %v4526_v50 = vsub.f32 %v3926_v40, %v3927_v45  ;;  %v3930_v51 = vld [vmem:[%s4450_s10 + $0x38] sm:$0xff] }
  0x19   : > { %v3925_v39 = vld [vmem:[%s4455_s13 + $0x20] sm:$0xff]  ;;  %v4508_v41 = vmin.f32 %v528_v29, 1.0  ;;  %1537 = vmatpush1.bf16.msra.mxu1 %v1514_v28  ;;  %v4524_v49 = vadd.f32 %v4501_v37, %v4499_v36  ;;  %v3931_v52 = vld [vmem:[%s4455_s13 + $0x38] sm:$0xff]  ;;  %1554 = vmatprep.mubr.bf16.mxu1 %v6176_v1  ;;  %v4533_v55 = vsub.f32 %v3928_v46, %v3929_v47  ;;  %v4555_v62 = vld [vmem:[%s4450_s10 + $0x48] sm:$0xff]  ;;  %v458_v22 = vsub.f32 %v3924_v38, %v4468_v14 }
  0x1a   : > { %6266 = vst [vmem:[#allocation3_spill] sm:$0xff] %v4496_v35  ;;  %v4510_v42 = vmin.f32 %v540_v30, 1.0  ;;  %v4514_v43 = vadd.f32 %v4491_v31, %v4482_v24  ;;  %v4516_v44 = vsub.f32 %v3924_v38, %v3925_v39  ;;  %v551_v48 = vmul.f32 0.2989, %v4496_v35  ;;  %3961 = vmatmul.mubr.msk.bf16.vlgmr.msra.gmra.mxu0 %vm1378_vm0, %v4426_v0  ;;  %v4551_v60 = vld [vmem:[%s4450_s10 + $0x40] sm:$0xff]  ;;  %v3935_v3 = vld [vmem:[%s4455_s13 + $0x48] sm:$0xff] }
  0x1b   : > { %6267 = vst [vmem:[#allocation4_spill] sm:$0xff] %v4508_v41  ;;  %v552_v53 = vmul.f32 0.587, %v4508_v41  ;;  %v4544_v58 = vsub.f32 %v3930_v51, %v3931_v52  ;;  %v3933_v61 = vld [vmem:[%s4455_s13 + $0x40] sm:$0xff]  ;;  %1437 = vmatprep.mubr.bf16.mxu0 %v6176_v1  ;;  %v4563_v4 = vld [vmem:[%s4450_s10 + $0x50] sm:$0xff]  ;;  %v4572_v9 = vsub.f32 %v4555_v62, %v3935_v3  ;;  %v3938_v12 = vld [vmem:[%s4450_s10 + $0x58] sm:$0xff] }
  0x1c   : > { %6268 = vst [vmem:[#allocation5_spill] sm:$0xff] %v4510_v42  ;;  %v554_v54 = vmul.f32 0.114, %v4510_v42  ;;  %v341_v57 = vadd.f32 %v4524_v49, %v4514_v43  ;;  %v4548_v59 = vadd.f32 %v4526_v50, %v4516_v44  ;;  %v4559_v2 = vsub.f32 %v4551_v60, %v3933_v61  ;;  %v3937_v5 = vld [vmem:[%s4455_s13 + $0x50] sm:$0xff]  ;;  %v3939_v13 = vld [vmem:[%s4455_s13 + $0x58] sm:$0xff]  ;;  %v4580_v16 = vld [vmem:[%s4442_s7 + $0x8] sm:$0xff] }
  0x1d   : > { %v553_v63 = vadd.f32 %v552_v53, %v551_v48  ;;  %v4569_v8 = vadd.f32 %v4544_v58, %v4533_v55  ;;  %v4575_v10 = vsub.f32 %v4563_v4, %v3937_v5  ;;  %v4582_v19 = vsub.f32 %v3938_v12, %v3939_v13  ;;  %v4586_v20 = vld [vmem:[%s4442_s7 + $0x10] sm:$0xff]  ;;  %v4589_v21 = vld [vmem:[%s4442_s7 + $0x18] sm:$0xff]  ;;  %v4593_v23 = vld [vmem:[%s4442_s7 + $0x28] sm:$0xff] }
  0x1e   : > { %v437_v17 = vsub.f32 %v3918_v25, %v4580_v16  ;;  %v342_v26 = vand.u32 2147483647, %v341_v57  ;;  %v4599_v29 = vadd.f32 %v4572_v9, %v4559_v2  ;;  %v440_v30 = vsub.f32 %v4487_v27, %v4586_v20  ;;  %v4611_v38 = vld [vmem:[%s4442_s7 + $0x30] sm:$0xff]  ;;  %v4614_v39 = vld [vmem:[%s4442_s7 + $0x38] sm:$0xff] }
  0x1f   : > { %v555_v18 = vadd.f32 %v554_v54, %v553_v63  ;;  %v375_v28 = vadd.f32 %v4569_v8, %v4548_v59  ;;  %v4605_v25 = vadd.f32 %v4582_v19, %v4575_v10  ;;  %v443_v32 = vsub.f32 %v3922_v33, %v4589_v21  ;;  %v4630_v3 = vld [vmem:[%s4442_s7 + $0x50] sm:$0xff]  ;;  %v4633_v5 = vld [vmem:[%s4442_s7 + $0x58] sm:$0xff] }
  0x20   : > { %3968 = vmatmul.mubr.msk.bf16.vlgmr.msra.gmra.mxu1 %vm1378_vm0, %v4540_v56  ;;  %v444_v34 = vadd.f32 %v437_v17, %v434_v7  ;;  %v445_v27 = vsub.f32 %v434_v7, %v437_v17  ;;  %v461_v47 = vsub.f32 %v3926_v40, %v4593_v23  ;;  %v464_v57 = vsub.f32 %v3928_v46, %v4611_v38  ;;  %v4627_v40 = vld [vmem:[%s4442_s7 + $0x48] sm:$0xff] }
  0x21   : > { %571 = vadd.xlane.f32.xlu1 %v555_v18  ;;  %v376_v45 = vand.u32 2147483647, %v375_v28  ;;  %1564 = vmatprep.mubr.bf16.mxu1 %v6176_v1  ;;  %v411_v48 = vadd.f32 %v4605_v25, %v4599_v29  ;;  %v446_v52 = vadd.f32 %v443_v32, %v440_v30  ;;  %v447_v53 = vsub.f32 %v440_v30, %v443_v32  ;;  %v4638_v7 = vld [vmem:[%s6173_s4 + $0x8] sm:$0xff]  }
  0x22   : > { %3962 = vmatmul.mubr.msk.bf16.gmra.mxu0 %vm1378_vm0, %v4460_v6  ;;  %v467_v61 = vsub.f32 %v3930_v51, %v4614_v39  ;;  %v468_v63 = vadd.f32 %v461_v47, %v458_v22  ;;  %v518_v51 = vmul.f32 1.05, %v4580_v16  ;;  %v483_v33 = vsub.f32 %v4551_v60, %v4471_v15 }
  0x23   : > { %v377_v54 = vadd.f32 %v376_v45, %v342_v26  ;;  %4122 = vmatprep.mubr.msk.bf16.mxu0 %vm1378_vm0, %v4540_v56  ;;  %v412_v13 = vand.u32 2147483647, %v411_v48  ;;  %v448_v18 = vadd.f32 %v447_v53, %v445_v27  ;;  %v450_v46 = vsub.f32 %v444_v34, %v446_v52 }
  0x24   : > { %v453_v17 = vsub.f32 %v445_v27, %v447_v53  ;;  %v469_v26 = vsub.f32 %v458_v22, %v461_v47  ;;  %v470_v28 = vadd.f32 %v467_v61, %v464_v57  ;;  %v471_v30 = vsub.f32 %v464_v57, %v467_v61 }
  0x25   : > { %v413_v32 = vadd.f32 %v412_v13, %v377_v54  ;;  %v449_v45 = vand.u32 2147483647, %v448_v18  ;;  %v451_v1 = vand.u32 2147483647, %v450_v46  ;;  %v486_v34 = vsub.f32 %v4555_v62, %v4627_v40 }
  0x26   : > { %v454_v42 = vand.u32 2147483647, %v453_v17  ;;  %v472_v41 = vadd.f32 %v471_v30, %v469_v26  ;;  %v474_v35 = vsub.f32 %v468_v63, %v470_v28  ;;  %v477_v14 = vsub.f32 %v469_v26, %v471_v30 }
  0x27   : > { %415 = vadd.xlane.f32.xlu0 %v413_v32  ;;  %v452_v48 = vadd.f32 %v451_v1, %v449_v45  ;;  %v489_v22 = vsub.f32 %v4563_v4, %v4630_v3  ;;  %v492_v27 = vsub.f32 %v3938_v12, %v4633_v5  ;;  %v369_v47 = vsub.f32 %v4548_v59, %v4569_v8 }
  0x28   : > { %v473_v52 = vand.u32 2147483647, %v472_v41  ;;  %v475_v53 = vand.u32 2147483647, %v474_v35  ;;  %v478_v60 = vand.u32 2147483647, %v477_v14  ;;  %3969 = vmatmul.mubr.msk.bf16.gmra.mxu1 %vm1378_vm0, %v4638_v7  ;;  %v493_v57 = vadd.f32 %v486_v34, %v483_v33 }
  0x29   : > { %v455_v54 = vadd.f32 %v454_v42, %v452_v48  ;;  %v494_v1 = vsub.f32 %v483_v33, %v486_v34  ;;  %v495_v61 = vadd.f32 %v492_v27, %v489_v22  ;;  %4128 = vmatprep.mubr.msk.bf16.mxu1 %vm1378_vm0, %v4426_v0  ;;  %v496_v4 = vsub.f32 %v489_v22, %v492_v27 }
  0x2a   : > { %v476_v62 = vadd.f32 %v475_v53, %v473_v52  ;;  %v519_v63 = vmax.f32 %v518_v51, 0.0  ;;  %v530_v12 = vmul.f32 1.05, %v4593_v23  ;;  %v542_v41 = vmul.f32 1.05, %v4627_v40 }
  0x2b   : > { %v499_v13 = vsub.f32 %v493_v57, %v495_v61  ;;  %v521_v14 = vmul.f32 1.05, %v4586_v20  ;;  %v533_v35 = vmul.f32 1.05, %v4611_v38  ;;  %v497_v42 = vadd.f32 %v496_v4, %v494_v1 }
  0x2c   : > { %v479_v59 = vadd.f32 %v478_v60, %v476_v62  ;;  %v502_v8 = vsub.f32 %v494_v1, %v496_v4  ;;  %v4660_v33 = vmin.f32 %v519_v63, 1.0  ;;  %v531_v46 = vmax.f32 %v530_v12, 0.0 }
  0x2d   : > { %v500_v18 = vand.u32 2147483647, %v499_v13  ;;  %v543_v17 = vmax.f32 %v542_v41, 0.0  ;;  %v522_v26 = vmax.f32 %v521_v14, 0.0  ;;  %v498_v51 = vand.u32 2147483647, %v497_v42 }
  0x2e   : > { %v480_v28 = vadd.f32 %v479_v59, %v455_v54  ;;  %v503_v30 = vand.u32 2147483647, %v502_v8  ;;  %v330_v32 = vsub.f32 %v4482_v24, %v4491_v31  ;;  %v4664_v45 = vmin.f32 %v531_v46, 1.0 }
  0x2f   : > { %v4666_v48 = vmin.f32 %v543_v17, 1.0  ;;  %v556_v34 = vmul.f32 0.2989, %v4660_v33  ;;  %v4669_v22 = vmin.f32 %v522_v26, 1.0  ;;  %v501_v27 = vadd.f32 %v500_v18, %v498_v51 }
  0x30   : > { %v534_v52 = vmax.f32 %v533_v35, 0.0  ;;  %v545_v53 = vmul.f32 1.05, %v4630_v3  ;;  %v332_v60 = vsub.f32 %v4499_v36, %v4501_v37  ;;  %v6269_v54 = vsub.f32 %v4514_v43, %v4524_v49 }
  0x31   : > { %v557_v24 = vmul.f32 0.587, %v4664_v45  ;;  %v559_v31 = vmul.f32 0.114, %v4666_v48  ;;  %v405_v1 = vsub.f32 %v4599_v29, %v4605_v25  ;;  %v504_v61 = vadd.f32 %v503_v30, %v501_v27 }
  0x32   : > { %v336_v57 = vand.u32 2147483647, %v6269_v54  ;;  %v4681_v62 = vmin.f32 %v534_v52, 1.0  ;;  %v546_v4 = vmax.f32 %v545_v53, 0.0  ;;  %v561_v12 = vmul.f32 0.2989, %v4669_v22 }
  0x33   : > { %v558_v63 = vadd.f32 %v557_v24, %v556_v34  ;;  %v333_v36 = vadd.f32 %v332_v60, %v330_v32  ;;  %v364_v37 = vsub.f32 %v4516_v44, %v4526_v50  ;;  %v370_v43 = vand.u32 2147483647, %v369_v47  ;;  %v1352_v50 = vld [vmem:[%s4437_s28 + $0x10] sm:$0xff]  ;;  %v3977_v47 = vld [vmem:[%s4437_s28 + $0x58] sm:$0xff] }
  0x34   : > { %v505_v49 = vadd.f32 %v504_v61, %v480_v28  ;;  %v4686_v13 = vmin.f32 %v546_v4, 1.0  ;;  %v562_v41 = vmul.f32 0.587, %v4681_v62  ;;  %v338_v14 = vsub.f32 %v330_v32, %v332_v60  ;;  %v3975_v4 = vld [vmem:[%s4437_s28 + $0x48] sm:$0xff] }
  0x35   : > { %v560_v29 = vadd.f32 %v559_v31, %v558_v63  ;;  %v334_v25 = vand.u32 2147483647, %v333_v36  ;;  %v366_v35 = vsub.f32 %v4533_v55, %v4544_v58  ;;  %v406_v59 = vand.u32 2147483647, %v405_v1 }
  0x36   : > { %506 = vadd.xlane.f32.xlu1 %v505_v49  ;;  %v563_v42 = vadd.f32 %v562_v41, %v561_v12  ;;  %v564_v8 = vmul.f32 0.114, %v4686_v13  ;;  %v400_v44 = vsub.f32 %v4559_v2, %v4572_v9  ;;  %v339_v46 = vand.u32 2147483647, %v338_v14 }
  0x37   : > { %580 = vadd.xlane.f32.xlu0 %v560_v29  ;;  %v337_v18 = vadd.f32 %v336_v57, %v334_v25  ;;  %v367_v17 = vadd.f32 %v366_v35, %v364_v37  ;;  %v372_v26 = vsub.f32 %v364_v37, %v366_v35  ;;  %v402_v51 = vsub.f32 %v4575_v10, %v4582_v19  ;;  %v3976_v57 = vld [vmem:[%s4437_s28 + $0x50] sm:$0xff]  ;;  %v3972_v29 = vld [vmem:[%s4437_s28 + $0x18] sm:$0xff]  ;;  %v3974_v25 = vld [vmem:[%s4437_s28 + $0x28] sm:$0xff] }
  0x38   : > { %v565_v28 = vadd.f32 %v564_v8, %v563_v42  ;;  %v524_v55 = vmul.f32 1.05, %v4589_v21  ;;  %v536_v58 = vmul.f32 1.05, %v4614_v39  ;;  %v548_v9 = vmul.f32 1.05, %v4633_v5 }
  0x39   : > { %v340_v30 = vadd.f32 %v339_v46, %v337_v18  ;;  %v368_v32 = vand.u32 2147483647, %v367_v17  ;;  %v373_v2 = vand.u32 2147483647, %v372_v26  ;;  %v403_v34 = vadd.f32 %v402_v51, %v400_v44  ;;  %v3973_v21 = vld [vmem:[%s4437_s28 + $0x20] sm:$0xff] }
  0x3a   : > { %590 = vadd.xlane.f32.xlu1 %v565_v28  ;;  %v408_v27 = vsub.f32 %v400_v44, %v402_v51  ;;  %v525_v52 = vmax.f32 %v524_v55, 0.0  ;;  %v537_v53 = vmax.f32 %v536_v58, 0.0  ;;  %v549_v54 = vmax.f32 %v548_v9, 0.0  ;;  %v4773_v58 = vld [vmem:[%s6174_s5 + $0x54] ss:$8 sps:$4 sm:$0xff]  }
  0x3b   : > { %v371_v60 = vadd.f32 %v370_v43, %v368_v32  ;;  %v1355_v10 = vpack.c.bf16 %v1352_v50, %v1352_v50  ;;  %v1637_v19 = vpack.c.bf16 %v3977_v47, %v3977_v47  ;;  %v404_v24 = vand.u32 2147483647, %v403_v34  ;;  %v4783_v32 = vld [vmem:[%s6174_s5 + $0xf4] ss:$8 sps:$4 sm:$0xff]   ;;  %v4796_v9 = vld [vmem:[%s6174_s5 + $0xe0] ss:$8 sps:$4 sm:$0xff]  }
  0x3c   : > { %v409_v31 = vand.u32 2147483647, %v408_v27  ;;  %v4703_v1 = vmin.f32 %v525_v52, 1.0  ;;  %v4705_v61 = vmin.f32 %v537_v53, 1.0  ;;  %v4708_v12 = vmin.f32 %v549_v54, 1.0  ;;  %6271 = vst [vmem:[#allocation6_spill] sm:$0xff] %v4783_v32 }
  0x3d   : > { %v374_v63 = vadd.f32 %v373_v2, %v371_v60  ;;  %4139 = vmatprep.subr.msk.bf16.mxu0 %vm1385_vm1, %v1355_v10  ;;  %4140 = vmatprep.subr.msk.bf16.mxu1 %vm1385_vm1, %v1637_v19  ;;  %v1520_v36 = vsel %vm1385_vm1, %v1355_v10, 0  ;;  %v1645_v37 = vsel %vm1385_vm1, %v1637_v19, 0  ;;  %v407_v43 = vadd.f32 %v406_v59, %v404_v24  ;;  %v4790_v2 = vld [vmem:[%s6174_s5 + $0x50] ss:$8 sps:$4 sm:$0xff]   ;;  %v4801_v34 = vld [vmem:[%s6174_s5 + $0xe4] ss:$8 sps:$4 sm:$0xff]  }
  0x3e   : > { %v566_v49 = vmul.f32 0.2989, %v4703_v1  ;;  %v567_v41 = vmul.f32 0.587, %v4705_v61  ;;  %4121 = vmatpush3.bf16.msra.mxu0 %v1520_v36  ;;  %4127 = vmatpush3.bf16.msra.mxu1 %v1645_v37  ;;  %v569_v35 = vmul.f32 0.114, %v4708_v12  ;;  %v1636_v44 = vpack.c.bf16 %v3976_v57, %v3976_v57 }
  0x3f   : > { %v378_v14 = vadd.f32 %v374_v63, %v340_v30  ;;  %v410_v42 = vadd.f32 %v409_v31, %v407_v43  ;;  %v1629_v50 = vpack.c.bf16 %v3973_v21, %v3973_v21  ;;  %v1635_v59 = vpack.c.bf16 %v3975_v4, %v3975_v4  ;;  %v4778_v30 = vld [vmem:[%s6174_s5 + $0xf0] ss:$8 sps:$4 sm:$0xff]   ;;  %v4807_v27 = vld [vmem:[%s6174_s5 + $0x44] ss:$8 sps:$4 sm:$0xff]   ;;  %v4814_v52 = vld [vmem:[%s6174_s5 + $0x40] ss:$8 sps:$4 sm:$0xff]  }
  0x40   : > { %v568_v8 = vadd.f32 %v567_v41, %v566_v49  ;;  %v1628_v47 = vpack.c.bf16 %v3972_v29, %v3972_v29  ;;  %v1630_v18 = vpack.c.bf16 %v3974_v25, %v3974_v25  ;;  %3978 = vmatprep.subr.msk.bf16.mxu0 %vm1385_vm1, %v1636_v44  ;;  %v6270_v28 = vmov 0   ;;  %v4821_v53 = vld [vmem:[%s6174_s5 + $0x34] ss:$8 sps:$4 sm:$0xff]   ;;  %v4827_v60 = vld [vmem:[%s6174_s5 + $0x30] ss:$8 sps:$4 sm:$0xff]  }
  0x41   : > { %4123 = vmatmul.mubr.msk.bf16.vlgmr.msra.gmra.mxu0 %vm1378_vm0, %v4638_v7  ;;  %4129 = vmatmul.mubr.msk.bf16.vlgmr.msra.gmra.mxu1 %vm1378_vm0, %v4460_v6  ;;  %v414_v46 = vadd.f32 %v410_v42, %v378_v14  ;;  %v1639_v17 = vsel %vm1385_vm1, %v1635_v59, 0  ;;  %v4833_v54 = vld [vmem:[%s6174_s5 + $0x24] ss:$8 sps:$4 sm:$0xff]   ;;  %v4838_v10 = vld [vmem:[%s6174_s5 + $0xd0] ss:$8 sps:$4 sm:$0xff]  }
  0x42   : > { %3983 = vmatprep.subr.msk.bf16.mxu1 %vm1385_vm1, %v1629_v50  ;;  %v1750_v26 = vsel %vm1385_vm1, %v1628_v47, 0  ;;  %1679 = vmatprep.mubr.bf16.mxu0 %v6270_v28  ;;  %v570_v51 = vadd.f32 %v569_v35, %v568_v8  ;;  %v1756_v55 = vsel %vm1385_vm1, %v1630_v18, 0  ;;  %v4843_v19 = vld [vmem:[%s6174_s5 + $0xd4] ss:$8 sps:$4 sm:$0xff]   ;;  %v4848_v57 = vld [vmem:[%s6174_s5 + $0xc4] ss:$8 sps:$4 sm:$0xff]  }
  0x43   : > { %1790 = vmatprep.mubr.bf16.mxu1 %v6270_v28  ;;  %424 = vadd.xlane.f32.xlu0 %v414_v46  ;;  %v4854_v21 = vld [vmem:[%s6174_s5 + $0x20] ss:$8 sps:$4 sm:$0xff]   ;;  %v4861_v24 = vld [vmem:[%s6174_s5 + $0x14] ss:$8 sps:$4 sm:$0xff]   ;;  %v4874_v4 = vld [vmem:[%s6174_s5 + $0x10] ss:$8 sps:$4 sm:$0xff]  }
  0x44   : > { %1662 = vmatpush1.bf16.msra.mxu0 %v1639_v17  ;;  %1773 = vmatpush1.bf16.msra.mxu1 %v1750_v26  ;;  %v4867_v31 = vld [vmem:[%s6174_s5 + $0xc0] ss:$8 sps:$4 sm:$0xff]   ;;  %v4880_v63 = vld [vmem:[%s6174_s5 + $0x4] ss:$8 sps:$4 sm:$0xff]   ;;  %v4895_v37 = vld [vmem:[%s6174_s5 + $0xb4] ss:$8 sps:$4 sm:$0xff]  }
  0x45   : > { %4141 = vmatprep.subr.msk.bf16.mxu0 %vm1385_vm1, %v1630_v18  ;;  %1975 = vmatprep.subr.bf16.mxu1 %v4783_v32  ;;  %v4887_v36 = vld [vmem:[%s6174_s5] ss:$8 sps:$4 sm:$0xff]   ;;  %6272 = vst [vmem:[#allocation7_spill] sm:$0xff] %v4895_v37  ;;  %v4900_v43 = vld [vmem:[%s6174_s5 + $0xb0] ss:$8 sps:$4 sm:$0xff]  }
  0x46   : > { %6273 = vst [vmem:[#allocation8_spill] sm:$0xff] %v4900_v43  ;;  %v4907_v49 = vld [vmem:[%s6174_s5 + $0xa4] ss:$8 sps:$4 sm:$0xff]   ;;  %v4912_v41 = vld [vmem:[%s6174_s5 + $0xa0] ss:$8 sps:$4 sm:$0xff]  }
  0x47   : > { %600 = vadd.xlane.f32.xlu0 %v570_v51  ;;  %6274 = vst [vmem:[#allocation9_spill] sm:$0xff] %v4907_v49  ;;  %6275 = vst [vmem:[#allocation10_spill] sm:$0xff] %v4912_v41  ;;  %v4919_v29 = vld [vmem:[%s6174_s5 + $0x94] ss:$8 sps:$4 sm:$0xff]   ;;  %v4924_v25 = vld [vmem:[%s6174_s5 + $0x90] ss:$8 sps:$4 sm:$0xff]  }
  0x48   : > { %6276 = vst [vmem:[#allocation11_spill] sm:$0xff] %v4919_v29  ;;  %6277 = vst [vmem:[#allocation12_spill] sm:$0xff] %v4924_v25  ;;  %v4929_v14 = vld [vmem:[%s6174_s5 + $0x84] ss:$8 sps:$4 sm:$0xff]   ;;  %v4936_v35 = vld [vmem:[%s6174_s5 + $0x80] ss:$8 sps:$4 sm:$0xff]  }
  0x49   : > { %3979 = vmatmul.mubr.msk.bf16.vlgmr.msra.gmra.mxu0 %vm1378_vm0, %v4426_v0  ;;  %3984 = vmatmul.mubr.msk.bf16.vlgmr.msra.gmra.mxu1 %vm1378_vm0, %v4540_v56  ;;  %v4750_v0 = vld [vmem:[%s6174_s5 + $0x70] ss:$8 sps:$4 sm:$0xff]   ;;  %6278 = vst [vmem:[#allocation13_spill] sm:$0xff] %v4929_v14  ;;  %6279 = vst [vmem:[#allocation14_spill] sm:$0xff] %v4936_v35  ;;  %v795_v42 = vmul.f32 0.95, %v4580_v16 }
  0x4a   : > { %1689 = vmatprep.mubr.bf16.mxu0 %v6270_v28  ;;  %4133 = vmatpush3.bf16.msra.mxu0 %v1756_v55  ;;  %v807_v8 = vmul.f32 0.95, %v4593_v23  ;;  %v819_v44 = vmul.f32 0.95, %v4627_v40  ;;  %v792_v26 = vmul.f32 0.95, %v4465_v11 }
  0x4b   : > { %1800 = vmatprep.mubr.bf16.mxu1 %v6270_v28  ;;  %1976 = vmatpush1.bf16.msra.mxu1 %v4778_v30  ;;  %v796_v50 = vmax.f32 %v795_v42, 0.0  ;;  %v6283_v51 = vld [vmem:[#allocation2_spill] sm:$0xff]  ;;  %v810_v11 = vmul.f32 0.95, %v4611_v38 }
  0x4c   : > { %1977 = vmatprep.subr.bf16.mxu1 %v4801_v34  ;;  %v808_v59 = vmax.f32 %v807_v8, 0.0  ;;  %v820_v47 = vmax.f32 %v819_v44, 0.0  ;;  %v804_v55 = vmul.f32 0.95, %v6283_v51  ;;  %v793_v40 = vmax.f32 %v792_v26, 0.0 }
  0x4d   : > { %v4944_v18 = vmin.f32 %v796_v50, 1.0  ;;  %v811_v26 = vmax.f32 %v810_v11, 0.0 }
  0x4e   : > { %v4946_v46 = vmin.f32 %v808_v59, 1.0  ;;  %v4948_v17 = vmin.f32 %v820_v47, 1.0  ;;  %v4956_v44 = vmin.f32 %v793_v40, 1.0  ;;  %v805_v50 = vmax.f32 %v804_v55, 0.0 }
  0x4f   : > { %1978 = vmatpush1.bf16.msra.mxu1 %v4796_v9  ;;  %6280 = vst [vmem:[#allocation15_spill] sm:$0xff] %v4944_v18  ;;  %v833_v16 = vmul.f32 0.2989, %v4944_v18  ;;  %v798_v47 = vmul.f32 0.95, %v4586_v20 }
  0x50   : > { %1979 = vmatprep.subr.bf16.mxu1 %v4843_v19  ;;  %6281 = vst [vmem:[#allocation16_spill] sm:$0xff] %v4946_v46  ;;  %6282 = vst [vmem:[#allocation17_spill] sm:$0xff] %v4948_v17  ;;  %v834_v23 = vmul.f32 0.587, %v4946_v46  ;;  %v836_v42 = vmul.f32 0.114, %v4948_v17 }
  0x51   : > { %3980 = vmatmul.mubr.msk.bf16.gmra.mxu0 %vm1378_vm0, %v4460_v6  ;;  %3985 = vmatmul.mubr.msk.bf16.gmra.mxu1 %vm1378_vm0, %v4638_v7  ;;  %v4755_v6 = vld [vmem:[%s6174_s5 + $0x74] ss:$8 sps:$4 sm:$0xff]   ;;  %6284 = vst [vmem:[#allocation2_spill] sm:$0xff] %v4956_v44  ;;  %v828_v51 = vmul.f32 0.2989, %v4956_v44  ;;  %v799_v46 = vmax.f32 %v798_v47, 0.0 }
  0x52   : > { %4134 = vmatprep.mubr.msk.bf16.mxu0 %vm1378_vm0, %v4540_v56  ;;  %2007 = vmatprep.mubr.bf16.mxu1 %v6270_v28  ;;  %v4760_v56 = vld [vmem:[%s6174_s5 + $0x64] ss:$8 sps:$4 sm:$0xff]   ;;  %v835_v8 = vadd.f32 %v834_v23, %v833_v16  ;;  %v822_v16 = vmul.f32 0.95, %v4630_v3 }
  0x53   : > { %2098 = vmatprep.subr.bf16.mxu0 %v4755_v6  ;;  %1980 = vmatpush1.bf16.msra.mxu1 %v4838_v10  ;;  %v4968_v40 = vmin.f32 %v799_v46, 1.0 }
  0x54   : > { %1981 = vmatprep.subr.bf16.mxu1 %v4848_v57 }
  0x55   : > { %6287 = vst [vmem:[#allocation20_spill] sm:$0xff] %v4968_v40 }
  0x57   : > { %1982 = vmatpush1.bf16.msra.mxu1 %v4867_v31 }
  0x58   : > { %1983 = vmatprep.subr.bf16.mxu1 %v4895_v37 }
  0x59   : > { %4135 = vmatmul.mubr.msk.bf16.vlgmr.msra.gmra.mxu0 %vm1378_vm0, %v4638_v7  ;;  %v4767_v7 = vld [vmem:[%s6174_s5 + $0x60] ss:$8 sps:$4 sm:$0xff]  }
  0x5a   : > { %2130 = vmatprep.mubr.bf16.mxu0 %v6270_v28  ;;  %2099 = vmatpush1.bf16.msra.mxu0 %v4750_v0 }
  0x5b   : > { %2100 = vmatprep.subr.bf16.mxu0 %v4760_v56  ;;  %1984 = vmatpush1.bf16.msra.mxu1 %v4900_v43 }
  0x5c   : > { %1985 = vmatprep.subr.bf16.mxu1 %v4907_v49 }
  0x5e   : > { %2101 = vmatpush1.bf16.msra.mxu0 %v4767_v7 }
  0x5f   : > { %2102 = vmatprep.subr.bf16.mxu0 %v4773_v58  ;;  %1986 = vmatpush1.bf16.msra.mxu1 %v4912_v41 }
  0x60   : > { %1987 = vmatprep.subr.bf16.mxu1 %v4919_v29 }
  0x62   : > { %2103 = vmatpush1.bf16.msra.mxu0 %v4790_v2 }
  0x63   : > { %2104 = vmatprep.subr.bf16.mxu0 %v4807_v27  ;;  %1988 = vmatpush1.bf16.msra.mxu1 %v4924_v25 }
  0x64   : > { %1989 = vmatprep.subr.bf16.mxu1 %v4929_v14 }
  0x66   : > { %2105 = vmatpush1.bf16.msra.mxu0 %v4814_v52 }
  0x67   : > { %2106 = vmatprep.subr.bf16.mxu0 %v4821_v53  ;;  %1990 = vmatpush1.bf16.msra.mxu1 %v4936_v35  ;;  %v837_v35 = vadd.f32 %v836_v42, %v835_v8  ;;  %v4970_v42 = vmin.f32 %v811_v26, 1.0  ;;  %v823_v8 = vmax.f32 %v822_v16, 0.0 }
  0x68   : > { %2143 = vmatprep.subr.bf16.mxu1 %v4783_v32  ;;  %v816_v32 = vmul.f32 0.95, %v4471_v15  ;;  %v4961_v15 = vmin.f32 %v805_v50, 1.0 }
  0x69   : > { %857 = vadd.xlane.f32.xlu1 %v837_v35  ;;  %6288 = vst [vmem:[#allocation21_spill] sm:$0xff] %v4970_v42  ;;  %v4973_v11 = vmin.f32 %v823_v8, 1.0  ;;  %v839_v3 = vmul.f32 0.587, %v4970_v42 }
  0x6a   : > { %2107 = vmatpush1.bf16.msra.mxu0 %v4827_v60  ;;  %v817_v59 = vmax.f32 %v816_v32, 0.0  ;;  %6285 = vst [vmem:[#allocation18_spill] sm:$0xff] %v4961_v15  ;;  %v829_v55 = vmul.f32 0.587, %v4961_v15 }
  0x6b   : > { %2108 = vmatprep.subr.bf16.mxu0 %v4833_v54  ;;  %6289 = vst [vmem:[#allocation22_spill] sm:$0xff] %v4973_v11 }
  0x6c   : > { %v4963_v18 = vmin.f32 %v817_v59, 1.0  ;;  %v830_v38 = vadd.f32 %v829_v55, %v828_v51  ;;  %v838_v59 = vmul.f32 0.2989, %v4968_v40 }
  0x6e   : > { %2109 = vmatpush1.bf16.msra.mxu0 %v4854_v21  ;;  %6286 = vst [vmem:[#allocation19_spill] sm:$0xff] %v4963_v18  ;;  %v831_v32 = vmul.f32 0.114, %v4963_v18  ;;  %v840_v15 = vadd.f32 %v839_v3, %v838_v59  ;;  %v841_v18 = vmul.f32 0.114, %v4973_v11 }
  0x6f   : > { %2110 = vmatprep.subr.bf16.mxu0 %v4861_v24 }
  0x70   : > { %v832_v47 = vadd.f32 %v831_v32, %v830_v38  ;;  %v842_v46 = vadd.f32 %v841_v18, %v840_v15 }
  0x72   : > { %2111 = vmatpush1.bf16.msra.mxu0 %v4874_v4  ;;  %848 = vadd.xlane.f32.xlu0 %v832_v47 }
  0x73   : > { %2112 = vmatprep.subr.bf16.mxu0 %v4880_v63 }
  0x76   : > { %2113 = vmatpush1.bf16.msra.mxu0 %v4887_v36  ;;  %867 = vadd.xlane.f32.xlu0 %v842_v46 }
  0x77   : > { %2186 = vmatprep.subr.bf16.mxu0 %v4755_v6 }
  0xaa   : > { %v572_v17 = vpop.xlane.xlu1 %571 }
  0xb0   : > { %v416_v23 = vpop.xlane.xlu0 %415 }
  0xb1   : > { %v417_v20 = vrot.slane %v416_v23, 4 }
  0xb3   : > { %v418_v50 = vadd.f32 %v417_v20, %v416_v23  ;;  %v573_v20 = vrot.slane %v572_v17, 4 }
  0xb5   : > { %v419_v35 = vrot.slane %v418_v50, 2  ;;  %v574_v40 = vadd.f32 %v573_v20, %v572_v17 }
  0xb7   : > { %v420_v44 = vadd.f32 %v419_v35, %v418_v50  ;;  %v575_v50 = vrot.slane %v574_v40, 2 }
  0xb9   : > { %v421_v51 = vrot.slane %v420_v44, 1  ;;  %v576_v25 = vadd.f32 %v575_v50, %v574_v40 }
  0xbb   : > { %v422_v26 = vadd.f32 %v421_v51, %v420_v44 }
  0xbd   : > { %4143 = vpush %v422_v26 }
  0xbf   : > { %v507_v16 = vpop.xlane.xlu1 %506 }
  0xc0   : > { %v581_v55 = vpop.xlane.xlu0 %580  ;;  %v508_v32 = vrot.slane %v507_v16, 4 }
  0xc1   : > { %v582_v8 = vrot.slane %v581_v55, 4 }
  0xc2   : > { %v509_v42 = vadd.f32 %v508_v32, %v507_v16 }
  0xc3   : > { %v591_v23 = vpop.xlane.xlu1 %590  ;;  %v583_v59 = vadd.f32 %v582_v8, %v581_v55  ;;  %v577_v55 = vrot.slane %v576_v25, 1 }
  0xc4   : > { %v592_v38 = vrot.slane %v591_v23, 4  ;;  %v510_v3 = vrot.slane %v509_v42, 2 }
  0xc5   : > { %v584_v35 = vrot.slane %v583_v59, 2  ;;  %v578_v40 = vadd.f32 %v577_v55, %v576_v25 }
  0xc6   : > { %v593_v47 = vadd.f32 %v592_v38, %v591_v23  ;;  %v511_v51 = vadd.f32 %v510_v3, %v509_v42 }
  0xc7   : > { %v585_v41 = vadd.f32 %v584_v35, %v583_v59 }
  0xc8   : > { %v594_v18 = vrot.slane %v593_v47, 2  ;;  %v512_v16 = vrot.slane %v511_v51, 1 }
  0xc9   : > { %v586_v20 = vrot.slane %v585_v41, 1 }
  0xca   : > { %v595_v29 = vadd.f32 %v594_v18, %v593_v47 }
  0xcc   : > { %v425_v11 = vpop.xlane.xlu0 %424  ;;  %v596_v32 = vrot.slane %v595_v29, 1 }
  0xcd   : > { %v426_v15 = vrot.slane %v425_v11, 4 }
  0xce   : > { %v597_v47 = vadd.f32 %v596_v32, %v595_v29 }
  0xcf   : > { %v427_v46 = vadd.f32 %v426_v15, %v425_v11  ;;  %v513_v11 = vadd.f32 %v512_v16, %v511_v51 }
  0xd0   : > { %v601_v44 = vpop.xlane.xlu0 %600 }
  0xd1   : > { %v428_v26 = vrot.slane %v427_v46, 2  ;;  %v602_v14 = vrot.slane %v601_v44, 4 }
  0xd3   : > { %v603_v49 = vadd.f32 %v602_v14, %v601_v44  ;;  %v429_v43 = vadd.f32 %v428_v26, %v427_v46  ;;  %v587_v14 = vadd.f32 %v586_v20, %v585_v41 }
  0xd5   : > { %v604_v17 = vrot.slane %v603_v49, 2  ;;  %v430_v23 = vrot.slane %v429_v43, 1 }
  0xd7   : > { %v431_v8 = vadd.f32 %v430_v23, %v429_v43  ;;  %v605_v37 = vadd.f32 %v604_v17, %v603_v49 }
  0xd8   : > { %v4977_v38 = vpop.f32.mrf.mxu1 }
  0xd9   : > { %4145 = vpush %v431_v8  ;;  %v606_v59 = vrot.slane %v605_v37, 1 }
  0xda   : > { %v4979_v15 = vpop.f32.mrf.mxu1  ;;  %v1429_v42 = vpop.f32.mrf.mxu0  ;;  %4147 = vpush %v513_v11 }
  0xdb   : > { %4149 = vpush %v578_v40  ;;  %v607_v18 = vadd.f32 %v606_v59, %v605_v37 }
  0xdc   : > { %v4119_v3 = vpop.f32.mrf.mxu1  ;;  %v1431_v50 = vpop.f32.mrf.mxu0  ;;  %4151 = vpush %v587_v14 }
  0xdd   : > { %4153 = vpush %v597_v47  ;;  %v813_v47 = vmul.f32 0.95, %v4614_v39 }
  0xde   : > { %v1485_v35 = vpop.f32.mrf.mxu1  ;;  %v1433_v46 = vpop.f32.mrf.mxu0  ;;  %4155 = vpush %v607_v18 }
  0xe0   : > { %v1556_v43 = vpop.f32.mrf.mxu1  ;;  %v1435_v49 = vpop.f32.mrf.mxu0 }
  0xe1   : > { %v1557_v51 = vadd.f32 %v1556_v43, %v1429_v42 }
  0xe2   : > { %v1558_v44 = vpop.f32.mrf.mxu1  ;;  %v1439_v26 = vpop.f32.mrf.mxu0 }
  0xe3   : > { %v1559_v18 = vadd.f32 %v1558_v44, %v1431_v50 }
  0xe4   : > { %v1560_v16 = vpop.f32.mrf.mxu1  ;;  %v1441_v23 = vpop.f32.mrf.mxu0 }
  0xe5   : > { %v1561_v25 = vadd.f32 %v1560_v16, %v1433_v46 }
  0xe6   : > { %v1562_v29 = vpop.f32.mrf.mxu1  ;;  %v1443_v32 = vpop.f32.mrf.mxu0 }
  0xe7   : > { %v1860_v17 = vpack.c.bf16 %v1561_v25, %v1557_v51  ;;  %v1563_v46 = vadd.f32 %v1562_v29, %v1435_v49 }
  0xe8   : > { %v1566_v41 = vpop.f32.mrf.mxu1  ;;  %v1445_v42 = vpop.f32.mrf.mxu0 }
  0xe9   : > { %2131 = vmatmul.mubr.bf16.vlgmr.msra.gmra.mxu0 %v1860_v17  ;;  %v4981_v55 = vadd.f32 %v1566_v41, %v1439_v26  ;;  %v3772_v26 = vlaneseq }
  0xea   : > { %2187 = vmatpush1.bf16.msra.mxu0 %v4750_v0  ;;  %2218 = vmatprep.mubr.bf16.mxu0 %v6270_v28  ;;  %v1568_v37 = vpop.f32.mrf.mxu1 }
  0xeb   : > { %2188 = vmatprep.subr.bf16.mxu0 %v4760_v56  ;;  %v4986_v20 = vadd.f32 %v1568_v37, %v1441_v23  ;;  %v2141_v23 = vpack.c.bf16 %v1563_v46, %v1559_v18  ;;  %v5018_v50 = vand.u32 127, %v3772_v26 }
  0xec   : > { %v1570_v8 = vpop.f32.mrf.mxu1 }
  0xed   : > { %6290 = vst [vmem:[#allocation23_spill] sm:$0xff] %v4986_v20  ;;  %v4988_v11 = vadd.f32 %v1570_v8, %v1443_v32  ;;  %6293 = vst [vmem:[#allocation26_spill] sm:$0xff] %v5018_v50  ;;  %vm3774_vm2 = vcmp.eq.s32.totalorder %v5018_v50, 0  ;;  %vm3778_vm3 = vcmp.eq.s32.totalorder %v5018_v50, 1  ;;  %vm3782_vm4 = vcmp.eq.s32.totalorder %v5018_v50, 2 }
  0xee   : > { %2189 = vmatpush1.bf16.msra.mxu0 %v4767_v7  ;;  %v1572_v40 = vpop.f32.mrf.mxu1  ;;  %s4144_s30 = spop %4143 }
  0xef   : > { %2190 = vmatprep.subr.bf16.mxu0 %v4773_v58  ;;  %v4994_v59 = vadd.f32 %v1572_v40, %v1445_v42 }
  0xf1   : > { %6291 = vst [vmem:[#allocation24_spill] sm:$0xff] %v4994_v59 }
  0xf2   : > { %2191 = vmatpush1.bf16.msra.mxu0 %v4790_v2 }
  0xf3   : > { %2192 = vmatprep.subr.bf16.mxu0 %v4807_v27 }
  0xf6   : > { %2193 = vmatpush1.bf16.msra.mxu0 %v4814_v52 }
  0xf7   : > { %2194 = vmatprep.subr.bf16.mxu0 %v4821_v53 }
  0xfa   : > { %2195 = vmatpush1.bf16.msra.mxu0 %v4827_v60 }
  0xfb   : > { %2196 = vmatprep.subr.bf16.mxu0 %v4833_v54 }
  0xfe   : > { %2197 = vmatpush1.bf16.msra.mxu0 %v4854_v21 }
  0xff   : > { %2198 = vmatprep.subr.bf16.mxu0 %v4861_v24 }
 0x101   : > { %v4124_v43 = vpop.f32.mrf.mxu0  ;;  %v5006_v51 = vpop.f32.mrf.mxu1 }
 0x102   : > { %2199 = vmatpush1.bf16.msra.mxu0 %v4874_v4  ;;  %v5010_v16 = vadd.f32 %v4124_v43, %v4977_v38 }
 0x103   : > { %2200 = vmatprep.subr.bf16.mxu0 %v4880_v63  ;;  %v1609_v25 = vpop.f32.mrf.mxu0  ;;  %v5013_v17 = vpop.f32.mrf.mxu1 }
 0x104   : > { %6292 = vst [vmem:[#allocation25_spill] sm:$0xff] %v5010_v16  ;;  %v5021_v49 = vadd.f32 %v1609_v25, %v4979_v15  ;;  %v3775_v15 = vstv %s4144_s30 }
 0x105   : > { %v4125_v41 = vpop.f32.mrf.mxu0  ;;  %v5015_v37 = vpop.f32.mrf.mxu1  ;;  %v3776_v46 = vsel %vm3774_vm2, %v3775_v15, 0.0  ;;  %v4322_v15 = vld [vmem:[%s4442_s7 + $0x18] sm:$0xff] }
 0x106   : > { %2201 = vmatpush1.bf16.msra.mxu0 %v4887_v36  ;;  %v5023_v44 = vadd.f32 %v4125_v41, %v4119_v3 }
 0x107   : > { %2274 = vmatprep.subr.bf16.mxu0 %v4755_v6  ;;  %v1612_v38 = vpop.f32.mrf.mxu0  ;;  %v5026_v29 = vpop.f32.mrf.mxu1 }
 0x108   : > { %6294 = vst [vmem:[#allocation27_spill] sm:$0xff] %v5023_v44  ;;  %v5030_v8 = vadd.f32 %v1612_v38, %v1485_v35  ;;  %v6307_v44 = vld [vmem:[#allocation11_spill] sm:$0xff] }
 0x109   : > { %2219 = vmatmul.mubr.bf16.vlgmr.msra.gmra.mxu0 %v2141_v23  ;;  %v1681_v42 = vpop.f32.mrf.mxu0  ;;  %v1792_v40 = vpop.f32.mrf.mxu1 }
 0x10a   : > { %2275 = vmatpush1.bf16.msra.mxu0 %v4750_v0  ;;  %2306 = vmatprep.mubr.bf16.mxu0 %v6270_v28  ;;  %s4146_s8 = spop %4145  ;;  %v1793_v0 = vadd.f32 %v1792_v40, %v1681_v42  ;;  %v6308_v20 = vpack.c.bf16 %v5030_v8, %v5021_v49 }
 0x10b   : > { %2276 = vmatprep.subr.bf16.mxu0 %v4760_v56  ;;  %v1683_v3 = vpop.f32.mrf.mxu0  ;;  %v1794_v35 = vpop.f32.mrf.mxu1  ;;  %v3779_v18 = vstv %s4146_s8  ;;  %s4148_s9 = spop %4147 }
 0x10c   : > { %v3780_v43 = vsel %vm3778_vm3, %v3779_v18, 0.0  ;;  %v3783_v26 = vstv %s4148_s9  ;;  %s4150_s11 = spop %4149  ;;  %v801_v18 = vmul.f32 0.95, %v4322_v15  ;;  %v649_v15 = vmul.f32 0.95, %v4666_v48 }
 0x10d   : > { %v1685_v25 = vpop.f32.mrf.mxu0  ;;  %v1796_v23 = vpop.f32.mrf.mxu1  ;;  %v3781_v41 = vadd.f32 %v3780_v43, %v3776_v46  ;;  %s4152_s12 = spop %4151  ;;  %v3784_v38 = vsel %vm3782_vm4, %v3783_v26, 0.0  ;;  %v6299_v26 = vld [vmem:[#allocation4_spill] sm:$0xff]  ;;  %v641_v48 = vmul.f32 0.95, %v4705_v61 }
 0x10e   : > { %2277 = vmatpush1.bf16.msra.mxu0 %v4767_v7  ;;  %v1797_v56 = vadd.f32 %v1796_v23, %v1685_v25  ;;  %s589_s13 = sadd.f32 %s4152_s12, %s4150_s11  ;;  %s4154_s14 = spop %4153  ;;  %v629_v25 = vmul.f32 0.95, %v6299_v26  ;;  %v6300_v23 = vld [vmem:[#allocation5_spill] sm:$0xff] }
 0x10f   : > { %2278 = vmatprep.subr.bf16.mxu0 %v4773_v58  ;;  %v1687_v32 = vpop.f32.mrf.mxu0  ;;  %v1798_v14 = vpop.f32.mrf.mxu1  ;;  %v5042_v42 = vadd.f32 %v3784_v38, %v3781_v41  ;;  %s4156_s15 = spop %4155  ;;  %v6298_v58 = vld [vmem:[#allocation3_spill] sm:$0xff]  ;;  %v617_v41 = vmul.f32 0.95, %v4660_v33  ;;  %v5062_v38 = vmul.f32 0.95, %v4633_v5 }
 0x110   : > { %v1861_v40 = vpack.c.bf16 %v1797_v56, %v1793_v0  ;;  %s599_s16 = sadd.f32 %s4154_s14, %s589_s13  ;;  %v612_v43 = vmul.f32 0.95, %v6298_v58  ;;  %v5055_v0 = vmul.f32 0.95, %v6300_v23  ;;  %v802_v56 = vmax.f32 %v801_v18, 0.0 }
 0x111   : > { %6295 = vst [vmem:[#allocation28_spill] sm:$0xff] %v5042_v42  ;;  %v5047_v7 = vpop.f32.mrf.mxu0  ;;  %v5049_v46 = vpop.f32.mrf.mxu1  ;;  %v5066_v58 = vadd.f32 %v1794_v35, %v1683_v3  ;;  %v5069_v26 = vadd.f32 %v1798_v14, %v1687_v32  ;;  %v637_v5 = vmul.f32 0.95, %v4681_v62  ;;  %v625_v18 = vmul.f32 0.95, %v4703_v1 }
 0x112   : > { %2279 = vmatpush1.bf16.msra.mxu0 %v4790_v2  ;;  %6296 = vst [vmem:[#allocation29_spill] sm:$0xff] %v5047_v7  ;;  %6297 = vst [vmem:[#allocation30_spill] sm:$0xff] %v5049_v46  ;;  %2008 = vmatmul.mubr.bf16.vlgmr.msra.gmra.mxu1 %v1861_v40  ;;  %s609_s17 = sadd.f32 %s4156_s15, %s599_s16  ;;  %v633_v40 = vmul.f32 0.95, %v4664_v45  ;;  %v653_v45 = vmul.f32 0.95, %v4686_v13 }
 0x113   : > { %2280 = vmatprep.subr.bf16.mxu0 %v4807_v27  ;;  %2144 = vmatpush1.bf16.msra.mxu1 %v4778_v30  ;;  %v1693_v39 = vpop.f32.mrf.mxu0  ;;  %v1804_v2 = vpop.f32.mrf.mxu1  ;;  %v814_v27 = vmax.f32 %v813_v47, 0.0  ;;  %v621_v47 = vmul.f32 0.95, %v4669_v22  ;;  %v657_v14 = vmul.f32 0.95, %v4708_v12  ;;  %v5084_v32 = vmin.f32 %v802_v56, 1.0 }
 0x114   : > { %2175 = vmatprep.mubr.bf16.mxu1 %v6270_v28  ;;  %2145 = vmatprep.subr.bf16.mxu1 %v4801_v34  ;;  %s610_s18 = smul.f32 0.00390625, %s609_s17  ;;  %v5092_v61 = vadd.f32 %v1804_v2, %v1693_v39 }
 0x115   : > { %v5071_v23 = vpop.f32.mrf.mxu0  ;;  %v5073_v33 = vpop.f32.mrf.mxu1  ;;  %v5086_v22 = vmin.f32 %v814_v27, 1.0 }
 0x116   : > { %2281 = vmatpush1.bf16.msra.mxu0 %v4814_v52  ;;  %6301 = vst [vmem:[#allocation3_spill] sm:$0xff] %v5071_v23  ;;  %6302 = vst [vmem:[#allocation4_spill] sm:$0xff] %v5073_v33  ;;  %s611_s19 = smul.f32 0.05, %s610_s18 }
 0x117   : > { %2282 = vmatprep.subr.bf16.mxu0 %v4821_v53  ;;  %2146 = vmatpush1.bf16.msra.mxu1 %v4796_v9  ;;  %v1808_v52 = vpop.f32.mrf.mxu1  ;;  %v1697_v1 = vpop.f32.mrf.mxu0 }
 0x118   : > { %2147 = vmatprep.subr.bf16.mxu1 %v4843_v19  ;;  %v613_v53 = vstv %s611_s19  ;;  %v5094_v3 = vadd.f32 %v1808_v52, %v1697_v1 }
 0x119   : > { %v614_v12 = vadd.f32 %v613_v53, %v612_v43  ;;  %v618_v35 = vadd.f32 %v617_v41, %v613_v53  ;;  %v622_v56 = vadd.f32 %v621_v47, %v613_v53  ;;  %v626_v27 = vadd.f32 %v625_v18, %v613_v53  ;;  %v4136_v52 = vpop.f32.mrf.mxu0 }
 0x11a   : > { %2283 = vmatpush1.bf16.msra.mxu0 %v4827_v60  ;;  %v630_v62 = vadd.f32 %v629_v25, %v613_v53  ;;  %v634_v6 = vadd.f32 %v633_v40, %v613_v53  ;;  %v638_v42 = vadd.f32 %v637_v5, %v613_v53  ;;  %v642_v50 = vadd.f32 %v641_v48, %v613_v53 }
 0x11b   : > { %2284 = vmatprep.subr.bf16.mxu0 %v4833_v54  ;;  %2148 = vmatpush1.bf16.msra.mxu1 %v4838_v10  ;;  %v615_v60 = vmax.f32 %v614_v12, 0.0  ;;  %v619_v13 = vmax.f32 %v618_v35, 0.0  ;;  %v623_v39 = vmax.f32 %v622_v56, 0.0  ;;  %v627_v2 = vmax.f32 %v626_v27, 0.0  ;;  %v6303_v35 = vld [vmem:[#allocation7_spill] sm:$0xff] }
 0x11c   : > { %2149 = vmatprep.subr.bf16.mxu1 %v4848_v57  ;;  %v631_v54 = vmax.f32 %v630_v62, 0.0  ;;  %v635_v43 = vmax.f32 %v634_v6, 0.0  ;;  %v639_v41 = vmax.f32 %v638_v42, 0.0  ;;  %v643_v47 = vmax.f32 %v642_v50, 0.0  ;;  %v1845_v62 = vpop.f32.mrf.mxu0 }
 0x11d   : > { %v616_v18 = vmin.f32 %v615_v60, 1.0  ;;  %v620_v1 = vmin.f32 %v619_v13, 1.0  ;;  %v624_v16 = vmin.f32 %v623_v39, 1.0  ;;  %v628_v25 = vmin.f32 %v627_v2, 1.0 }
 0x11e   : > { %2285 = vmatpush1.bf16.msra.mxu0 %v4854_v21  ;;  %v632_v40 = vmin.f32 %v631_v54, 1.0  ;;  %v636_v5 = vmin.f32 %v635_v43, 1.0  ;;  %v5102_v48 = vmin.f32 %v639_v41, 1.0  ;;  %v5104_v12 = vmin.f32 %v643_v47, 1.0  ;;  %v5132_v47 = vld [vmem:[%s6174_s5 + $0x170] ss:$8 sps:$4 sm:$0xff]  }
 0x11f   : > { %2286 = vmatprep.subr.bf16.mxu0 %v4861_v24  ;;  %2150 = vmatpush1.bf16.msra.mxu1 %v4867_v31  ;;  %v646_v21 = vadd.f32 %v5055_v0, %v613_v53  ;;  %v650_v6 = vadd.f32 %v649_v15, %v613_v53  ;;  %v654_v50 = vadd.f32 %v653_v45, %v613_v53  ;;  %v661_v13 = vmul.f32 0.2989, %v616_v18  ;;  %v5116_v0 = vld [vmem:[%s6174_s5 + $0x174] ss:$8 sps:$4 sm:$0xff]  }
 0x120   : > { %2151 = vmatprep.subr.bf16.mxu1 %v6303_v35  ;;  %v658_v42 = vadd.f32 %v657_v14, %v613_v53  ;;  %v662_v56 = vmul.f32 0.587, %v632_v40  ;;  %v666_v27 = vmul.f32 0.2989, %v620_v1  ;;  %v5110_v24 = vadd.f32 %v4136_v52, %v5006_v51  ;;  %v6304_v15 = vld [vmem:[#allocation8_spill] sm:$0xff]  ;;  %v6305_v51 = vld [vmem:[#allocation9_spill] sm:$0xff] }
 0x121   : > { %v647_v60 = vmax.f32 %v646_v21, 0.0  ;;  %v651_v39 = vmax.f32 %v650_v6, 0.0  ;;  %v655_v2 = vmax.f32 %v654_v50, 0.0  ;;  %v667_v14 = vmul.f32 0.587, %v636_v5  ;;  %v4137_v21 = vpop.f32.mrf.mxu0 }
 0x122   : > { %2287 = vmatpush1.bf16.msra.mxu0 %v4874_v4  ;;  %v659_v54 = vmax.f32 %v658_v42, 0.0  ;;  %v663_v45 = vadd.f32 %v662_v56, %v661_v13  ;;  %v671_v53 = vmul.f32 0.2989, %v624_v16  ;;  %v672_v4 = vmul.f32 0.587, %v5102_v48 }
 0x123   : > { %2288 = vmatprep.subr.bf16.mxu0 %v4880_v63  ;;  %2152 = vmatpush1.bf16.msra.mxu1 %v6304_v15  ;;  %v5121_v52 = vmin.f32 %v647_v60, 1.0  ;;  %v5123_v43 = vmin.f32 %v651_v39, 1.0  ;;  %v5125_v41 = vmin.f32 %v655_v2, 1.0  ;;  %v668_v6 = vadd.f32 %v667_v14, %v666_v27  ;;  %v5139_v56 = vld [vmem:[%s6174_s5 + $0x164] ss:$8 sps:$4 sm:$0xff]  }
 0x124   : > { %2153 = vmatprep.subr.bf16.mxu1 %v6305_v51  ;;  %v5127_v63 = vmin.f32 %v659_v54, 1.0  ;;  %v673_v50 = vadd.f32 %v672_v4, %v671_v53  ;;  %v676_v42 = vmul.f32 0.2989, %v628_v25  ;;  %v677_v13 = vmul.f32 0.587, %v5104_v12  ;;  %v6306_v54 = vld [vmem:[#allocation10_spill] sm:$0xff] }
 0x125   : > { %v664_v60 = vmul.f32 0.114, %v5121_v52  ;;  %v669_v39 = vmul.f32 0.114, %v5123_v43  ;;  %v674_v2 = vmul.f32 0.114, %v5125_v41  ;;  %v5146_v27 = vadd.f32 %v1845_v62, %v5013_v17 }
 0x126   : > { %2289 = vmatpush1.bf16.msra.mxu0 %v4887_v36  ;;  %v678_v14 = vadd.f32 %v677_v13, %v676_v42  ;;  %v679_v36 = vmul.f32 0.114, %v5127_v63  ;;  %v685_v53 = vmul.f32 1.1, %v616_v18  ;;  %v689_v4 = vmul.f32 1.1, %v620_v1  ;;  %v1848_v1 = vpop.f32.mrf.mxu0 }
 0x127   : > { %2556 = vmatprep.subr.bf16.mxu0 %v5116_v0  ;;  %2154 = vmatpush1.bf16.msra.mxu1 %v6306_v54  ;;  %v665_v33 = vadd.f32 %v664_v60, %v663_v45  ;;  %v670_v23 = vadd.f32 %v669_v39, %v668_v6  ;;  %v675_v46 = vadd.f32 %v674_v2, %v673_v50  ;;  %v693_v7 = vmul.f32 1.1, %v624_v16  ;;  %v5157_v17 = vld [vmem:[%s6174_s5 + $0x160] ss:$8 sps:$4 sm:$0xff]   ;;  %v5162_v18 = vld [vmem:[%s6174_s5 + $0x154] ss:$8 sps:$4 sm:$0xff]  }
 0x128   : > { %2155 = vmatprep.subr.bf16.mxu1 %v6307_v44  ;;  %v680_v62 = vadd.f32 %v679_v36, %v678_v14  ;;  %v697_v45 = vmul.f32 1.1, %v628_v25  ;;  %v701_v6 = vmul.f32 1.1, %v632_v40  ;;  %v705_v50 = vmul.f32 1.1, %v636_v5 }
 0x129   : > { %2307 = vmatmul.mubr.bf16.vlgmr.msra.gmra.mxu0 %v6308_v20  ;;  %v681_v20 = vmul.f32 -0.1, %v665_v33  ;;  %v682_v16 = vmul.f32 -0.1, %v670_v23  ;;  %v683_v49 = vmul.f32 -0.1, %v675_v46  ;;  %v5168_v8 = vadd.f32 %v4137_v21, %v5015_v37 }
 0x12a   : > { %2557 = vmatpush1.bf16.msra.mxu0 %v5132_v47  ;;  %2588 = vmatprep.mubr.bf16.mxu0 %v6270_v28  ;;  %v6309_v42 = vld [vmem:[#allocation12_spill] sm:$0xff]  ;;  %v684_v13 = vmul.f32 -0.1, %v680_v62  ;;  %v709_v60 = vmul.f32 1.1, %v5102_v48  ;;  %v5174_v40 = vadd.f32 %v1848_v1, %v5026_v29  ;;  %v6310_v5 = vld [vmem:[#allocation13_spill] sm:$0xff] }
 0x12b   : > { %2558 = vmatprep.subr.bf16.mxu0 %v5139_v56  ;;  %2156 = vmatpush1.bf16.msra.mxu1 %v6309_v42  ;;  %v713_v25 = vmul.f32 1.1, %v5104_v12  ;;  %v686_v33 = vadd.f32 %v685_v53, %v681_v20  ;;  %v690_v23 = vadd.f32 %v689_v4, %v682_v16  ;;  %v694_v46 = vadd.f32 %v693_v7, %v683_v49  ;;  %v5181_v48 = vld [vmem:[%s6174_s5 + $0x150] ss:$8 sps:$4 sm:$0xff]   ;;  %v5187_v7 = vld [vmem:[%s6174_s5 + $0x144] ss:$8 sps:$4 sm:$0xff]  }
 0x12c   : > { %2157 = vmatprep.subr.bf16.mxu1 %v6310_v5  ;;  %v702_v39 = vadd.f32 %v701_v6, %v681_v20  ;;  %v698_v2 = vadd.f32 %v697_v45, %v684_v13  ;;  %v706_v14 = vadd.f32 %v705_v50, %v682_v16  ;;  %v710_v37 = vadd.f32 %v709_v60, %v683_v49  ;;  %v6311_v53 = vld [vmem:[#allocation14_spill] sm:$0xff] }
 0x12d   : > { %v714_v21 = vadd.f32 %v713_v25, %v684_v13  ;;  %v687_v12 = vmax.f32 %v686_v33, 0.0  ;;  %v691_v29 = vmax.f32 %v690_v23, 0.0  ;;  %v695_v36 = vmax.f32 %v694_v46, 0.0  ;;  %v6312_v23 = vld [vmem:[#allocation6_spill] sm:$0xff] }
 0x12e   : > { %2559 = vmatpush1.bf16.msra.mxu0 %v5157_v17  ;;  %v703_v1 = vmax.f32 %v702_v39, 0.0  ;;  %v699_v4 = vmax.f32 %v698_v2, 0.0  ;;  %v707_v62 = vmax.f32 %v706_v14, 0.0  ;;  %v711_v45 = vmax.f32 %v710_v37, 0.0  ;;  %v5194_v46 = vld [vmem:[%s6174_s5 + $0x140] ss:$8 sps:$4 sm:$0xff]  }
 0x12f   : > { %2560 = vmatprep.subr.bf16.mxu0 %v5162_v18  ;;  %2158 = vmatpush1.bf16.msra.mxu1 %v6311_v53  ;;  %v715_v6 = vmax.f32 %v714_v21, 0.0  ;;  %v688_v50 = vmin.f32 %v687_v12, 1.0  ;;  %v692_v60 = vmin.f32 %v691_v29, 1.0  ;;  %v696_v25 = vmin.f32 %v695_v36, 1.0  ;;  %v5200_v37 = vld [vmem:[%s6174_s5 + $0x134] ss:$8 sps:$4 sm:$0xff]  }
 0x130   : > { %v704_v33 = vmin.f32 %v703_v1, 1.0  ;;  %2231 = vmatprep.subr.bf16.mxu1 %v6312_v23  ;;  %v700_v39 = vmin.f32 %v699_v4, 1.0  ;;  %v708_v59 = vmin.f32 %v707_v62, 1.0  ;;  %v712_v2 = vmin.f32 %v711_v45, 1.0  ;;  %v5206_v36 = vld [vmem:[%s4450_s10] sm:$0xff]  ;;  %v5215_v45 = vld [vmem:[%s4450_s10 + $0x8] sm:$0xff] }
 0x131   : > { %v716_v14 = vmin.f32 %v715_v6, 1.0  ;;  %v717_v21 = vmul.f32 1.1, %v5121_v52  ;;  %v721_v12 = vmul.f32 1.1, %v5123_v43  ;;  %v733_v1 = vsub.f32 %v5206_v36, %v688_v50  ;;  %6314 = vst [vmem:[#allocation5_spill] sm:$0xff] %v5215_v45 }
 0x132   : > { %2561 = vmatpush1.bf16.msra.mxu0 %v5181_v48  ;;  %v725_v29 = vmul.f32 1.1, %v5125_v41  ;;  %v6313_v4 = vpack.c.bf16 %v5069_v26, %v5066_v58  ;;  %v729_v62 = vmul.f32 1.1, %v5127_v63  ;;  %v734_v52 = vsub.f32 %v5215_v45, %v692_v60  ;;  %v5219_v43 = vld [vmem:[%s4450_s10 + $0x10] sm:$0xff]  ;;  %v5223_v6 = vld [vmem:[%s4450_s10 + $0x18] sm:$0xff] }
 0x133   : > { %2562 = vmatprep.subr.bf16.mxu0 %v5187_v7  ;;  %6315 = vst [vmem:[#allocation7_spill] sm:$0xff] %v5219_v43  ;;  %v735_v41 = vsub.f32 %v5219_v43, %v696_v25  ;;  %v736_v50 = vsub.f32 %v5223_v6, %v700_v39  ;;  %v718_v58 = vadd.f32 %v717_v21, %v681_v20  ;;  %v5229_v63 = vld [vmem:[%s4450_s10 + $0x20] sm:$0xff]  ;;  %v5246_v21 = vld [vmem:[%s4450_s10 + $0x28] sm:$0xff] }
 0x134   : > { %2176 = vmatmul.mubr.bf16.vlgmr.msra.gmra.mxu1 %v6313_v4  ;;  %v722_v26 = vadd.f32 %v721_v12, %v682_v16  ;;  %v726_v23 = vadd.f32 %v725_v29, %v683_v49  ;;  %v749_v4 = vsub.f32 %v5229_v63, %v704_v33  ;;  %v730_v60 = vadd.f32 %v729_v62, %v684_v13  ;;  %v5250_v29 = vld [vmem:[%s4450_s10 + $0x30] sm:$0xff] }
 0x135   : > { %2232 = vmatpush1.bf16.msra.mxu1 %v4778_v30  ;;  %2263 = vmatprep.mubr.bf16.mxu1 %v6270_v28  ;;  %v737_v25 = vadd.f32 %v734_v52, %v733_v1  ;;  %v738_v43 = vsub.f32 %v733_v1, %v734_v52  ;;  %v739_v45 = vadd.f32 %v736_v50, %v735_v41  ;;  %v5237_v30 = vld [vmem:[%s6174_s5 + $0x130] ss:$8 sps:$4 sm:$0xff]   ;;  %v719_v20 = vmax.f32 %v718_v58, 0.0 }
 0x136   : > { %2233 = vmatprep.subr.bf16.mxu1 %v4801_v34  ;;  %2563 = vmatpush1.bf16.msra.mxu0 %v5194_v46  ;;  %v723_v16 = vmax.f32 %v722_v26, 0.0  ;;  %v727_v49 = vmax.f32 %v726_v23, 0.0  ;;  %v740_v39 = vsub.f32 %v735_v41, %v736_v50  ;;  %v5243_v34 = vld [vmem:[%s6174_s5 + $0x124] ss:$8 sps:$4 sm:$0xff]   ;;  %v731_v13 = vmax.f32 %v730_v60, 0.0  ;;  %v5256_v23 = vld [vmem:[%s4450_s10 + $0x38] sm:$0xff] }
 0x137   : > { %2564 = vmatprep.subr.bf16.mxu0 %v5200_v37  ;;  %v743_v33 = vsub.f32 %v737_v25, %v739_v45  ;;  %v750_v12 = vsub.f32 %v5246_v21, %v708_v59  ;;  %v751_v1 = vsub.f32 %v5250_v29, %v712_v2  ;;  %v720_v62 = vmin.f32 %v719_v20, 1.0  ;;  %v5266_v25 = vld [vmem:[%s4450_s10 + $0x40] sm:$0xff] }
 0x138   : > { %v724_v52 = vmin.f32 %v723_v16, 1.0  ;;  %v728_v41 = vmin.f32 %v727_v49, 1.0  ;;  %v741_v50 = vadd.f32 %v740_v39, %v738_v43  ;;  %v732_v58 = vmin.f32 %v731_v13, 1.0  ;;  %6316 = vst [vmem:[#allocation8_spill] sm:$0xff] %v5266_v25 }
 0x139   : > { %2234 = vmatpush1.bf16.msra.mxu1 %v4796_v9  ;;  %v744_v26 = vand.u32 2147483647, %v743_v33  ;;  %v746_v45 = vsub.f32 %v738_v43, %v740_v39  ;;  %v752_v59 = vsub.f32 %v5256_v23, %v716_v14  ;;  %v5263_v9 = vld [vmem:[%s6174_s5 + $0x120] ss:$8 sps:$4 sm:$0xff]   ;;  %v753_v60 = vadd.f32 %v750_v12, %v749_v4  ;;  %v5273_v14 = vld [vmem:[%s6174_s5 + $0x114] ss:$8 sps:$4 sm:$0xff]  }
 0x13a   : > { %2235 = vmatprep.subr.bf16.mxu1 %v4843_v19  ;;  %2565 = vmatpush1.bf16.msra.mxu0 %v5237_v30  ;;  %v742_v2 = vand.u32 2147483647, %v741_v50  ;;  %v754_v19 = vsub.f32 %v749_v4, %v750_v12  ;;  %v766_v43 = vsub.f32 %v5266_v25, %v720_v62  ;;  %v5276_v39 = vld [vmem:[%s4450_s10 + $0x48] sm:$0xff]  ;;  %v5281_v33 = vld [vmem:[%s4450_s10 + $0x50] sm:$0xff]  ;;  %v5285_v62 = vld [vmem:[%s4450_s10 + $0x58] sm:$0xff] }
 0x13b   : > { %2566 = vmatprep.subr.bf16.mxu0 %v5243_v34  ;;  %v747_v20 = vand.u32 2147483647, %v746_v45  ;;  %v755_v16 = vadd.f32 %v752_v59, %v751_v1  ;;  %v756_v49 = vsub.f32 %v751_v1, %v752_v59  ;;  %v767_v13 = vsub.f32 %v5276_v39, %v724_v52 }
 0x13c   : > { %v745_v4 = vadd.f32 %v744_v26, %v742_v2  ;;  %v768_v12 = vsub.f32 %v5281_v33, %v728_v41  ;;  %v769_v50 = vsub.f32 %v5285_v62, %v732_v58  ;;  %v2688_v1 = vpack.c.bf16 %v5168_v8, %v5110_v24 }
 0x13d   : > { %2236 = vmatpush1.bf16.msra.mxu1 %v4838_v10  ;;  %v757_v45 = vadd.f32 %v756_v49, %v754_v19  ;;  %v759_v59 = vsub.f32 %v753_v60, %v755_v16  ;;  %v762_v25 = vsub.f32 %v754_v19, %v756_v49  ;;  %v770_v52 = vadd.f32 %v767_v13, %v766_v43  ;;  %v5295_v10 = vld [vmem:[%s6174_s5 + $0x110] ss:$8 sps:$4 sm:$0xff]  }
 0x13e   : > { %2237 = vmatprep.subr.bf16.mxu1 %v4848_v57  ;;  %2567 = vmatpush1.bf16.msra.mxu0 %v5263_v9  ;;  %v748_v41 = vadd.f32 %v747_v20, %v745_v4  ;;  %v771_v26 = vsub.f32 %v766_v43, %v767_v13  ;;  %v772_v2 = vadd.f32 %v769_v50, %v768_v12  ;;  %v5301_v57 = vld [vmem:[%s6174_s5 + $0x104] ss:$8 sps:$4 sm:$0xff]   ;;  %v6317_v16 = vmax.f32 %v5062_v38, 0.0 }
 0x13f   : > { %v773_v58 = vsub.f32 %v768_v12, %v769_v50  ;;  %2568 = vmatprep.subr.bf16.mxu0 %v5273_v14  ;;  %v758_v60 = vand.u32 2147483647, %v757_v45  ;;  %v760_v19 = vand.u32 2147483647, %v759_v59  ;;  %v2230_v43 = vpack.c.bf16 %v5174_v40, %v5146_v27 }
 0x140   : > { %v5305_v49 = vmin.f32 %v6317_v16, 1.0  ;;  %v776_v13 = vsub.f32 %v770_v52, %v772_v2  ;;  %v2600_v12 = vpack.c.bf16 %v5094_v3, %v5092_v61  ;;  %v763_v45 = vand.u32 2147483647, %v762_v25  ;;  %v5397_v16 = vld [vmem:[%s6174_s5 + $0x1b4] ss:$8 sps:$4 sm:$0xff]   ;;  %v4336_v3 = vld [vmem:[%s4442_s7 + $0x28] sm:$0xff] }
 0x141   : > { %2238 = vmatpush1.bf16.msra.mxu1 %v4867_v31  ;;  %v774_v20 = vadd.f32 %v773_v58, %v771_v26  ;;  %v779_v4 = vsub.f32 %v771_v26, %v773_v58  ;;  %v761_v50 = vadd.f32 %v760_v19, %v758_v60  ;;  %v843_v59 = vmul.f32 0.2989, %v5084_v32  ;;  %v5318_v31 = vld [vmem:[%s6174_s5 + $0x100] ss:$8 sps:$4 sm:$0xff]  }
 0x142   : > { %2239 = vmatprep.subr.bf16.mxu1 %v6303_v35  ;;  %2569 = vmatpush1.bf16.msra.mxu0 %v5295_v10  ;;  %v777_v27 = vand.u32 2147483647, %v776_v13  ;;  %v844_v40 = vmul.f32 0.587, %v5086_v22  ;;  %v846_v60 = vmul.f32 0.114, %v5305_v49 }
 0x143   : > { %v775_v38 = vand.u32 2147483647, %v774_v20  ;;  %2570 = vmatprep.subr.bf16.mxu0 %v5301_v57  ;;  %v764_v35 = vadd.f32 %v763_v45, %v761_v50  ;;  %v780_v25 = vand.u32 2147483647, %v779_v4  ;;  %v5411_v20 = vld [vmem:[%s6174_s5 + $0x1a4] ss:$8 sps:$4 sm:$0xff]  }
 0x144   : > { %v845_v58 = vadd.f32 %v844_v40, %v843_v59  ;;  %v5419_v13 = vld [vmem:[%s6174_s5 + $0x1a0] ss:$8 sps:$4 sm:$0xff]   ;;  %v5425_v4 = vld [vmem:[%s6174_s5 + $0x194] ss:$8 sps:$4 sm:$0xff]   ;;  %v5433_v50 = vld [vmem:[%s6174_s5 + $0x190] ss:$8 sps:$4 sm:$0xff]  }
 0x145   : > { %2240 = vmatpush1.bf16.msra.mxu1 %v6304_v15  ;;  %v778_v52 = vadd.f32 %v777_v27, %v775_v38  ;;  %v765_v26 = vadd.f32 %v764_v35, %v748_v41  ;;  %v6318_v15 = vpack.c.bf16 %v4988_v11, %v4981_v55  ;;  %v5348_v55 = vld [vmem:[%s6174_s5 + $0x1f0] ss:$8 sps:$4 sm:$0xff]   ;;  %v5354_v11 = vld [vmem:[%s6174_s5 + $0x1e4] ss:$8 sps:$4 sm:$0xff]   ;;  %v5391_v41 = vld [vmem:[%s6174_s5 + $0x1c0] ss:$8 sps:$4 sm:$0xff]  }
 0x146   : > { %2241 = vmatprep.subr.bf16.mxu1 %v6305_v51  ;;  %2571 = vmatpush1.bf16.msra.mxu0 %v5318_v31  ;;  %v847_v51 = vadd.f32 %v846_v60, %v845_v58  ;;  %v5439_v45 = vld [vmem:[%s6174_s5 + $0x184] ss:$8 sps:$4 sm:$0xff]   ;;  %v6319_v59 = vld [vmem:[#allocation24_spill] sm:$0xff] }
 0x147   : > { %v781_v2 = vadd.f32 %v780_v25, %v778_v52  ;;  %2644 = vmatprep.subr.bf16.mxu0 %v5116_v0  ;;  %v6320_v38 = vld [vmem:[#allocation23_spill] sm:$0xff]  ;;  %v6323_v40 = vld [vmem:[#allocation30_spill] sm:$0xff]  ;;  %v6325_v25 = vld [vmem:[#allocation4_spill] sm:$0xff] }
 0x148   : > { %v6321_v27 = vpack.c.bf16 %v6319_v59, %v6320_v38  ;;  %v6324_v52 = vld [vmem:[#allocation3_spill] sm:$0xff]  ;;  %v4341_v58 = vld [vmem:[%s4442_s7 + $0x10] sm:$0xff] }
 0x149   : > { %2242 = vmatpush1.bf16.msra.mxu1 %v6306_v54  ;;  %v782_v19 = vadd.f32 %v781_v2, %v765_v26  ;;  %2589 = vmatmul.mubr.bf16.vlgmr.msra.gmra.mxu0 %v6318_v15  ;;  %v5362_v54 = vld [vmem:[%s6174_s5 + $0x1e0] ss:$8 sps:$4 sm:$0xff]   ;;  %v1807_v26 = vadd.f32 %v6325_v25, %v6324_v52  ;;  %v1075_v60 = vmul.f32 1.1, %v4341_v58 }
 0x14a   : > { %2243 = vmatprep.subr.bf16.mxu1 %v6307_v44  ;;  %2645 = vmatpush1.bf16.msra.mxu0 %v5132_v47  ;;  %v5340_v44 = vld [vmem:[%s6174_s5 + $0x1f4] ss:$8 sps:$4 sm:$0xff]   ;;  %v5455_v2 = vld [vmem:[%s6174_s5 + $0x180] ss:$8 sps:$4 sm:$0xff]  }
 0x14b   : > { %2676 = vmatprep.mubr.bf16.mxu0 %v6270_v28  ;;  %783 = vadd.xlane.f32.xlu1 %v782_v19 }
 0x14c   : > { %2646 = vmatprep.subr.bf16.mxu0 %v5139_v56 }
 0x14d   : > { %2244 = vmatpush1.bf16.msra.mxu1 %v6309_v42  ;;  %v5369_v42 = vld [vmem:[%s6174_s5 + $0x1d4] ss:$8 sps:$4 sm:$0xff]  }
 0x14e   : > { %2245 = vmatprep.subr.bf16.mxu1 %v6310_v5  ;;  %2647 = vmatpush1.bf16.msra.mxu0 %v5157_v17  ;;  %v5377_v5 = vld [vmem:[%s6174_s5 + $0x1d0] ss:$8 sps:$4 sm:$0xff]  }
 0x14f   : > { %877 = vadd.xlane.f32.xlu1 %v847_v51  ;;  %2648 = vmatprep.subr.bf16.mxu0 %v5162_v18 }
 0x151   : > { %2246 = vmatpush1.bf16.msra.mxu1 %v6311_v53  ;;  %v5383_v53 = vld [vmem:[%s6174_s5 + $0x1c4] ss:$8 sps:$4 sm:$0xff]  }
 0x152   : > { %2433 = vmatprep.subr.bf16.mxu1 %v5340_v44  ;;  %2649 = vmatpush1.bf16.msra.mxu0 %v5181_v48 }
 0x153   : > { %2650 = vmatprep.subr.bf16.mxu0 %v5187_v7 }
 0x154   : > { %2264 = vmatmul.mubr.bf16.vlgmr.msra.gmra.mxu1 %v2230_v43  ;;  %v5405_v43 = vld [vmem:[%s6174_s5 + $0x1b0] ss:$8 sps:$4 sm:$0xff]  }
 0x155   : > { %2434 = vmatpush1.bf16.msra.mxu1 %v5348_v55  ;;  %2465 = vmatprep.mubr.bf16.mxu1 %v6270_v28 }
 0x156   : > { %2435 = vmatprep.subr.bf16.mxu1 %v5354_v11  ;;  %2651 = vmatpush1.bf16.msra.mxu0 %v5194_v46 }
 0x157   : > { %2652 = vmatprep.subr.bf16.mxu0 %v5200_v37 }
 0x159   : > { %2436 = vmatpush1.bf16.msra.mxu1 %v5362_v54 }
 0x15a   : > { %2437 = vmatprep.subr.bf16.mxu1 %v5369_v42  ;;  %2653 = vmatpush1.bf16.msra.mxu0 %v5237_v30 }
 0x15b   : > { %2654 = vmatprep.subr.bf16.mxu0 %v5243_v34 }
 0x15d   : > { %2438 = vmatpush1.bf16.msra.mxu1 %v5377_v5 }
 0x15e   : > { %2439 = vmatprep.subr.bf16.mxu1 %v5383_v53  ;;  %2655 = vmatpush1.bf16.msra.mxu0 %v5263_v9 }
 0x15f   : > { %2656 = vmatprep.subr.bf16.mxu0 %v5273_v14 }
 0x161   : > { %2440 = vmatpush1.bf16.msra.mxu1 %v5391_v41 }
 0x162   : > { %2441 = vmatprep.subr.bf16.mxu1 %v5397_v16  ;;  %2657 = vmatpush1.bf16.msra.mxu0 %v5295_v10 }
 0x163   : > { %2658 = vmatprep.subr.bf16.mxu0 %v5301_v57 }
 0x165   : > { %2442 = vmatpush1.bf16.msra.mxu1 %v5405_v43 }
 0x166   : > { %2443 = vmatprep.subr.bf16.mxu1 %v5411_v20  ;;  %2659 = vmatpush1.bf16.msra.mxu0 %v5318_v31 }
 0x167   : > { %2732 = vmatprep.subr.bf16.mxu0 %v5116_v0  ;;  %v6322_v0 = vld [vmem:[#allocation29_spill] sm:$0xff] }
 0x168   : > { %v1803_v35 = vadd.f32 %v6323_v40, %v6322_v0 }
 0x169   : > { %2444 = vmatpush1.bf16.msra.mxu1 %v5419_v13  ;;  %2677 = vmatmul.mubr.bf16.vlgmr.msra.gmra.mxu0 %v6321_v27 }
 0x16a   : > { %2445 = vmatprep.subr.bf16.mxu1 %v5425_v4  ;;  %2733 = vmatpush1.bf16.msra.mxu0 %v5132_v47  ;;  %v2318_v47 = vpack.c.bf16 %v1807_v26, %v1803_v35 }
 0x16b   : > { %2764 = vmatprep.mubr.bf16.mxu0 %v6270_v28  ;;  %2734 = vmatprep.subr.bf16.mxu0 %v5139_v56  ;;  %v6326_v56 = vld [vmem:[#allocation27_spill] sm:$0xff] }
 0x16d   : > { %2446 = vmatpush1.bf16.msra.mxu1 %v5433_v50 }
 0x16e   : > { %2447 = vmatprep.subr.bf16.mxu1 %v5439_v45  ;;  %2735 = vmatpush1.bf16.msra.mxu0 %v5157_v17  ;;  %v6327_v17 = vld [vmem:[#allocation25_spill] sm:$0xff] }
 0x16f   : > { %2736 = vmatprep.subr.bf16.mxu0 %v5162_v18  ;;  %v6328_v18 = vpack.c.bf16 %v6326_v56, %v6327_v17  ;;  %v4343_v56 = vld [vmem:[%s4442_s7 + $0x50] sm:$0xff] }
 0x170   : > { %v1099_v17 = vmul.f32 1.1, %v4343_v56 }
 0x171   : > { %2448 = vmatpush1.bf16.msra.mxu1 %v5455_v2 }
 0x172   : > { %2601 = vmatprep.subr.bf16.mxu1 %v5340_v44  ;;  %2737 = vmatpush1.bf16.msra.mxu0 %v5181_v48  ;;  %v4335_v48 = vld [vmem:[%s4442_s7 + $0x8] sm:$0xff] }
 0x173   : > { %2738 = vmatprep.subr.bf16.mxu0 %v5187_v7  ;;  %v1072_v61 = vmul.f32 1.1, %v4335_v48  ;;  %v1084_v7 = vmul.f32 1.1, %v4336_v3  ;;  %v1100_v3 = vmax.f32 %v1099_v17, 0.0 }
 0x174   : > { %2466 = vmatmul.mubr.bf16.vlgmr.msra.gmra.mxu1 %v2318_v47 }
 0x175   : > { %2602 = vmatpush1.bf16.msra.mxu1 %v5348_v55  ;;  %2633 = vmatprep.mubr.bf16.mxu1 %v6270_v28 }
 0x176   : > { %2603 = vmatprep.subr.bf16.mxu1 %v5354_v11  ;;  %2739 = vmatpush1.bf16.msra.mxu0 %v5194_v46  ;;  %v4337_v46 = vld [vmem:[%s4442_s7 + $0x48] sm:$0xff] }
 0x177   : > { %2740 = vmatprep.subr.bf16.mxu0 %v5200_v37  ;;  %v1096_v37 = vmul.f32 1.1, %v4337_v46 }
 0x179   : > { %2604 = vmatpush1.bf16.msra.mxu1 %v5362_v54 }
 0x17a   : > { %2605 = vmatprep.subr.bf16.mxu1 %v5369_v42  ;;  %2741 = vmatpush1.bf16.msra.mxu0 %v5237_v30 }
 0x17b   : > { %2742 = vmatprep.subr.bf16.mxu0 %v5243_v34  ;;  %v4339_v34 = vld [vmem:[%s4442_s7 + $0x20] sm:$0xff] }
 0x17d   : > { %2606 = vmatpush1.bf16.msra.mxu1 %v5377_v5 }
 0x17e   : > { %2607 = vmatprep.subr.bf16.mxu1 %v5383_v53  ;;  %2743 = vmatpush1.bf16.msra.mxu0 %v5263_v9  ;;  %v1081_v9 = vmul.f32 1.1, %v4339_v34 }
 0x17f   : > { %2744 = vmatprep.subr.bf16.mxu0 %v5273_v14  ;;  %v4340_v14 = vld [vmem:[%s4442_s7 + $0x40] sm:$0xff] }
 0x180   : > { %v1082_v15 = vmax.f32 %v1081_v9, 0.0 }
 0x181   : > { %2608 = vmatpush1.bf16.msra.mxu1 %v5391_v41 }
 0x182   : > { %2609 = vmatprep.subr.bf16.mxu1 %v5397_v16  ;;  %2745 = vmatpush1.bf16.msra.mxu0 %v5295_v10  ;;  %v1093_v10 = vmul.f32 1.1, %v4340_v14 }
 0x183   : > { %2746 = vmatprep.subr.bf16.mxu0 %v5301_v57  ;;  %v1073_v57 = vmax.f32 %v1072_v61, 0.0 }
 0x184   : > { %v1094_v51 = vmax.f32 %v1093_v10, 0.0 }
 0x185   : > { %2610 = vmatpush1.bf16.msra.mxu1 %v5405_v43 }
 0x186   : > { %2611 = vmatprep.subr.bf16.mxu1 %v5411_v20  ;;  %2747 = vmatpush1.bf16.msra.mxu0 %v5318_v31  ;;  %v1097_v31 = vmax.f32 %v1096_v37, 0.0  ;;  %v849_v37 = vpop.xlane.xlu0 %848 }
 0x189   : > { %2612 = vmatpush1.bf16.msra.mxu1 %v5419_v13  ;;  %2765 = vmatmul.mubr.bf16.vlgmr.msra.gmra.mxu0 %v6328_v18 }
 0x18a   : > { %2613 = vmatprep.subr.bf16.mxu1 %v5425_v4 }
 0x18d   : > { %2614 = vmatpush1.bf16.msra.mxu1 %v5433_v50 }
 0x18e   : > { %2615 = vmatprep.subr.bf16.mxu1 %v5439_v45 }
 0x191   : > { %2616 = vmatpush1.bf16.msra.mxu1 %v5455_v2 }
 0x192   : > { %2689 = vmatprep.subr.bf16.mxu1 %v5340_v44  ;;  %v4342_v44 = vld [vmem:[%s4442_s7 + $0x30] sm:$0xff] }
 0x194   : > { %2634 = vmatmul.mubr.bf16.vlgmr.msra.gmra.mxu1 %v2600_v12  ;;  %v1085_v12 = vmax.f32 %v1084_v7, 0.0 }
 0x195   : > { %2690 = vmatpush1.bf16.msra.mxu1 %v5348_v55  ;;  %2721 = vmatprep.mubr.bf16.mxu1 %v6270_v28  ;;  %v4338_v28 = vld [vmem:[%s4442_s7] sm:$0xff]  ;;  %v1087_v55 = vmul.f32 1.1, %v4342_v44 }
 0x196   : > { %2691 = vmatprep.subr.bf16.mxu1 %v5354_v11  ;;  %v1069_v30 = vmul.f32 1.1, %v4338_v28  ;;  %v5513_v11 = vmin.f32 %v1073_v57, 1.0  ;;  %v858_v28 = vpop.xlane.xlu1 %857 }
 0x197   : > { %v1088_v59 = vmax.f32 %v1087_v55, 0.0  ;;  %v859_v34 = vrot.slane %v858_v28, 4 }
 0x198   : > { %v1070_v19 = vmax.f32 %v1069_v30, 0.0  ;;  %6329 = vst [vmem:[#allocation9_spill] sm:$0xff] %v5513_v11  ;;  %v1110_v38 = vmul.f32 0.2989, %v5513_v11  ;;  %v850_v30 = vrot.slane %v849_v37, 4 }
 0x199   : > { %2692 = vmatpush1.bf16.msra.mxu1 %v5362_v54  ;;  %v5515_v54 = vmin.f32 %v1085_v12, 1.0  ;;  %v5537_v47 = vmin.f32 %v1088_v59, 1.0  ;;  %v860_v14 = vadd.f32 %v859_v34, %v858_v28 }
 0x19a   : > { %2693 = vmatprep.subr.bf16.mxu1 %v5369_v42  ;;  %v5517_v42 = vmin.f32 %v1097_v31, 1.0  ;;  %v851_v9 = vadd.f32 %v850_v30, %v849_v37 }
 0x19b   : > { %6330 = vst [vmem:[#allocation10_spill] sm:$0xff] %v5515_v54  ;;  %v1111_v27 = vmul.f32 0.587, %v5515_v54  ;;  %6336 = vst [vmem:[#allocation24_spill] sm:$0xff] %v5537_v47  ;;  %v1116_v61 = vmul.f32 0.587, %v5537_v47 }
 0x19c   : > { %6331 = vst [vmem:[#allocation11_spill] sm:$0xff] %v5517_v42  ;;  %v1113_v0 = vmul.f32 0.114, %v5517_v42  ;;  %v852_v57 = vrot.slane %v851_v9, 2  ;;  %v861_v31 = vrot.slane %v860_v14, 2 }
 0x19d   : > { %2694 = vmatpush1.bf16.msra.mxu1 %v5377_v5  ;;  %v1076_v5 = vmax.f32 %v1075_v60, 0.0  ;;  %v1112_v40 = vadd.f32 %v1111_v27, %v1110_v38 }
 0x19e   : > { %2695 = vmatprep.subr.bf16.mxu1 %v5383_v53  ;;  %v5520_v53 = vmin.f32 %v1070_v19, 1.0  ;;  %v862_v38 = vadd.f32 %v861_v31, %v860_v14 }
 0x19f   : > { %v1114_v25 = vadd.f32 %v1113_v0, %v1112_v40 }
 0x1a0   : > { %6332 = vst [vmem:[#allocation12_spill] sm:$0xff] %v5520_v53  ;;  %v1105_v35 = vmul.f32 0.2989, %v5520_v53 }
 0x1a1   : > { %2696 = vmatpush1.bf16.msra.mxu1 %v5391_v41  ;;  %v5522_v41 = vmin.f32 %v1082_v15, 1.0  ;;  %1134 = vadd.xlane.f32.xlu0 %v1114_v25 }
 0x1a2   : > { %2697 = vmatprep.subr.bf16.mxu1 %v5397_v16  ;;  %v5524_v16 = vmin.f32 %v1094_v51, 1.0  ;;  %v853_v51 = vadd.f32 %v852_v57, %v851_v9 }
 0x1a3   : > { %6333 = vst [vmem:[#allocation13_spill] sm:$0xff] %v5522_v41 }
 0x1a4   : > { %6334 = vst [vmem:[#allocation14_spill] sm:$0xff] %v5524_v16  ;;  %v1108_v52 = vmul.f32 0.114, %v5524_v16 }
 0x1a5   : > { %2698 = vmatpush1.bf16.msra.mxu1 %v5405_v43  ;;  %v1106_v43 = vmul.f32 0.587, %v5522_v41 }
 0x1a6   : > { %2699 = vmatprep.subr.bf16.mxu1 %v5411_v20  ;;  %v5535_v20 = vmin.f32 %v1076_v5, 1.0 }
 0x1a7   : > { %v1107_v26 = vadd.f32 %v1106_v43, %v1105_v35 }
 0x1a8   : > { %6335 = vst [vmem:[#allocation6_spill] sm:$0xff] %v5535_v20  ;;  %v1115_v48 = vmul.f32 0.2989, %v5535_v20 }
 0x1a9   : > { %2700 = vmatpush1.bf16.msra.mxu1 %v5419_v13  ;;  %v1109_v18 = vadd.f32 %v1108_v52, %v1107_v26  ;;  %v5544_v13 = vmin.f32 %v1100_v3, 1.0  ;;  %v2132_v60 = vpop.f32.mrf.mxu0  ;;  %v854_v26 = vrot.slane %v853_v51, 1 }
 0x1aa   : > { %2701 = vmatprep.subr.bf16.mxu1 %v5425_v4  ;;  %v1117_v4 = vadd.f32 %v1116_v61, %v1115_v48  ;;  %v863_v48 = vrot.slane %v862_v38, 1 }
 0x1ab   : > { %1125 = vadd.xlane.f32.xlu1 %v1109_v18  ;;  %6337 = vst [vmem:[#allocation23_spill] sm:$0xff] %v5544_v13  ;;  %v1118_v7 = vmul.f32 0.114, %v5544_v13  ;;  %v2134_v8 = vpop.f32.mrf.mxu0 }
 0x1ad   : > { %2702 = vmatpush1.bf16.msra.mxu1 %v5433_v50  ;;  %v1119_v46 = vadd.f32 %v1118_v7, %v1117_v4  ;;  %v868_v50 = vpop.xlane.xlu0 %867  ;;  %v2136_v27 = vpop.f32.mrf.mxu0  ;;  %v855_v7 = vadd.f32 %v854_v26, %v853_v51 }
 0x1ae   : > { %2703 = vmatprep.subr.bf16.mxu1 %v5439_v45  ;;  %v869_v45 = vrot.slane %v868_v50, 4 }
 0x1af   : > { %1144 = vadd.xlane.f32.xlu1 %v1119_v46  ;;  %v2138_v25 = vpop.f32.mrf.mxu0  ;;  %v864_v46 = vadd.f32 %v863_v48, %v862_v38  ;;  %v6347_v48 = vld [vmem:[#allocation15_spill] sm:$0xff] }
 0x1b0   : > { %v870_v10 = vadd.f32 %v869_v45, %v868_v50 }
 0x1b1   : > { %2704 = vmatpush1.bf16.msra.mxu1 %v5455_v2 }
 0x1b2   : > { %v871_v19 = vrot.slane %v870_v10, 2 }
 0x1b4   : > { %2722 = vmatmul.mubr.bf16.vlgmr.msra.gmra.mxu1 %v2688_v1  ;;  %v872_v0 = vadd.f32 %v871_v19, %v870_v10 }
 0x1b6   : > { %v873_v61 = vrot.slane %v872_v0, 1 }
 0x1b8   : > { %v874_v28 = vadd.f32 %v873_v61, %v872_v0  ;;  %v894_v61 = vmul.f32 1.05, %v6347_v48  ;;  %v902_v48 = vmul.f32 1.05, %v5084_v32 }
 0x1c9   : > { %v2220_v30 = vpop.f32.mrf.mxu0 }
 0x1cb   : > { %v2222_v34 = vpop.f32.mrf.mxu0 }
 0x1cd   : > { %v2224_v14 = vpop.f32.mrf.mxu0 }
 0x1cf   : > { %v2226_v31 = vpop.f32.mrf.mxu0 }
 0x1d2   : > { %v2009_v2 = vpop.f32.mrf.mxu1 }
 0x1d3   : > { %v5561_v19 = vadd.f32 %v2132_v60, %v2009_v2 }
 0x1d4   : > { %v784_v12 = vpop.xlane.xlu1 %783  ;;  %v2011_v15 = vpop.f32.mrf.mxu1 }
 0x1d5   : > { %v785_v58 = vrot.slane %v784_v12, 4  ;;  %v5551_v44 = vadd.f32 %v2134_v8, %v2011_v15  ;;  %6340 = vst [vmem:[#allocation3_spill] sm:$0xff] %v5561_v19 }
 0x1d6   : > { %v2013_v55 = vpop.f32.mrf.mxu1 }
 0x1d7   : > { %v786_v24 = vadd.f32 %v785_v58, %v784_v12  ;;  %6338 = vst [vmem:[#allocation29_spill] sm:$0xff] %v5551_v44  ;;  %v5553_v40 = vadd.f32 %v2136_v27, %v2013_v55  ;;  %v6341_v55 = vld [vmem:[#allocation26_spill] sm:$0xff] }
 0x1d8   : > { %v878_v1 = vpop.xlane.xlu1 %877  ;;  %v2015_v52 = vpop.f32.mrf.mxu1  ;;  %vm3786_vm5 = vcmp.eq.s32.totalorder %v6341_v55, 3  ;;  %vm3790_vm6 = vcmp.eq.s32.totalorder %v6341_v55, 4  ;;  %vm3794_vm7 = vcmp.eq.s32.totalorder %v6341_v55, 5 }
 0x1d9   : > { %v787_v5 = vrot.slane %v786_v24, 2  ;;  %v879_v59 = vrot.slane %v878_v1, 4  ;;  %v5555_v56 = vadd.f32 %v2138_v25, %v2015_v52  ;;  %v4344_v52 = vld [vmem:[%s4442_s7 + $0x18] sm:$0xff] }
 0x1da   : > { %v1078_v25 = vmul.f32 1.1, %v4344_v52  ;;  %v6356_v52 = vld [vmem:[#allocation21_spill] sm:$0xff] }
 0x1db   : > { %v880_v35 = vadd.f32 %v879_v59, %v878_v1  ;;  %v788_v43 = vadd.f32 %v787_v5, %v786_v24  ;;  %v2834_v24 = vmul.f32 1.05, %v5561_v19 }
 0x1dd   : > { %v881_v17 = vrot.slane %v880_v35, 2  ;;  %v789_v18 = vrot.slane %v788_v43, 1  ;;  %v2835_v1 = vmax.f32 %v2834_v24, 0.0 }
 0x1df   : > { %v790_v3 = vadd.f32 %v789_v18, %v788_v43  ;;  %v882_v4 = vadd.f32 %v881_v17, %v880_v35  ;;  %v5568_v5 = vmin.f32 %v2835_v1, 1.0  ;;  %v6345_v35 = vld [vmem:[#allocation28_spill] sm:$0xff] }
 0x1e1   : > { %4157 = vpush %v790_v3  ;;  %v883_v37 = vrot.slane %v882_v4, 1  ;;  %6342 = vst [vmem:[#allocation4_spill] sm:$0xff] %v5568_v5  ;;  %v2870_v17 = vmul.f32 0.2989, %v5568_v5  ;;  %v6348_v3 = vld [vmem:[#allocation16_spill] sm:$0xff] }
 0x1e2   : > { %4159 = vpush %v855_v7  ;;  %v4345_v7 = vld [vmem:[%s4442_s7 + $0x38] sm:$0xff] }
 0x1e3   : > { %4161 = vpush %v864_v46  ;;  %v884_v50 = vadd.f32 %v883_v37, %v882_v4  ;;  %v910_v4 = vmul.f32 1.05, %v6348_v3  ;;  %v1090_v46 = vmul.f32 1.1, %v4345_v7  ;;  %v6357_v3 = vld [vmem:[#allocation22_spill] sm:$0xff] }
 0x1e4   : > { %4163 = vpush %v874_v28  ;;  %v6350_v28 = vld [vmem:[#allocation17_spill] sm:$0xff]  ;;  %v930_v7 = vmul.f32 1.05, %v6357_v3 }
 0x1e5   : > { %4165 = vpush %v884_v50  ;;  %v926_v50 = vmul.f32 1.05, %v6350_v28  ;;  %v918_v28 = vmul.f32 1.05, %v5086_v22 }
 0x1e9   : > { %v2308_v60 = vpop.f32.mrf.mxu0 }
 0x1f4   : > { %v2177_v45 = vpop.f32.mrf.mxu1 }
 0x1f5   : > { %v5563_v15 = vadd.f32 %v2220_v30, %v2177_v45  ;;  %v6351_v30 = vld [vmem:[#allocation2_spill] sm:$0xff] }
 0x1f6   : > { %v2179_v9 = vpop.f32.mrf.mxu1  ;;  %v889_v45 = vmul.f32 1.05, %v6351_v30 }
 0x1f7   : > { %v2846_v8 = vmul.f32 1.05, %v5563_v15  ;;  %v5584_v37 = vadd.f32 %v2222_v34, %v2179_v9  ;;  %v1091_v9 = vmax.f32 %v1090_v46, 0.0 }
 0x1f8   : > { %v2181_v10 = vpop.f32.mrf.mxu1 }
 0x1f9   : > { %v5557_v57 = vadd.f32 %v2224_v14, %v2181_v10  ;;  %v2847_v51 = vmax.f32 %v2846_v8, 0.0  ;;  %6349 = vst [vmem:[#allocation15_spill] sm:$0xff] %v5584_v37  ;;  %v6352_v10 = vld [vmem:[#allocation18_spill] sm:$0xff]  ;;  %v6354_v8 = vld [vmem:[#allocation20_spill] sm:$0xff] }
 0x1fa   : > { %v2183_v12 = vpop.f32.mrf.mxu1  ;;  %v898_v1 = vmul.f32 1.05, %v6354_v8 }
 0x1fb   : > { %6339 = vst [vmem:[#allocation30_spill] sm:$0xff] %v5557_v57  ;;  %v5559_v58 = vadd.f32 %v2226_v31, %v2183_v12  ;;  %v5570_v59 = vmin.f32 %v2847_v51, 1.0  ;;  %v906_v12 = vmul.f32 1.05, %v6352_v10  ;;  %v6353_v31 = vld [vmem:[#allocation19_spill] sm:$0xff]  ;;  %v1079_v51 = vmax.f32 %v1078_v25, 0.0 }
 0x1fc   : > { %v922_v24 = vmul.f32 1.05, %v6353_v31  ;;  %v5611_v10 = vmin.f32 %v1091_v9, 1.0 }
 0x1fd   : > { %6343 = vst [vmem:[#allocation27_spill] sm:$0xff] %v5570_v59  ;;  %v2871_v18 = vmul.f32 0.587, %v5570_v59 }
 0x1ff   : > { %v2872_v34 = vadd.f32 %v2871_v18, %v2870_v17  ;;  %v934_v17 = vmul.f32 1.05, %v5305_v49  ;;  %v5608_v18 = vmin.f32 %v1079_v51, 1.0 }
 0x212   : > { %s4158_s30 = spop %4157 }
 0x213   : > { %v3787_v38 = vstv %s4158_s30  ;;  %s4160_s8 = spop %4159 }
 0x214   : > { %v2265_v2 = vpop.f32.mrf.mxu1  ;;  %v3788_v27 = vsel %vm3786_vm5, %v3787_v38, 0.0  ;;  %s4162_s9 = spop %4161  ;;  %v4346_v38 = vld [vmem:[%s4442_s7 + $0x58] sm:$0xff] }
 0x215   : > { %v5572_v0 = vadd.f32 %v2308_v60, %v2265_v2  ;;  %v5575_v43 = vadd.f32 %v3788_v27, %v6345_v35  ;;  %s866_s11 = sadd.f32 %s4162_s9, %s4160_s8  ;;  %s4164_s12 = spop %4163  ;;  %v5592_v2 = vmul.f32 1.1, %v4346_v38  ;;  %v5597_v27 = vmul.f32 1.05, %v5551_v44 }
 0x216   : > { %s4166_s13 = spop %4165  ;;  %v5600_v35 = vmul.f32 1.05, %v5584_v37  ;;  %v2267_v42 = vpop.f32.mrf.mxu1 }
 0x217   : > { %6344 = vst [vmem:[#allocation25_spill] sm:$0xff] %v5572_v0  ;;  %6346 = vst [vmem:[#allocation28_spill] sm:$0xff] %v5575_v43  ;;  %v2858_v26 = vmul.f32 1.05, %v5572_v0  ;;  %s876_s14 = sadd.f32 %s4164_s12, %s866_s11 }
 0x219   : > { %v2859_v14 = vmax.f32 %v2858_v26, 0.0  ;;  %s886_s15 = sadd.f32 %s4166_s13, %s876_s14  ;;  %v914_v26 = vmul.f32 1.05, %v6356_v52 }
 0x21b   : > { %v5594_v60 = vmin.f32 %v2859_v14, 1.0  ;;  %s887_s16 = smul.f32 0.00390625, %s886_s15 }
 0x21d   : > { %6355 = vst [vmem:[#allocation16_spill] sm:$0xff] %v5594_v60  ;;  %v2873_v25 = vmul.f32 0.114, %v5594_v60  ;;  %s888_s7 = smul.f32 -0.05, %s887_s16 }
 0x21f   : > { %v2874_v30 = vadd.f32 %v2873_v25, %v2872_v34  ;;  %v890_v14 = vstv %s888_s7 }
 0x220   : > { %v891_v8 = vadd.f32 %v890_v14, %v889_v45  ;;  %v895_v38 = vadd.f32 %v894_v61, %v890_v14  ;;  %v899_v52 = vadd.f32 %v898_v1, %v890_v14  ;;  %v903_v3 = vadd.f32 %v902_v48, %v890_v14 }
 0x221   : > { %2890 = vadd.xlane.f32.xlu1 %v2874_v30  ;;  %v907_v22 = vadd.f32 %v906_v12, %v890_v14  ;;  %v911_v60 = vadd.f32 %v910_v4, %v890_v14  ;;  %v915_v49 = vadd.f32 %v914_v26, %v890_v14  ;;  %v919_v51 = vadd.f32 %v918_v28, %v890_v14 }
 0x222   : > { %v892_v59 = vmax.f32 %v891_v8, 0.0  ;;  %v896_v5 = vmax.f32 %v895_v38, 0.0  ;;  %v900_v46 = vmax.f32 %v899_v52, 0.0  ;;  %v904_v34 = vmax.f32 %v903_v3, 0.0 }
 0x223   : > { %v908_v25 = vmax.f32 %v907_v22, 0.0  ;;  %v912_v9 = vmax.f32 %v911_v60, 0.0  ;;  %v916_v13 = vmax.f32 %v915_v49, 0.0  ;;  %v920_v47 = vmax.f32 %v919_v51, 0.0 }
 0x224   : > { %v893_v31 = vmin.f32 %v892_v59, 1.0  ;;  %v897_v20 = vmin.f32 %v896_v5, 1.0  ;;  %v901_v32 = vmin.f32 %v900_v46, 1.0  ;;  %v905_v45 = vmin.f32 %v904_v34, 1.0 }
 0x225   : > { %v909_v61 = vmin.f32 %v908_v25, 1.0  ;;  %v913_v1 = vmin.f32 %v912_v9, 1.0  ;;  %v917_v48 = vmin.f32 %v916_v13, 1.0  ;;  %v921_v30 = vmin.f32 %v920_v47, 1.0 }
 0x226   : > { %v923_v12 = vadd.f32 %v922_v24, %v890_v14  ;;  %v927_v4 = vadd.f32 %v926_v50, %v890_v14  ;;  %v931_v26 = vadd.f32 %v930_v7, %v890_v14  ;;  %v935_v28 = vadd.f32 %v934_v17, %v890_v14 }
 0x227   : > { %v938_v8 = vmul.f32 0.2989, %v893_v31  ;;  %v939_v38 = vmul.f32 0.587, %v909_v61  ;;  %v943_v52 = vmul.f32 0.2989, %v897_v20 }
 0x228   : > { %v924_v3 = vmax.f32 %v923_v12, 0.0  ;;  %v928_v22 = vmax.f32 %v927_v4, 0.0  ;;  %v932_v60 = vmax.f32 %v931_v26, 0.0  ;;  %v936_v49 = vmax.f32 %v935_v28, 0.0 }
 0x229   : > { %v940_v51 = vadd.f32 %v939_v38, %v938_v8  ;;  %v944_v59 = vmul.f32 0.587, %v913_v1  ;;  %v948_v5 = vmul.f32 0.2989, %v901_v32  ;;  %v949_v46 = vmul.f32 0.587, %v917_v48 }
 0x22a   : > { %v925_v34 = vmin.f32 %v924_v3, 1.0  ;;  %v929_v25 = vmin.f32 %v928_v22, 1.0  ;;  %v933_v9 = vmin.f32 %v932_v60, 1.0  ;;  %v937_v13 = vmin.f32 %v936_v49, 1.0  ;;  %v2310_v3 = vpop.f32.mrf.mxu0 }
 0x22b   : > { %v945_v47 = vadd.f32 %v944_v59, %v943_v52  ;;  %v950_v24 = vadd.f32 %v949_v46, %v948_v5  ;;  %v953_v50 = vmul.f32 0.2989, %v905_v45  ;;  %v954_v7 = vmul.f32 0.587, %v921_v30 }
 0x22c   : > { %v941_v17 = vmul.f32 0.114, %v925_v34  ;;  %v946_v14 = vmul.f32 0.114, %v929_v25  ;;  %v951_v16 = vmul.f32 0.114, %v933_v9 }
 0x22d   : > { %v955_v41 = vadd.f32 %v954_v7, %v953_v50  ;;  %v956_v12 = vmul.f32 0.114, %v937_v13  ;;  %v962_v4 = vmul.f32 0.9, %v893_v31  ;;  %v966_v26 = vmul.f32 0.9, %v897_v20 }
 0x22e   : > { %v942_v28 = vadd.f32 %v941_v17, %v940_v51  ;;  %v947_v8 = vadd.f32 %v946_v14, %v945_v47  ;;  %v952_v38 = vadd.f32 %v951_v16, %v950_v24  ;;  %v970_v53 = vmul.f32 0.9, %v901_v32 }
 0x22f   : > { %v957_v22 = vadd.f32 %v956_v12, %v955_v41  ;;  %v974_v60 = vmul.f32 0.9, %v905_v45  ;;  %v978_v49 = vmul.f32 0.9, %v909_v61  ;;  %v982_v52 = vmul.f32 0.9, %v913_v1 }
 0x230   : > { %v958_v59 = vmul.f32 0.1, %v942_v28  ;;  %v959_v5 = vmul.f32 0.1, %v947_v8  ;;  %v960_v46 = vmul.f32 0.1, %v952_v38  ;;  %v5615_v50 = vadd.f32 %v2310_v3, %v2267_v42 }
 0x231   : > { %v961_v54 = vmul.f32 0.1, %v957_v22  ;;  %v986_v11 = vmul.f32 0.9, %v917_v48  ;;  %v990_v43 = vmul.f32 0.9, %v921_v30 }
 0x232   : > { %v963_v31 = vadd.f32 %v962_v4, %v958_v59  ;;  %v967_v20 = vadd.f32 %v966_v26, %v959_v5  ;;  %v971_v51 = vadd.f32 %v970_v53, %v960_v46  ;;  %v979_v47 = vadd.f32 %v978_v49, %v958_v59  ;;  %v6358_v49 = vld [vmem:[#allocation5_spill] sm:$0xff] }
 0x233   : > { %v975_v16 = vadd.f32 %v974_v60, %v961_v54  ;;  %v983_v32 = vadd.f32 %v982_v52, %v959_v5  ;;  %v987_v24 = vadd.f32 %v986_v11, %v960_v46  ;;  %v991_v7 = vadd.f32 %v990_v43, %v961_v54 }
 0x234   : > { %v964_v41 = vmax.f32 %v963_v31, 0.0  ;;  %v968_v45 = vmax.f32 %v967_v20, 0.0  ;;  %v972_v61 = vmax.f32 %v971_v51, 0.0  ;;  %v980_v1 = vmax.f32 %v979_v47, 0.0  ;;  %v6359_v31 = vld [vmem:[#allocation7_spill] sm:$0xff] }
 0x235   : > { %v976_v17 = vmax.f32 %v975_v16, 0.0  ;;  %v984_v14 = vmax.f32 %v983_v32, 0.0  ;;  %v988_v12 = vmax.f32 %v987_v24, 0.0  ;;  %v992_v28 = vmax.f32 %v991_v7, 0.0 }
 0x236   : > { %v965_v48 = vmin.f32 %v964_v41, 1.0  ;;  %v969_v30 = vmin.f32 %v968_v45, 1.0  ;;  %v973_v42 = vmin.f32 %v972_v61, 1.0  ;;  %v981_v8 = vmin.f32 %v980_v1, 1.0 }
 0x237   : > { %v977_v4 = vmin.f32 %v976_v17, 1.0  ;;  %v985_v26 = vmin.f32 %v984_v14, 1.0  ;;  %v989_v53 = vmin.f32 %v988_v12, 1.0  ;;  %v993_v38 = vmin.f32 %v992_v28, 1.0 }
 0x238   : > { %v994_v3 = vmul.f32 0.9, %v925_v34  ;;  %v998_v22 = vmul.f32 0.9, %v929_v25  ;;  %v1002_v11 = vmul.f32 0.9, %v933_v9  ;;  %v1010_v43 = vsub.f32 %v5206_v36, %v965_v48 }
 0x239   : > { %v1006_v60 = vmul.f32 0.9, %v937_v13  ;;  %v1011_v52 = vsub.f32 %v6358_v49, %v969_v30  ;;  %v1012_v20 = vsub.f32 %v6359_v31, %v973_v42  ;;  %v1013_v51 = vsub.f32 %v5223_v6, %v977_v4 }
 0x23a   : > { %v995_v47 = vadd.f32 %v994_v3, %v958_v59  ;;  %v999_v16 = vadd.f32 %v998_v22, %v959_v5  ;;  %v1003_v32 = vadd.f32 %v1002_v11, %v960_v46  ;;  %v1026_v24 = vsub.f32 %v5229_v63, %v981_v8  ;;  %v6360_v8 = vld [vmem:[#allocation8_spill] sm:$0xff] }
 0x23b   : > { %v1007_v7 = vadd.f32 %v1006_v60, %v961_v54  ;;  %v1014_v41 = vadd.f32 %v1011_v52, %v1010_v43  ;;  %v1015_v45 = vsub.f32 %v1010_v43, %v1011_v52  ;;  %v1016_v34 = vadd.f32 %v1013_v51, %v1012_v20 }
 0x23c   : > { %v996_v25 = vmax.f32 %v995_v47, 0.0  ;;  %v1000_v9 = vmax.f32 %v999_v16, 0.0  ;;  %v1004_v61 = vmax.f32 %v1003_v32, 0.0  ;;  %v1017_v36 = vsub.f32 %v1012_v20, %v1013_v51  ;;  %v5630_v47 = vpop.f32.mrf.mxu1 }
 0x23d   : > { %v1008_v13 = vmax.f32 %v1007_v7, 0.0  ;;  %v1020_v1 = vsub.f32 %v1014_v41, %v1016_v34  ;;  %v1027_v17 = vsub.f32 %v5246_v21, %v985_v26  ;;  %v1028_v14 = vsub.f32 %v5250_v29, %v989_v53 }
 0x23e   : > { %v997_v6 = vmin.f32 %v996_v25, 1.0  ;;  %v1001_v59 = vmin.f32 %v1000_v9, 1.0  ;;  %v1005_v5 = vmin.f32 %v1004_v61, 1.0  ;;  %v1018_v46 = vadd.f32 %v1017_v36, %v1015_v45 }
 0x23f   : > { %v1009_v12 = vmin.f32 %v1008_v13, 1.0  ;;  %v1021_v63 = vand.u32 2147483647, %v1020_v1  ;;  %v1023_v54 = vsub.f32 %v1015_v45, %v1017_v36  ;;  %v1029_v28 = vsub.f32 %v5256_v23, %v993_v38  ;;  %v5637_v45 = vpop.f32.mrf.mxu0 }
 0x240   : > { %v1019_v48 = vand.u32 2147483647, %v1018_v46  ;;  %v1030_v30 = vadd.f32 %v1027_v17, %v1026_v24  ;;  %v1031_v42 = vsub.f32 %v1026_v24, %v1027_v17  ;;  %v1043_v4 = vsub.f32 %v6360_v8, %v997_v6 }
 0x241   : > { %v1032_v3 = vadd.f32 %v1029_v28, %v1028_v14  ;;  %v1033_v22 = vsub.f32 %v1028_v14, %v1029_v28  ;;  %v1044_v21 = vsub.f32 %v5276_v39, %v1001_v59  ;;  %v2861_v29 = vmul.f32 1.05, %v5615_v50 }
 0x242   : > { %v1022_v26 = vadd.f32 %v1021_v63, %v1019_v48  ;;  %v1024_v53 = vand.u32 2147483647, %v1023_v54  ;;  %v1045_v11 = vsub.f32 %v5281_v33, %v1005_v5  ;;  %v1046_v43 = vsub.f32 %v5285_v62, %v1009_v12  ;;  %v5650_v12 = vpop.f32.mrf.mxu0 }
 0x243   : > { %v1034_v60 = vadd.f32 %v1033_v22, %v1031_v42  ;;  %v1036_v49 = vsub.f32 %v1030_v30, %v1032_v3  ;;  %v1039_v23 = vsub.f32 %v1031_v42, %v1033_v22  ;;  %v1047_v38 = vadd.f32 %v1044_v21, %v1043_v4 }
 0x244   : > { %v1025_v52 = vadd.f32 %v1024_v53, %v1022_v26  ;;  %v1048_v31 = vsub.f32 %v1043_v4, %v1044_v21  ;;  %v1049_v20 = vadd.f32 %v1046_v43, %v1045_v11  ;;  %v1050_v51 = vsub.f32 %v1045_v11, %v1046_v43  ;;  %v2590_v4 = vpop.f32.mrf.mxu0 }
 0x245   : > { %v1035_v16 = vand.u32 2147483647, %v1034_v60  ;;  %v1037_v39 = vand.u32 2147483647, %v1036_v49  ;;  %v6361_v32 = vmax.f32 %v5592_v2, 0.0  ;;  %v6362_v61 = vmax.f32 %v5597_v27, 0.0  ;;  %v5644_v2 = vpop.f32.mrf.mxu1 }
 0x246   : > { %v1051_v7 = vadd.f32 %v1050_v51, %v1048_v31  ;;  %v1053_v33 = vsub.f32 %v1047_v38, %v1049_v20  ;;  %v1056_v41 = vsub.f32 %v1048_v31, %v1050_v51  ;;  %v1120_v62 = vmul.f32 0.2989, %v5608_v18  ;;  %v2592_v26 = vpop.f32.mrf.mxu0 }
 0x247   : > { %v5634_v24 = vmin.f32 %v6361_v32, 1.0  ;;  %v1038_v34 = vadd.f32 %v1037_v39, %v1035_v16  ;;  %v1040_v25 = vand.u32 2147483647, %v1039_v23  ;;  %v1121_v9 = vmul.f32 0.587, %v5611_v10  ;;  %v2467_v48 = vpop.f32.mrf.mxu1 }
 0x248   : > { %v5642_v36 = vmin.f32 %v6362_v61, 1.0  ;;  %v1052_v13 = vand.u32 2147483647, %v1051_v7  ;;  %v1054_v1 = vand.u32 2147483647, %v1053_v33  ;;  %v6363_v17 = vmax.f32 %v5600_v35, 0.0  ;;  %v2594_v43 = vpop.f32.mrf.mxu0 }
 0x249   : > { %v2862_v6 = vmax.f32 %v2861_v29, 0.0  ;;  %v1041_v59 = vadd.f32 %v1040_v25, %v1038_v34  ;;  %v1057_v46 = vand.u32 2147483647, %v1056_v41  ;;  %v1122_v54 = vadd.f32 %v1121_v9, %v1120_v62  ;;  %v2469_v22 = vpop.f32.mrf.mxu1 }
 0x24a   : > { %v5648_v14 = vmin.f32 %v6363_v17, 1.0  ;;  %v1055_v5 = vadd.f32 %v1054_v1, %v1052_v13  ;;  %v1123_v27 = vmul.f32 0.114, %v5634_v24  ;;  %v2875_v42 = vmul.f32 0.2989, %v5642_v36  ;;  %v2596_v49 = vpop.f32.mrf.mxu0 }
 0x24b   : > { %v1042_v63 = vadd.f32 %v1041_v59, %v1025_v52  ;;  %v5653_v30 = vmin.f32 %v2862_v6, 1.0  ;;  %v2471_v53 = vpop.f32.mrf.mxu1  ;;  %v5660_v7 = vadd.f32 %v2590_v4, %v2467_v48  ;;  %v5662_v33 = vadd.f32 %v2592_v26, %v2469_v22 }
 0x24c   : > { %v1058_v28 = vadd.f32 %v1057_v46, %v1055_v5  ;;  %v2876_v35 = vmul.f32 0.587, %v5648_v14  ;;  %v1124_v3 = vadd.f32 %v1123_v27, %v1122_v54  ;;  %v2678_v38 = vpop.f32.mrf.mxu0  ;;  %v5664_v41 = vadd.f32 %v2594_v43, %v2471_v53 }
 0x24d   : > { %v2878_v29 = vmul.f32 0.114, %v5653_v30  ;;  %v2473_v60 = vpop.f32.mrf.mxu1  ;;  %v2775_v1 = vsub.f32 %v5660_v7, %v5561_v19  ;;  %v2776_v17 = vsub.f32 %v5662_v33, %v5551_v44 }
 0x24e   : > { %v1059_v8 = vadd.f32 %v1058_v28, %v1042_v63  ;;  %v2877_v21 = vadd.f32 %v2876_v35, %v2875_v42  ;;  %v2680_v31 = vpop.f32.mrf.mxu0  ;;  %v5666_v62 = vadd.f32 %v2596_v49, %v2473_v60  ;;  %v2777_v6 = vsub.f32 %v5664_v41, %v5553_v40 }
 0x24f   : > { %v2779_v48 = vadd.f32 %v2776_v17, %v2775_v1  ;;  %v2780_v42 = vsub.f32 %v2775_v1, %v2776_v17  ;;  %v2855_v60 = vmul.f32 1.05, %v5559_v58  ;;  %v3135_v49 = vmul.f32 0.95, %v5563_v15 }
 0x250   : > { %1060 = vadd.xlane.f32.xlu0 %v1059_v8  ;;  %v2879_v11 = vadd.f32 %v2878_v29, %v2877_v21  ;;  %v2682_v51 = vpop.f32.mrf.mxu0  ;;  %v2778_v59 = vsub.f32 %v5666_v62, %v5555_v56  ;;  %v2843_v21 = vmul.f32 1.05, %v5555_v56  ;;  %v3123_v29 = vmul.f32 0.95, %v5561_v19 }
 0x252   : > { %v2684_v39 = vpop.f32.mrf.mxu0  ;;  %v2781_v35 = vadd.f32 %v2778_v59, %v2777_v6  ;;  %v3124_v1 = vmax.f32 %v3123_v29, 0.0 }
 0x254   : > { %1154 = vadd.xlane.f32.xlu0 %v1124_v3  ;;  %v2635_v23 = vpop.f32.mrf.mxu1  ;;  %v2766_v13 = vpop.f32.mrf.mxu0  ;;  %v2782_v3 = vsub.f32 %v2777_v6, %v2778_v59 }
 0x255   : > { %v5672_v9 = vadd.f32 %v2678_v38, %v2635_v23  ;;  %v5698_v38 = vadd.f32 %v5650_v12, %v5644_v2  ;;  %v5707_v2 = vadd.f32 %v5637_v45, %v5630_v47 }
 0x256   : > { %v2637_v52 = vpop.f32.mrf.mxu1  ;;  %v2768_v27 = vpop.f32.mrf.mxu0 }
 0x257   : > { %v5668_v34 = vadd.f32 %v2680_v31, %v2637_v52  ;;  %v2791_v63 = vsub.f32 %v5672_v9, %v5563_v15  ;;  %6368 = vst [vmem:[#allocation20_spill] sm:$0xff] %v5698_v38  ;;  %v2783_v31 = vadd.f32 %v2782_v3, %v2780_v42 }
 0x258   : > { %2899 = vadd.xlane.f32.xlu0 %v2879_v11  ;;  %v2639_v20 = vpop.f32.mrf.mxu1  ;;  %v2770_v26 = vpop.f32.mrf.mxu0 }
 0x259   : > { %6365 = vst [vmem:[#allocation2_spill] sm:$0xff] %v5668_v34  ;;  %v5670_v25 = vadd.f32 %v2682_v51, %v2639_v20  ;;  %v2792_v5 = vsub.f32 %v5668_v34, %v5584_v37  ;;  %v2785_v20 = vsub.f32 %v2779_v48, %v2781_v35  ;;  %v3129_v51 = vmul.f32 0.95, %v5553_v40 }
 0x25a   : > { %v2641_v16 = vpop.f32.mrf.mxu1  ;;  %v2772_v17 = vpop.f32.mrf.mxu0  ;;  %v2788_v35 = vsub.f32 %v2780_v42, %v2782_v3 }
 0x25b   : > { %v5658_v32 = vadd.f32 %v2684_v39, %v2641_v16  ;;  %6366 = vst [vmem:[#allocation18_spill] sm:$0xff] %v5670_v25  ;;  %v2793_v46 = vsub.f32 %v5670_v25, %v5557_v57  ;;  %v2795_v8 = vadd.f32 %v2792_v5, %v2791_v63  ;;  %v2796_v22 = vsub.f32 %v2791_v63, %v2792_v5 }
 0x25c   : > { %v3136_v63 = vmax.f32 %v3135_v49, 0.0  ;;  %v2786_v48 = vand.u32 2147483647, %v2785_v20  ;;  %v3147_v20 = vmul.f32 0.95, %v5572_v0 }
 0x25d   : > { %6364 = vst [vmem:[#allocation17_spill] sm:$0xff] %v5658_v32  ;;  %v2794_v61 = vsub.f32 %v5658_v32, %v5559_v58 }
 0x25f   : > { %v2797_v54 = vadd.f32 %v2794_v61, %v2793_v46  ;;  %v2798_v28 = vsub.f32 %v2793_v46, %v2794_v61  ;;  %v2844_v61 = vmax.f32 %v2843_v21, 0.0  ;;  %v2856_v46 = vmax.f32 %v2855_v60, 0.0 }
 0x261   : > { %v2799_v11 = vadd.f32 %v2798_v28, %v2796_v22  ;;  %v2801_v43 = vsub.f32 %v2795_v8, %v2797_v54  ;;  %v2867_v8 = vmul.f32 1.05, %v5698_v38  ;;  %v2804_v45 = vsub.f32 %v2796_v22, %v2798_v28 }
 0x263   : > { %v2800_v59 = vand.u32 2147483647, %v2799_v11  ;;  %v2802_v5 = vand.u32 2147483647, %v2801_v43  ;;  %v3141_v11 = vmul.f32 0.95, %v5557_v57 }
 0x265   : > { %v2803_v29 = vadd.f32 %v2802_v5, %v2800_v59  ;;  %v5730_v59 = vmin.f32 %v3136_v63, 1.0  ;;  %v3130_v5 = vmax.f32 %v3129_v51, 0.0 }
 0x267   : > { %6373 = vst [vmem:[#allocation8_spill] sm:$0xff] %v5730_v59  ;;  %v5738_v63 = vmin.f32 %v3130_v5, 1.0 }
 0x269   : > { %6374 = vst [vmem:[#allocation31_spill] sm:$0xff] %v5738_v63 }
 0x274   : > { %v2723_v4 = vpop.f32.mrf.mxu1 }
 0x275   : > { %v5701_v16 = vadd.f32 %v2766_v13, %v2723_v4  ;;  %v3415_v13 = vmul.f32 1.1, %v5551_v44 }
 0x276   : > { %v2725_v53 = vpop.f32.mrf.mxu1 }
 0x277   : > { %v5694_v23 = vadd.f32 %v2768_v27, %v2725_v53  ;;  %6369 = vst [vmem:[#allocation21_spill] sm:$0xff] %v5701_v16  ;;  %v2784_v27 = vand.u32 2147483647, %v2783_v31  ;;  %v2808_v4 = vsub.f32 %v5701_v16, %v5572_v0  ;;  %v5723_v53 = vmin.f32 %v2856_v46, 1.0 }
 0x278   : > { %v2727_v52 = vpop.f32.mrf.mxu1  ;;  %v2868_v31 = vmax.f32 %v2867_v8, 0.0  ;;  %v3142_v8 = vmax.f32 %v3141_v11, 0.0 }
 0x279   : > { %6367 = vst [vmem:[#allocation19_spill] sm:$0xff] %v5694_v23  ;;  %v5703_v39 = vadd.f32 %v2770_v26, %v2727_v52  ;;  %v2809_v12 = vsub.f32 %v5694_v23, %v5615_v50  ;;  %v5721_v26 = vmin.f32 %v2844_v61, 1.0  ;;  %v2787_v49 = vadd.f32 %v2786_v48, %v2784_v27 }
 0x27a   : > { %v2729_v6 = vpop.f32.mrf.mxu1  ;;  %v2789_v52 = vand.u32 2147483647, %v2788_v35  ;;  %v5728_v61 = vmin.f32 %v3124_v1, 1.0  ;;  %v3427_v27 = vmul.f32 1.1, %v5584_v37  ;;  %v3148_v35 = vmax.f32 %v3147_v20, 0.0 }
 0x27b   : > { %6370 = vst [vmem:[#allocation22_spill] sm:$0xff] %v5703_v39  ;;  %v5711_v54 = vadd.f32 %v2772_v17, %v2729_v6  ;;  %v2810_v21 = vsub.f32 %v5703_v39, %v5707_v2  ;;  %v2812_v42 = vadd.f32 %v2809_v12, %v2808_v4  ;;  %v2813_v3 = vsub.f32 %v2808_v4, %v2809_v12 }
 0x27c   : > { %v2805_v17 = vand.u32 2147483647, %v2804_v45  ;;  %v2885_v22 = vmul.f32 0.2989, %v5721_v26  ;;  %6372 = vst [vmem:[#allocation7_spill] sm:$0xff] %v5728_v61  ;;  %v3428_v11 = vmax.f32 %v3427_v27, 0.0 }
 0x27d   : > { %6371 = vst [vmem:[#allocation5_spill] sm:$0xff] %v5711_v54  ;;  %v2811_v47 = vsub.f32 %v5711_v54, %v5698_v38  ;;  %v2886_v48 = vmul.f32 0.587, %v5723_v53  ;;  %v3159_v1 = vmul.f32 0.2989, %v5728_v61 }
 0x27e   : > { %v2806_v46 = vadd.f32 %v2805_v17, %v2803_v29  ;;  %v5741_v17 = vmin.f32 %v3142_v8, 1.0  ;;  %v3439_v20 = vmul.f32 1.1, %v5615_v50 }
 0x27f   : > { %v2814_v43 = vadd.f32 %v2811_v47, %v2810_v21  ;;  %v2815_v60 = vsub.f32 %v2810_v21, %v2811_v47  ;;  %v3153_v21 = vmul.f32 0.95, %v5707_v2  ;;  %v2790_v47 = vadd.f32 %v2789_v52, %v2787_v49 }
 0x280   : > { %6375 = vst [vmem:[#allocation32_spill] sm:$0xff] %v5741_v17 }
 0x281   : > { %v2816_v6 = vadd.f32 %v2815_v60, %v2813_v3  ;;  %v2818_v54 = vsub.f32 %v2812_v42, %v2814_v43  ;;  %v2821_v28 = vsub.f32 %v2813_v3, %v2815_v60  ;;  %v5735_v3 = vmin.f32 %v2868_v31, 1.0 }
 0x282   : > { %v2807_v51 = vadd.f32 %v2806_v46, %v2790_v47  ;;  %v3416_v43 = vmax.f32 %v3415_v13, 0.0  ;;  %v2887_v60 = vadd.f32 %v2886_v48, %v2885_v22  ;;  %v5745_v31 = vmin.f32 %v3148_v35, 1.0 }
 0x283   : > { %v2817_v12 = vand.u32 2147483647, %v2816_v6  ;;  %v2819_v4 = vand.u32 2147483647, %v2818_v54  ;;  %v2822_v42 = vand.u32 2147483647, %v2821_v28 }
 0x284   : > { %v3160_v54 = vmul.f32 0.587, %v5730_v59  ;;  %v2888_v52 = vmul.f32 0.114, %v5735_v3  ;;  %6376 = vst [vmem:[#allocation33_spill] sm:$0xff] %v5745_v31  ;;  %v3154_v6 = vmax.f32 %v3153_v21, 0.0 }
 0x285   : > { %v2820_v45 = vadd.f32 %v2819_v4, %v2817_v12  ;;  %v3169_v28 = vmul.f32 0.2989, %v5738_v63  ;;  %v3170_v46 = vmul.f32 0.587, %v5741_v17  ;;  %v5749_v12 = vmin.f32 %v3416_v43, 1.0  ;;  %v1126_v43 = vpop.xlane.xlu1 %1125 }
 0x286   : > { %v3161_v5 = vadd.f32 %v3160_v54, %v3159_v1  ;;  %v5751_v13 = vmin.f32 %v3428_v11, 1.0  ;;  %v2889_v22 = vadd.f32 %v2888_v52, %v2887_v60  ;;  %v3162_v4 = vmul.f32 0.114, %v5745_v31  ;;  %v1135_v60 = vpop.xlane.xlu0 %1134 }
 0x287   : > { %v2823_v29 = vadd.f32 %v2822_v42, %v2820_v45  ;;  %6377 = vst [vmem:[#allocation34_spill] sm:$0xff] %v5749_v12  ;;  %v5754_v27 = vmin.f32 %v3154_v6, 1.0  ;;  %v3440_v48 = vmax.f32 %v3439_v20, 0.0  ;;  %v3171_v35 = vadd.f32 %v3170_v46, %v3169_v28 }
 0x288   : > { %6378 = vst [vmem:[#allocation35_spill] sm:$0xff] %v5751_v13  ;;  %v3453_v8 = vmul.f32 0.2989, %v5749_v12  ;;  %v3163_v21 = vadd.f32 %v3162_v4, %v3161_v5  ;;  %v3454_v42 = vmul.f32 0.587, %v5751_v13  ;;  %v1127_v20 = vrot.slane %v1126_v43, 4 }
 0x289   : > { %v2824_v49 = vadd.f32 %v2823_v29, %v2807_v51  ;;  %6379 = vst [vmem:[#allocation36_spill] sm:$0xff] %v5754_v27  ;;  %v3172_v47 = vmul.f32 0.114, %v5754_v27  ;;  %v5758_v45 = vmin.f32 %v3440_v48, 1.0  ;;  %v1145_v11 = vpop.xlane.xlu1 %1144 }
 0x28a   : > { %v3455_v51 = vadd.f32 %v3454_v42, %v3453_v8  ;;  %v1146_v52 = vrot.slane %v1145_v11, 4  ;;  %v1128_v6 = vadd.f32 %v1127_v20, %v1126_v43 }
 0x28b   : > { %2825 = vadd.xlane.f32.xlu0 %v2824_v49  ;;  %6380 = vst [vmem:[#allocation37_spill] sm:$0xff] %v5758_v45  ;;  %v3173_v1 = vadd.f32 %v3172_v47, %v3171_v35  ;;  %v3456_v29 = vmul.f32 0.114, %v5758_v45  ;;  %v1136_v49 = vrot.slane %v1135_v60, 4 }
 0x28c   : > { %v1147_v5 = vadd.f32 %v1146_v52, %v1145_v11  ;;  %v1129_v46 = vrot.slane %v1128_v6, 2 }
 0x28d   : > { %v3457_v54 = vadd.f32 %v3456_v29, %v3455_v51  ;;  %v1137_v28 = vadd.f32 %v1136_v49, %v1135_v60 }
 0x28e   : > { %v1148_v35 = vrot.slane %v1147_v5, 2  ;;  %v1130_v47 = vadd.f32 %v1129_v46, %v1128_v6  ;;  %v6381_v46 = vld [vmem:[#allocation28_spill] sm:$0xff] }
 0x28f   : > { %2919 = vadd.xlane.f32.xlu0 %v2889_v22  ;;  %v1138_v4 = vrot.slane %v1137_v28, 2 }
 0x290   : > { %v1149_v29 = vadd.f32 %v1148_v35, %v1147_v5  ;;  %v1131_v13 = vrot.slane %v1130_v47, 1  ;;  %v6384_v35 = vld [vmem:[#allocation11_spill] sm:$0xff] }
 0x291   : > { %v1139_v51 = vadd.f32 %v1138_v4, %v1137_v28  ;;  %v6383_v4 = vld [vmem:[#allocation10_spill] sm:$0xff] }
 0x292   : > { %v1150_v60 = vrot.slane %v1149_v29, 1  ;;  %v1132_v49 = vadd.f32 %v1131_v13, %v1130_v47  ;;  %v6382_v13 = vld [vmem:[#allocation9_spill] sm:$0xff] }
 0x293   : > { %3179 = vadd.xlane.f32.xlu0 %v3163_v21  ;;  %v1140_v43 = vrot.slane %v1139_v51, 1 }
 0x295   : > { %v1141_v52 = vadd.f32 %v1140_v43, %v1139_v51  ;;  %v5774_v51 = vmul.f32 0.95, %v5551_v44  ;;  %v5777_v43 = vmul.f32 0.95, %v5584_v37 }
 0x297   : > { %3198 = vadd.xlane.f32.xlu0 %v3173_v1 }
 0x29b   : > { %3477 = vadd.xlane.f32.xlu0 %v3457_v54 }
 0x2d9   : > { %v1061_v22 = vpop.xlane.xlu0 %1060 }
 0x2da   : > { %v1062_v48 = vrot.slane %v1061_v22, 4 }
 0x2dc   : > { %v1063_v8 = vadd.f32 %v1062_v48, %v1061_v22  ;;  %v1151_v22 = vadd.f32 %v1150_v60, %v1149_v29  ;;  %v1187_v48 = vmul.f32 0.9, %v6383_v4  ;;  %v6387_v60 = vld [vmem:[#allocation14_spill] sm:$0xff] }
 0x2dd   : > { %v1155_v21 = vpop.xlane.xlu0 %1154 }
 0x2de   : > { %v1064_v42 = vrot.slane %v1063_v8, 2  ;;  %v1156_v1 = vrot.slane %v1155_v21, 4 }
 0x2e0   : > { %v1157_v54 = vadd.f32 %v1156_v1, %v1155_v21  ;;  %v1065_v45 = vadd.f32 %v1064_v42, %v1063_v8  ;;  %v1203_v8 = vmul.f32 0.9, %v6384_v35  ;;  %v6385_v21 = vld [vmem:[#allocation12_spill] sm:$0xff]  ;;  %v6386_v42 = vld [vmem:[#allocation13_spill] sm:$0xff] }
 0x2e1   : > { %v1166_v47 = vmul.f32 0.9, %v6385_v21  ;;  %v1183_v1 = vmul.f32 0.9, %v6386_v42 }
 0x2e2   : > { %v1158_v12 = vrot.slane %v1157_v54, 2  ;;  %v1066_v27 = vrot.slane %v1065_v45, 1 }
 0x2e4   : > { %v1067_v11 = vadd.f32 %v1066_v27, %v1065_v45  ;;  %v1159_v20 = vadd.f32 %v1158_v12, %v1157_v54  ;;  %v2840_v12 = vmul.f32 1.05, %v5553_v40  ;;  %v1171_v45 = vmul.f32 0.9, %v6382_v13 }
 0x2e5   : > { %v1211_v13 = vmul.f32 0.9, %v5634_v24 }
 0x2e6   : > { %4167 = vpush %v1067_v11  ;;  %v1160_v31 = vrot.slane %v1159_v20, 1  ;;  %v2841_v29 = vmax.f32 %v2840_v12, 0.0  ;;  %v1199_v11 = vmul.f32 0.9, %v6387_v60 }
 0x2e7   : > { %4169 = vpush %v1132_v49 }
 0x2e8   : > { %4171 = vpush %v1141_v52  ;;  %v1161_v6 = vadd.f32 %v1160_v31, %v1159_v20  ;;  %v2852_v31 = vmul.f32 1.05, %v5557_v57  ;;  %v6388_v20 = vld [vmem:[#allocation6_spill] sm:$0xff]  ;;  %v1179_v52 = vmul.f32 0.9, %v5608_v18  ;;  %v5787_v4 = vmin.f32 %v2841_v29, 1.0 }
 0x2e9   : > { %4173 = vpush %v1151_v22  ;;  %v1175_v49 = vmul.f32 0.9, %v6388_v20  ;;  %v6389_v22 = vld [vmem:[#allocation24_spill] sm:$0xff] }
 0x2ea   : > { %4175 = vpush %v1161_v6  ;;  %v2853_v54 = vmax.f32 %v2852_v31, 0.0  ;;  %v1191_v6 = vmul.f32 0.9, %v6389_v22 }
 0x2ec   : > { %v5789_v35 = vmin.f32 %v2853_v54, 1.0 }
 0x317   : > { %s4168_s17 = spop %4167 }
 0x318   : > { %v3791_v28 = vstv %s4168_s17  ;;  %s4170_s18 = spop %4169 }
 0x319   : > { %v3792_v5 = vsel %vm3790_vm6, %v3791_v28, 0.0  ;;  %s4172_s19 = spop %4171  ;;  %v1195_v28 = vmul.f32 0.9, %v5611_v10 }
 0x31a   : > { %v5764_v27 = vadd.f32 %v3792_v5, %v6381_v46  ;;  %s1143_s20 = sadd.f32 %s4172_s19, %s4170_s18  ;;  %s4174_s23 = spop %4173  ;;  %v6390_v5 = vld [vmem:[#allocation23_spill] sm:$0xff] }
 0x31b   : > { %s4176_s24 = spop %4175  ;;  %v1207_v46 = vmul.f32 0.9, %v6390_v5 }
 0x31c   : > { %s1153_s25 = sadd.f32 %s4174_s23, %s1143_s20 }
 0x31e   : > { %s1163_s26 = sadd.f32 %s4176_s24, %s1153_s25 }
 0x320   : > { %s1164_s27 = smul.f32 0.00390625, %s1163_s26 }
 0x322   : > { %s1165_s29 = smul.f32 0.1, %s1164_s27 }
 0x324   : > { %v1167_v31 = vstv %s1165_s29 }
 0x325   : > { %v1168_v42 = vadd.f32 %v1167_v31, %v1166_v47  ;;  %v1172_v18 = vadd.f32 %v1171_v45, %v1167_v31  ;;  %v1176_v60 = vadd.f32 %v1175_v49, %v1167_v31  ;;  %v1180_v20 = vadd.f32 %v1179_v52, %v1167_v31 }
 0x326   : > { %v1184_v22 = vadd.f32 %v1183_v1, %v1167_v31  ;;  %v1188_v10 = vadd.f32 %v1187_v48, %v1167_v31  ;;  %v1192_v37 = vadd.f32 %v1191_v6, %v1167_v31  ;;  %v1196_v44 = vadd.f32 %v1195_v28, %v1167_v31 }
 0x327   : > { %v1169_v5 = vmax.f32 %v1168_v42, 0.0  ;;  %v1173_v17 = vmax.f32 %v1172_v18, 0.0  ;;  %v1177_v24 = vmax.f32 %v1176_v60, 0.0  ;;  %v1181_v63 = vmax.f32 %v1180_v20, 0.0 }
 0x328   : > { %v1185_v12 = vmax.f32 %v1184_v22, 0.0  ;;  %v1189_v59 = vmax.f32 %v1188_v10, 0.0  ;;  %v1193_v29 = vmax.f32 %v1192_v37, 0.0  ;;  %v1197_v61 = vmax.f32 %v1196_v44, 0.0 }
 0x329   : > { %v1170_v54 = vmin.f32 %v1169_v5, 1.0  ;;  %v1174_v57 = vmin.f32 %v1173_v17, 1.0  ;;  %v1178_v0 = vmin.f32 %v1177_v24, 1.0  ;;  %v1182_v21 = vmin.f32 %v1181_v63, 1.0 }
 0x32a   : > { %v1186_v47 = vmin.f32 %v1185_v12, 1.0  ;;  %v1190_v45 = vmin.f32 %v1189_v59, 1.0  ;;  %v1194_v49 = vmin.f32 %v1193_v29, 1.0  ;;  %v1198_v52 = vmin.f32 %v1197_v61, 1.0 }
 0x32b   : > { %v1200_v1 = vadd.f32 %v1199_v11, %v1167_v31  ;;  %v1204_v48 = vadd.f32 %v1203_v8, %v1167_v31  ;;  %v1208_v6 = vadd.f32 %v1207_v46, %v1167_v31  ;;  %v1212_v28 = vadd.f32 %v1211_v13, %v1167_v31 }
 0x32c   : > { %v1215_v42 = vmul.f32 0.2989, %v1170_v54  ;;  %v1216_v18 = vmul.f32 0.587, %v1186_v47  ;;  %v1220_v60 = vmul.f32 0.2989, %v1174_v57 }
 0x32d   : > { %v1201_v20 = vmax.f32 %v1200_v1, 0.0  ;;  %v1205_v22 = vmax.f32 %v1204_v48, 0.0  ;;  %v1209_v10 = vmax.f32 %v1208_v6, 0.0  ;;  %v1213_v37 = vmax.f32 %v1212_v28, 0.0 }
 0x32e   : > { %v1217_v44 = vadd.f32 %v1216_v18, %v1215_v42  ;;  %v1221_v5 = vmul.f32 0.587, %v1190_v45  ;;  %v1225_v17 = vmul.f32 0.2989, %v1178_v0  ;;  %v1226_v24 = vmul.f32 0.587, %v1194_v49 }
 0x32f   : > { %v1202_v63 = vmin.f32 %v1201_v20, 1.0  ;;  %v1206_v12 = vmin.f32 %v1205_v22, 1.0  ;;  %v1210_v59 = vmin.f32 %v1209_v10, 1.0  ;;  %v1214_v29 = vmin.f32 %v1213_v37, 1.0 }
 0x330   : > { %v1222_v61 = vadd.f32 %v1221_v5, %v1220_v60  ;;  %v1227_v11 = vadd.f32 %v1226_v24, %v1225_v17  ;;  %v1230_v8 = vmul.f32 0.2989, %v1182_v21  ;;  %v1231_v46 = vmul.f32 0.587, %v1198_v52 }
 0x331   : > { %v1218_v13 = vmul.f32 0.114, %v1202_v63  ;;  %v1223_v31 = vmul.f32 0.114, %v1206_v12  ;;  %v1228_v39 = vmul.f32 0.114, %v1210_v59 }
 0x332   : > { %v1232_v23 = vadd.f32 %v1231_v46, %v1230_v8  ;;  %v1233_v1 = vmul.f32 0.114, %v1214_v29  ;;  %v1239_v48 = vmul.f32 1.05, %v1170_v54  ;;  %v1243_v6 = vmul.f32 1.05, %v1174_v57 }
 0x333   : > { %v1219_v28 = vadd.f32 %v1218_v13, %v1217_v44  ;;  %v1224_v42 = vadd.f32 %v1223_v31, %v1222_v61  ;;  %v1229_v18 = vadd.f32 %v1228_v39, %v1227_v11  ;;  %v1247_v16 = vmul.f32 1.05, %v1178_v0 }
 0x334   : > { %v1234_v32 = vadd.f32 %v1233_v1, %v1232_v23  ;;  %v1251_v20 = vmul.f32 1.05, %v1182_v21  ;;  %v1255_v22 = vmul.f32 1.05, %v1186_v47  ;;  %v1259_v10 = vmul.f32 1.05, %v1190_v45 }
 0x335   : > { %v1235_v37 = vmul.f32 -0.05, %v1219_v28  ;;  %v1236_v60 = vmul.f32 -0.05, %v1224_v42  ;;  %v1237_v5 = vmul.f32 -0.05, %v1229_v18 }
 0x336   : > { %v1238_v17 = vmul.f32 -0.05, %v1234_v32  ;;  %v1263_v24 = vmul.f32 1.05, %v1194_v49  ;;  %v1267_v25 = vmul.f32 1.05, %v1198_v52 }
 0x337   : > { %v1240_v38 = vadd.f32 %v1239_v48, %v1235_v37  ;;  %v1244_v34 = vadd.f32 %v1243_v6, %v1236_v60  ;;  %v1248_v8 = vadd.f32 %v1247_v16, %v1237_v5  ;;  %v1256_v46 = vadd.f32 %v1255_v22, %v1235_v37  ;;  %v4347_v28 = vld [vmem:[%s4450_s10] sm:$0xff] }
 0x338   : > { %v1252_v54 = vadd.f32 %v1251_v20, %v1238_v17  ;;  %v1260_v57 = vadd.f32 %v1259_v10, %v1236_v60  ;;  %v1264_v44 = vadd.f32 %v1263_v24, %v1237_v5  ;;  %v1268_v61 = vadd.f32 %v1267_v25, %v1238_v17  ;;  %v4348_v20 = vld [vmem:[%s4450_s10 + $0x8] sm:$0xff]  ;;  %v4349_v10 = vld [vmem:[%s4450_s10 + $0x10] sm:$0xff] }
 0x339   : > { %v1241_v39 = vmax.f32 %v1240_v38, 0.0  ;;  %v1245_v0 = vmax.f32 %v1244_v34, 0.0  ;;  %v1249_v23 = vmax.f32 %v1248_v8, 0.0  ;;  %v1257_v21 = vmax.f32 %v1256_v46, 0.0  ;;  %v4350_v8 = vld [vmem:[%s4450_s10 + $0x18] sm:$0xff] }
 0x33a   : > { %v1253_v47 = vmax.f32 %v1252_v54, 0.0  ;;  %v1261_v45 = vmax.f32 %v1260_v57, 0.0  ;;  %v1265_v11 = vmax.f32 %v1264_v44, 0.0  ;;  %v1269_v32 = vmax.f32 %v1268_v61, 0.0  ;;  %v4351_v61 = vld [vmem:[%s4450_s10 + $0x20] sm:$0xff] }
 0x33b   : > { %v1242_v49 = vmin.f32 %v1241_v39, 1.0  ;;  %v1246_v52 = vmin.f32 %v1245_v0, 1.0  ;;  %v1250_v13 = vmin.f32 %v1249_v23, 1.0  ;;  %v1258_v16 = vmin.f32 %v1257_v21, 1.0 }
 0x33c   : > { %v1254_v31 = vmin.f32 %v1253_v47, 1.0  ;;  %v1262_v1 = vmin.f32 %v1261_v45, 1.0  ;;  %v1266_v48 = vmin.f32 %v1265_v11, 1.0  ;;  %v1270_v25 = vmin.f32 %v1269_v32, 1.0  ;;  %v4352_v32 = vld [vmem:[%s4450_s10 + $0x28] sm:$0xff] }
 0x33d   : > { %v1271_v34 = vmul.f32 1.05, %v1202_v63  ;;  %v1275_v38 = vmul.f32 1.05, %v1206_v12  ;;  %v1279_v6 = vmul.f32 1.05, %v1210_v59  ;;  %v1287_v42 = vsub.f32 %v4347_v28, %v1242_v49 }
 0x33e   : > { %v1283_v18 = vmul.f32 1.05, %v1214_v29  ;;  %v1288_v22 = vsub.f32 %v4348_v20, %v1246_v52  ;;  %v1289_v24 = vsub.f32 %v4349_v10, %v1250_v13  ;;  %v1290_v46 = vsub.f32 %v4350_v8, %v1254_v31  ;;  %v4355_v20 = vld [vmem:[%s4450_s10 + $0x40] sm:$0xff] }
 0x33f   : > { %v1272_v54 = vadd.f32 %v1271_v34, %v1235_v37  ;;  %v1276_v57 = vadd.f32 %v1275_v38, %v1236_v60  ;;  %v1280_v44 = vadd.f32 %v1279_v6, %v1237_v5  ;;  %v1303_v39 = vsub.f32 %v4351_v61, %v1258_v16  ;;  %v4353_v37 = vld [vmem:[%s4450_s10 + $0x30] sm:$0xff]  ;;  %v4354_v38 = vld [vmem:[%s4450_s10 + $0x38] sm:$0xff] }
 0x340   : > { %v1284_v0 = vadd.f32 %v1283_v18, %v1238_v17  ;;  %v1291_v63 = vadd.f32 %v1288_v22, %v1287_v42  ;;  %v1292_v12 = vsub.f32 %v1287_v42, %v1288_v22  ;;  %v1293_v59 = vadd.f32 %v1290_v46, %v1289_v24  ;;  %v4358_v61 = vld [vmem:[%s4450_s10 + $0x58] sm:$0xff] }
 0x341   : > { %v1273_v23 = vmax.f32 %v1272_v54, 0.0  ;;  %v1277_v21 = vmax.f32 %v1276_v57, 0.0  ;;  %v1281_v29 = vmax.f32 %v1280_v44, 0.0  ;;  %v1294_v47 = vsub.f32 %v1289_v24, %v1290_v46  ;;  %v4357_v57 = vld [vmem:[%s4450_s10 + $0x50] sm:$0xff] }
 0x342   : > { %v1285_v45 = vmax.f32 %v1284_v0, 0.0  ;;  %v1297_v11 = vsub.f32 %v1291_v63, %v1293_v59  ;;  %v1304_v49 = vsub.f32 %v4352_v32, %v1262_v1  ;;  %v1305_v60 = vsub.f32 %v4353_v37, %v1266_v48  ;;  %v4356_v48 = vld [vmem:[%s4450_s10 + $0x48] sm:$0xff] }
 0x343   : > { %v1274_v52 = vmin.f32 %v1273_v23, 1.0  ;;  %v1278_v5 = vmin.f32 %v1277_v21, 1.0  ;;  %v1282_v13 = vmin.f32 %v1281_v29, 1.0  ;;  %v1295_v17 = vadd.f32 %v1294_v47, %v1292_v12 }
 0x344   : > { %v1286_v16 = vmin.f32 %v1285_v45, 1.0  ;;  %v1298_v31 = vand.u32 2147483647, %v1297_v11  ;;  %v1300_v34 = vsub.f32 %v1292_v12, %v1294_v47  ;;  %v1306_v6 = vsub.f32 %v4354_v38, %v1270_v25 }
 0x345   : > { %v1296_v28 = vand.u32 2147483647, %v1295_v17  ;;  %v1307_v42 = vadd.f32 %v1304_v49, %v1303_v39  ;;  %v1308_v18 = vsub.f32 %v1303_v39, %v1304_v49  ;;  %v1320_v22 = vsub.f32 %v4355_v20, %v1274_v52 }
 0x346   : > { %v1309_v1 = vadd.f32 %v1306_v6, %v1305_v60  ;;  %v1310_v10 = vsub.f32 %v1305_v60, %v1306_v6  ;;  %v1321_v24 = vsub.f32 %v4356_v48, %v1278_v5  ;;  %v2864_v8 = vmul.f32 1.05, %v5707_v2 }
 0x347   : > { %v1299_v46 = vadd.f32 %v1298_v31, %v1296_v28  ;;  %v1301_v54 = vand.u32 2147483647, %v1300_v34  ;;  %v1322_v44 = vsub.f32 %v4357_v57, %v1282_v13  ;;  %v1323_v0 = vsub.f32 %v4358_v61, %v1286_v16 }
 0x348   : > { %v1311_v63 = vadd.f32 %v1310_v10, %v1308_v18  ;;  %v1313_v12 = vsub.f32 %v1307_v42, %v1309_v1  ;;  %v1316_v25 = vsub.f32 %v1308_v18, %v1310_v10  ;;  %v1324_v59 = vadd.f32 %v1321_v24, %v1320_v22 }
 0x349   : > { %v1302_v23 = vadd.f32 %v1301_v54, %v1299_v46  ;;  %v1325_v39 = vsub.f32 %v1320_v22, %v1321_v24  ;;  %v1326_v21 = vadd.f32 %v1323_v0, %v1322_v44  ;;  %v1327_v29 = vsub.f32 %v1322_v44, %v1323_v0 }
 0x34a   : > { %v1312_v47 = vand.u32 2147483647, %v1311_v63  ;;  %v1314_v45 = vand.u32 2147483647, %v1313_v12  ;;  %v3150_v11 = vmul.f32 0.95, %v5615_v50  ;;  %v2900_v63 = vpop.xlane.xlu0 %2899 }
 0x34b   : > { %v1328_v32 = vadd.f32 %v1327_v29, %v1325_v39  ;;  %v1330_v49 = vsub.f32 %v1324_v59, %v1326_v21  ;;  %v1333_v37 = vsub.f32 %v1325_v39, %v1327_v29  ;;  %v2865_v60 = vmax.f32 %v2864_v8, 0.0 }
 0x34c   : > { %v1315_v52 = vadd.f32 %v1314_v45, %v1312_v47  ;;  %v1317_v5 = vand.u32 2147483647, %v1316_v25  ;;  %v6391_v16 = vmax.f32 %v5774_v51, 0.0  ;;  %v2880_v38 = vmul.f32 0.2989, %v5787_v4  ;;  %v2891_v25 = vpop.xlane.xlu1 %2890 }
 0x34d   : > { %v1329_v13 = vand.u32 2147483647, %v1328_v32  ;;  %v1331_v17 = vand.u32 2147483647, %v1330_v49  ;;  %v2881_v6 = vmul.f32 0.587, %v5789_v35 }
 0x34e   : > { %v5808_v31 = vmin.f32 %v6391_v16, 1.0  ;;  %v1318_v34 = vadd.f32 %v1317_v5, %v1315_v52  ;;  %v6392_v28 = vmax.f32 %v5777_v43, 0.0  ;;  %v1334_v20 = vand.u32 2147483647, %v1333_v37  ;;  %v2826_v12 = vpop.xlane.xlu0 %2825 }
 0x34f   : > { %v1332_v18 = vadd.f32 %v1331_v17, %v1329_v13  ;;  %v5816_v22 = vmin.f32 %v2865_v60, 1.0  ;;  %v3151_v1 = vmax.f32 %v3150_v11, 0.0  ;;  %v2882_v46 = vadd.f32 %v2881_v6, %v2880_v38 }
 0x350   : > { %v5814_v42 = vmin.f32 %v6392_v28, 1.0  ;;  %v1319_v10 = vadd.f32 %v1318_v34, %v1302_v23  ;;  %v3164_v51 = vmul.f32 0.2989, %v5808_v31  ;;  %v2827_v59 = vrot.slane %v2826_v12, 4 }
 0x351   : > { %v1335_v48 = vadd.f32 %v1334_v20, %v1332_v18  ;;  %v2883_v54 = vmul.f32 0.114, %v5816_v22  ;;  %v5821_v57 = vmin.f32 %v3151_v1, 1.0  ;;  %v2892_v23 = vrot.slane %v2891_v25, 4 }
 0x352   : > { %v3165_v24 = vmul.f32 0.587, %v5814_v42  ;;  %v2920_v39 = vpop.xlane.xlu0 %2919  ;;  %v2901_v21 = vrot.slane %v2900_v63, 4  ;;  %v2828_v29 = vadd.f32 %v2827_v59, %v2826_v12 }
 0x353   : > { %v1336_v8 = vadd.f32 %v1335_v48, %v1319_v10  ;;  %v2884_v43 = vadd.f32 %v2883_v54, %v2882_v46  ;;  %v3167_v61 = vmul.f32 0.114, %v5821_v57  ;;  %v2921_v47 = vrot.slane %v2920_v39, 4 }
 0x354   : > { %v3166_v44 = vadd.f32 %v3165_v24, %v3164_v51  ;;  %v2893_v45 = vadd.f32 %v2892_v23, %v2891_v25  ;;  %v2902_v11 = vadd.f32 %v2901_v21, %v2900_v63  ;;  %v2829_v32 = vrot.slane %v2828_v29, 2 }
 0x355   : > { %1337 = vadd.xlane.f32.xlu1 %v1336_v8  ;;  %v2922_v49 = vadd.f32 %v2921_v47, %v2920_v39  ;;  %v6394_v47 = vld [vmem:[#allocation4_spill] sm:$0xff] }
 0x356   : > { %v3168_v0 = vadd.f32 %v3167_v61, %v3166_v44  ;;  %v2894_v60 = vrot.slane %v2893_v45, 2  ;;  %v2903_v5 = vrot.slane %v2902_v11, 2  ;;  %v2830_v34 = vadd.f32 %v2829_v32, %v2828_v29 }
 0x357   : > { %v2923_v17 = vrot.slane %v2922_v49, 2  ;;  %v5831_v29 = vmul.f32 0.95, %v5555_v56 }
 0x358   : > { %v2895_v28 = vadd.f32 %v2894_v60, %v2893_v45  ;;  %v2904_v18 = vadd.f32 %v2903_v5, %v2902_v11  ;;  %v2831_v10 = vrot.slane %v2830_v34, 1  ;;  %v2931_v45 = vmul.f32 0.95, %v6394_v47  ;;  %v6395_v11 = vld [vmem:[#allocation27_spill] sm:$0xff] }
 0x359   : > { %2909 = vadd.xlane.f32.xlu1 %v2884_v43  ;;  %v2924_v48 = vadd.f32 %v2923_v17, %v2922_v49  ;;  %v2948_v32 = vmul.f32 0.95, %v6395_v11  ;;  %v2936_v49 = vmul.f32 0.95, %v5642_v36  ;;  %v2960_v60 = vmul.f32 0.95, %v5723_v53 }
 0x35a   : > { %v2896_v8 = vrot.slane %v2895_v28, 1  ;;  %v2905_v46 = vrot.slane %v2904_v18, 1  ;;  %v2832_v44 = vadd.f32 %v2831_v10, %v2830_v34  ;;  %v5841_v5 = vmul.f32 0.95, %v5559_v58 }
 0x35b   : > { %v2925_v61 = vrot.slane %v2924_v48, 1  ;;  %v2956_v34 = vmul.f32 0.95, %v5789_v35  ;;  %v2968_v36 = vmul.f32 0.95, %v5653_v30 }
 0x35c   : > { %v2906_v12 = vadd.f32 %v2905_v46, %v2904_v18 }
 0x35d   : > { %3188 = vadd.xlane.f32.xlu1 %v3168_v0  ;;  %v2897_v0 = vadd.f32 %v2896_v8, %v2895_v28  ;;  %v2926_v59 = vadd.f32 %v2925_v61, %v2924_v48 }
 0x3de   : > { %v1338_v37 = vpop.xlane.xlu1 %1337 }
 0x3df   : > { %v1339_v52 = vrot.slane %v1338_v37, 4 }
 0x3e1   : > { %v1340_v13 = vadd.f32 %v1339_v52, %v1338_v37  ;;  %v2952_v37 = vmul.f32 0.95, %v5648_v14  ;;  %v3133_v52 = vmax.f32 %v5831_v29, 0.0  ;;  %v2976_v14 = vmul.f32 0.95, %v5735_v3 }
 0x3e2   : > { %v2910_v16 = vpop.xlane.xlu1 %2909 }
 0x3e3   : > { %v1341_v38 = vrot.slane %v1340_v13, 2  ;;  %v2911_v6 = vrot.slane %v2910_v16, 4 }
 0x3e5   : > { %v2912_v20 = vadd.f32 %v2911_v6, %v2910_v16  ;;  %v1342_v1 = vadd.f32 %v1341_v38, %v1340_v13  ;;  %v6396_v13 = vld [vmem:[#allocation16_spill] sm:$0xff]  ;;  %v2940_v16 = vmul.f32 0.95, %v5787_v4 }
 0x3e6   : > { %v2964_v17 = vmul.f32 0.95, %v6396_v13 }
 0x3e7   : > { %v2913_v51 = vrot.slane %v2912_v20, 2  ;;  %v1343_v24 = vrot.slane %v1342_v1, 1 }
 0x3e9   : > { %v1344_v54 = vadd.f32 %v1343_v24, %v1342_v1  ;;  %v2914_v43 = vadd.f32 %v2913_v51, %v2912_v20 }
 0x3eb   : > { %4177 = vpush %v1344_v54  ;;  %v2915_v63 = vrot.slane %v2914_v43, 1 }
 0x3ec   : > { %4179 = vpush %v2832_v44 }
 0x3ed   : > { %4181 = vpush %v2897_v0  ;;  %v2916_v25 = vadd.f32 %v2915_v63, %v2914_v43 }
 0x3ee   : > { %4183 = vpush %v2906_v12 }
 0x3ef   : > { %4185 = vpush %v2916_v25 }
 0x3f0   : > { %4187 = vpush %v2926_v59 }
 0x41c   : > { %s4178_s10 = spop %4177 }
 0x41d   : > { %v3795_v23 = vstv %s4178_s10  ;;  %s5825_s30 = spop %4179 }
 0x41e   : > { %v3796_v39 = vsel %vm3794_vm7, %v3795_v23, 0.0  ;;  %s4182_s8 = spop %4181 }
 0x41f   : > { %v5828_v21 = vadd.f32 %v3796_v39, %v5764_v27  ;;  %s4184_s9 = spop %4183  ;;  %v2944_v27 = vmul.f32 0.95, %v5721_v26  ;;  %v2972_v26 = vmul.f32 0.95, %v5816_v22 }
 0x420   : > { %s2908_s11 = sadd.f32 %s4184_s9, %s4182_s8  ;;  %s4186_s12 = spop %4185 }
 0x421   : > { %6393 = vst [vmem:[#allocation28_spill] sm:$0xff] %v5828_v21  ;;  %s4188_s14 = spop %4187 }
 0x422   : > { %s2918_s13 = sadd.f32 %s4186_s12, %s2908_s11 }
 0x424   : > { %s2928_s15 = sadd.f32 %s4188_s14, %s2918_s13 }
 0x426   : > { %s2929_s16 = smul.f32 0.00390625, %s2928_s15 }
 0x428   : > { %s2930_s7 = smul.f32 0.05, %s2929_s16 }
 0x42a   : > { %v2932_v38 = vstv %s2930_s7 }
 0x42b   : > { %v2933_v53 = vadd.f32 %v2932_v38, %v2931_v45  ;;  %v2937_v6 = vadd.f32 %v2936_v49, %v2932_v38  ;;  %v2941_v28 = vadd.f32 %v2940_v16, %v2932_v38  ;;  %v2945_v18 = vadd.f32 %v2944_v27, %v2932_v38 }
 0x42c   : > { %v2949_v20 = vadd.f32 %v2948_v32, %v2932_v38  ;;  %v2953_v1 = vadd.f32 %v2952_v37, %v2932_v38  ;;  %v2957_v10 = vadd.f32 %v2956_v34, %v2932_v38  ;;  %v2961_v48 = vadd.f32 %v2960_v60, %v2932_v38 }
 0x42d   : > { %v2934_v51 = vmax.f32 %v2933_v53, 0.0  ;;  %v2938_v24 = vmax.f32 %v2937_v6, 0.0  ;;  %v2942_v4 = vmax.f32 %v2941_v28, 0.0  ;;  %v2946_v8 = vmax.f32 %v2945_v18, 0.0 }
 0x42e   : > { %v2950_v35 = vmax.f32 %v2949_v20, 0.0  ;;  %v2954_v46 = vmax.f32 %v2953_v1, 0.0  ;;  %v2958_v30 = vmax.f32 %v2957_v10, 0.0  ;;  %v2962_v54 = vmax.f32 %v2961_v48, 0.0 }
 0x42f   : > { %v2935_v3 = vmin.f32 %v2934_v51, 1.0  ;;  %v2939_v43 = vmin.f32 %v2938_v24, 1.0  ;;  %v2943_v22 = vmin.f32 %v2942_v4, 1.0  ;;  %v2947_v44 = vmin.f32 %v2946_v8, 1.0 }
 0x430   : > { %v2951_v61 = vmin.f32 %v2950_v35, 1.0  ;;  %v2955_v0 = vmin.f32 %v2954_v46, 1.0  ;;  %v2959_v63 = vmin.f32 %v2958_v30, 1.0  ;;  %v2963_v12 = vmin.f32 %v2962_v54, 1.0 }
 0x431   : > { %v2965_v25 = vadd.f32 %v2964_v17, %v2932_v38  ;;  %v2969_v59 = vadd.f32 %v2968_v36, %v2932_v38  ;;  %v2973_v23 = vadd.f32 %v2972_v26, %v2932_v38  ;;  %v2977_v39 = vadd.f32 %v2976_v14, %v2932_v38 }
 0x432   : > { %v2980_v47 = vmul.f32 0.2989, %v2935_v3  ;;  %v2981_v45 = vmul.f32 0.587, %v2951_v61  ;;  %v2985_v11 = vmul.f32 0.2989, %v2939_v43 }
 0x433   : > { %v2966_v32 = vmax.f32 %v2965_v25, 0.0  ;;  %v2970_v49 = vmax.f32 %v2969_v59, 0.0  ;;  %v2974_v37 = vmax.f32 %v2973_v23, 0.0  ;;  %v2978_v27 = vmax.f32 %v2977_v39, 0.0 }
 0x434   : > { %v2982_v60 = vadd.f32 %v2981_v45, %v2980_v47  ;;  %v2986_v13 = vmul.f32 0.587, %v2955_v0  ;;  %v2990_v16 = vmul.f32 0.2989, %v2943_v22  ;;  %v2991_v34 = vmul.f32 0.587, %v2959_v63 }
 0x435   : > { %v2967_v53 = vmin.f32 %v2966_v32, 1.0  ;;  %v2971_v6 = vmin.f32 %v2970_v49, 1.0  ;;  %v2975_v28 = vmin.f32 %v2974_v37, 1.0  ;;  %v2979_v18 = vmin.f32 %v2978_v27, 1.0 }
 0x436   : > { %v2987_v20 = vadd.f32 %v2986_v13, %v2985_v11  ;;  %v2992_v17 = vadd.f32 %v2991_v34, %v2990_v16  ;;  %v2995_v36 = vmul.f32 0.2989, %v2947_v44  ;;  %v2996_v26 = vmul.f32 0.587, %v2963_v12 }
 0x437   : > { %v2983_v14 = vmul.f32 0.114, %v2967_v53  ;;  %v2988_v38 = vmul.f32 0.114, %v2971_v6  ;;  %v2993_v1 = vmul.f32 0.114, %v2975_v28 }
 0x438   : > { %v2997_v10 = vadd.f32 %v2996_v26, %v2995_v36  ;;  %v2998_v48 = vmul.f32 0.114, %v2979_v18  ;;  %v3004_v51 = vmul.f32 1.1, %v2935_v3  ;;  %v3008_v24 = vmul.f32 1.1, %v2939_v43 }
 0x439   : > { %v2984_v4 = vadd.f32 %v2983_v14, %v2982_v60  ;;  %v2989_v8 = vadd.f32 %v2988_v38, %v2987_v20  ;;  %v2994_v35 = vadd.f32 %v2993_v1, %v2992_v17  ;;  %v3012_v46 = vmul.f32 1.1, %v2943_v22 }
 0x43a   : > { %v2999_v30 = vadd.f32 %v2998_v48, %v2997_v10  ;;  %v3016_v54 = vmul.f32 1.1, %v2947_v44  ;;  %v3020_v25 = vmul.f32 1.1, %v2951_v61  ;;  %v3024_v59 = vmul.f32 1.1, %v2955_v0 }
 0x43b   : > { %v3000_v23 = vmul.f32 -0.1, %v2984_v4  ;;  %v3001_v39 = vmul.f32 -0.1, %v2989_v8  ;;  %v3002_v47 = vmul.f32 -0.1, %v2994_v35 }
 0x43c   : > { %v3003_v45 = vmul.f32 -0.1, %v2999_v30  ;;  %v3028_v11 = vmul.f32 1.1, %v2959_v63  ;;  %v3032_v32 = vmul.f32 1.1, %v2963_v12 }
 0x43d   : > { %v3005_v49 = vadd.f32 %v3004_v51, %v3000_v23  ;;  %v3009_v37 = vadd.f32 %v3008_v24, %v3001_v39  ;;  %v3013_v27 = vadd.f32 %v3012_v46, %v3002_v47  ;;  %v3021_v13 = vadd.f32 %v3020_v25, %v3000_v23 }
 0x43e   : > { %v3017_v3 = vadd.f32 %v3016_v54, %v3003_v45  ;;  %v3025_v43 = vadd.f32 %v3024_v59, %v3001_v39  ;;  %v3029_v60 = vadd.f32 %v3028_v11, %v3002_v47  ;;  %v3033_v16 = vadd.f32 %v3032_v32, %v3003_v45 }
 0x43f   : > { %v3006_v34 = vmax.f32 %v3005_v49, 0.0  ;;  %v3010_v22 = vmax.f32 %v3009_v37, 0.0  ;;  %v3014_v20 = vmax.f32 %v3013_v27, 0.0  ;;  %v5850_v61 = vmul.f32 1.1, %v5561_v19 }
 0x440   : > { %v3018_v44 = vmax.f32 %v3017_v3, 0.0  ;;  %v5853_v0 = vmul.f32 1.1, %v5563_v15  ;;  %v3022_v63 = vmax.f32 %v3021_v13, 0.0  ;;  %v5857_v12 = vmin.f32 %v3133_v52, 1.0 }
 0x441   : > { %v3145_v17 = vmax.f32 %v5841_v5, 0.0  ;;  %v5861_v36 = vmul.f32 1.1, %v5553_v40  ;;  %v5863_v26 = vmin.f32 %v3006_v34, 1.0  ;;  %v5865_v14 = vmin.f32 %v3010_v22, 1.0  ;;  %v6398_v34 = vld [vmem:[#allocation2_spill] sm:$0xff] }
 0x442   : > { %v3026_v38 = vmax.f32 %v3025_v43, 0.0  ;;  %v3030_v1 = vmax.f32 %v3029_v60, 0.0  ;;  %v3036_v10 = vmul.f32 1.1, %v2967_v53  ;;  %v3040_v48 = vmul.f32 1.1, %v2971_v6 }
 0x443   : > { %6397 = vst [vmem:[#allocation9_spill] sm:$0xff] %v5863_v26  ;;  %v3044_v51 = vmul.f32 1.1, %v2975_v28  ;;  %v5867_v24 = vmin.f32 %v3014_v20, 1.0  ;;  %v5869_v4 = vmin.f32 %v3018_v44, 1.0  ;;  %v3034_v29 = vmax.f32 %v3033_v16, 0.0 }
 0x444   : > { %v3048_v52 = vmul.f32 1.1, %v2979_v18  ;;  %v5871_v8 = vmin.f32 %v3022_v63, 1.0  ;;  %v3037_v5 = vadd.f32 %v3036_v10, %v3000_v23  ;;  %v3041_v35 = vadd.f32 %v3040_v48, %v3001_v39  ;;  %v6399_v20 = vld [vmem:[#allocation20_spill] sm:$0xff]  ;;  %v6401_v48 = vld [vmem:[#allocation17_spill] sm:$0xff] }
 0x445   : > { %v3045_v46 = vadd.f32 %v3044_v51, %v3002_v47  ;;  %v5873_v30 = vmin.f32 %v3026_v38, 1.0  ;;  %v3064_v25 = vsub.f32 %v5660_v7, %v5863_v26  ;;  %v5877_v53 = vmin.f32 %v3145_v17, 1.0 }
 0x446   : > { %v3049_v54 = vadd.f32 %v3048_v52, %v3003_v45  ;;  %v3038_v6 = vmax.f32 %v3037_v5, 0.0  ;;  %v3042_v28 = vmax.f32 %v3041_v35, 0.0  ;;  %v3065_v11 = vsub.f32 %v5662_v33, %v5865_v14 }
 0x447   : > { %v3046_v59 = vmax.f32 %v3045_v46, 0.0  ;;  %v3066_v23 = vsub.f32 %v5664_v41, %v5867_v24  ;;  %v3067_v39 = vsub.f32 %v5666_v62, %v5869_v4  ;;  %v3413_v47 = vmax.f32 %v5850_v61, 0.0  ;;  %v6402_v46 = vld [vmem:[#allocation21_spill] sm:$0xff] }
 0x448   : > { %v3050_v18 = vmax.f32 %v3049_v54, 0.0  ;;  %v5886_v45 = vmin.f32 %v3030_v1, 1.0  ;;  %v5888_v32 = vmin.f32 %v3034_v29, 1.0  ;;  %v3068_v49 = vadd.f32 %v3065_v11, %v3064_v25  ;;  %v6400_v1 = vld [vmem:[#allocation18_spill] sm:$0xff] }
 0x449   : > { %v3080_v37 = vsub.f32 %v5672_v9, %v5871_v8  ;;  %v5892_v27 = vmin.f32 %v3038_v6, 1.0  ;;  %v3069_v13 = vsub.f32 %v3064_v25, %v3065_v11  ;;  %v3070_v3 = vadd.f32 %v3067_v39, %v3066_v23 }
 0x44a   : > { %v3071_v43 = vsub.f32 %v3066_v23, %v3067_v39  ;;  %v5894_v60 = vmin.f32 %v3042_v28, 1.0  ;;  %v5896_v16 = vmin.f32 %v3046_v59, 1.0  ;;  %v3081_v22 = vsub.f32 %v6398_v34, %v5873_v30  ;;  %v6403_v59 = vld [vmem:[#allocation19_spill] sm:$0xff] }
 0x44b   : > { %v3156_v44 = vmul.f32 0.95, %v6399_v20  ;;  %v5901_v61 = vmin.f32 %v3050_v18, 1.0  ;;  %v3074_v17 = vsub.f32 %v3068_v49, %v3070_v3  ;;  %v3082_v10 = vsub.f32 %v6400_v1, %v5886_v45  ;;  %v6404_v18 = vld [vmem:[#allocation22_spill] sm:$0xff] }
 0x44c   : > { %v3072_v63 = vadd.f32 %v3071_v43, %v3069_v13  ;;  %v3077_v38 = vsub.f32 %v3069_v13, %v3071_v43  ;;  %v3083_v51 = vsub.f32 %v6401_v48, %v5888_v32  ;;  %v3084_v29 = vadd.f32 %v3081_v22, %v3080_v37  ;;  %v6405_v13 = vld [vmem:[#allocation5_spill] sm:$0xff] }
 0x44d   : > { %v3085_v52 = vsub.f32 %v3080_v37, %v3081_v22  ;;  %v3075_v35 = vand.u32 2147483647, %v3074_v17  ;;  %v3097_v54 = vsub.f32 %v6402_v46, %v5892_v27  ;;  %v3425_v25 = vmax.f32 %v5853_v0, 0.0 }
 0x44e   : > { %v3073_v5 = vand.u32 2147483647, %v3072_v63  ;;  %v3086_v6 = vadd.f32 %v3083_v51, %v3082_v10  ;;  %v3087_v28 = vsub.f32 %v3082_v10, %v3083_v51  ;;  %v3098_v11 = vsub.f32 %v6403_v59, %v5894_v60  ;;  %v6406_v59 = vld [vmem:[#allocation25_spill] sm:$0xff] }
 0x44f   : > { %v3099_v23 = vsub.f32 %v6404_v18, %v5896_v16  ;;  %v3078_v49 = vand.u32 2147483647, %v3077_v38  ;;  %v3100_v37 = vsub.f32 %v6405_v13, %v5901_v61  ;;  %v3157_v3 = vmax.f32 %v3156_v44, 0.0  ;;  %v6407_v38 = vld [vmem:[#allocation30_spill] sm:$0xff] }
 0x450   : > { %v3076_v39 = vadd.f32 %v3075_v35, %v3073_v5  ;;  %v3088_v43 = vadd.f32 %v3087_v28, %v3085_v52  ;;  %v3090_v22 = vsub.f32 %v3084_v29, %v3086_v6  ;;  %v3093_v63 = vsub.f32 %v3085_v52, %v3087_v28 }
 0x451   : > { %v3101_v17 = vadd.f32 %v3098_v11, %v3097_v54  ;;  %v3102_v0 = vsub.f32 %v3097_v54, %v3098_v11  ;;  %v3103_v55 = vadd.f32 %v3100_v37, %v3099_v23  ;;  %v3104_v10 = vsub.f32 %v3099_v23, %v3100_v37 }
 0x452   : > { %v3079_v21 = vadd.f32 %v3078_v49, %v3076_v39  ;;  %v3089_v51 = vand.u32 2147483647, %v3088_v43  ;;  %v3091_v46 = vand.u32 2147483647, %v3090_v22  ;;  %v3436_v26 = vmul.f32 1.1, %v6406_v59 }
 0x453   : > { %v3105_v19 = vadd.f32 %v3104_v10, %v3102_v0  ;;  %v3107_v18 = vsub.f32 %v3101_v17, %v3103_v55  ;;  %v3110_v5 = vsub.f32 %v3102_v0, %v3104_v10  ;;  %v3430_v35 = vmul.f32 1.1, %v6407_v38 }
 0x454   : > { %v3092_v48 = vadd.f32 %v3091_v46, %v3089_v51  ;;  %v3094_v13 = vand.u32 2147483647, %v3093_v63  ;;  %v3174_v44 = vmul.f32 0.2989, %v5857_v12  ;;  %v3175_v29 = vmul.f32 0.587, %v5877_v53 }
 0x455   : > { %v3106_v52 = vand.u32 2147483647, %v3105_v19  ;;  %v3108_v6 = vand.u32 2147483647, %v3107_v18  ;;  %v5920_v54 = vmin.f32 %v3157_v3, 1.0  ;;  %v5922_v28 = vmin.f32 %v3413_v47, 1.0 }
 0x456   : > { %v3095_v11 = vadd.f32 %v3094_v13, %v3092_v48  ;;  %v5924_v23 = vmin.f32 %v3425_v25, 1.0  ;;  %v3437_v39 = vmax.f32 %v3436_v26, 0.0  ;;  %v3419_v55 = vmax.f32 %v5861_v36, 0.0 }
 0x457   : > { %v3109_v49 = vadd.f32 %v3108_v6, %v3106_v52  ;;  %v3111_v37 = vand.u32 2147483647, %v3110_v5  ;;  %v3431_v46 = vmax.f32 %v3430_v35, 0.0  ;;  %v3442_v43 = vmul.f32 1.1, %v5707_v2  ;;  %v3180_v6 = vpop.xlane.xlu0 %3179 }
 0x458   : > { %v3096_v22 = vadd.f32 %v3095_v11, %v3079_v21  ;;  %v3177_v19 = vmul.f32 0.114, %v5920_v54  ;;  %v3176_v18 = vadd.f32 %v3175_v29, %v3174_v44  ;;  %v5929_v3 = vmin.f32 %v3437_v39, 1.0  ;;  %v3189_v11 = vpop.xlane.xlu1 %3188 }
 0x459   : > { %v3112_v63 = vadd.f32 %v3111_v37, %v3109_v49  ;;  %v3448_v47 = vmul.f32 0.2989, %v5922_v28  ;;  %v3449_v48 = vmul.f32 0.587, %v5924_v23  ;;  %v5933_v26 = vmin.f32 %v3419_v55, 1.0 }
 0x45a   : > { %v5935_v36 = vmin.f32 %v3431_v46, 1.0  ;;  %v3443_v13 = vmax.f32 %v3442_v43, 0.0  ;;  %v3178_v17 = vadd.f32 %v3177_v19, %v3176_v18  ;;  %v3451_v21 = vmul.f32 0.114, %v5929_v3 }
 0x45b   : > { %v3113_v25 = vadd.f32 %v3112_v63, %v3096_v22  ;;  %v3450_v0 = vadd.f32 %v3449_v48, %v3448_v47  ;;  %v3458_v51 = vmul.f32 0.2989, %v5933_v26  ;;  %v3199_v39 = vpop.xlane.xlu0 %3198  ;;  %v3181_v55 = vrot.slane %v3180_v6, 4 }
 0x45c   : > { %6408 = vst [vmem:[#allocation10_spill] sm:$0xff] %v5935_v36  ;;  %v5938_v10 = vmin.f32 %v3443_v13, 1.0  ;;  %v3459_v5 = vmul.f32 0.587, %v5935_v36  ;;  %v3190_v49 = vrot.slane %v3189_v11, 4  ;;  %v3200_v37 = vrot.slane %v3199_v39, 4 }
 0x45d   : > { %3114 = vadd.xlane.f32.xlu1 %v3113_v25  ;;  %v3452_v35 = vadd.f32 %v3451_v21, %v3450_v0  ;;  %v3182_v46 = vadd.f32 %v3181_v55, %v3180_v6 }
 0x45e   : > { %6409 = vst [vmem:[#allocation11_spill] sm:$0xff] %v5938_v10  ;;  %v3460_v44 = vadd.f32 %v3459_v5, %v3458_v51  ;;  %v3461_v29 = vmul.f32 0.114, %v5938_v10  ;;  %v3191_v43 = vadd.f32 %v3190_v49, %v3189_v11  ;;  %v3201_v22 = vadd.f32 %v3200_v37, %v3199_v39 }
 0x45f   : > { %v3183_v63 = vrot.slane %v3182_v46, 2 }
 0x460   : > { %v3462_v52 = vadd.f32 %v3461_v29, %v3460_v44  ;;  %v3192_v18 = vrot.slane %v3191_v43, 2  ;;  %v3202_v48 = vrot.slane %v3201_v22, 2 }
 0x461   : > { %3208 = vadd.xlane.f32.xlu1 %v3178_v17  ;;  %v3184_v17 = vadd.f32 %v3183_v63, %v3182_v46 }
 0x462   : > { %v3193_v51 = vadd.f32 %v3192_v18, %v3191_v43  ;;  %v3203_v5 = vadd.f32 %v3202_v48, %v3201_v22  ;;  %v6411_v22 = vld [vmem:[#allocation8_spill] sm:$0xff]  ;;  %v6412_v18 = vld [vmem:[#allocation31_spill] sm:$0xff] }
 0x463   : > { %v3185_v29 = vrot.slane %v3184_v17, 1  ;;  %v3237_v63 = vmul.f32 1.05, %v6411_v22  ;;  %v6413_v48 = vld [vmem:[#allocation32_spill] sm:$0xff] }
 0x464   : > { %v3194_v6 = vrot.slane %v3193_v51, 1  ;;  %v3204_v11 = vrot.slane %v3203_v5, 1 }
 0x465   : > { %3468 = vadd.xlane.f32.xlu1 %v3452_v35  ;;  %v3186_v49 = vadd.f32 %v3185_v29, %v3184_v17  ;;  %v6414_v17 = vld [vmem:[#allocation33_spill] sm:$0xff]  ;;  %v3257_v29 = vmul.f32 1.05, %v5821_v57  ;;  %v5978_v57 = vadd.f32 %v5869_v4, %v5555_v56 }
 0x466   : > { %v3195_v37 = vadd.f32 %v3194_v6, %v3193_v51  ;;  %v3241_v51 = vmul.f32 1.05, %v5814_v42  ;;  %v3265_v6 = vmul.f32 1.05, %v5920_v54  ;;  %v6416_v42 = vld [vmem:[#allocation29_spill] sm:$0xff]  ;;  %v6417_v54 = vld [vmem:[#allocation15_spill] sm:$0xff] }
 0x469   : > { %3487 = vadd.xlane.f32.xlu1 %v3462_v52 }
 0x4e6   : > { %v3115_v19 = vpop.xlane.xlu1 %3114 }
 0x4e7   : > { %v3116_v47 = vrot.slane %v3115_v19, 4 }
 0x4e9   : > { %v3117_v25 = vadd.f32 %v3116_v47, %v3115_v19  ;;  %v3205_v19 = vadd.f32 %v3204_v11, %v3203_v5  ;;  %v3229_v47 = vmul.f32 1.05, %v6412_v18  ;;  %v6415_v5 = vld [vmem:[#allocation36_spill] sm:$0xff] }
 0x4ea   : > { %v3209_v13 = vpop.xlane.xlu1 %3208 }
 0x4eb   : > { %v3118_v21 = vrot.slane %v3117_v25, 2  ;;  %v3210_v0 = vrot.slane %v3209_v13, 4 }
 0x4ed   : > { %v3211_v35 = vadd.f32 %v3210_v0, %v3209_v13  ;;  %v3119_v44 = vadd.f32 %v3118_v21, %v3117_v25  ;;  %v3245_v25 = vmul.f32 1.05, %v6413_v48  ;;  %v5953_v13 = vmul.f32 1.1, %v5559_v58 }
 0x4ee   : > { %v3253_v21 = vmul.f32 1.05, %v6414_v17  ;;  %v3225_v0 = vmul.f32 1.05, %v5808_v31  ;;  %v5966_v31 = vmul.f32 1.1, %v6399_v20 }
 0x4ef   : > { %v3212_v52 = vrot.slane %v3211_v35, 2  ;;  %v3120_v10 = vrot.slane %v3119_v44, 1 }
 0x4f1   : > { %v3121_v39 = vadd.f32 %v3120_v10, %v3119_v44  ;;  %v3213_v55 = vadd.f32 %v3212_v52, %v3211_v35  ;;  %v6410_v10 = vld [vmem:[#allocation7_spill] sm:$0xff]  ;;  %v3261_v35 = vmul.f32 1.05, %v6415_v5  ;;  %v3233_v44 = vmul.f32 1.05, %v5857_v12 }
 0x4f2   : > { %v3220_v43 = vmul.f32 1.05, %v6410_v10  ;;  %v3249_v52 = vmul.f32 1.05, %v5877_v53  ;;  %v5974_v12 = vadd.f32 %v5867_v24, %v5553_v40  ;;  %v5982_v53 = vadd.f32 %v5871_v8, %v5563_v15 }
 0x4f3   : > { %4189 = vpush %v3121_v39  ;;  %v3214_v36 = vrot.slane %v3213_v55, 1  ;;  %v5994_v40 = vadd.f32 %v5888_v32, %v5559_v58 }
 0x4f4   : > { %4191 = vpush %v3186_v49  ;;  %v5986_v49 = vadd.f32 %v5873_v30, %v6417_v54 }
 0x4f5   : > { %4193 = vpush %v3195_v37  ;;  %v3215_v46 = vadd.f32 %v3214_v36, %v3213_v55  ;;  %v5950_v36 = vmul.f32 1.1, %v5555_v56  ;;  %v5970_v55 = vadd.f32 %v5865_v14, %v6416_v42  ;;  %v5990_v14 = vadd.f32 %v5886_v45, %v6407_v38 }
 0x4f6   : > { %4195 = vpush %v3205_v19 }
 0x4f7   : > { %4197 = vpush %v3215_v46  ;;  %v3422_v11 = vmax.f32 %v5950_v36, 0.0 }
 0x524   : > { %s5943_s17 = spop %4189 }
 0x525   : > { %s4192_s18 = spop %4191 }
 0x526   : > { %s4194_s19 = spop %4193 }
 0x527   : > { %s3197_s20 = sadd.f32 %s4194_s19, %s4192_s18  ;;  %s4196_s23 = spop %4195 }
 0x528   : > { %s4198_s24 = spop %4197  ;;  %s3917_s19 = sshll.u32 %s6434_s22, 3 }
 0x529   : > { %s3207_s25 = sadd.f32 %s4196_s23, %s3197_s20 }
 0x52b   : > { %s3217_s26 = sadd.f32 %s4198_s24, %s3207_s25 }
 0x52d   : > { %s3218_s27 = smul.f32 0.00390625, %s3217_s26 }
 0x52f   : > { %s3219_s29 = smul.f32 -0.05, %s3218_s27 }
 0x531   : > { %v3221_v24 = vstv %s3219_s29 }
 0x532   : > { %v3222_v37 = vadd.f32 %v3221_v24, %v3220_v43  ;;  %v3226_v56 = vadd.f32 %v3225_v0, %v3221_v24  ;;  %v3230_v4 = vadd.f32 %v3229_v47, %v3221_v24  ;;  %v3234_v19 = vadd.f32 %v3233_v44, %v3221_v24 }
 0x533   : > { %v3238_v46 = vadd.f32 %v3237_v63, %v3221_v24  ;;  %v3242_v15 = vadd.f32 %v3241_v51, %v3221_v24  ;;  %v3246_v8 = vadd.f32 %v3245_v25, %v3221_v24  ;;  %v3250_v10 = vadd.f32 %v3249_v52, %v3221_v24 }
 0x534   : > { %v3223_v22 = vmax.f32 %v3222_v37, 0.0  ;;  %v3227_v30 = vmax.f32 %v3226_v56, 0.0  ;;  %v3231_v18 = vmax.f32 %v3230_v4, 0.0  ;;  %v3235_v48 = vmax.f32 %v3234_v19, 0.0 }
 0x535   : > { %v3239_v17 = vmax.f32 %v3238_v46, 0.0  ;;  %v3243_v45 = vmax.f32 %v3242_v15, 0.0  ;;  %v3247_v38 = vmax.f32 %v3246_v8, 0.0  ;;  %v3251_v5 = vmax.f32 %v3250_v10, 0.0 }
 0x536   : > { %v3224_v42 = vmin.f32 %v3223_v22, 1.0  ;;  %v3228_v58 = vmin.f32 %v3227_v30, 1.0  ;;  %v3232_v32 = vmin.f32 %v3231_v18, 1.0  ;;  %v3236_v54 = vmin.f32 %v3235_v48, 1.0 }
 0x537   : > { %v3240_v43 = vmin.f32 %v3239_v17, 1.0  ;;  %v3244_v0 = vmin.f32 %v3243_v45, 1.0  ;;  %v3248_v47 = vmin.f32 %v3247_v38, 1.0  ;;  %v3252_v44 = vmin.f32 %v3251_v5, 1.0 }
 0x538   : > { %v3254_v63 = vadd.f32 %v3253_v21, %v3221_v24  ;;  %v3258_v51 = vadd.f32 %v3257_v29, %v3221_v24  ;;  %v3262_v25 = vadd.f32 %v3261_v35, %v3221_v24  ;;  %v3266_v52 = vadd.f32 %v3265_v6, %v3221_v24 }
 0x539   : > { %v5998_v37 = vadd.f32 %v5892_v27, %v6406_v59  ;;  %v3269_v56 = vmul.f32 0.2989, %v3224_v42  ;;  %v3270_v4 = vmul.f32 0.587, %v3240_v43  ;;  %v3274_v19 = vmul.f32 0.2989, %v3228_v58 }
 0x53a   : > { %v3255_v46 = vmax.f32 %v3254_v63, 0.0  ;;  %v3259_v15 = vmax.f32 %v3258_v51, 0.0  ;;  %v3263_v8 = vmax.f32 %v3262_v25, 0.0  ;;  %v3267_v10 = vmax.f32 %v3266_v52, 0.0 }
 0x53b   : > { %v3271_v22 = vadd.f32 %v3270_v4, %v3269_v56  ;;  %v3275_v30 = vmul.f32 0.587, %v3244_v0  ;;  %v3279_v18 = vmul.f32 0.2989, %v3232_v32  ;;  %v3280_v48 = vmul.f32 0.587, %v3248_v47 }
 0x53c   : > { %v3256_v17 = vmin.f32 %v3255_v46, 1.0  ;;  %v3260_v21 = vmin.f32 %v3259_v15, 1.0  ;;  %v3264_v29 = vmin.f32 %v3263_v8, 1.0  ;;  %v3268_v35 = vmin.f32 %v3267_v10, 1.0 }
 0x53d   : > { %v3276_v6 = vadd.f32 %v3275_v30, %v3274_v19  ;;  %v3281_v24 = vadd.f32 %v3280_v48, %v3279_v18  ;;  %v3284_v45 = vmul.f32 0.2989, %v3236_v54  ;;  %v3285_v27 = vmul.f32 0.587, %v3252_v44 }
 0x53e   : > { %v6002_v59 = vadd.f32 %v5894_v60, %v5615_v50  ;;  %v3272_v38 = vmul.f32 0.114, %v3256_v17  ;;  %v3277_v5 = vmul.f32 0.114, %v3260_v21  ;;  %v3282_v63 = vmul.f32 0.114, %v3264_v29 }
 0x53f   : > { %v3286_v51 = vadd.f32 %v3285_v27, %v3284_v45  ;;  %v3287_v25 = vmul.f32 0.114, %v3268_v35  ;;  %v3293_v52 = vmul.f32 0.9, %v3224_v42  ;;  %v3297_v56 = vmul.f32 0.9, %v3228_v58 }
 0x540   : > { %v3273_v4 = vadd.f32 %v3272_v38, %v3271_v22  ;;  %v3278_v46 = vadd.f32 %v3277_v5, %v3276_v6  ;;  %v3283_v15 = vadd.f32 %v3282_v63, %v3281_v24  ;;  %v3301_v8 = vmul.f32 0.9, %v3232_v32 }
 0x541   : > { %v3288_v10 = vadd.f32 %v3287_v25, %v3286_v51  ;;  %v3305_v19 = vmul.f32 0.9, %v3236_v54  ;;  %v3309_v30 = vmul.f32 0.9, %v3240_v43  ;;  %v3313_v18 = vmul.f32 0.9, %v3244_v0 }
 0x542   : > { %v6006_v48 = vadd.f32 %v5896_v16, %v5707_v2  ;;  %v3289_v50 = vmul.f32 0.1, %v3273_v4  ;;  %v3290_v60 = vmul.f32 0.1, %v3278_v46  ;;  %v3291_v39 = vmul.f32 0.1, %v3283_v15 }
 0x543   : > { %v6010_v45 = vadd.f32 %v5901_v61, %v6399_v20  ;;  %v3292_v42 = vmul.f32 0.1, %v3288_v10  ;;  %v3317_v58 = vmul.f32 0.9, %v3248_v47  ;;  %v3321_v22 = vmul.f32 0.9, %v3252_v44 }
 0x544   : > { %v3294_v6 = vadd.f32 %v3293_v52, %v3289_v50  ;;  %v3298_v32 = vadd.f32 %v3297_v56, %v3290_v60  ;;  %v3302_v24 = vadd.f32 %v3301_v8, %v3291_v39  ;;  %v3310_v54 = vadd.f32 %v3309_v30, %v3289_v50 }
 0x545   : > { %v3306_v43 = vadd.f32 %v3305_v19, %v3292_v42  ;;  %v3314_v0 = vadd.f32 %v3313_v18, %v3290_v60  ;;  %v3318_v27 = vadd.f32 %v3317_v58, %v3291_v39  ;;  %v3322_v38 = vadd.f32 %v3321_v22, %v3292_v42 }
 0x546   : > { %v3295_v2 = vmax.f32 %v3294_v6, 0.0  ;;  %v3299_v16 = vmax.f32 %v3298_v32, 0.0  ;;  %v3303_v5 = vmax.f32 %v3302_v24, 0.0  ;;  %v3311_v63 = vmax.f32 %v3310_v54, 0.0 }
 0x547   : > { %v3307_v51 = vmax.f32 %v3306_v43, 0.0  ;;  %v3315_v25 = vmax.f32 %v3314_v0, 0.0  ;;  %v3319_v4 = vmax.f32 %v3318_v27, 0.0  ;;  %v3323_v20 = vmax.f32 %v3322_v38, 0.0 }
 0x548   : > { %v6012_v61 = vmin.f32 %v3295_v2, 1.0  ;;  %v3300_v47 = vmin.f32 %v3299_v16, 1.0  ;;  %v3304_v44 = vmin.f32 %v3303_v5, 1.0  ;;  %v3312_v52 = vmin.f32 %v3311_v63, 1.0 }
 0x549   : > { %v3308_v56 = vmin.f32 %v3307_v51, 1.0  ;;  %v3316_v46 = vmin.f32 %v3315_v25, 1.0  ;;  %v3320_v15 = vmin.f32 %v3319_v4, 1.0  ;;  %v3324_v8 = vmin.f32 %v3323_v20, 1.0 }
 0x54a   : > { %v3325_v10 = vmul.f32 0.9, %v3256_v17  ;;  %v3329_v19 = vmul.f32 0.9, %v3260_v21  ;;  %v3333_v30 = vmul.f32 0.9, %v3264_v29  ;;  %v6015_v18 = vadd.f32 %v3300_v47, %v5970_v55 }
 0x54b   : > { %v3337_v58 = vmul.f32 0.9, %v3268_v35  ;;  %v6018_v22 = vadd.f32 %v3304_v44, %v5974_v12  ;;  %v6021_v6 = vadd.f32 %v3308_v56, %v5978_v57  ;;  %v6024_v32 = vadd.f32 %v3312_v52, %v5982_v53 }
 0x54c   : > { %v3326_v24 = vadd.f32 %v3325_v10, %v3289_v50  ;;  %v3330_v54 = vadd.f32 %v3329_v19, %v3290_v60  ;;  %v3334_v43 = vadd.f32 %v3333_v30, %v3291_v39  ;;  %v6027_v17 = vadd.f32 %v3316_v46, %v5986_v49  ;;  %v6418_v10 = vld [vmem:[#allocation17_spill] sm:$0xff] }
 0x54d   : > { %v3338_v21 = vadd.f32 %v3337_v58, %v3292_v42  ;;  %v6030_v55 = vadd.f32 %v3320_v15, %v5990_v14  ;;  %v6033_v29 = vadd.f32 %v3324_v8, %v5994_v40  ;;  %v3353_v12 = vsub.f32 %v5660_v7, %v6012_v61  ;;  %v6419_v58 = vld [vmem:[#allocation3_spill] sm:$0xff] }
 0x54e   : > { %v3327_v57 = vmax.f32 %v3326_v24, 0.0  ;;  %v3331_v35 = vmax.f32 %v3330_v54, 0.0  ;;  %v3335_v53 = vmax.f32 %v3334_v43, 0.0  ;;  %v3354_v50 = vsub.f32 %v5662_v33, %v3300_v47  ;;  %v6421_v43 = vld [vmem:[#allocation21_spill] sm:$0xff] }
 0x54f   : > { %v3339_v60 = vmax.f32 %v3338_v21, 0.0  ;;  %v3355_v39 = vsub.f32 %v5664_v41, %v3304_v44  ;;  %v3356_v49 = vsub.f32 %v5666_v62, %v3308_v56  ;;  %v3369_v42 = vsub.f32 %v5672_v9, %v3312_v52 }
 0x550   : > { %v3328_v14 = vmin.f32 %v3327_v57, 1.0  ;;  %v3332_v0 = vmin.f32 %v3331_v35, 1.0  ;;  %v3336_v27 = vmin.f32 %v3335_v53, 1.0  ;;  %v3357_v40 = vadd.f32 %v3354_v50, %v3353_v12  ;;  %v6423_v35 = vld [vmem:[#allocation22_spill] sm:$0xff] }
 0x551   : > { %v3340_v38 = vmin.f32 %v3339_v60, 1.0  ;;  %v3358_v2 = vsub.f32 %v3353_v12, %v3354_v50  ;;  %v3359_v16 = vadd.f32 %v3356_v49, %v3355_v39  ;;  %v3360_v5 = vsub.f32 %v3355_v39, %v3356_v49 }
 0x552   : > { %v6042_v63 = vadd.f32 %v3328_v14, %v5998_v37  ;;  %v6045_v51 = vadd.f32 %v3332_v0, %v6002_v59  ;;  %v6048_v25 = vadd.f32 %v3336_v27, %v6006_v48  ;;  %v3370_v4 = vsub.f32 %v6398_v34, %v3316_v46  ;;  %v6420_v59 = vld [vmem:[#allocation9_spill] sm:$0xff] }
 0x553   : > { %v6052_v20 = vadd.f32 %v3340_v38, %v6010_v45  ;;  %v3361_v47 = vadd.f32 %v3360_v5, %v3358_v2  ;;  %v3363_v44 = vsub.f32 %v3357_v40, %v3359_v16  ;;  %v3366_v52 = vsub.f32 %v3358_v2, %v3360_v5  ;;  %v6422_v45 = vld [vmem:[#allocation19_spill] sm:$0xff] }
 0x554   : > { %v3371_v56 = vsub.f32 %v6400_v1, %v3320_v15  ;;  %v3372_v19 = vsub.f32 %v6418_v10, %v3324_v8  ;;  %v3373_v37 = vadd.f32 %v3370_v4, %v3369_v42  ;;  %v3374_v30 = vsub.f32 %v3369_v42, %v3370_v4  ;;  %v6424_v15 = vld [vmem:[#allocation5_spill] sm:$0xff] }
 0x555   : > { %v3052_v24 = vadd.f32 %v6420_v59, %v6419_v58  ;;  %v3362_v54 = vand.u32 2147483647, %v3361_v47  ;;  %v3364_v48 = vand.u32 2147483647, %v3363_v44  ;;  %v3386_v21 = vsub.f32 %v6421_v43, %v3328_v14 }
 0x556   : > { %v3375_v46 = vadd.f32 %v3372_v19, %v3371_v56  ;;  %v3376_v12 = vsub.f32 %v3371_v56, %v3372_v19  ;;  %v3387_v57 = vsub.f32 %v6422_v45, %v3332_v0  ;;  %v3388_v53 = vsub.f32 %v6423_v35, %v3336_v27 }
 0x557   : > { %v3365_v50 = vadd.f32 %v3364_v48, %v3362_v54  ;;  %v3367_v60 = vand.u32 2147483647, %v3366_v52  ;;  %v3389_v39 = vsub.f32 %v6424_v15, %v3340_v38  ;;  %v6063_v8 = vadd.f32 %v6012_v61, %v3052_v24 }
 0x558   : > { %v3377_v49 = vadd.f32 %v3376_v12, %v3374_v30  ;;  %v3379_v42 = vsub.f32 %v3373_v37, %v3375_v46  ;;  %v3382_v40 = vsub.f32 %v3374_v30, %v3376_v12  ;;  %v3390_v2 = vadd.f32 %v3387_v57, %v3386_v21 }
 0x559   : > { %v3368_v16 = vadd.f32 %v3367_v60, %v3365_v50  ;;  %v3391_v5 = vsub.f32 %v3386_v21, %v3387_v57  ;;  %v3392_v14 = vadd.f32 %v3389_v39, %v3388_v53  ;;  %v3393_v4 = vsub.f32 %v3388_v53, %v3389_v39  ;;  %v3469_v50 = vpop.xlane.xlu1 %3468  ;;  %v3478_v60 = vpop.xlane.xlu0 %3477 }
 0x55a   : > { %v3378_v47 = vand.u32 2147483647, %v3377_v49  ;;  %v3380_v44 = vand.u32 2147483647, %v3379_v42  ;;  %v6067_v0 = vmin.f32 %v3422_v11, 1.0  ;;  %v3446_v27 = vmax.f32 %v5966_v31, 0.0 }
 0x55b   : > { %v3394_v38 = vadd.f32 %v3393_v4, %v3391_v5  ;;  %v3396_v52 = vsub.f32 %v3390_v2, %v3392_v14  ;;  %v3399_v61 = vsub.f32 %v3391_v5, %v3393_v4  ;;  %v6425_v56 = vmax.f32 %v5953_v13, 0.0 }
 0x55c   : > { %v3381_v37 = vadd.f32 %v3380_v44, %v3378_v47  ;;  %v3383_v30 = vand.u32 2147483647, %v3382_v40  ;;  %v3463_v54 = vmul.f32 0.2989, %v6067_v0  ;;  %v6075_v11 = vmin.f32 %v3446_v27, 1.0 }
 0x55d   : > { %v6072_v19 = vmin.f32 %v6425_v56, 1.0  ;;  %v3395_v58 = vand.u32 2147483647, %v3394_v38  ;;  %v3397_v59 = vand.u32 2147483647, %v3396_v52  ;;  %v3488_v39 = vpop.xlane.xlu1 %3487  ;;  %v3470_v49 = vrot.slane %v3469_v50, 4 }
 0x55e   : > { %v3384_v24 = vadd.f32 %v3383_v30, %v3381_v37  ;;  %v3400_v36 = vand.u32 2147483647, %v3399_v61  ;;  %v3466_v13 = vmul.f32 0.114, %v6075_v11  ;;  %v3479_v42 = vrot.slane %v3478_v60, 4 }
 0x55f   : > { %v3398_v48 = vadd.f32 %v3397_v59, %v3395_v58  ;;  %v3464_v31 = vmul.f32 0.587, %v6072_v19  ;;  %v3489_v40 = vrot.slane %v3488_v39, 4  ;;  %v3471_v2 = vadd.f32 %v3470_v49, %v3469_v50 }
 0x560   : > { %v3385_v21 = vadd.f32 %v3384_v24, %v3368_v16  ;;  %v3480_v5 = vadd.f32 %v3479_v42, %v3478_v60  ;;  %v6427_v42 = vld [vmem:[#allocation35_spill] sm:$0xff] }
 0x561   : > { %v3401_v46 = vadd.f32 %v3400_v36, %v3398_v48  ;;  %v3465_v57 = vadd.f32 %v3464_v31, %v3463_v54  ;;  %v3490_v14 = vadd.f32 %v3489_v40, %v3488_v39  ;;  %v3472_v4 = vrot.slane %v3471_v2, 2  ;;  %v6426_v39 = vld [vmem:[#allocation34_spill] sm:$0xff] }
 0x562   : > { %v3481_v16 = vrot.slane %v3480_v5, 2  ;;  %v3514_v49 = vmul.f32 0.9, %v6426_v39  ;;  %v3530_v40 = vmul.f32 0.9, %v6427_v42 }
 0x563   : > { %v3402_v12 = vadd.f32 %v3401_v46, %v3385_v21  ;;  %v3467_v53 = vadd.f32 %v3466_v13, %v3465_v57  ;;  %v3491_v27 = vrot.slane %v3490_v14, 2  ;;  %v3473_v61 = vadd.f32 %v3472_v4, %v3471_v2  ;;  %v6428_v2 = vld [vmem:[#allocation37_spill] sm:$0xff] }
 0x564   : > { %v3482_v30 = vadd.f32 %v3481_v16, %v3480_v5  ;;  %v3546_v5 = vmul.f32 0.9, %v6428_v2  ;;  %v3526_v4 = vmul.f32 0.9, %v5924_v23  ;;  %v3518_v16 = vmul.f32 0.9, %v5933_v26 }
 0x565   : > { %3403 = vadd.xlane.f32.xlu0 %v3402_v12  ;;  %v3492_v58 = vadd.f32 %v3491_v27, %v3490_v14  ;;  %v3474_v54 = vrot.slane %v3473_v61, 1  ;;  %v3509_v14 = vmul.f32 0.9, %v5922_v28 }
 0x566   : > { %v3483_v31 = vrot.slane %v3482_v30, 1 }
 0x567   : > { %v3493_v21 = vrot.slane %v3492_v58, 1  ;;  %v3475_v57 = vadd.f32 %v3474_v54, %v3473_v61 }
 0x568   : > { %v3484_v13 = vadd.f32 %v3483_v31, %v3482_v30 }
 0x569   : > { %3497 = vadd.xlane.f32.xlu0 %v3467_v53  ;;  %v3494_v50 = vadd.f32 %v3493_v21, %v3492_v58 }
 0x5ee   : > { %v3404_v47 = vpop.xlane.xlu0 %3403 }
 0x5ef   : > { %v3405_v44 = vrot.slane %v3404_v47, 4 }
 0x5f1   : > { %v3406_v38 = vadd.f32 %v3405_v44, %v3404_v47  ;;  %v3542_v47 = vmul.f32 0.9, %v5929_v3  ;;  %v6429_v44 = vld [vmem:[#allocation10_spill] sm:$0xff] }
 0x5f2   : > { %v3498_v52 = vpop.xlane.xlu0 %3497  ;;  %v3534_v27 = vmul.f32 0.9, %v6429_v44 }
 0x5f3   : > { %v3407_v56 = vrot.slane %v3406_v38, 2  ;;  %v3499_v37 = vrot.slane %v3498_v52, 4 }
 0x5f5   : > { %v3500_v59 = vadd.f32 %v3499_v37, %v3498_v52  ;;  %v3408_v24 = vadd.f32 %v3407_v56, %v3406_v38  ;;  %v3522_v38 = vmul.f32 0.9, %v6067_v0  ;;  %v6430_v52 = vld [vmem:[#allocation11_spill] sm:$0xff]  ;;  %v3538_v56 = vmul.f32 0.9, %v6072_v19 }
 0x5f6   : > { %v3550_v61 = vmul.f32 0.9, %v6430_v52  ;;  %v3554_v37 = vmul.f32 0.9, %v6075_v11 }
 0x5f7   : > { %v3501_v48 = vrot.slane %v3500_v59, 2  ;;  %v3409_v36 = vrot.slane %v3408_v24, 1 }
 0x5f9   : > { %v3410_v46 = vadd.f32 %v3409_v36, %v3408_v24  ;;  %v3502_v12 = vadd.f32 %v3501_v48, %v3500_v59 }
 0x5fb   : > { %4199 = vpush %v3410_v46  ;;  %v3503_v53 = vrot.slane %v3502_v12, 1 }
 0x5fc   : > { %4201 = vpush %v3475_v57 }
 0x5fd   : > { %4203 = vpush %v3484_v13  ;;  %v3504_v60 = vadd.f32 %v3503_v53, %v3502_v12 }
 0x5fe   : > { %4205 = vpush %v3494_v50 }
 0x5ff   : > { %4207 = vpush %v3504_v60 }
 0x62c   : > { %s6079_s10 = spop %4199 }
 0x62d   : > { %s4202_s8 = spop %4201 }
 0x62e   : > { %s4204_s9 = spop %4203 }
 0x62f   : > { %s3486_s11 = sadd.f32 %s4204_s9, %s4202_s8  ;;  %s4206_s12 = spop %4205 }
 0x630   : > { %s4208_s13 = spop %4207 }
 0x631   : > { %s3496_s14 = sadd.f32 %s4206_s12, %s3486_s11 }
 0x633   : > { %s3506_s15 = sadd.f32 %s4208_s13, %s3496_s14 }
 0x635   : > { %s3507_s16 = smul.f32 0.00390625, %s3506_s15 }
 0x637   : > { %s3508_s7 = smul.f32 0.1, %s3507_s16 }
 0x639   : > { %v3510_v30 = vstv %s3508_s7 }
 0x63a   : > { %v3511_v58 = vadd.f32 %v3510_v30, %v3509_v14  ;;  %v3515_v28 = vadd.f32 %v3514_v49, %v3510_v30  ;;  %v3519_v59 = vadd.f32 %v3518_v16, %v3510_v30  ;;  %v3523_v23 = vadd.f32 %v3522_v38, %v3510_v30 }
 0x63b   : > { %v3527_v24 = vadd.f32 %v3526_v4, %v3510_v30  ;;  %v3531_v3 = vadd.f32 %v3530_v40, %v3510_v30  ;;  %v3535_v54 = vadd.f32 %v3534_v27, %v3510_v30  ;;  %v3539_v48 = vadd.f32 %v3538_v56, %v3510_v30 }
 0x63c   : > { %v3512_v26 = vmax.f32 %v3511_v58, 0.0  ;;  %v3516_v36 = vmax.f32 %v3515_v28, 0.0  ;;  %v3520_v31 = vmax.f32 %v3519_v59, 0.0  ;;  %v3524_v21 = vmax.f32 %v3523_v23, 0.0 }
 0x63d   : > { %v3528_v0 = vmax.f32 %v3527_v24, 0.0  ;;  %v3532_v46 = vmax.f32 %v3531_v3, 0.0  ;;  %v3536_v12 = vmax.f32 %v3535_v54, 0.0  ;;  %v3540_v57 = vmax.f32 %v3539_v48, 0.0 }
 0x63e   : > { %v3513_v19 = vmin.f32 %v3512_v26, 1.0  ;;  %v3517_v13 = vmin.f32 %v3516_v36, 1.0  ;;  %v3521_v11 = vmin.f32 %v3520_v31, 1.0  ;;  %v3525_v53 = vmin.f32 %v3524_v21, 1.0 }
 0x63f   : > { %v3529_v50 = vmin.f32 %v3528_v0, 1.0  ;;  %v3533_v60 = vmin.f32 %v3532_v46, 1.0  ;;  %v3537_v39 = vmin.f32 %v3536_v12, 1.0  ;;  %v3541_v49 = vmin.f32 %v3540_v57, 1.0 }
 0x640   : > { %v3543_v42 = vadd.f32 %v3542_v47, %v3510_v30  ;;  %v3547_v40 = vadd.f32 %v3546_v5, %v3510_v30  ;;  %v3551_v2 = vadd.f32 %v3550_v61, %v3510_v30  ;;  %v3555_v14 = vadd.f32 %v3554_v37, %v3510_v30 }
 0x641   : > { %v3558_v4 = vmul.f32 0.2989, %v3513_v19  ;;  %v3559_v16 = vmul.f32 0.587, %v3529_v50  ;;  %v3563_v44 = vmul.f32 0.2989, %v3517_v13 }
 0x642   : > { %v3544_v27 = vmax.f32 %v3543_v42, 0.0  ;;  %v3548_v38 = vmax.f32 %v3547_v40, 0.0  ;;  %v3552_v52 = vmax.f32 %v3551_v2, 0.0  ;;  %v3556_v56 = vmax.f32 %v3555_v14, 0.0 }
 0x643   : > { %v3560_v58 = vadd.f32 %v3559_v16, %v3558_v4  ;;  %v3564_v28 = vmul.f32 0.587, %v3533_v60  ;;  %v3568_v59 = vmul.f32 0.2989, %v3521_v11  ;;  %v3569_v23 = vmul.f32 0.587, %v3537_v39 }
 0x644   : > { %v3545_v24 = vmin.f32 %v3544_v27, 1.0  ;;  %v3549_v3 = vmin.f32 %v3548_v38, 1.0  ;;  %v3553_v54 = vmin.f32 %v3552_v52, 1.0  ;;  %v3557_v48 = vmin.f32 %v3556_v56, 1.0 }
 0x645   : > { %v3565_v26 = vadd.f32 %v3564_v28, %v3563_v44  ;;  %v3570_v47 = vadd.f32 %v3569_v23, %v3568_v59  ;;  %v3573_v5 = vmul.f32 0.2989, %v3525_v53  ;;  %v3574_v61 = vmul.f32 0.587, %v3541_v49 }
 0x646   : > { %v3561_v37 = vmul.f32 0.114, %v3545_v24  ;;  %v3566_v30 = vmul.f32 0.114, %v3549_v3  ;;  %v3571_v36 = vmul.f32 0.114, %v3553_v54 }
 0x647   : > { %v3575_v31 = vadd.f32 %v3574_v61, %v3573_v5  ;;  %v3576_v21 = vmul.f32 0.114, %v3557_v48  ;;  %v3582_v0 = vmul.f32 1.05, %v3513_v19  ;;  %v3586_v46 = vmul.f32 1.05, %v3517_v13 }
 0x648   : > { %v3562_v12 = vadd.f32 %v3561_v37, %v3560_v58  ;;  %v3567_v57 = vadd.f32 %v3566_v30, %v3565_v26  ;;  %v3572_v42 = vadd.f32 %v3571_v36, %v3570_v47  ;;  %v3590_v40 = vmul.f32 1.05, %v3521_v11 }
 0x649   : > { %v3577_v2 = vadd.f32 %v3576_v21, %v3575_v31  ;;  %v3594_v14 = vmul.f32 1.05, %v3525_v53  ;;  %v3598_v4 = vmul.f32 1.05, %v3529_v50  ;;  %v3602_v16 = vmul.f32 1.05, %v3533_v60 }
 0x64a   : > { %v3578_v27 = vmul.f32 -0.05, %v3562_v12  ;;  %v3579_v44 = vmul.f32 -0.05, %v3567_v57  ;;  %v3580_v38 = vmul.f32 -0.05, %v3572_v42 }
 0x64b   : > { %v3581_v52 = vmul.f32 -0.05, %v3577_v2  ;;  %v3606_v56 = vmul.f32 1.05, %v3537_v39  ;;  %v3610_v28 = vmul.f32 1.05, %v3541_v49 }
 0x64c   : > { %v3583_v59 = vadd.f32 %v3582_v0, %v3578_v27  ;;  %v3587_v23 = vadd.f32 %v3586_v46, %v3579_v44  ;;  %v3591_v5 = vadd.f32 %v3590_v40, %v3580_v38  ;;  %v3599_v61 = vadd.f32 %v3598_v4, %v3578_v27 }
 0x64d   : > { %v3595_v19 = vadd.f32 %v3594_v14, %v3581_v52  ;;  %v3603_v13 = vadd.f32 %v3602_v16, %v3579_v44  ;;  %v3607_v58 = vadd.f32 %v3606_v56, %v3580_v38  ;;  %v3611_v26 = vadd.f32 %v3610_v28, %v3581_v52 }
 0x64e   : > { %v3584_v47 = vmax.f32 %v3583_v59, 0.0  ;;  %v3588_v11 = vmax.f32 %v3587_v23, 0.0  ;;  %v3592_v37 = vmax.f32 %v3591_v5, 0.0  ;;  %v3600_v53 = vmax.f32 %v3599_v61, 0.0 }
 0x64f   : > { %v3596_v50 = vmax.f32 %v3595_v19, 0.0  ;;  %v3604_v60 = vmax.f32 %v3603_v13, 0.0  ;;  %v3608_v30 = vmax.f32 %v3607_v58, 0.0  ;;  %v3612_v36 = vmax.f32 %v3611_v26, 0.0 }
 0x650   : > { %v3585_v31 = vmin.f32 %v3584_v47, 1.0  ;;  %v3589_v21 = vmin.f32 %v3588_v11, 1.0  ;;  %v6093_v39 = vmin.f32 %v3592_v37, 1.0  ;;  %v6095_v49 = vmin.f32 %v3600_v53, 1.0 }
 0x651   : > { %v6097_v0 = vmin.f32 %v3596_v50, 1.0  ;;  %v6099_v46 = vmin.f32 %v3604_v60, 1.0  ;;  %v6101_v12 = vmin.f32 %v3608_v30, 1.0  ;;  %v6103_v57 = vmin.f32 %v3612_v36, 1.0 }
 0x652   : > { %v3614_v42 = vmul.f32 1.05, %v3545_v24  ;;  %v3618_v40 = vmul.f32 1.05, %v3549_v3  ;;  %v3622_v2 = vmul.f32 1.05, %v3553_v54  ;;  %v3642_v14 = vsub.f32 %v5660_v7, %v3585_v31 }
 0x653   : > { %v3626_v4 = vmul.f32 1.05, %v3557_v48  ;;  %v3643_v16 = vsub.f32 %v5662_v33, %v3589_v21  ;;  %v3644_v56 = vsub.f32 %v5664_v41, %v6093_v39  ;;  %v3645_v28 = vsub.f32 %v5666_v62, %v6097_v0 }
 0x654   : > { %v3615_v59 = vadd.f32 %v3614_v42, %v3578_v27  ;;  %v3619_v23 = vadd.f32 %v3618_v40, %v3579_v44  ;;  %v3623_v5 = vadd.f32 %v3622_v2, %v3580_v38  ;;  %v3658_v61 = vsub.f32 %v5672_v9, %v6095_v49 }
 0x655   : > { %v3627_v24 = vadd.f32 %v3626_v4, %v3581_v52  ;;  %v3646_v3 = vadd.f32 %v3643_v16, %v3642_v14  ;;  %v3647_v54 = vsub.f32 %v3642_v14, %v3643_v16  ;;  %v3648_v19 = vadd.f32 %v3645_v28, %v3644_v56 }
 0x656   : > { %v3616_v7 = vmax.f32 %v3615_v59, 0.0  ;;  %v3620_v48 = vmax.f32 %v3619_v23, 0.0  ;;  %v3624_v13 = vmax.f32 %v3623_v5, 0.0  ;;  %v3649_v33 = vsub.f32 %v3644_v56, %v3645_v28 }
 0x657   : > { %v3628_v58 = vmax.f32 %v3627_v24, 0.0  ;;  %v3652_v26 = vsub.f32 %v3646_v3, %v3648_v19  ;;  %v3659_v41 = vsub.f32 %v6398_v34, %v6099_v46  ;;  %v3660_v62 = vsub.f32 %v6400_v1, %v6101_v12 }
 0x658   : > { %v3617_v27 = vmin.f32 %v3616_v7, 1.0  ;;  %v3621_v44 = vmin.f32 %v3620_v48, 1.0  ;;  %v3625_v38 = vmin.f32 %v3624_v13, 1.0  ;;  %v3650_v9 = vadd.f32 %v3649_v33, %v3647_v54 }
 0x659   : > { %v3629_v52 = vmin.f32 %v3628_v58, 1.0  ;;  %v3653_v47 = vand.u32 2147483647, %v3652_v26  ;;  %v3655_v11 = vsub.f32 %v3647_v54, %v3649_v33  ;;  %v3661_v37 = vsub.f32 %v6418_v10, %v6103_v57 }
 0x65a   : > { %v3651_v53 = vand.u32 2147483647, %v3650_v9  ;;  %v3662_v50 = vadd.f32 %v3659_v41, %v3658_v61  ;;  %v3663_v60 = vsub.f32 %v3658_v61, %v3659_v41  ;;  %v3675_v30 = vsub.f32 %v6421_v43, %v3617_v27 }
 0x65b   : > { %v3656_v36 = vand.u32 2147483647, %v3655_v11  ;;  %v3664_v34 = vadd.f32 %v3661_v37, %v3660_v62  ;;  %v3665_v42 = vsub.f32 %v3660_v62, %v3661_v37  ;;  %v3676_v1 = vsub.f32 %v6422_v45, %v3621_v44  ;;  %v4364_v37 = vld [vmem:[%s4437_s28 + $0x20] sm:$0xff] }
 0x65c   : > { %v3654_v40 = vadd.f32 %v3653_v47, %v3651_v53  ;;  %v3677_v2 = vsub.f32 %v6423_v35, %v3625_v38  ;;  %v3678_v14 = vsub.f32 %v6424_v15, %v3629_v52  ;;  %v3630_v4 = vadd.f32 %v3585_v31, %v6063_v8  ;;  %v4363_v47 = vld [vmem:[%s4437_s28 + $0x8] sm:$0xff] }
 0x65d   : > { %v3666_v16 = vadd.f32 %v3665_v42, %v3663_v60  ;;  %v3668_v56 = vsub.f32 %v3662_v50, %v3664_v34  ;;  %v3671_v10 = vsub.f32 %v3663_v60, %v3665_v42  ;;  %v3679_v28 = vadd.f32 %v3676_v1, %v3675_v30  ;;  %v4365_v42 = vld [vmem:[%s4437_s28 + $0x38] sm:$0xff] }
 0x65e   : > { %v3657_v59 = vadd.f32 %v3656_v36, %v3654_v40  ;;  %v3680_v23 = vsub.f32 %v3675_v30, %v3676_v1  ;;  %v3681_v5 = vadd.f32 %v3678_v14, %v3677_v2  ;;  %v3682_v43 = vsub.f32 %v3677_v2, %v3678_v14  ;;  %v4366_v40 = vld [vmem:[%s4437_s28 + $0x50] sm:$0xff] }
 0x65f   : > { %v3667_v61 = vand.u32 2147483647, %v3666_v16  ;;  %v3669_v24 = vand.u32 2147483647, %v3668_v56  ;;  %v3672_v3 = vand.u32 2147483647, %v3671_v10  ;;  %v3631_v45 = vadd.f32 %v3589_v21, %v6015_v18 }
 0x660   : > { %v3683_v54 = vadd.f32 %v3682_v43, %v3680_v23  ;;  %v3685_v19 = vsub.f32 %v3679_v28, %v3681_v5  ;;  %v3688_v35 = vsub.f32 %v3680_v23, %v3682_v43  ;;  %v3632_v15 = vadd.f32 %v6093_v39, %v6018_v22 }
 0x661   : > { %v3670_v8 = vadd.f32 %v3669_v24, %v3667_v61  ;;  %v3633_v31 = vadd.f32 %v6097_v0, %v6021_v6  ;;  %v3634_v7 = vadd.f32 %v6095_v49, %v6024_v32  ;;  %v3635_v48 = vadd.f32 %v6099_v46, %v6027_v17 }
 0x662   : > { %v3684_v13 = vand.u32 2147483647, %v3683_v54  ;;  %v3686_v33 = vand.u32 2147483647, %v3685_v19  ;;  %v3689_v18 = vand.u32 2147483647, %v3688_v35  ;;  %v3636_v21 = vadd.f32 %v6101_v12, %v6030_v55 }
 0x663   : > { %v3673_v58 = vadd.f32 %v3672_v3, %v3670_v8  ;;  %v3637_v22 = vadd.f32 %v6103_v57, %v6033_v29  ;;  %v3638_v6 = vadd.f32 %v3617_v27, %v6042_v63  ;;  %v3639_v39 = vadd.f32 %v3621_v44, %v6045_v51  ;;  %v4359_v57 = vld [vmem:[%s4437_s28] sm:$0xff]  ;;  %v4360_v51 = vld [vmem:[%s4437_s28 + $0x18] sm:$0xff]  ;;  %v4361_v44 = vld [vmem:[%s4437_s28 + $0x30] sm:$0xff] }
 0x664   : > { %v3687_v32 = vadd.f32 %v3686_v33, %v3684_v13  ;;  %v3640_v17 = vadd.f32 %v3625_v38, %v6048_v25  ;;  %v3641_v49 = vadd.f32 %v3629_v52, %v6052_v20  ;;  %v3701_v0 = vmul.f32 0.25, %v3630_v4  ;;  %v4362_v38 = vld [vmem:[%s4437_s28 + $0x48] sm:$0xff]  ;;  %v4367_v3 = vld [vmem:[%s4437_s28 + $0x10] sm:$0xff] }
 0x665   : > { %v3674_v46 = vadd.f32 %v3673_v58, %v3657_v59  ;;  %v3703_v26 = vmul.f32 0.25, %v3631_v45  ;;  %v3705_v55 = vmul.f32 0.25, %v3632_v15  ;;  %v3707_v12 = vmul.f32 0.25, %v3633_v31  ;;  %v4368_v15 = vld [vmem:[%s4437_s28 + $0x28] sm:$0xff] }
 0x666   : > { %v3690_v29 = vadd.f32 %v3689_v18, %v3687_v32  ;;  %v3702_v41 = vsub.f32 %v3701_v0, %v4359_v57  ;;  %v3721_v63 = vmul.f32 0.25, %v3634_v7  ;;  %v3723_v62 = vmul.f32 0.25, %v3635_v48  ;;  %v4369_v48 = vld [vmem:[%s4437_s28 + $0x40] sm:$0xff] }
 0x667   : > { %v3704_v27 = vsub.f32 %v3703_v26, %v4360_v51  ;;  %v3706_v25 = vsub.f32 %v3705_v55, %v4361_v44  ;;  %v3708_v20 = vsub.f32 %v3707_v12, %v4362_v38  ;;  %v3725_v9 = vmul.f32 0.25, %v3636_v21 }
 0x668   : > { %v3691_v52 = vadd.f32 %v3690_v29, %v3674_v46  ;;  %v3722_v11 = vsub.f32 %v3721_v63, %v4363_v47  ;;  %v3724_v53 = vsub.f32 %v3723_v62, %v4364_v37  ;;  %v3727_v50 = vmul.f32 0.25, %v3637_v22 }
 0x669   : > { %v3709_v60 = vadd.f32 %v3704_v27, %v3702_v41  ;;  %v3710_v30 = vsub.f32 %v3702_v41, %v3704_v27  ;;  %v3711_v36 = vadd.f32 %v3708_v20, %v3706_v25  ;;  %v3712_v34 = vsub.f32 %v3706_v25, %v3708_v20 }
 0x66a   : > { %3692 = vadd.xlane.f32.xlu1 %v3691_v52  ;;  %v3726_v1 = vsub.f32 %v3725_v9, %v4365_v42  ;;  %v3728_v2 = vsub.f32 %v3727_v50, %v4366_v40  ;;  %v3729_v14 = vadd.f32 %v3724_v53, %v3722_v11  ;;  %v3730_v4 = vsub.f32 %v3722_v11, %v3724_v53  ;;  %v6431_v42 = vld [vmem:[#allocation26_spill] sm:$0xff] }
 0x66b   : > { %v3713_v16 = vadd.f32 %v3712_v34, %v3710_v30  ;;  %v3715_v56 = vsub.f32 %v3709_v60, %v3711_v36  ;;  %v3718_v10 = vsub.f32 %v3710_v30, %v3712_v34  ;;  %v3742_v28 = vmul.f32 0.25, %v3638_v6  ;;  %v4370_v6 = vld [vmem:[%s4437_s28 + $0x58] sm:$0xff] }
 0x66c   : > { %v3731_v59 = vadd.f32 %v3728_v2, %v3726_v1  ;;  %v3732_v23 = vsub.f32 %v3726_v1, %v3728_v2  ;;  %v3744_v5 = vmul.f32 0.25, %v3639_v39  ;;  %v3746_v43 = vmul.f32 0.25, %v3640_v17 }
 0x66d   : > { %v3714_v61 = vand.u32 2147483647, %v3713_v16  ;;  %v3716_v24 = vand.u32 2147483647, %v3715_v56  ;;  %v3743_v45 = vsub.f32 %v3742_v28, %v4367_v3  ;;  %v3719_v7 = vand.u32 2147483647, %v3718_v10 }
 0x66e   : > { %v3733_v54 = vadd.f32 %v3732_v23, %v3730_v4  ;;  %v3735_v19 = vsub.f32 %v3729_v14, %v3731_v59  ;;  %v3738_v35 = vsub.f32 %v3730_v4, %v3732_v23  ;;  %v3745_v8 = vsub.f32 %v3744_v5, %v4368_v15  ;;  %v6432_v4 = vld [vmem:[#allocation28_spill] sm:$0xff] }
 0x66f   : > { %v3717_v31 = vadd.f32 %v3716_v24, %v3714_v61  ;;  %v3747_v13 = vsub.f32 %v3746_v43, %v4369_v48  ;;  %v3748_v33 = vmul.f32 0.25, %v3641_v49  ;;  %vm3798_vm8 = vcmp.eq.s32.totalorder %v6431_v42, 6 }
 0x670   : > { %v3734_v18 = vand.u32 2147483647, %v3733_v54  ;;  %v3736_v21 = vand.u32 2147483647, %v3735_v19  ;;  %v3750_v58 = vadd.f32 %v3745_v8, %v3743_v45  ;;  %v3751_v32 = vsub.f32 %v3743_v45, %v3745_v8 }
 0x671   : > { %v3720_v22 = vadd.f32 %v3719_v7, %v3717_v31  ;;  %v3749_v39 = vsub.f32 %v3748_v33, %v4370_v6  ;;  %v3739_v0 = vand.u32 2147483647, %v3738_v35  ;;  %vm3802_vm9 = vcmp.eq.s32.totalorder %v6431_v42, 7 }
 0x672   : > { %v3737_v17 = vadd.f32 %v3736_v21, %v3734_v18  ;;  %v3803_v1 = vstv %s5825_s30  ;;  %vm3806_vm10 = vcmp.eq.s32.totalorder %v6431_v42, 8  ;;  %v3807_v14 = vstv %s5943_s17  ;;  %s309_s17 = scalar_lea.vmem %s6175_s6, %s3917_s19 }
 0x673   : > { %v3752_v46 = vadd.f32 %v3749_v39, %v3747_v13  ;;  %v3753_v26 = vsub.f32 %v3747_v13, %v3749_v39  ;;  %v3804_v56 = vsel %vm3802_vm9, %v3803_v1, 0.0  ;;  %vm3810_vm11 = vcmp.eq.s32.totalorder %v6431_v42, 9 }
 0x674   : > { %v3740_v55 = vadd.f32 %v3739_v0, %v3737_v17  ;;  %v3811_v10 = vstv %s6079_s10  ;;  %v3808_v59 = vsel %vm3806_vm10, %v3807_v14, 0.0  ;;  %vm3814_vm12 = vcmp.eq.s32.totalorder %v6431_v42, 10 }
 0x675   : > { %v3754_v12 = vadd.f32 %v3753_v26, %v3751_v32  ;;  %v3756_v29 = vsub.f32 %v3750_v58, %v3752_v46  ;;  %v3759_v57 = vsub.f32 %v3751_v32, %v3753_v26  ;;  %v3812_v43 = vsel %vm3810_vm11, %v3811_v10, 0.0 }
 0x676   : > { %v3741_v41 = vadd.f32 %v3740_v55, %v3720_v22 }
 0x677   : > { %v3755_v63 = vand.u32 2147483647, %v3754_v12  ;;  %v3757_v62 = vand.u32 2147483647, %v3756_v29  ;;  %v3760_v49 = vand.u32 2147483647, %v3759_v57 }
 0x679   : > { %v3758_v51 = vadd.f32 %v3757_v62, %v3755_v63 }
 0x67b   : > { %v3761_v27 = vadd.f32 %v3760_v49, %v3758_v51 }
 0x67d   : > { %v3762_v44 = vadd.f32 %v3761_v27, %v3741_v41 }
 0x67f   : > { %3763 = vadd.xlane.f32.xlu0 %v3762_v44 }
 0x6f3   : > { %v3693_v25 = vpop.xlane.xlu1 %3692 }
 0x6f4   : > { %v3694_v38 = vrot.slane %v3693_v25, 4 }
 0x6f6   : > { %v3695_v20 = vadd.f32 %v3694_v38, %v3693_v25 }
 0x6f8   : > { %v3696_v9 = vrot.slane %v3695_v20, 2 }
 0x6fa   : > { %v3697_v52 = vadd.f32 %v3696_v9, %v3695_v20 }
 0x6fc   : > { %v3698_v47 = vrot.slane %v3697_v52, 1 }
 0x6fe   : > { %v3699_v11 = vadd.f32 %v3698_v47, %v3697_v52 }
 0x700   : > { %4209 = vpush %v3699_v11 }
 0x708   : > { %v3764_v37 = vpop.xlane.xlu0 %3763 }
 0x709   : > { %v3765_v53 = vrot.slane %v3764_v37, 4 }
 0x70b   : > { %v3766_v50 = vadd.f32 %v3765_v53, %v3764_v37 }
 0x70d   : > { %v3767_v60 = vrot.slane %v3766_v50, 2 }
 0x70f   : > { %v3768_v30 = vadd.f32 %v3767_v60, %v3766_v50 }
 0x711   : > { %v3769_v36 = vrot.slane %v3768_v30, 1 }
 0x713   : > { %v3770_v34 = vadd.f32 %v3769_v36, %v3768_v30 }
 0x715   : > { %4211 = vpush %v3770_v34 }
 0x731   : > { %s4210_s28 = spop %4209 }
 0x732   : > { %v3815_v23 = vstv %s4210_s28 }
 0x733   : > { %v3816_v24 = vsel %vm3814_vm12, %v3815_v23, 0.0 }
 0x746   : > { %s4212_s18 = spop %4211 }
 0x747   : > { %v3799_v40 = vstv %s4212_s18 }
 0x748   : > { %v3800_v2 = vsel %vm3798_vm8, %v3799_v40, 0.0 }
 0x749   : > { %v3801_v16 = vadd.f32 %v3800_v2, %v6432_v4 }
 0x74b   : > { %v3805_v28 = vadd.f32 %v3804_v56, %v3801_v16 }
 0x74d   : > { %v3809_v5 = vadd.f32 %v3808_v59, %v3805_v28 }
 0x74f   : > { %v3813_v61 = vadd.f32 %v3812_v43, %v3809_v5 }
 0x751   : > { %v3817_v3 = vadd.f32 %v3816_v24, %v3813_v61 }
 0x753   : > { %3818 = vst [vmem:[%s309_s17] sm:$0xff] %v3817_v3 }
 0x754 PF: > { %s16_s21 = sadd.s32 1, %s4377_s21  }
 0x755   : > { %p13_p4 = scmp.ge.s32.totalorder %s16_s21, 4  }
 0x757   :  { %15 = sbr.rel (!%p13_p4) target bundleno = 1 (0x1), region = 123 }

</bundles_post_ra>
